<compile_context>
chip_gen: v7x
topology: tpu7x:2x2x1
jax: 0.10.0
libtpu: 0.0.40
codegen_flags: <defaults>
</compile_context>

<pallas_src>
import math
from functools import partial

import numpy as np
import jax
import jax.numpy as jnp
from jax import lax
from jax.experimental import pallas as pl
from jax.experimental.pallas import tpu as pltpu

# ---- hyper-params (node_dim must equal hidden_dim: the module applies LayerNorm(hidden_dim) to h_V) ----
NODE_DIM = 16
EDGE_DIM = 8
HIDDEN = 16
HEADS = 4
N_QPTS = 8
N_VPTS = 4
OUT_DIM = HEADS * (EDGE_DIM + HIDDEN + N_VPTS * 4)   # 160
LN_EPS = 1e-5

HC = HEADS * HIDDEN            # 64
NQ = HEADS * N_QPTS            # 32
NV = HEADS * N_VPTS            # 16
F_SRC = 2 * HC + 3 * NQ + 3 * NV   # 272 :  k | v | kp_x,kp_y,kp_z (scaled) | vp_x,vp_y,vp_z
_OFF_V = HC
_OFF_KP = 2 * HC
_OFF_VP = 2 * HC + 3 * NQ

_HP = jax.lax.Precision.HIGHEST      # only for small (cheap) matmuls; big gather matmul stays DEFAULT
_VMEM_BUDGET = 32 * 1024 * 1024      # planning budget for tile sizing
_VMEM_LIMIT = 48 * 1024 * 1024       # <= v7x physical 64 MiB; plenty of headroom on v5e/v6e
_SRC_ROW_BUDGET = 2048               # row budget for the (cheap) source-table kernel


# -------------------------------------------------------------------------------------------------
# small helpers
# -------------------------------------------------------------------------------------------------
def _round_up(x, m):
    return (x + m - 1) // m * m


def _split_rows(n, row_budget, min_blocks=1):
    """Pick a row tile (multiple of 8, <= row_budget) and the padded row count it divides."""
    n8 = _round_up(max(n, 1), 8)
    t = max(8, min(n8, (row_budget // 8) * 8))
    nb = max(min(min_blocks, n8 // 8), -(-n8 // t))
    t = _round_up(-(-n8 // nb), 8)
    return t, t * nb


def _main_row_budget(K, n_src_est):
    """VMEM-aware row budget for the fused kernel (everything counted in f32 words)."""
    stream = 2 * (NODE_DIM + K * EDGE_DIM + 2 * K + 9 + 3 + 1 + NODE_DIM)   # double-buffered per-row I/O
    temps = (K + 4) * F_SRC + 10 * K * HEADS + 4 * OUT_DIM                  # gathered rows + softmax + misc
    fixed = 2 * n_src_est * F_SRC + 60000                                   # resident src table + constants
    avail = _VMEM_BUDGET // 4 - fixed
    return max(8, avail // (stream + temps))


def _ln(x, g, b):
    mu = jnp.mean(x, axis=-1, keepdims=True)
    xc = x - mu
    var = jnp.mean(xc * xc, axis=-1, keepdims=True)
    return xc * jax.lax.rsqrt(var + LN_EPS) * g + b


# -------------------------------------------------------------------------------------------------
# Kernel 1: source table  (k | v | k_pts_scaled | v_pts)  — projection + rigid apply fused
# -------------------------------------------------------------------------------------------------
def _src_kernel(hv_ref, r9_ref, t3_ref, w_ref, b_ref, scl_ref, o_ref):
    hv = hv_ref[...]
    r9 = r9_ref[...]
    t3 = t3_ref[...]
    proj = (jnp.dot(hv, w_ref[...], preferred_element_type=jnp.float32, precision=_HP)
            + b_ref[...])                                     # [T, 272]  (k | v | kp xyz | vp xyz)
    scl = scl_ref[...]                                        # [1, H*PQ]  sqrt(0.5*c_pt*softplus(hw_h))

    def rigid(x, y, z):                                       # global = R @ local + t
        gx = r9[:, 0:1] * x + r9[:, 1:2] * y + r9[:, 2:3] * z + t3[:, 0:1]
        gy = r9[:, 3:4] * x + r9[:, 4:5] * y + r9[:, 5:6] * z + t3[:, 1:2]
        gz = r9[:, 6:7] * x + r9[:, 7:8] * y + r9[:, 8:9] * z + t3[:, 2:3]
        return gx, gy, gz

    kpx, kpy, kpz = rigid(proj[:, _OFF_KP:_OFF_KP + NQ],
                          proj[:, _OFF_KP + NQ:_OFF_KP + 2 * NQ],
                          proj[:, _OFF_KP + 2 * NQ:_OFF_KP + 3 * NQ])
    vpx, vpy, vpz = rigid(proj[:, _OFF_VP:_OFF_VP + NV],
                          proj[:, _OFF_VP + NV:_OFF_VP + 2 * NV],
                          proj[:, _OFF_VP + 2 * NV:_OFF_VP + 3 * NV])
    o_ref[...] = jnp.concatenate(
        [proj[:, :2 * HC], kpx * scl, kpy * scl, kpz * scl, vpx, vpy, vpz], axis=1)


def _source_table(hv, r9, t3, Wsrc, bsrc, scale_q):
    M = hv.shape[0]
    T, Mpad = _split_rows(M, _SRC_ROW_BUDGET)
    pad = Mpad - M
    if pad:
        hv = jnp.pad(hv, ((0, pad), (0, 0)))
        r9 = jnp.pad(r9, ((0, pad), (0, 0)))
        t3 = jnp.pad(t3, ((0, pad), (0, 0)))
    out = pl.pallas_call(
        _src_kernel,
        out_shape=jax.ShapeDtypeStruct((Mpad, F_SRC), jnp.float32),
        grid=(Mpad // T,),
        in_specs=[pl.BlockSpec((T, NODE_DIM), lambda i: (i, 0)),
                  pl.BlockSpec((T, 9), lambda i: (i, 0)),
                  pl.BlockSpec((T, 3), lambda i: (i, 0)),
                  pl.BlockSpec(Wsrc.shape, lambda i: (0, 0)),
                  pl.BlockSpec(bsrc.shape, lambda i: (0, 0)),
                  pl.BlockSpec(scale_q.shape, lambda i: (0, 0))],
        out_specs=pl.BlockSpec((T, F_SRC), lambda i: (i, 0)),
        compiler_params=pltpu.CompilerParams(
            dimension_semantics=("parallel",),
            vmem_limit_bytes=_VMEM_LIMIT),
    )(hv, r9, t3, Wsrc, bsrc, scale_q)
    return out[:M]


# -------------------------------------------------------------------------------------------------
# Kernel 2: fused IPA (in-kernel gather + attention + invert-apply + output block)
# -------------------------------------------------------------------------------------------------
def _ipa_main_kernel(*refs, K, Npad):
    (hv_ref, he_ref, idx_ref, ma_ref, r9_ref, t3_ref, mv_ref, src_ref,
     wq_ref, bq_ref, scl_ref,
     hsum_ref, kpsel_ref, hsumq_ref,
     wbk_ref, bbk_ref, mrep_ref, repk_ref, sumk_ref,
     expf_ref, expe_ref, tile_e_ref,
     wo_ref, bo_ref, g0_ref, be0_ref, w1_ref, b1_ref, w2_ref, b2_ref, g1_ref, be1_ref,
     out_ref) = refs

    H, C, PQ, PV, E = HEADS, HIDDEN, N_QPTS, N_VPTS, EDGE_DIM

    def dot(a, b, prec=None):
        return jnp.dot(a, b, preferred_element_type=jnp.float32, precision=prec)

    hv = hv_ref[0]                      # [T, D]
    he = he_ref[0]                      # [T, K*E]
    idx = idx_ref[0]                    # [T, K] int32
    r9 = r9_ref[0]                      # [T, 9]
    t3 = t3_ref[0]                      # [T, 3]
    src = src_ref[0]                    # [Npad, F_SRC]  per-batch VMEM-resident source table
    T = hv.shape[0]

    # ---- query-side projection (q | q_pts), rigid apply + folded per-head point scale ----
    qall = dot(hv, wq_ref[...], _HP) + bq_ref[...]            # [T, HC + 3*NQ]
    q = qall[:, :HC]
    qx = qall[:, HC:HC + NQ]
    qy = qall[:, HC + NQ:HC + 2 * NQ]
    qz = qall[:, HC + 2 * NQ:]
    scl = scl_ref[...]
    gx = (r9[:, 0:1] * qx + r9[:, 1:2] * qy + r9[:, 2:3] * qz + t3[:, 0:1]) * scl
    gy = (r9[:, 3:4] * qx + r9[:, 4:5] * qy + r9[:, 5:6] * qz + t3[:, 1:2]) * scl
    gz = (r9[:, 6:7] * qx + r9[:, 7:8] * qy + r9[:, 8:9] * qz + t3[:, 2:3]) * scl
    qpf = jnp.concatenate([gx, gy, gz], axis=1)               # [T, 3*NQ] coord-major
    qsq = dot(qpf * qpf, hsumq_ref[...], _HP)                 # [T, H]  |q_pts|^2 per head

    # row-wise multiplier so every per-neighbor logit is one elementwise op + one MXU reduction
    c_qk = math.sqrt(1.0 / (3.0 * C))
    qmul = jnp.concatenate([q * c_qk,
                            jnp.zeros((T, HC), jnp.float32),
                            2.0 * qpf,
                            jnp.zeros((T, 3 * NV), jnp.float32)], axis=1)   # [T, F_SRC]

    # logits base: edge bias (linear_b fused) + mask bias + (-|q_pts|^2), broadcast via MXU indicators
    mterm = 100000.0 * (ma_ref[0] - 1.0)                      # [T, K]
    base = (dot(he, wbk_ref[...]) + bbk_ref[...]
            + dot(mterm, mrep_ref[...])
            - dot(qsq, repk_ref[...]))                        # [T, K*H]

    # ---- pass 1: in-kernel neighbor gather (one-hot MXU matmul) + logits ----
    iota = lax.broadcasted_iota(jnp.int32, (T, Npad), 1)
    kpsel = kpsel_ref[...]
    gathered = []
    logit_parts = []
    for k in range(K):
        onehot = (idx[:, k:k + 1] == iota).astype(jnp.float32)      # [T, Npad]
        g = dot(onehot, src)                                         # [T, F_SRC]  gathered source row
        gathered.append(g)
        # per head:  c_qk q.k  +  2 q_pts.k_pts  -  |k_pts|^2     (point term completed by base)
        logit_parts.append(dot((qmul - g * kpsel) * g, hsum_ref[...], _HP))
    logits = jnp.concatenate(logit_parts, axis=1) + base             # [T, K*H]

    # ---- softmax over the K neighbors (max chain; denominator via MXU; reciprocal on the EUP) ----
    mx = logits[:, 0:H]
    for k in range(1, K):
        mx = jnp.maximum(mx, logits[:, k * H:(k + 1) * H])
    e = jnp.exp(logits - dot(mx, repk_ref[...]))
    den = dot(e, sumk_ref[...], _HP)                                  # [T, H]
    rinv = pl.reciprocal(den, approx=True)
    rinv = rinv * (2.0 - den * rinv)                                  # one Newton step -> f32 accuracy
    p = e * dot(rinv, repk_ref[...], _HP)                             # [T, K*H]

    # ---- pass 2: weighted sums over neighbors ----
    acc = jnp.zeros((T, F_SRC), jnp.float32)                          # collects o (v region) and o_pt (vp region)
    opair = jnp.zeros((T, H * E), jnp.float32)
    for k in range(K):
        pk = p[:, k * H:(k + 1) * H]                                  # [T, H]
        acc = acc + dot(pk, expf_ref[...], _HP) * gathered[k]
        opair = opair + dot(pk, expe_ref[...], _HP) * dot(he[:, k * E:(k + 1) * E], tile_e_ref[...])

    o = acc[:, _OFF_V:_OFF_V + HC]                                    # [T, HC]
    px = acc[:, _OFF_VP:_OFF_VP + NV] - t3[:, 0:1]
    py = acc[:, _OFF_VP + NV:_OFF_VP + 2 * NV] - t3[:, 1:2]
    pz = acc[:, _OFF_VP + 2 * NV:] - t3[:, 2:3]
    lx = r9[:, 0:1] * px + r9[:, 3:4] * py + r9[:, 6:7] * pz          # R^T (x - t)
    ly = r9[:, 1:2] * px + r9[:, 4:5] * py + r9[:, 7:8] * pz
    lz = r9[:, 2:3] * px + r9[:, 5:6] * py + r9[:, 8:9] * pz
    nrm = jnp.sqrt(lx * lx + ly * ly + lz * lz + 1e-8)

    feat = jnp.concatenate([o, lx, ly, lz, nrm, opair], axis=1)       # [T, 160] lane-dense slab

    # ---- linear_out + residual + LN + MLP + residual + LN + node mask (dropout = identity) ----
    s = dot(feat, wo_ref[...], _HP) + bo_ref[...]
    x = _ln(hv + s, g0_ref[...], be0_ref[...])
    hmid = jnp.maximum(dot(x, w1_ref[...], _HP) + b1_ref[...], 0.0)
    y = _ln(x + dot(hmid, w2_ref[...], _HP) + b2_ref[...], g1_ref[...], be1_ref[...])
    out_ref[0] = y * mv_ref[0]


def _build_indicators(K):
    """Small constant matrices turning per-head reductions / K,H broadcasts into MXU matmuls."""
    H, C, PQ, PV, E = HEADS, HIDDEN, N_QPTS, N_VPTS, EDGE_DIM
    hsum = np.zeros((F_SRC, H), np.float32)       # head-membership reduction (k + kp regions)
    expf = np.zeros((H, F_SRC), np.float32)       # head -> (v | vp) region broadcast
    kpsel = np.zeros((1, F_SRC), np.float32)      # selects the k_pts region
    hsumq = np.zeros((3 * NQ, H), np.float32)     # head reduction over the query points
    for h in range(H):
        hsum[h * C:(h + 1) * C, h] = 1.0
        expf[h, _OFF_V + h * C:_OFF_V + (h + 1) * C] = 1.0
        for i in range(3):
            kb = _OFF_KP + i * NQ + h * PQ
            hsum[kb:kb + PQ, h] = 1.0
            hsumq[i * NQ + h * PQ:i * NQ + (h + 1) * PQ, h] = 1.0
            vb = _OFF_VP + i * NV + h * PV
            expf[h, vb:vb + PV] = 1.0
    kpsel[0, _OFF_KP:_OFF_KP + 3 * NQ] = 1.0
    repk = np.zeros((H, K * H), np.float32)       # replicate per-head value across K
    sumk = np.zeros((K * H, H), np.float32)       # reduce over K
    mrep = np.zeros((K, K * H), np.float32)       # replicate per-k mask across heads
    for k in range(K):
        for h in range(H):
            repk[h, k * H + h] = 1.0
            sumk[k * H + h, h] = 1.0
            mrep[k, k * H + h] = 1.0
    expe = np.zeros((H, H * E), np.float32)       # head -> edge-feature broadcast
    tile_e = np.zeros((E, H * E), np.float32)     # tile edge feature across heads
    for h in range(H):
        expe[h, h * E:(h + 1) * E] = 1.0
        for e in range(E):
            tile_e[e, h * E + e] = 1.0
    return dict(hsum=hsum, expf=expf, kpsel=kpsel, hsumq=hsumq,
                repk=repk, sumk=sumk, mrep=mrep, expe=expe, tile_e=tile_e)


# -------------------------------------------------------------------------------------------------
# JAX glue: layouts, rigid frames, full forward
# -------------------------------------------------------------------------------------------------
def gather_nodes_jax(nodes, idx):
    return jax.vmap(lambda nb, ib: nb[ib])(nodes, idx)


def quat_to_rotmat(q):
    q = q / jnp.linalg.norm(q, axis=-1, keepdims=True)
    w, x, y, z = q[..., 0], q[..., 1], q[..., 2], q[..., 3]
    r0 = jnp.stack([1 - 2 * (y * y + z * z), 2 * (x * y - w * z), 2 * (x * z + w * y)], -1)
    r1 = jnp.stack([2 * (x * y + w * z), 1 - 2 * (x * x + z * z), 2 * (y * z - w * x)], -1)
    r2 = jnp.stack([2 * (x * z - w * y), 2 * (y * z + w * x), 1 - 2 * (x * x + y * y)], -1)
    return jnp.stack([r0, r1, r2], -2)


def ipa_pallas(params, h_V, h_E, E_idx, R, t, mask_V=None, mask_attend=None):
    B, N, D = h_V.shape
    K = E_idx.shape[-1]
    H, C, PQ, PV, E = HEADS, HIDDEN, N_QPTS, N_VPTS, EDGE_DIM

    # ---------- VMEM-aware node tiling ----------
    row_budget = _main_row_budget(K, _round_up(N, 8))
    T, Npad = _split_rows(N, row_budget, min_blocks=(2 if B == 1 else 1))
    n_tiles = Npad // T
    pad_n = Npad - N

    def pad_nodes(x):
        if pad_n == 0:
            return x
        cfg = [(0, 0)] * x.ndim
        cfg[1] = (0, pad_n)
        return jnp.pad(x, cfg)

    hv = pad_nodes(h_V)
    he = pad_nodes(h_E).reshape(B, Npad, K * E)
    idx = pad_nodes(E_idx.astype(jnp.int32))
    R9 = pad_nodes(R.reshape(B, N, 9))
    t3 = pad_nodes(t)
    ma = (pad_nodes(mask_attend.astype(jnp.float32)) if mask_attend is not None
          else jnp.ones((B, Npad, K), jnp.float32))
    mv = (pad_nodes(mask_V.astype(jnp.float32)[..., None]) if mask_V is not None
          else jnp.ones((B, Npad, 1), jnp.float32))

    # ---------- source table (projection + rigid apply + per-head point scale fused) ----------
    PT = PQ + PV
    perm_k = np.array([h * 2 * C + c for h in range(H) for c in range(C)])
    perm_v = perm_k + C
    perm_kp = np.array([i * H * PT + h * PT + p
                        for i in range(3) for h in range(H) for p in range(PQ)])
    perm_vp = np.array([i * H * PT + h * PT + PQ + p
                        for i in range(3) for h in range(H) for p in range(PV)])
    Wsrc = jnp.concatenate([params["Wkv"][:, perm_k], params["Wkv"][:, perm_v],
                            params["Wkvp"][:, perm_kp], params["Wkvp"][:, perm_vp]], axis=1)
    bsrc = jnp.concatenate([params["bkv"][perm_k], params["bkv"][perm_v],
                            params["bkvp"][perm_kp], params["bkvp"][perm_vp]])[None, :]

    c_pt = math.sqrt(1.0 / (3.0 * (PQ * 9.0 / 2.0)))
    s_head = jnp.sqrt(0.5 * c_pt * jax.nn.softplus(params["head_weights"]))     # [H]
    scale_q = jnp.repeat(s_head, PQ)[None, :]                                   # [1, NQ]

    src = _source_table(hv.reshape(B * Npad, D), R9.reshape(B * Npad, 9),
                        t3.reshape(B * Npad, 3), Wsrc, bsrc, scale_q)
    src = src.reshape(B, Npad, F_SRC)

    # ---------- constants for the fused kernel ----------
    ind = {k: jnp.asarray(v) for k, v in _build_indicators(K).items()}
    Wqall = jnp.concatenate([params["Wq"], params["Wqp"]], axis=1)               # [D, HC + 3*NQ]
    bqall = jnp.concatenate([params["bq"], params["bqp"]])[None, :]
    c_b = math.sqrt(1.0 / 3.0)
    Wbk = jnp.kron(jnp.eye(K, dtype=jnp.float32), c_b * params["Wb"])            # [K*E, K*H]
    bbk = jnp.tile(c_b * params["bb"], K)[None, :]

    consts = [
        Wqall, bqall, scale_q,
        ind["hsum"], ind["kpsel"], ind["hsumq"],
        Wbk, bbk, ind["mrep"], ind["repk"], ind["sumk"],
        ind["expf"], ind["expe"], ind["tile_e"],
        params["Wout"], params["bout"][None, :],
        params["ln0_g"][None, :], params["ln0_b"][None, :],
        params["W1"], params["b1"][None, :],
        params["W2"], params["b2"][None, :],
        params["ln1_g"][None, :], params["ln1_b"][None, :],
    ]

    streamed = [hv, he, idx, ma, R9, t3, mv, src]
    node_map = lambda b, i: (b, i, 0)
    stream_specs = [
        pl.BlockSpec((1, T, D), node_map),
        pl.BlockSpec((1, T, K * E), node_map),
        pl.BlockSpec((1, T, K), node_map),
        pl.BlockSpec((1, T, K), node_map),
        pl.BlockSpec((1, T, 9), node_map),
        pl.BlockSpec((1, T, 3), node_map),
        pl.BlockSpec((1, T, 1), node_map),
        pl.BlockSpec((1, Npad, F_SRC), lambda b, i: (b, 0, 0)),   # per-batch table, VMEM-resident
    ]
    const_specs = [pl.BlockSpec(c.shape, lambda b, i: (0, 0)) for c in consts]

    out = pl.pallas_call(
        partial(_ipa_main_kernel, K=K, Npad=Npad),
        out_shape=jax.ShapeDtypeStruct((B, Npad, D), jnp.float32),
        grid=(B, n_tiles),
        in_specs=stream_specs + const_specs,
        out_specs=pl.BlockSpec((1, T, D), node_map),
        compiler_params=pltpu.CompilerParams(
            dimension_semantics=("parallel", "parallel"),
            vmem_limit_bytes=_VMEM_LIMIT),
    )(*streamed, *consts)
    return out[:, :N, :]


# -------------------------------------------------------------------------------------------------
# Pure-JAX mirror of the PyTorch forward (eval mode) for validation — HIGHEST precision matmuls
# -------------------------------------------------------------------------------------------------
def ipa_reference(params, h_V, h_E, E_idx, R, t, mask_V=None, mask_attend=None):
    B, N, D = h_V.shape
    H, C, PQ, PV, E = HEADS, HIDDEN, N_QPTS, N_VPTS, EDGE_DIM
    mm = lambda a, b: jnp.dot(a, b, precision=_HP)
    es = partial(jnp.einsum, precision=_HP)
    gather = gather_nodes_jax

    q = (mm(h_V, params["Wq"]) + params["bq"]).reshape(B, N, H, C)
    kv = (mm(h_V, params["Wkv"]) + params["bkv"]).reshape(B, N, H, 2 * C)
    k, v = kv[..., :C], kv[..., C:]

    def pts(raw, npts):
        p = jnp.stack(jnp.split(raw, 3, axis=-1), axis=-1)
        p = es('bnij,bnmj->bnmi', R, p) + t[:, :, None, :]
        return p.reshape(B, N, H, npts // H, 3)

    q_pts = pts(mm(h_V, params["Wqp"]) + params["bqp"], H * PQ)
    kv_pts = pts(mm(h_V, params["Wkvp"]) + params["bkvp"], H * (PQ + PV))
    k_pts, v_pts = kv_pts[..., :PQ, :], kv_pts[..., PQ:, :]

    b = mm(h_E, params["Wb"]) + params["bb"]

    a = es('bnhc,bnkhc->bnkh', q, gather(k, E_idx)) * math.sqrt(1.0 / (3 * C))
    a = a + math.sqrt(1.0 / 3) * b

    pt_att = q_pts[:, :, None] - gather(k_pts, E_idx)
    pt_att = jnp.sum(pt_att ** 2, axis=-1)
    hw = jax.nn.softplus(params["head_weights"]).reshape(1, 1, 1, H, 1)
    pt_att = math.sqrt(1.0 / (3 * (PQ * 9.0 / 2))) * hw * pt_att
    pt_att = jnp.sum(pt_att, axis=-1) * (-0.5)

    if mask_attend is not None:
        att_mask = 100000.0 * (mask_attend.astype(jnp.float32) - 1.0)
    else:
        att_mask = jnp.zeros(E_idx.shape, jnp.float32)
    a = jax.nn.softmax(a + pt_att + att_mask[..., None], axis=-2)

    o = es('bnkh,bnkhc->bnhc', a, gather(v, E_idx)).reshape(B, N, H * C)
    o_pt = es('bnkh,bnkhpx->bnhpx', a, gather(v_pts, E_idx))
    o_pt = es('bnji,bnhpj->bnhpi', R, o_pt - t[:, :, None, None, :])
    o_pt_norm = jnp.sqrt(jnp.sum(o_pt ** 2, axis=-1) + 1e-8).reshape(B, N, H * PV)
    o_pt = o_pt.reshape(B, N, H * PV, 3)
    o_pair = es('bnkh,bnke->bnhe', a, h_E).reshape(B, N, H * E)

    s = jnp.concatenate([o, o_pt[..., 0], o_pt[..., 1], o_pt[..., 2], o_pt_norm, o_pair], -1)
    s = mm(s, params["Wout"]) + params["bout"]

    def ln(x, g, bb_):
        mu = jnp.mean(x, -1, keepdims=True)
        xc = x - mu
        var = jnp.mean(xc * xc, -1, keepdims=True)
        return xc / jnp.sqrt(var + LN_EPS) * g + bb_

    x = ln(h_V + s, params["ln0_g"], params["ln0_b"])
    m = mm(jnp.maximum(mm(x, params["W1"]) + params["b1"], 0.0), params["W2"]) + params["b2"]
    y = ln(x + m, params["ln1_g"], params["ln1_b"])
    if mask_V is not None:
        y = y * mask_V[..., None]
    return y


def init_params(key):
    H, C, PQ, PV = HEADS, HIDDEN, N_QPTS, N_VPTS
    keys = jax.random.split(key, 8)

    def lin(kk, fin, fout):
        kw, kb = jax.random.split(kk)
        return (jax.random.normal(kw, (fin, fout), jnp.float32) / math.sqrt(fin),
                0.02 * jax.random.normal(kb, (fout,), jnp.float32))

    Wq, bq = lin(keys[0], NODE_DIM, H * C)
    Wkv, bkv = lin(keys[1], NODE_DIM, 2 * H * C)
    Wqp, bqp = lin(keys[2], NODE_DIM, H * PQ * 3)
    Wkvp, bkvp = lin(keys[3], NODE_DIM, H * (PQ + PV) * 3)
    Wb, bb = lin(keys[4], EDGE_DIM, H)
    Wout, bout = lin(keys[5], OUT_DIM, NODE_DIM)
    W1, b1 = lin(keys[6], NODE_DIM, 4 * NODE_DIM)
    W2, b2 = lin(keys[7], 4 * NODE_DIM, NODE_DIM)
    return dict(
        Wq=Wq, bq=bq, Wkv=Wkv, bkv=bkv, Wqp=Wqp, bqp=bqp, Wkvp=Wkvp, bkvp=bkvp,
        Wb=Wb, bb=bb, Wout=Wout, bout=bout, W1=W1, b1=b1, W2=W2, b2=b2,
        head_weights=jnp.full((H,), 0.541324854612918, jnp.float32),
        ln0_g=jnp.ones((NODE_DIM,), jnp.float32), ln0_b=jnp.zeros((NODE_DIM,), jnp.float32),
        ln1_g=jnp.ones((NODE_DIM,), jnp.float32), ln1_b=jnp.zeros((NODE_DIM,), jnp.float32),
    )


if __name__ == "__main__":
    B, N, K = 2, 8, 4
    root = jax.random.PRNGKey(0)
    kp, k1, k2, k3, k4, k5, k6, k7 = jax.random.split(root, 8)

    params = init_params(kp)
    h_V = jax.random.normal(k1, (B, N, NODE_DIM), jnp.float32)
    h_E = jax.random.normal(k2, (B, N, K, EDGE_DIM), jnp.float32)
    E_idx = jax.random.randint(k3, (B, N, K), 0, N)
    R = quat_to_rotmat(jax.random.normal(k4, (B, N, 4), jnp.float32))
    t = jax.random.normal(k5, (B, N, 3), jnp.float32)
    mask_attend = (jax.random.uniform(k6, (B, N, K)) > 0.2).astype(jnp.float32)
    mask_V = (jax.random.uniform(k7, (B, N)) > 0.1).astype(jnp.float32)

    fwd = jax.jit(ipa_pallas)
    ref_fn = jax.jit(ipa_reference)

    out = jax.block_until_ready(fwd(params, h_V, h_E, E_idx, R, t, mask_V, mask_attend))
    ref = jax.block_until_ready(ref_fn(params, h_V, h_E, E_idx, R, t, mask_V, mask_attend))
    # DEFAULT-precision (bf16-input) gather/streaming matmuls vs the f32 HIGHEST reference -> ~1e-2 match.
    np.testing.assert_allclose(np.asarray(out), np.asarray(ref), rtol=2e-2, atol=2e-2)

    print("KERNEL_OK")
</pallas_src>

<mosaic_0001>
module attributes {stable_mosaic.version = 11 : i64} {
  func.func @_src_kernel(%arg0: i32, %arg1: memref<16x16xf32, #tpu.memory_space<vmem>>, %arg2: memref<16x9xf32, #tpu.memory_space<vmem>>, %arg3: memref<16x3xf32, #tpu.memory_space<vmem>>, %arg4: memref<16x272xf32, #tpu.memory_space<vmem>>, %arg5: memref<1x272xf32, #tpu.memory_space<vmem>>, %arg6: memref<1x32xf32, #tpu.memory_space<vmem>>, %arg7: memref<16x272xf32, #tpu.memory_space<vmem>>) attributes {dimension_semantics = [#tpu.dimension_semantics<parallel>], iteration_bounds = array<i64: 1>, scalar_prefetch = 0 : i64, scratch_operands = 0 : i64, tpu.core_type = #tpu.core_type<tc>, window_params = [{transform_indices = @transform_0, window_bounds = array<i64: 16, 16>}, {transform_indices = @transform_1, window_bounds = array<i64: 16, 9>}, {transform_indices = @transform_2, window_bounds = array<i64: 16, 3>}, {pipeline_mode = #tpu.pipeline_mode<synchronous>, transform_indices = @transform_3, window_bounds = array<i64: 16, 272>}, {pipeline_mode = #tpu.pipeline_mode<synchronous>, transform_indices = @transform_4, window_bounds = array<i64: 1, 272>}, {pipeline_mode = #tpu.pipeline_mode<synchronous>, transform_indices = @transform_5, window_bounds = array<i64: 1, 32>}, {transform_indices = @transform_6, window_bounds = array<i64: 16, 272>}]} {
    %c0 = arith.constant 0 : index
    %c0_0 = arith.constant 0 : index
    %0 = vector.load %arg1[%c0, %c0_0] : memref<16x16xf32, #tpu.memory_space<vmem>>, vector<16x16xf32>
    %c0_1 = arith.constant 0 : index
    %c0_2 = arith.constant 0 : index
    %1 = vector.load %arg2[%c0_1, %c0_2] : memref<16x9xf32, #tpu.memory_space<vmem>>, vector<16x9xf32>
    %c0_3 = arith.constant 0 : index
    %c0_4 = arith.constant 0 : index
    %2 = vector.load %arg3[%c0_3, %c0_4] : memref<16x3xf32, #tpu.memory_space<vmem>>, vector<16x3xf32>
    %c0_5 = arith.constant 0 : index
    %c0_6 = arith.constant 0 : index
    %3 = vector.load %arg4[%c0_5, %c0_6] : memref<16x272xf32, #tpu.memory_space<vmem>>, vector<16x272xf32>
    %cst = arith.constant dense<0.000000e+00> : vector<16x272xf32>
    %4 = tpu.matmul %0, %3, %cst {dimension_numbers = #tpu.dot_dimension_numbers<[1], [0], [0], [1], [0, 0, 1, 1], [], []>, precision = #tpu.contract_precision<fp32>} : vector<16x16xf32>, vector<16x272xf32>, vector<16x272xf32> -> vector<16x272xf32>
    %c0_7 = arith.constant 0 : index
    %c0_8 = arith.constant 0 : index
    %5 = vector.load %arg5[%c0_7, %c0_8] : memref<1x272xf32, #tpu.memory_space<vmem>>, vector<1x272xf32>
    %6 = vector.broadcast %5 : vector<1x272xf32> to vector<16x272xf32>
    %7 = arith.addf %4, %6 : vector<16x272xf32>
    %c0_9 = arith.constant 0 : index
    %c0_10 = arith.constant 0 : index
    %8 = vector.load %arg6[%c0_9, %c0_10] : memref<1x32xf32, #tpu.memory_space<vmem>>, vector<1x32xf32>
    %9 = vector.extract_strided_slice %7 {offsets = [0, 128], sizes = [16, 32], strides = [1, 1]} : vector<16x272xf32> to vector<16x32xf32>
    %10 = vector.extract_strided_slice %7 {offsets = [0, 160], sizes = [16, 32], strides = [1, 1]} : vector<16x272xf32> to vector<16x32xf32>
    %11 = vector.extract_strided_slice %7 {offsets = [0, 192], sizes = [16, 32], strides = [1, 1]} : vector<16x272xf32> to vector<16x32xf32>
    %12 = vector.extract_strided_slice %1 {offsets = [0, 0], sizes = [16, 1], strides = [1, 1]} : vector<16x9xf32> to vector<16x1xf32>
    %13 = vector.broadcast %12 : vector<16x1xf32> to vector<16x32xf32>
    %14 = arith.mulf %13, %9 : vector<16x32xf32>
    %15 = vector.extract_strided_slice %1 {offsets = [0, 1], sizes = [16, 1], strides = [1, 1]} : vector<16x9xf32> to vector<16x1xf32>
    %16 = vector.broadcast %15 : vector<16x1xf32> to vector<16x32xf32>
    %17 = arith.mulf %16, %10 : vector<16x32xf32>
    %18 = arith.addf %14, %17 : vector<16x32xf32>
    %19 = vector.extract_strided_slice %1 {offsets = [0, 2], sizes = [16, 1], strides = [1, 1]} : vector<16x9xf32> to vector<16x1xf32>
    %20 = vector.broadcast %19 : vector<16x1xf32> to vector<16x32xf32>
    %21 = arith.mulf %20, %11 : vector<16x32xf32>
    %22 = arith.addf %18, %21 : vector<16x32xf32>
    %23 = vector.extract_strided_slice %2 {offsets = [0, 0], sizes = [16, 1], strides = [1, 1]} : vector<16x3xf32> to vector<16x1xf32>
    %24 = vector.broadcast %23 : vector<16x1xf32> to vector<16x32xf32>
    %25 = arith.addf %22, %24 : vector<16x32xf32>
    %26 = vector.extract_strided_slice %1 {offsets = [0, 3], sizes = [16, 1], strides = [1, 1]} : vector<16x9xf32> to vector<16x1xf32>
    %27 = vector.broadcast %26 : vector<16x1xf32> to vector<16x32xf32>
    %28 = arith.mulf %27, %9 : vector<16x32xf32>
    %29 = vector.extract_strided_slice %1 {offsets = [0, 4], sizes = [16, 1], strides = [1, 1]} : vector<16x9xf32> to vector<16x1xf32>
    %30 = vector.broadcast %29 : vector<16x1xf32> to vector<16x32xf32>
    %31 = arith.mulf %30, %10 : vector<16x32xf32>
    %32 = arith.addf %28, %31 : vector<16x32xf32>
    %33 = vector.extract_strided_slice %1 {offsets = [0, 5], sizes = [16, 1], strides = [1, 1]} : vector<16x9xf32> to vector<16x1xf32>
    %34 = vector.broadcast %33 : vector<16x1xf32> to vector<16x32xf32>
    %35 = arith.mulf %34, %11 : vector<16x32xf32>
    %36 = arith.addf %32, %35 : vector<16x32xf32>
    %37 = vector.extract_strided_slice %2 {offsets = [0, 1], sizes = [16, 1], strides = [1, 1]} : vector<16x3xf32> to vector<16x1xf32>
    %38 = vector.broadcast %37 : vector<16x1xf32> to vector<16x32xf32>
    %39 = arith.addf %36, %38 : vector<16x32xf32>
    %40 = vector.extract_strided_slice %1 {offsets = [0, 6], sizes = [16, 1], strides = [1, 1]} : vector<16x9xf32> to vector<16x1xf32>
    %41 = vector.broadcast %40 : vector<16x1xf32> to vector<16x32xf32>
    %42 = arith.mulf %41, %9 : vector<16x32xf32>
    %43 = vector.extract_strided_slice %1 {offsets = [0, 7], sizes = [16, 1], strides = [1, 1]} : vector<16x9xf32> to vector<16x1xf32>
    %44 = vector.broadcast %43 : vector<16x1xf32> to vector<16x32xf32>
    %45 = arith.mulf %44, %10 : vector<16x32xf32>
    %46 = arith.addf %42, %45 : vector<16x32xf32>
    %47 = vector.extract_strided_slice %1 {offsets = [0, 8], sizes = [16, 1], strides = [1, 1]} : vector<16x9xf32> to vector<16x1xf32>
    %48 = vector.broadcast %47 : vector<16x1xf32> to vector<16x32xf32>
    %49 = arith.mulf %48, %11 : vector<16x32xf32>
    %50 = arith.addf %46, %49 : vector<16x32xf32>
    %51 = vector.extract_strided_slice %2 {offsets = [0, 2], sizes = [16, 1], strides = [1, 1]} : vector<16x3xf32> to vector<16x1xf32>
    %52 = vector.broadcast %51 : vector<16x1xf32> to vector<16x32xf32>
    %53 = arith.addf %50, %52 : vector<16x32xf32>
    %54 = vector.extract_strided_slice %7 {offsets = [0, 224], sizes = [16, 16], strides = [1, 1]} : vector<16x272xf32> to vector<16x16xf32>
    %55 = vector.extract_strided_slice %7 {offsets = [0, 240], sizes = [16, 16], strides = [1, 1]} : vector<16x272xf32> to vector<16x16xf32>
    %56 = vector.extract_strided_slice %7 {offsets = [0, 256], sizes = [16, 16], strides = [1, 1]} : vector<16x272xf32> to vector<16x16xf32>
    %57 = vector.extract_strided_slice %1 {offsets = [0, 0], sizes = [16, 1], strides = [1, 1]} : vector<16x9xf32> to vector<16x1xf32>
    %58 = vector.broadcast %57 : vector<16x1xf32> to vector<16x16xf32>
    %59 = arith.mulf %58, %54 : vector<16x16xf32>
    %60 = vector.extract_strided_slice %1 {offsets = [0, 1], sizes = [16, 1], strides = [1, 1]} : vector<16x9xf32> to vector<16x1xf32>
    %61 = vector.broadcast %60 : vector<16x1xf32> to vector<16x16xf32>
    %62 = arith.mulf %61, %55 : vector<16x16xf32>
    %63 = arith.addf %59, %62 : vector<16x16xf32>
    %64 = vector.extract_strided_slice %1 {offsets = [0, 2], sizes = [16, 1], strides = [1, 1]} : vector<16x9xf32> to vector<16x1xf32>
    %65 = vector.broadcast %64 : vector<16x1xf32> to vector<16x16xf32>
    %66 = arith.mulf %65, %56 : vector<16x16xf32>
    %67 = arith.addf %63, %66 : vector<16x16xf32>
    %68 = vector.extract_strided_slice %2 {offsets = [0, 0], sizes = [16, 1], strides = [1, 1]} : vector<16x3xf32> to vector<16x1xf32>
    %69 = vector.broadcast %68 : vector<16x1xf32> to vector<16x16xf32>
    %70 = arith.addf %67, %69 : vector<16x16xf32>
    %71 = vector.extract_strided_slice %1 {offsets = [0, 3], sizes = [16, 1], strides = [1, 1]} : vector<16x9xf32> to vector<16x1xf32>
    %72 = vector.broadcast %71 : vector<16x1xf32> to vector<16x16xf32>
    %73 = arith.mulf %72, %54 : vector<16x16xf32>
    %74 = vector.extract_strided_slice %1 {offsets = [0, 4], sizes = [16, 1], strides = [1, 1]} : vector<16x9xf32> to vector<16x1xf32>
    %75 = vector.broadcast %74 : vector<16x1xf32> to vector<16x16xf32>
    %76 = arith.mulf %75, %55 : vector<16x16xf32>
    %77 = arith.addf %73, %76 : vector<16x16xf32>
    %78 = vector.extract_strided_slice %1 {offsets = [0, 5], sizes = [16, 1], strides = [1, 1]} : vector<16x9xf32> to vector<16x1xf32>
    %79 = vector.broadcast %78 : vector<16x1xf32> to vector<16x16xf32>
    %80 = arith.mulf %79, %56 : vector<16x16xf32>
    %81 = arith.addf %77, %80 : vector<16x16xf32>
    %82 = vector.extract_strided_slice %2 {offsets = [0, 1], sizes = [16, 1], strides = [1, 1]} : vector<16x3xf32> to vector<16x1xf32>
    %83 = vector.broadcast %82 : vector<16x1xf32> to vector<16x16xf32>
    %84 = arith.addf %81, %83 : vector<16x16xf32>
    %85 = vector.extract_strided_slice %1 {offsets = [0, 6], sizes = [16, 1], strides = [1, 1]} : vector<16x9xf32> to vector<16x1xf32>
    %86 = vector.broadcast %85 : vector<16x1xf32> to vector<16x16xf32>
    %87 = arith.mulf %86, %54 : vector<16x16xf32>
    %88 = vector.extract_strided_slice %1 {offsets = [0, 7], sizes = [16, 1], strides = [1, 1]} : vector<16x9xf32> to vector<16x1xf32>
    %89 = vector.broadcast %88 : vector<16x1xf32> to vector<16x16xf32>
    %90 = arith.mulf %89, %55 : vector<16x16xf32>
    %91 = arith.addf %87, %90 : vector<16x16xf32>
    %92 = vector.extract_strided_slice %1 {offsets = [0, 8], sizes = [16, 1], strides = [1, 1]} : vector<16x9xf32> to vector<16x1xf32>
    %93 = vector.broadcast %92 : vector<16x1xf32> to vector<16x16xf32>
    %94 = arith.mulf %93, %56 : vector<16x16xf32>
    %95 = arith.addf %91, %94 : vector<16x16xf32>
    %96 = vector.extract_strided_slice %2 {offsets = [0, 2], sizes = [16, 1], strides = [1, 1]} : vector<16x3xf32> to vector<16x1xf32>
    %97 = vector.broadcast %96 : vector<16x1xf32> to vector<16x16xf32>
    %98 = arith.addf %95, %97 : vector<16x16xf32>
    %99 = vector.extract_strided_slice %7 {offsets = [0, 0], sizes = [16, 128], strides = [1, 1]} : vector<16x272xf32> to vector<16x128xf32>
    %100 = vector.broadcast %8 : vector<1x32xf32> to vector<16x32xf32>
    %101 = arith.mulf %25, %100 : vector<16x32xf32>
    %102 = vector.broadcast %8 : vector<1x32xf32> to vector<16x32xf32>
    %103 = arith.mulf %39, %102 : vector<16x32xf32>
    %104 = vector.broadcast %8 : vector<1x32xf32> to vector<16x32xf32>
    %105 = arith.mulf %53, %104 : vector<16x32xf32>
    %106 = tpu.concatenate %99, %101, %103, %105, %70, %84, %98 in 1 : vector<16x128xf32>, vector<16x32xf32>, vector<16x32xf32>, vector<16x32xf32>, vector<16x16xf32>, vector<16x16xf32>, vector<16x16xf32> -> vector<16x272xf32>
    %c0_11 = arith.constant 0 : index
    %c0_12 = arith.constant 0 : index
    %107 = vector.load %arg7[%c0_11, %c0_12] : memref<16x272xf32, #tpu.memory_space<vmem>>, vector<16x272xf32>
    tpu.vector_store %arg7[%c0_11, %c0_12], %106 {strides = array<i32>} : memref<16x272xf32, #tpu.memory_space<vmem>>, vector<16x272xf32>,
    return
  }
  func.func @transform_0(%arg0: i32) -> (i32, i32) {
    %c0_i32 = arith.constant 0 : i32
    %c0_i32_0 = arith.constant 0 : i32
    return %arg0, %c0_i32 : i32, i32
  }
  func.func @transform_1(%arg0: i32) -> (i32, i32) {
    %c0_i32 = arith.constant 0 : i32
    %c0_i32_0 = arith.constant 0 : i32
    return %arg0, %c0_i32 : i32, i32
  }
  func.func @transform_2(%arg0: i32) -> (i32, i32) {
    %c0_i32 = arith.constant 0 : i32
    %c0_i32_0 = arith.constant 0 : i32
    return %arg0, %c0_i32 : i32, i32
  }
  func.func @transform_3(%arg0: i32) -> (i32, i32) {
    %c0_i32 = arith.constant 0 : i32
    %c0_i32_0 = arith.constant 0 : i32
    %c0_i32_1 = arith.constant 0 : i32
    return %c0_i32, %c0_i32_0 : i32, i32
  }
  func.func @transform_4(%arg0: i32) -> (i32, i32) {
    %c0_i32 = arith.constant 0 : i32
    %c0_i32_0 = arith.constant 0 : i32
    %c0_i32_1 = arith.constant 0 : i32
    return %c0_i32, %c0_i32_0 : i32, i32
  }
  func.func @transform_5(%arg0: i32) -> (i32, i32) {
    %c0_i32 = arith.constant 0 : i32
    %c0_i32_0 = arith.constant 0 : i32
    %c0_i32_1 = arith.constant 0 : i32
    return %c0_i32, %c0_i32_0 : i32, i32
  }
  func.func @transform_6(%arg0: i32) -> (i32, i32) {
    %c0_i32 = arith.constant 0 : i32
    %c0_i32_0 = arith.constant 0 : i32
    return %arg0, %c0_i32 : i32, i32
  }
}

module attributes {stable_mosaic.version = 11 : i64} {
  func.func @_ipa_main_kernel(%arg0: i32, %arg1: i32, %arg2: memref<1x8x16xf32, #tpu.memory_space<vmem>>, %arg3: memref<1x8x32xf32, #tpu.memory_space<vmem>>, %arg4: memref<1x8x4xi32, #tpu.memory_space<vmem>>, %arg5: memref<1x8x4xf32, #tpu.memory_space<vmem>>, %arg6: memref<1x8x9xf32, #tpu.memory_space<vmem>>, %arg7: memref<1x8x3xf32, #tpu.memory_space<vmem>>, %arg8: memref<1x8x1xf32, #tpu.memory_space<vmem>>, %arg9: memref<1x8x272xf32, #tpu.memory_space<vmem>>, %arg10: memref<16x160xf32, #tpu.memory_space<vmem>>, %arg11: memref<1x160xf32, #tpu.memory_space<vmem>>, %arg12: memref<1x32xf32, #tpu.memory_space<vmem>>, %arg13: memref<272x4xf32, #tpu.memory_space<vmem>>, %arg14: memref<1x272xf32, #tpu.memory_space<vmem>>, %arg15: memref<96x4xf32, #tpu.memory_space<vmem>>, %arg16: memref<32x16xf32, #tpu.memory_space<vmem>>, %arg17: memref<1x16xf32, #tpu.memory_space<vmem>>, %arg18: memref<4x16xf32, #tpu.memory_space<vmem>>, %arg19: memref<4x16xf32, #tpu.memory_space<vmem>>, %arg20: memref<16x4xf32, #tpu.memory_space<vmem>>, %arg21: memref<4x272xf32, #tpu.memory_space<vmem>>, %arg22: memref<4x32xf32, #tpu.memory_space<vmem>>, %arg23: memref<8x32xf32, #tpu.memory_space<vmem>>, %arg24: memref<160x16xf32, #tpu.memory_space<vmem>>, %arg25: memref<1x16xf32, #tpu.memory_space<vmem>>, %arg26: memref<1x16xf32, #tpu.memory_space<vmem>>, %arg27: memref<1x16xf32, #tpu.memory_space<vmem>>, %arg28: memref<16x64xf32, #tpu.memory_space<vmem>>, %arg29: memref<1x64xf32, #tpu.memory_space<vmem>>, %arg30: memref<64x16xf32, #tpu.memory_space<vmem>>, %arg31: memref<1x16xf32, #tpu.memory_space<vmem>>, %arg32: memref<1x16xf32, #tpu.memory_space<vmem>>, %arg33: memref<1x16xf32, #tpu.memory_space<vmem>>, %arg34: memref<1x8x16xf32, #tpu.memory_space<vmem>>) attributes {dimension_semantics = [#tpu.dimension_semantics<parallel>, #tpu.dimension_semantics<parallel>], iteration_bounds = array<i64: 2, 1>, scalar_prefetch = 0 : i64, scratch_operands = 0 : i64, tpu.core_type = #tpu.core_type<tc>, window_params = [{transform_indices = @transform_0, window_bounds = array<i64: 1, 8, 16>}, {transform_indices = @transform_1, window_bounds = array<i64: 1, 8, 32>}, {transform_indices = @transform_2, window_bounds = array<i64: 1, 8, 4>}, {transform_indices = @transform_3, window_bounds = array<i64: 1, 8, 4>}, {transform_indices = @transform_4, window_bounds = array<i64: 1, 8, 9>}, {transform_indices = @transform_5, window_bounds = array<i64: 1, 8, 3>}, {transform_indices = @transform_6, window_bounds = array<i64: 1, 8, 1>}, {transform_indices = @transform_7, window_bounds = array<i64: 1, 8, 272>}, {pipeline_mode = #tpu.pipeline_mode<synchronous>, transform_indices = @transform_8, window_bounds = array<i64: 16, 160>}, {pipeline_mode = #tpu.pipeline_mode<synchronous>, transform_indices = @transform_9, window_bounds = array<i64: 1, 160>}, {pipeline_mode = #tpu.pipeline_mode<synchronous>, transform_indices = @transform_10, window_bounds = array<i64: 1, 32>}, {pipeline_mode = #tpu.pipeline_mode<synchronous>, transform_indices = @transform_11, window_bounds = array<i64: 272, 4>}, {pipeline_mode = #tpu.pipeline_mode<synchronous>, transform_indices = @transform_12, window_bounds = array<i64: 1, 272>}, {pipeline_mode = #tpu.pipeline_mode<synchronous>, transform_indices = @transform_13, window_bounds = array<i64: 96, 4>}, {pipeline_mode = #tpu.pipeline_mode<synchronous>, transform_indices = @transform_14, window_bounds = array<i64: 32, 16>}, {pipeline_mode = #tpu.pipeline_mode<synchronous>, transform_indices = @transform_15, window_bounds = array<i64: 1, 16>}, {pipeline_mode = #tpu.pipeline_mode<synchronous>, transform_indices = @transform_16, window_bounds = array<i64: 4, 16>}, {pipeline_mode = #tpu.pipeline_mode<synchronous>, transform_indices = @transform_17, window_bounds = array<i64: 4, 16>}, {pipeline_mode = #tpu.pipeline_mode<synchronous>, transform_indices = @transform_18, window_bounds = array<i64: 16, 4>}, {pipeline_mode = #tpu.pipeline_mode<synchronous>, transform_indices = @transform_19, window_bounds = array<i64: 4, 272>}, {pipeline_mode = #tpu.pipeline_mode<synchronous>, transform_indices = @transform_20, window_bounds = array<i64: 4, 32>}, {pipeline_mode = #tpu.pipeline_mode<synchronous>, transform_indices = @transform_21, window_bounds = array<i64: 8, 32>}, {pipeline_mode = #tpu.pipeline_mode<synchronous>, transform_indices = @transform_22, window_bounds = array<i64: 160, 16>}, {pipeline_mode = #tpu.pipeline_mode<synchronous>, transform_indices = @transform_23, window_bounds = array<i64: 1, 16>}, {pipeline_mode = #tpu.pipeline_mode<synchronous>, transform_indices = @transform_24, window_bounds = array<i64: 1, 16>}, {pipeline_mode = #tpu.pipeline_mode<synchronous>, transform_indices = @transform_25, window_bounds = array<i64: 1, 16>}, {pipeline_mode = #tpu.pipeline_mode<synchronous>, transform_indices = @transform_26, window_bounds = array<i64: 16, 64>}, {pipeline_mode = #tpu.pipeline_mode<synchronous>, transform_indices = @transform_27, window_bounds = array<i64: 1, 64>}, {pipeline_mode = #tpu.pipeline_mode<synchronous>, transform_indices = @transform_28, window_bounds = array<i64: 64, 16>}, {pipeline_mode = #tpu.pipeline_mode<synchronous>, transform_indices = @transform_29, window_bounds = array<i64: 1, 16>}, {pipeline_mode = #tpu.pipeline_mode<synchronous>, transform_indices = @transform_30, window_bounds = array<i64: 1, 16>}, {pipeline_mode = #tpu.pipeline_mode<synchronous>, transform_indices = @transform_31, window_bounds = array<i64: 1, 16>}, {transform_indices = @transform_32, window_bounds = array<i64: 1, 8, 16>}]} {
    %c0 = arith.constant 0 : index
    %c0_0 = arith.constant 0 : index
    %c0_1 = arith.constant 0 : index
    %0 = vector.load %arg2[%c0, %c0_0, %c0_1] : memref<1x8x16xf32, #tpu.memory_space<vmem>>, vector<1x8x16xf32>
    %1 = vector.shape_cast %0 : vector<1x8x16xf32> to vector<8x16xf32>
    %c0_2 = arith.constant 0 : index
    %c0_3 = arith.constant 0 : index
    %c0_4 = arith.constant 0 : index
    %2 = vector.load %arg3[%c0_2, %c0_3, %c0_4] : memref<1x8x32xf32, #tpu.memory_space<vmem>>, vector<1x8x32xf32>
    %3 = vector.shape_cast %2 : vector<1x8x32xf32> to vector<8x32xf32>
    %c0_5 = arith.constant 0 : index
    %c0_6 = arith.constant 0 : index
    %c0_7 = arith.constant 0 : index
    %4 = vector.load %arg4[%c0_5, %c0_6, %c0_7] : memref<1x8x4xi32, #tpu.memory_space<vmem>>, vector<1x8x4xi32>
    %5 = vector.shape_cast %4 : vector<1x8x4xi32> to vector<8x4xi32>
    %c0_8 = arith.constant 0 : index
    %c0_9 = arith.constant 0 : index
    %c0_10 = arith.constant 0 : index
    %6 = vector.load %arg6[%c0_8, %c0_9, %c0_10] : memref<1x8x9xf32, #tpu.memory_space<vmem>>, vector<1x8x9xf32>
    %7 = vector.shape_cast %6 : vector<1x8x9xf32> to vector<8x9xf32>
    %c0_11 = arith.constant 0 : index
    %c0_12 = arith.constant 0 : index
    %c0_13 = arith.constant 0 : index
    %8 = vector.load %arg7[%c0_11, %c0_12, %c0_13] : memref<1x8x3xf32, #tpu.memory_space<vmem>>, vector<1x8x3xf32>
    %9 = vector.shape_cast %8 : vector<1x8x3xf32> to vector<8x3xf32>
    %c0_14 = arith.constant 0 : index
    %c0_15 = arith.constant 0 : index
    %c0_16 = arith.constant 0 : index
    %10 = vector.load %arg9[%c0_14, %c0_15, %c0_16] : memref<1x8x272xf32, #tpu.memory_space<vmem>>, vector<1x8x272xf32>
    %11 = vector.shape_cast %10 : vector<1x8x272xf32> to vector<8x272xf32>
    %c0_17 = arith.constant 0 : index
    %c0_18 = arith.constant 0 : index
    %12 = vector.load %arg10[%c0_17, %c0_18] : memref<16x160xf32, #tpu.memory_space<vmem>>, vector<16x160xf32>
    %cst = arith.constant dense<0.000000e+00> : vector<8x160xf32>
    %13 = tpu.matmul %1, %12, %cst {dimension_numbers = #tpu.dot_dimension_numbers<[1], [0], [0], [1], [0, 0, 1, 1], [], []>, precision = #tpu.contract_precision<fp32>} : vector<8x16xf32>, vector<16x160xf32>, vector<8x160xf32> -> vector<8x160xf32>
    %c0_19 = arith.constant 0 : index
    %c0_20 = arith.constant 0 : index
    %14 = vector.load %arg11[%c0_19, %c0_20] : memref<1x160xf32, #tpu.memory_space<vmem>>, vector<1x160xf32>
    %15 = vector.broadcast %14 : vector<1x160xf32> to vector<8x160xf32>
    %16 = arith.addf %13, %15 : vector<8x160xf32>
    %17 = vector.extract_strided_slice %16 {offsets = [0, 0], sizes = [8, 64], strides = [1, 1]} : vector<8x160xf32> to vector<8x64xf32>
    %18 = vector.extract_strided_slice %16 {offsets = [0, 64], sizes = [8, 32], strides = [1, 1]} : vector<8x160xf32> to vector<8x32xf32>
    %19 = vector.extract_strided_slice %16 {offsets = [0, 96], sizes = [8, 32], strides = [1, 1]} : vector<8x160xf32> to vector<8x32xf32>
    %20 = vector.extract_strided_slice %16 {offsets = [0, 128], sizes = [8, 32], strides = [1, 1]} : vector<8x160xf32> to vector<8x32xf32>
    %c0_21 = arith.constant 0 : index
    %c0_22 = arith.constant 0 : index
    %21 = vector.load %arg12[%c0_21, %c0_22] : memref<1x32xf32, #tpu.memory_space<vmem>>, vector<1x32xf32>
    %22 = vector.extract_strided_slice %7 {offsets = [0, 0], sizes = [8, 1], strides = [1, 1]} : vector<8x9xf32> to vector<8x1xf32>
    %23 = vector.broadcast %22 : vector<8x1xf32> to vector<8x32xf32>
    %24 = arith.mulf %23, %18 : vector<8x32xf32>
    %25 = vector.extract_strided_slice %7 {offsets = [0, 1], sizes = [8, 1], strides = [1, 1]} : vector<8x9xf32> to vector<8x1xf32>
    %26 = vector.broadcast %25 : vector<8x1xf32> to vector<8x32xf32>
    %27 = arith.mulf %26, %19 : vector<8x32xf32>
    %28 = arith.addf %24, %27 : vector<8x32xf32>
    %29 = vector.extract_strided_slice %7 {offsets = [0, 2], sizes = [8, 1], strides = [1, 1]} : vector<8x9xf32> to vector<8x1xf32>
    %30 = vector.broadcast %29 : vector<8x1xf32> to vector<8x32xf32>
    %31 = arith.mulf %30, %20 : vector<8x32xf32>
    %32 = arith.addf %28, %31 : vector<8x32xf32>
    %33 = vector.extract_strided_slice %9 {offsets = [0, 0], sizes = [8, 1], strides = [1, 1]} : vector<8x3xf32> to vector<8x1xf32>
    %34 = vector.broadcast %33 : vector<8x1xf32> to vector<8x32xf32>
    %35 = arith.addf %32, %34 : vector<8x32xf32>
    %36 = vector.broadcast %21 : vector<1x32xf32> to vector<8x32xf32>
    %37 = arith.mulf %35, %36 : vector<8x32xf32>
    %38 = vector.extract_strided_slice %7 {offsets = [0, 3], sizes = [8, 1], strides = [1, 1]} : vector<8x9xf32> to vector<8x1xf32>
    %39 = vector.broadcast %38 : vector<8x1xf32> to vector<8x32xf32>
    %40 = arith.mulf %39, %18 : vector<8x32xf32>
    %41 = vector.extract_strided_slice %7 {offsets = [0, 4], sizes = [8, 1], strides = [1, 1]} : vector<8x9xf32> to vector<8x1xf32>
    %42 = vector.broadcast %41 : vector<8x1xf32> to vector<8x32xf32>
    %43 = arith.mulf %42, %19 : vector<8x32xf32>
    %44 = arith.addf %40, %43 : vector<8x32xf32>
    %45 = vector.extract_strided_slice %7 {offsets = [0, 5], sizes = [8, 1], strides = [1, 1]} : vector<8x9xf32> to vector<8x1xf32>
    %46 = vector.broadcast %45 : vector<8x1xf32> to vector<8x32xf32>
    %47 = arith.mulf %46, %20 : vector<8x32xf32>
    %48 = arith.addf %44, %47 : vector<8x32xf32>
    %49 = vector.extract_strided_slice %9 {offsets = [0, 1], sizes = [8, 1], strides = [1, 1]} : vector<8x3xf32> to vector<8x1xf32>
    %50 = vector.broadcast %49 : vector<8x1xf32> to vector<8x32xf32>
    %51 = arith.addf %48, %50 : vector<8x32xf32>
    %52 = vector.broadcast %21 : vector<1x32xf32> to vector<8x32xf32>
    %53 = arith.mulf %51, %52 : vector<8x32xf32>
    %54 = vector.extract_strided_slice %7 {offsets = [0, 6], sizes = [8, 1], strides = [1, 1]} : vector<8x9xf32> to vector<8x1xf32>
    %55 = vector.broadcast %54 : vector<8x1xf32> to vector<8x32xf32>
    %56 = arith.mulf %55, %18 : vector<8x32xf32>
    %57 = vector.extract_strided_slice %7 {offsets = [0, 7], sizes = [8, 1], strides = [1, 1]} : vector<8x9xf32> to vector<8x1xf32>
    %58 = vector.broadcast %57 : vector<8x1xf32> to vector<8x32xf32>
    %59 = arith.mulf %58, %19 : vector<8x32xf32>
    %60 = arith.addf %56, %59 : vector<8x32xf32>
    %61 = vector.extract_strided_slice %7 {offsets = [0, 8], sizes = [8, 1], strides = [1, 1]} : vector<8x9xf32> to vector<8x1xf32>
    %62 = vector.broadcast %61 : vector<8x1xf32> to vector<8x32xf32>
    %63 = arith.mulf %62, %20 : vector<8x32xf32>
    %64 = arith.addf %60, %63 : vector<8x32xf32>
    %65 = vector.extract_strided_slice %9 {offsets = [0, 2], sizes = [8, 1], strides = [1, 1]} : vector<8x3xf32> to vector<8x1xf32>
    %66 = vector.broadcast %65 : vector<8x1xf32> to vector<8x32xf32>
    %67 = arith.addf %64, %66 : vector<8x32xf32>
    %68 = vector.broadcast %21 : vector<1x32xf32> to vector<8x32xf32>
    %69 = arith.mulf %67, %68 : vector<8x32xf32>
    %70 = tpu.concatenate %37, %53, %69 in 1 : vector<8x32xf32>, vector<8x32xf32>, vector<8x32xf32> -> vector<8x96xf32>
    %71 = arith.mulf %70, %70 : vector<8x96xf32>
    %c0_23 = arith.constant 0 : index
    %c0_24 = arith.constant 0 : index
    %72 = vector.load %arg15[%c0_23, %c0_24] : memref<96x4xf32, #tpu.memory_space<vmem>>, vector<96x4xf32>
    %cst_25 = arith.constant dense<0.000000e+00> : vector<8x4xf32>
    %73 = tpu.matmul %71, %72, %cst_25 {dimension_numbers = #tpu.dot_dimension_numbers<[1], [0], [0], [1], [0, 0, 1, 1], [], []>, precision = #tpu.contract_precision<fp32>} : vector<8x96xf32>, vector<96x4xf32>, vector<8x4xf32> -> vector<8x4xf32>
    %cst_26 = arith.constant 0.144337565 : f32
    %74 = vector.broadcast %cst_26 : f32 to vector<8x64xf32>
    %75 = arith.mulf %17, %74 : vector<8x64xf32>
    %cst_27 = arith.constant 0.000000e+00 : f32
    %76 = vector.broadcast %cst_27 : f32 to vector<8x64xf32>
    %cst_28 = arith.constant 2.000000e+00 : f32
    %77 = vector.broadcast %cst_28 : f32 to vector<8x96xf32>
    %78 = arith.mulf %77, %70 : vector<8x96xf32>
    %cst_29 = arith.constant 0.000000e+00 : f32
    %79 = vector.broadcast %cst_29 : f32 to vector<8x48xf32>
    %80 = tpu.concatenate %75, %76, %78, %79 in 1 : vector<8x64xf32>, vector<8x64xf32>, vector<8x96xf32>, vector<8x48xf32> -> vector<8x272xf32>
    %c0_30 = arith.constant 0 : index
    %c0_31 = arith.constant 0 : index
    %c0_32 = arith.constant 0 : index
    %81 = vector.load %arg5[%c0_30, %c0_31, %c0_32] : memref<1x8x4xf32, #tpu.memory_space<vmem>>, vector<1x8x4xf32>
    %82 = vector.shape_cast %81 : vector<1x8x4xf32> to vector<8x4xf32>
    %cst_33 = arith.constant 1.000000e+00 : f32
    %83 = vector.broadcast %cst_33 : f32 to vector<8x4xf32>
    %84 = arith.subf %82, %83 : vector<8x4xf32>
    %cst_34 = arith.constant 1.000000e+05 : f32
    %85 = vector.broadcast %cst_34 : f32 to vector<8x4xf32>
    %86 = arith.mulf %85, %84 : vector<8x4xf32>
    %c0_35 = arith.constant 0 : index
    %c0_36 = arith.constant 0 : index
    %87 = vector.load %arg16[%c0_35, %c0_36] : memref<32x16xf32, #tpu.memory_space<vmem>>, vector<32x16xf32>
    %cst_37 = arith.constant dense<0.000000e+00> : vector<8x16xf32>
    %88 = tpu.matmul %3, %87, %cst_37 {dimension_numbers = #tpu.dot_dimension_numbers<[1], [0], [0], [1], [0, 0, 1, 1], [], []>} : vector<8x32xf32>, vector<32x16xf32>, vector<8x16xf32> -> vector<8x16xf32>
    %c0_38 = arith.constant 0 : index
    %c0_39 = arith.constant 0 : index
    %89 = vector.load %arg17[%c0_38, %c0_39] : memref<1x16xf32, #tpu.memory_space<vmem>>, vector<1x16xf32>
    %90 = vector.broadcast %89 : vector<1x16xf32> to vector<8x16xf32>
    %91 = arith.addf %88, %90 : vector<8x16xf32>
    %c0_40 = arith.constant 0 : index
    %c0_41 = arith.constant 0 : index
    %92 = vector.load %arg18[%c0_40, %c0_41] : memref<4x16xf32, #tpu.memory_space<vmem>>, vector<4x16xf32>
    %cst_42 = arith.constant dense<0.000000e+00> : vector<8x16xf32>
    %93 = tpu.matmul %86, %92, %cst_42 {dimension_numbers = #tpu.dot_dimension_numbers<[1], [0], [0], [1], [0, 0, 1, 1], [], []>} : vector<8x4xf32>, vector<4x16xf32>, vector<8x16xf32> -> vector<8x16xf32>
    %94 = arith.addf %91, %93 : vector<8x16xf32>
    %c0_43 = arith.constant 0 : index
    %c0_44 = arith.constant 0 : index
    %95 = vector.load %arg19[%c0_43, %c0_44] : memref<4x16xf32, #tpu.memory_space<vmem>>, vector<4x16xf32>
    %cst_45 = arith.constant dense<0.000000e+00> : vector<8x16xf32>
    %96 = tpu.matmul %73, %95, %cst_45 {dimension_numbers = #tpu.dot_dimension_numbers<[1], [0], [0], [1], [0, 0, 1, 1], [], []>} : vector<8x4xf32>, vector<4x16xf32>, vector<8x16xf32> -> vector<8x16xf32>
    %97 = arith.subf %94, %96 : vector<8x16xf32>
    %98 = tpu.iota {dimensions = array<i32: 1>} : vector<8x8xi32>
    %c0_46 = arith.constant 0 : index
    %c0_47 = arith.constant 0 : index
    %99 = vector.load %arg14[%c0_46, %c0_47] : memref<1x272xf32, #tpu.memory_space<vmem>>, vector<1x272xf32>
    %100 = vector.extract_strided_slice %5 {offsets = [0, 0], sizes = [8, 1], strides = [1, 1]} : vector<8x4xi32> to vector<8x1xi32>
    %101 = vector.broadcast %100 : vector<8x1xi32> to vector<8x8xi32>
    %102 = arith.cmpi eq, %101, %98 : vector<8x8xi32>
    %103 = arith.extui %102 : vector<8x8xi1> to vector<8x8xi32>
    %104 = arith.sitofp %103 : vector<8x8xi32> to vector<8x8xf32>
    %cst_48 = arith.constant dense<0.000000e+00> : vector<8x272xf32>
    %105 = tpu.matmul %104, %11, %cst_48 {dimension_numbers = #tpu.dot_dimension_numbers<[1], [0], [0], [1], [0, 0, 1, 1], [], []>} : vector<8x8xf32>, vector<8x272xf32>, vector<8x272xf32> -> vector<8x272xf32>
    %106 = vector.broadcast %99 : vector<1x272xf32> to vector<8x272xf32>
    %107 = arith.mulf %105, %106 : vector<8x272xf32>
    %108 = arith.subf %80, %107 : vector<8x272xf32>
    %109 = arith.mulf %108, %105 : vector<8x272xf32>
    %c0_49 = arith.constant 0 : index
    %c0_50 = arith.constant 0 : index
    %110 = vector.load %arg13[%c0_49, %c0_50] : memref<272x4xf32, #tpu.memory_space<vmem>>, vector<272x4xf32>
    %cst_51 = arith.constant dense<0.000000e+00> : vector<8x4xf32>
    %111 = tpu.matmul %109, %110, %cst_51 {dimension_numbers = #tpu.dot_dimension_numbers<[1], [0], [0], [1], [0, 0, 1, 1], [], []>, precision = #tpu.contract_precision<fp32>} : vector<8x272xf32>, vector<272x4xf32>, vector<8x4xf32> -> vector<8x4xf32>
    %112 = vector.extract_strided_slice %5 {offsets = [0, 1], sizes = [8, 1], strides = [1, 1]} : vector<8x4xi32> to vector<8x1xi32>
    %113 = vector.broadcast %112 : vector<8x1xi32> to vector<8x8xi32>
    %114 = arith.cmpi eq, %113, %98 : vector<8x8xi32>
    %115 = arith.extui %114 : vector<8x8xi1> to vector<8x8xi32>
    %116 = arith.sitofp %115 : vector<8x8xi32> to vector<8x8xf32>
    %cst_52 = arith.constant dense<0.000000e+00> : vector<8x272xf32>
    %117 = tpu.matmul %116, %11, %cst_52 {dimension_numbers = #tpu.dot_dimension_numbers<[1], [0], [0], [1], [0, 0, 1, 1], [], []>} : vector<8x8xf32>, vector<8x272xf32>, vector<8x272xf32> -> vector<8x272xf32>
    %118 = vector.broadcast %99 : vector<1x272xf32> to vector<8x272xf32>
    %119 = arith.mulf %117, %118 : vector<8x272xf32>
    %120 = arith.subf %80, %119 : vector<8x272xf32>
    %121 = arith.mulf %120, %117 : vector<8x272xf32>
    %c0_53 = arith.constant 0 : index
    %c0_54 = arith.constant 0 : index
    %122 = vector.load %arg13[%c0_53, %c0_54] : memref<272x4xf32, #tpu.memory_space<vmem>>, vector<272x4xf32>
    %cst_55 = arith.constant dense<0.000000e+00> : vector<8x4xf32>
    %123 = tpu.matmul %121, %122, %cst_55 {dimension_numbers = #tpu.dot_dimension_numbers<[1], [0], [0], [1], [0, 0, 1, 1], [], []>, precision = #tpu.contract_precision<fp32>} : vector<8x272xf32>, vector<272x4xf32>, vector<8x4xf32> -> vector<8x4xf32>
    %124 = vector.extract_strided_slice %5 {offsets = [0, 2], sizes = [8, 1], strides = [1, 1]} : vector<8x4xi32> to vector<8x1xi32>
    %125 = vector.broadcast %124 : vector<8x1xi32> to vector<8x8xi32>
    %126 = arith.cmpi eq, %125, %98 : vector<8x8xi32>
    %127 = arith.extui %126 : vector<8x8xi1> to vector<8x8xi32>
    %128 = arith.sitofp %127 : vector<8x8xi32> to vector<8x8xf32>
    %cst_56 = arith.constant dense<0.000000e+00> : vector<8x272xf32>
    %129 = tpu.matmul %128, %11, %cst_56 {dimension_numbers = #tpu.dot_dimension_numbers<[1], [0], [0], [1], [0, 0, 1, 1], [], []>} : vector<8x8xf32>, vector<8x272xf32>, vector<8x272xf32> -> vector<8x272xf32>
    %130 = vector.broadcast %99 : vector<1x272xf32> to vector<8x272xf32>
    %131 = arith.mulf %129, %130 : vector<8x272xf32>
    %132 = arith.subf %80, %131 : vector<8x272xf32>
    %133 = arith.mulf %132, %129 : vector<8x272xf32>
    %c0_57 = arith.constant 0 : index
    %c0_58 = arith.constant 0 : index
    %134 = vector.load %arg13[%c0_57, %c0_58] : memref<272x4xf32, #tpu.memory_space<vmem>>, vector<272x4xf32>
    %cst_59 = arith.constant dense<0.000000e+00> : vector<8x4xf32>
    %135 = tpu.matmul %133, %134, %cst_59 {dimension_numbers = #tpu.dot_dimension_numbers<[1], [0], [0], [1], [0, 0, 1, 1], [], []>, precision = #tpu.contract_precision<fp32>} : vector<8x272xf32>, vector<272x4xf32>, vector<8x4xf32> -> vector<8x4xf32>
    %136 = vector.extract_strided_slice %5 {offsets = [0, 3], sizes = [8, 1], strides = [1, 1]} : vector<8x4xi32> to vector<8x1xi32>
    %137 = vector.broadcast %136 : vector<8x1xi32> to vector<8x8xi32>
    %138 = arith.cmpi eq, %137, %98 : vector<8x8xi32>
    %139 = arith.extui %138 : vector<8x8xi1> to vector<8x8xi32>
    %140 = arith.sitofp %139 : vector<8x8xi32> to vector<8x8xf32>
    %cst_60 = arith.constant dense<0.000000e+00> : vector<8x272xf32>
    %141 = tpu.matmul %140, %11, %cst_60 {dimension_numbers = #tpu.dot_dimension_numbers<[1], [0], [0], [1], [0, 0, 1, 1], [], []>} : vector<8x8xf32>, vector<8x272xf32>, vector<8x272xf32> -> vector<8x272xf32>
    %142 = vector.broadcast %99 : vector<1x272xf32> to vector<8x272xf32>
    %143 = arith.mulf %141, %142 : vector<8x272xf32>
    %144 = arith.subf %80, %143 : vector<8x272xf32>
    %145 = arith.mulf %144, %141 : vector<8x272xf32>
    %c0_61 = arith.constant 0 : index
    %c0_62 = arith.constant 0 : index
    %146 = vector.load %arg13[%c0_61, %c0_62] : memref<272x4xf32, #tpu.memory_space<vmem>>, vector<272x4xf32>
    %cst_63 = arith.constant dense<0.000000e+00> : vector<8x4xf32>
    %147 = tpu.matmul %145, %146, %cst_63 {dimension_numbers = #tpu.dot_dimension_numbers<[1], [0], [0], [1], [0, 0, 1, 1], [], []>, precision = #tpu.contract_precision<fp32>} : vector<8x272xf32>, vector<272x4xf32>, vector<8x4xf32> -> vector<8x4xf32>
    %148 = tpu.concatenate %111, %123, %135, %147 in 1 : vector<8x4xf32>, vector<8x4xf32>, vector<8x4xf32>, vector<8x4xf32> -> vector<8x16xf32>
    %149 = arith.addf %148, %97 : vector<8x16xf32>
    %150 = vector.extract_strided_slice %149 {offsets = [0, 0], sizes = [8, 4], strides = [1, 1]} : vector<8x16xf32> to vector<8x4xf32>
    %151 = vector.extract_strided_slice %149 {offsets = [0, 4], sizes = [8, 4], strides = [1, 1]} : vector<8x16xf32> to vector<8x4xf32>
    %152 = arith.maximumf %150, %151 : vector<8x4xf32>
    %153 = vector.extract_strided_slice %149 {offsets = [0, 8], sizes = [8, 4], strides = [1, 1]} : vector<8x16xf32> to vector<8x4xf32>
    %154 = arith.maximumf %152, %153 : vector<8x4xf32>
    %155 = vector.extract_strided_slice %149 {offsets = [0, 12], sizes = [8, 4], strides = [1, 1]} : vector<8x16xf32> to vector<8x4xf32>
    %156 = arith.maximumf %154, %155 : vector<8x4xf32>
    %c0_64 = arith.constant 0 : index
    %c0_65 = arith.constant 0 : index
    %157 = vector.load %arg19[%c0_64, %c0_65] : memref<4x16xf32, #tpu.memory_space<vmem>>, vector<4x16xf32>
    %cst_66 = arith.constant dense<0.000000e+00> : vector<8x16xf32>
    %158 = tpu.matmul %156, %157, %cst_66 {dimension_numbers = #tpu.dot_dimension_numbers<[1], [0], [0], [1], [0, 0, 1, 1], [], []>} : vector<8x4xf32>, vector<4x16xf32>, vector<8x16xf32> -> vector<8x16xf32>
    %159 = arith.subf %149, %158 : vector<8x16xf32>
    %160 = math.exp %159 : vector<8x16xf32>
    %c0_67 = arith.constant 0 : index
    %c0_68 = arith.constant 0 : index
    %161 = vector.load %arg20[%c0_67, %c0_68] : memref<16x4xf32, #tpu.memory_space<vmem>>, vector<16x4xf32>
    %cst_69 = arith.constant dense<0.000000e+00> : vector<8x4xf32>
    %162 = tpu.matmul %160, %161, %cst_69 {dimension_numbers = #tpu.dot_dimension_numbers<[1], [0], [0], [1], [0, 0, 1, 1], [], []>, precision = #tpu.contract_precision<fp32>} : vector<8x16xf32>, vector<16x4xf32>, vector<8x4xf32> -> vector<8x4xf32>
    %163 = tpu.reciprocal %162 {approx = true} : vector<8x4xf32> -> vector<8x4xf32>
    %164 = arith.mulf %162, %163 : vector<8x4xf32>
    %cst_70 = arith.constant 2.000000e+00 : f32
    %165 = vector.broadcast %cst_70 : f32 to vector<8x4xf32>
    %166 = arith.subf %165, %164 : vector<8x4xf32>
    %167 = arith.mulf %163, %166 : vector<8x4xf32>
    %c0_71 = arith.constant 0 : index
    %c0_72 = arith.constant 0 : index
    %168 = vector.load %arg19[%c0_71, %c0_72] : memref<4x16xf32, #tpu.memory_space<vmem>>, vector<4x16xf32>
    %cst_73 = arith.constant dense<0.000000e+00> : vector<8x16xf32>
    %169 = tpu.matmul %167, %168, %cst_73 {dimension_numbers = #tpu.dot_dimension_numbers<[1], [0], [0], [1], [0, 0, 1, 1], [], []>, precision = #tpu.contract_precision<fp32>} : vector<8x4xf32>, vector<4x16xf32>, vector<8x16xf32> -> vector<8x16xf32>
    %170 = arith.mulf %160, %169 : vector<8x16xf32>
    %cst_74 = arith.constant 0.000000e+00 : f32
    %171 = vector.broadcast %cst_74 : f32 to vector<8x272xf32>
    %cst_75 = arith.constant 0.000000e+00 : f32
    %172 = vector.broadcast %cst_75 : f32 to vector<8x32xf32>
    %173 = vector.extract_strided_slice %170 {offsets = [0, 0], sizes = [8, 4], strides = [1, 1]} : vector<8x16xf32> to vector<8x4xf32>
    %c0_76 = arith.constant 0 : index
    %c0_77 = arith.constant 0 : index
    %174 = vector.load %arg21[%c0_76, %c0_77] : memref<4x272xf32, #tpu.memory_space<vmem>>, vector<4x272xf32>
    %cst_78 = arith.constant dense<0.000000e+00> : vector<8x272xf32>
    %175 = tpu.matmul %173, %174, %cst_78 {dimension_numbers = #tpu.dot_dimension_numbers<[1], [0], [0], [1], [0, 0, 1, 1], [], []>, precision = #tpu.contract_precision<fp32>} : vector<8x4xf32>, vector<4x272xf32>, vector<8x272xf32> -> vector<8x272xf32>
    %176 = arith.mulf %175, %105 : vector<8x272xf32>
    %177 = arith.addf %171, %176 : vector<8x272xf32>
    %c0_79 = arith.constant 0 : index
    %c0_80 = arith.constant 0 : index
    %178 = vector.load %arg22[%c0_79, %c0_80] : memref<4x32xf32, #tpu.memory_space<vmem>>, vector<4x32xf32>
    %cst_81 = arith.constant dense<0.000000e+00> : vector<8x32xf32>
    %179 = tpu.matmul %173, %178, %cst_81 {dimension_numbers = #tpu.dot_dimension_numbers<[1], [0], [0], [1], [0, 0, 1, 1], [], []>, precision = #tpu.contract_precision<fp32>} : vector<8x4xf32>, vector<4x32xf32>, vector<8x32xf32> -> vector<8x32xf32>
    %180 = vector.extract_strided_slice %3 {offsets = [0, 0], sizes = [8, 8], strides = [1, 1]} : vector<8x32xf32> to vector<8x8xf32>
    %c0_82 = arith.constant 0 : index
    %c0_83 = arith.constant 0 : index
    %181 = vector.load %arg23[%c0_82, %c0_83] : memref<8x32xf32, #tpu.memory_space<vmem>>, vector<8x32xf32>
    %cst_84 = arith.constant dense<0.000000e+00> : vector<8x32xf32>
    %182 = tpu.matmul %180, %181, %cst_84 {dimension_numbers = #tpu.dot_dimension_numbers<[1], [0], [0], [1], [0, 0, 1, 1], [], []>} : vector<8x8xf32>, vector<8x32xf32>, vector<8x32xf32> -> vector<8x32xf32>
    %183 = arith.mulf %179, %182 : vector<8x32xf32>
    %184 = arith.addf %172, %183 : vector<8x32xf32>
    %185 = vector.extract_strided_slice %170 {offsets = [0, 4], sizes = [8, 4], strides = [1, 1]} : vector<8x16xf32> to vector<8x4xf32>
    %c0_85 = arith.constant 0 : index
    %c0_86 = arith.constant 0 : index
    %186 = vector.load %arg21[%c0_85, %c0_86] : memref<4x272xf32, #tpu.memory_space<vmem>>, vector<4x272xf32>
    %cst_87 = arith.constant dense<0.000000e+00> : vector<8x272xf32>
    %187 = tpu.matmul %185, %186, %cst_87 {dimension_numbers = #tpu.dot_dimension_numbers<[1], [0], [0], [1], [0, 0, 1, 1], [], []>, precision = #tpu.contract_precision<fp32>} : vector<8x4xf32>, vector<4x272xf32>, vector<8x272xf32> -> vector<8x272xf32>
    %188 = arith.mulf %187, %117 : vector<8x272xf32>
    %189 = arith.addf %177, %188 : vector<8x272xf32>
    %c0_88 = arith.constant 0 : index
    %c0_89 = arith.constant 0 : index
    %190 = vector.load %arg22[%c0_88, %c0_89] : memref<4x32xf32, #tpu.memory_space<vmem>>, vector<4x32xf32>
    %cst_90 = arith.constant dense<0.000000e+00> : vector<8x32xf32>
    %191 = tpu.matmul %185, %190, %cst_90 {dimension_numbers = #tpu.dot_dimension_numbers<[1], [0], [0], [1], [0, 0, 1, 1], [], []>, precision = #tpu.contract_precision<fp32>} : vector<8x4xf32>, vector<4x32xf32>, vector<8x32xf32> -> vector<8x32xf32>
    %192 = vector.extract_strided_slice %3 {offsets = [0, 8], sizes = [8, 8], strides = [1, 1]} : vector<8x32xf32> to vector<8x8xf32>
    %c0_91 = arith.constant 0 : index
    %c0_92 = arith.constant 0 : index
    %193 = vector.load %arg23[%c0_91, %c0_92] : memref<8x32xf32, #tpu.memory_space<vmem>>, vector<8x32xf32>
    %cst_93 = arith.constant dense<0.000000e+00> : vector<8x32xf32>
    %194 = tpu.matmul %192, %193, %cst_93 {dimension_numbers = #tpu.dot_dimension_numbers<[1], [0], [0], [1], [0, 0, 1, 1], [], []>} : vector<8x8xf32>, vector<8x32xf32>, vector<8x32xf32> -> vector<8x32xf32>
    %195 = arith.mulf %191, %194 : vector<8x32xf32>
    %196 = arith.addf %184, %195 : vector<8x32xf32>
    %197 = vector.extract_strided_slice %170 {offsets = [0, 8], sizes = [8, 4], strides = [1, 1]} : vector<8x16xf32> to vector<8x4xf32>
    %c0_94 = arith.constant 0 : index
    %c0_95 = arith.constant 0 : index
    %198 = vector.load %arg21[%c0_94, %c0_95] : memref<4x272xf32, #tpu.memory_space<vmem>>, vector<4x272xf32>
    %cst_96 = arith.constant dense<0.000000e+00> : vector<8x272xf32>
    %199 = tpu.matmul %197, %198, %cst_96 {dimension_numbers = #tpu.dot_dimension_numbers<[1], [0], [0], [1], [0, 0, 1, 1], [], []>, precision = #tpu.contract_precision<fp32>} : vector<8x4xf32>, vector<4x272xf32>, vector<8x272xf32> -> vector<8x272xf32>
    %200 = arith.mulf %199, %129 : vector<8x272xf32>
    %201 = arith.addf %189, %200 : vector<8x272xf32>
    %c0_97 = arith.constant 0 : index
    %c0_98 = arith.constant 0 : index
    %202 = vector.load %arg22[%c0_97, %c0_98] : memref<4x32xf32, #tpu.memory_space<vmem>>, vector<4x32xf32>
    %cst_99 = arith.constant dense<0.000000e+00> : vector<8x32xf32>
    %203 = tpu.matmul %197, %202, %cst_99 {dimension_numbers = #tpu.dot_dimension_numbers<[1], [0], [0], [1], [0, 0, 1, 1], [], []>, precision = #tpu.contract_precision<fp32>} : vector<8x4xf32>, vector<4x32xf32>, vector<8x32xf32> -> vector<8x32xf32>
    %204 = vector.extract_strided_slice %3 {offsets = [0, 16], sizes = [8, 8], strides = [1, 1]} : vector<8x32xf32> to vector<8x8xf32>
    %c0_100 = arith.constant 0 : index
    %c0_101 = arith.constant 0 : index
    %205 = vector.load %arg23[%c0_100, %c0_101] : memref<8x32xf32, #tpu.memory_space<vmem>>, vector<8x32xf32>
    %cst_102 = arith.constant dense<0.000000e+00> : vector<8x32xf32>
    %206 = tpu.matmul %204, %205, %cst_102 {dimension_numbers = #tpu.dot_dimension_numbers<[1], [0], [0], [1], [0, 0, 1, 1], [], []>} : vector<8x8xf32>, vector<8x32xf32>, vector<8x32xf32> -> vector<8x32xf32>
    %207 = arith.mulf %203, %206 : vector<8x32xf32>
    %208 = arith.addf %196, %207 : vector<8x32xf32>
    %209 = vector.extract_strided_slice %170 {offsets = [0, 12], sizes = [8, 4], strides = [1, 1]} : vector<8x16xf32> to vector<8x4xf32>
    %c0_103 = arith.constant 0 : index
    %c0_104 = arith.constant 0 : index
    %210 = vector.load %arg21[%c0_103, %c0_104] : memref<4x272xf32, #tpu.memory_space<vmem>>, vector<4x272xf32>
    %cst_105 = arith.constant dense<0.000000e+00> : vector<8x272xf32>
    %211 = tpu.matmul %209, %210, %cst_105 {dimension_numbers = #tpu.dot_dimension_numbers<[1], [0], [0], [1], [0, 0, 1, 1], [], []>, precision = #tpu.contract_precision<fp32>} : vector<8x4xf32>, vector<4x272xf32>, vector<8x272xf32> -> vector<8x272xf32>
    %212 = arith.mulf %211, %141 : vector<8x272xf32>
    %213 = arith.addf %201, %212 : vector<8x272xf32>
    %c0_106 = arith.constant 0 : index
    %c0_107 = arith.constant 0 : index
    %214 = vector.load %arg22[%c0_106, %c0_107] : memref<4x32xf32, #tpu.memory_space<vmem>>, vector<4x32xf32>
    %cst_108 = arith.constant dense<0.000000e+00> : vector<8x32xf32>
    %215 = tpu.matmul %209, %214, %cst_108 {dimension_numbers = #tpu.dot_dimension_numbers<[1], [0], [0], [1], [0, 0, 1, 1], [], []>, precision = #tpu.contract_precision<fp32>} : vector<8x4xf32>, vector<4x32xf32>, vector<8x32xf32> -> vector<8x32xf32>
    %216 = vector.extract_strided_slice %3 {offsets = [0, 24], sizes = [8, 8], strides = [1, 1]} : vector<8x32xf32> to vector<8x8xf32>
    %c0_109 = arith.constant 0 : index
    %c0_110 = arith.constant 0 : index
    %217 = vector.load %arg23[%c0_109, %c0_110] : memref<8x32xf32, #tpu.memory_space<vmem>>, vector<8x32xf32>
    %cst_111 = arith.constant dense<0.000000e+00> : vector<8x32xf32>
    %218 = tpu.matmul %216, %217, %cst_111 {dimension_numbers = #tpu.dot_dimension_numbers<[1], [0], [0], [1], [0, 0, 1, 1], [], []>} : vector<8x8xf32>, vector<8x32xf32>, vector<8x32xf32> -> vector<8x32xf32>
    %219 = arith.mulf %215, %218 : vector<8x32xf32>
    %220 = arith.addf %208, %219 : vector<8x32xf32>
    %221 = vector.extract_strided_slice %213 {offsets = [0, 64], sizes = [8, 64], strides = [1, 1]} : vector<8x272xf32> to vector<8x64xf32>
    %222 = vector.extract_strided_slice %213 {offsets = [0, 224], sizes = [8, 16], strides = [1, 1]} : vector<8x272xf32> to vector<8x16xf32>
    %223 = vector.extract_strided_slice %9 {offsets = [0, 0], sizes = [8, 1], strides = [1, 1]} : vector<8x3xf32> to vector<8x1xf32>
    %224 = vector.broadcast %223 : vector<8x1xf32> to vector<8x16xf32>
    %225 = arith.subf %222, %224 : vector<8x16xf32>
    %226 = vector.extract_strided_slice %213 {offsets = [0, 240], sizes = [8, 16], strides = [1, 1]} : vector<8x272xf32> to vector<8x16xf32>
    %227 = vector.extract_strided_slice %9 {offsets = [0, 1], sizes = [8, 1], strides = [1, 1]} : vector<8x3xf32> to vector<8x1xf32>
    %228 = vector.broadcast %227 : vector<8x1xf32> to vector<8x16xf32>
    %229 = arith.subf %226, %228 : vector<8x16xf32>
    %230 = vector.extract_strided_slice %213 {offsets = [0, 256], sizes = [8, 16], strides = [1, 1]} : vector<8x272xf32> to vector<8x16xf32>
    %231 = vector.extract_strided_slice %9 {offsets = [0, 2], sizes = [8, 1], strides = [1, 1]} : vector<8x3xf32> to vector<8x1xf32>
    %232 = vector.broadcast %231 : vector<8x1xf32> to vector<8x16xf32>
    %233 = arith.subf %230, %232 : vector<8x16xf32>
    %234 = vector.extract_strided_slice %7 {offsets = [0, 0], sizes = [8, 1], strides = [1, 1]} : vector<8x9xf32> to vector<8x1xf32>
    %235 = vector.broadcast %234 : vector<8x1xf32> to vector<8x16xf32>
    %236 = arith.mulf %235, %225 : vector<8x16xf32>
    %237 = vector.extract_strided_slice %7 {offsets = [0, 3], sizes = [8, 1], strides = [1, 1]} : vector<8x9xf32> to vector<8x1xf32>
    %238 = vector.broadcast %237 : vector<8x1xf32> to vector<8x16xf32>
    %239 = arith.mulf %238, %229 : vector<8x16xf32>
    %240 = arith.addf %236, %239 : vector<8x16xf32>
    %241 = vector.extract_strided_slice %7 {offsets = [0, 6], sizes = [8, 1], strides = [1, 1]} : vector<8x9xf32> to vector<8x1xf32>
    %242 = vector.broadcast %241 : vector<8x1xf32> to vector<8x16xf32>
    %243 = arith.mulf %242, %233 : vector<8x16xf32>
    %244 = arith.addf %240, %243 : vector<8x16xf32>
    %245 = vector.extract_strided_slice %7 {offsets = [0, 1], sizes = [8, 1], strides = [1, 1]} : vector<8x9xf32> to vector<8x1xf32>
    %246 = vector.broadcast %245 : vector<8x1xf32> to vector<8x16xf32>
    %247 = arith.mulf %246, %225 : vector<8x16xf32>
    %248 = vector.extract_strided_slice %7 {offsets = [0, 4], sizes = [8, 1], strides = [1, 1]} : vector<8x9xf32> to vector<8x1xf32>
    %249 = vector.broadcast %248 : vector<8x1xf32> to vector<8x16xf32>
    %250 = arith.mulf %249, %229 : vector<8x16xf32>
    %251 = arith.addf %247, %250 : vector<8x16xf32>
    %252 = vector.extract_strided_slice %7 {offsets = [0, 7], sizes = [8, 1], strides = [1, 1]} : vector<8x9xf32> to vector<8x1xf32>
    %253 = vector.broadcast %252 : vector<8x1xf32> to vector<8x16xf32>
    %254 = arith.mulf %253, %233 : vector<8x16xf32>
    %255 = arith.addf %251, %254 : vector<8x16xf32>
    %256 = vector.extract_strided_slice %7 {offsets = [0, 2], sizes = [8, 1], strides = [1, 1]} : vector<8x9xf32> to vector<8x1xf32>
    %257 = vector.broadcast %256 : vector<8x1xf32> to vector<8x16xf32>
    %258 = arith.mulf %257, %225 : vector<8x16xf32>
    %259 = vector.extract_strided_slice %7 {offsets = [0, 5], sizes = [8, 1], strides = [1, 1]} : vector<8x9xf32> to vector<8x1xf32>
    %260 = vector.broadcast %259 : vector<8x1xf32> to vector<8x16xf32>
    %261 = arith.mulf %260, %229 : vector<8x16xf32>
    %262 = arith.addf %258, %261 : vector<8x16xf32>
    %263 = vector.extract_strided_slice %7 {offsets = [0, 8], sizes = [8, 1], strides = [1, 1]} : vector<8x9xf32> to vector<8x1xf32>
    %264 = vector.broadcast %263 : vector<8x1xf32> to vector<8x16xf32>
    %265 = arith.mulf %264, %233 : vector<8x16xf32>
    %266 = arith.addf %262, %265 : vector<8x16xf32>
    %267 = arith.mulf %244, %244 : vector<8x16xf32>
    %268 = arith.mulf %255, %255 : vector<8x16xf32>
    %269 = arith.addf %267, %268 : vector<8x16xf32>
    %270 = arith.mulf %266, %266 : vector<8x16xf32>
    %271 = arith.addf %269, %270 : vector<8x16xf32>
    %cst_112 = arith.constant 9.99999993E-9 : f32
    %272 = vector.broadcast %cst_112 : f32 to vector<8x16xf32>
    %273 = arith.addf %271, %272 : vector<8x16xf32>
    %274 = math.sqrt %273 : vector<8x16xf32>
    %275 = tpu.concatenate %221, %244, %255, %266, %274, %220 in 1 : vector<8x64xf32>, vector<8x16xf32>, vector<8x16xf32>, vector<8x16xf32>, vector<8x16xf32>, vector<8x32xf32> -> vector<8x160xf32>
    %c0_113 = arith.constant 0 : index
    %c0_114 = arith.constant 0 : index
    %276 = vector.load %arg24[%c0_113, %c0_114] : memref<160x16xf32, #tpu.memory_space<vmem>>, vector<160x16xf32>
    %cst_115 = arith.constant dense<0.000000e+00> : vector<8x16xf32>
    %277 = tpu.matmul %275, %276, %cst_115 {dimension_numbers = #tpu.dot_dimension_numbers<[1], [0], [0], [1], [0, 0, 1, 1], [], []>, precision = #tpu.contract_precision<fp32>} : vector<8x160xf32>, vector<160x16xf32>, vector<8x16xf32> -> vector<8x16xf32>
    %c0_116 = arith.constant 0 : index
    %c0_117 = arith.constant 0 : index
    %278 = vector.load %arg25[%c0_116, %c0_117] : memref<1x16xf32, #tpu.memory_space<vmem>>, vector<1x16xf32>
    %279 = vector.broadcast %278 : vector<1x16xf32> to vector<8x16xf32>
    %280 = arith.addf %277, %279 : vector<8x16xf32>
    %281 = arith.addf %1, %280 : vector<8x16xf32>
    %c0_118 = arith.constant 0 : index
    %c0_119 = arith.constant 0 : index
    %282 = vector.load %arg26[%c0_118, %c0_119] : memref<1x16xf32, #tpu.memory_space<vmem>>, vector<1x16xf32>
    %c0_120 = arith.constant 0 : index
    %c0_121 = arith.constant 0 : index
    %283 = vector.load %arg27[%c0_120, %c0_121] : memref<1x16xf32, #tpu.memory_space<vmem>>, vector<1x16xf32>
    %cst_122 = arith.constant dense<0.000000e+00> : vector<8xf32>
    %284 = vector.multi_reduction <add>, %281, %cst_122 [1] : vector<8x16xf32> to vector<8xf32>
    %285 = vector.shape_cast %284 : vector<8xf32> to vector<8x1xf32>
    %cst_123 = arith.constant 1.600000e+01 : f32
    %286 = vector.broadcast %cst_123 : f32 to vector<8x1xf32>
    %287 = arith.divf %285, %286 : vector<8x1xf32>
    %288 = vector.broadcast %287 : vector<8x1xf32> to vector<8x16xf32>
    %289 = arith.subf %281, %288 : vector<8x16xf32>
    %290 = arith.mulf %289, %289 : vector<8x16xf32>
    %cst_124 = arith.constant dense<0.000000e+00> : vector<8xf32>
    %291 = vector.multi_reduction <add>, %290, %cst_124 [1] : vector<8x16xf32> to vector<8xf32>
    %292 = vector.shape_cast %291 : vector<8xf32> to vector<8x1xf32>
    %cst_125 = arith.constant 1.600000e+01 : f32
    %293 = vector.broadcast %cst_125 : f32 to vector<8x1xf32>
    %294 = arith.divf %292, %293 : vector<8x1xf32>
    %cst_126 = arith.constant 9.99999974E-6 : f32
    %295 = vector.broadcast %cst_126 : f32 to vector<8x1xf32>
    %296 = arith.addf %294, %295 : vector<8x1xf32>
    %297 = math.rsqrt %296 : vector<8x1xf32>
    %298 = vector.broadcast %297 : vector<8x1xf32> to vector<8x16xf32>
    %299 = arith.mulf %289, %298 : vector<8x16xf32>
    %300 = vector.broadcast %282 : vector<1x16xf32> to vector<8x16xf32>
    %301 = arith.mulf %299, %300 : vector<8x16xf32>
    %302 = vector.broadcast %283 : vector<1x16xf32> to vector<8x16xf32>
    %303 = arith.addf %301, %302 : vector<8x16xf32>
    %c0_127 = arith.constant 0 : index
    %c0_128 = arith.constant 0 : index
    %304 = vector.load %arg28[%c0_127, %c0_128] : memref<16x64xf32, #tpu.memory_space<vmem>>, vector<16x64xf32>
    %cst_129 = arith.constant dense<0.000000e+00> : vector<8x64xf32>
    %305 = tpu.matmul %303, %304, %cst_129 {dimension_numbers = #tpu.dot_dimension_numbers<[1], [0], [0], [1], [0, 0, 1, 1], [], []>, precision = #tpu.contract_precision<fp32>} : vector<8x16xf32>, vector<16x64xf32>, vector<8x64xf32> -> vector<8x64xf32>
    %c0_130 = arith.constant 0 : index
    %c0_131 = arith.constant 0 : index
    %306 = vector.load %arg29[%c0_130, %c0_131] : memref<1x64xf32, #tpu.memory_space<vmem>>, vector<1x64xf32>
    %307 = vector.broadcast %306 : vector<1x64xf32> to vector<8x64xf32>
    %308 = arith.addf %305, %307 : vector<8x64xf32>
    %cst_132 = arith.constant 0.000000e+00 : f32
    %309 = vector.broadcast %cst_132 : f32 to vector<8x64xf32>
    %310 = arith.maximumf %308, %309 : vector<8x64xf32>
    %c0_133 = arith.constant 0 : index
    %c0_134 = arith.constant 0 : index
    %311 = vector.load %arg30[%c0_133, %c0_134] : memref<64x16xf32, #tpu.memory_space<vmem>>, vector<64x16xf32>
    %cst_135 = arith.constant dense<0.000000e+00> : vector<8x16xf32>
    %312 = tpu.matmul %310, %311, %cst_135 {dimension_numbers = #tpu.dot_dimension_numbers<[1], [0], [0], [1], [0, 0, 1, 1], [], []>, precision = #tpu.contract_precision<fp32>} : vector<8x64xf32>, vector<64x16xf32>, vector<8x16xf32> -> vector<8x16xf32>
    %313 = arith.addf %303, %312 : vector<8x16xf32>
    %c0_136 = arith.constant 0 : index
    %c0_137 = arith.constant 0 : index
    %314 = vector.load %arg31[%c0_136, %c0_137] : memref<1x16xf32, #tpu.memory_space<vmem>>, vector<1x16xf32>
    %315 = vector.broadcast %314 : vector<1x16xf32> to vector<8x16xf32>
    %316 = arith.addf %313, %315 : vector<8x16xf32>
    %c0_138 = arith.constant 0 : index
    %c0_139 = arith.constant 0 : index
    %317 = vector.load %arg32[%c0_138, %c0_139] : memref<1x16xf32, #tpu.memory_space<vmem>>, vector<1x16xf32>
    %c0_140 = arith.constant 0 : index
    %c0_141 = arith.constant 0 : index
    %318 = vector.load %arg33[%c0_140, %c0_141] : memref<1x16xf32, #tpu.memory_space<vmem>>, vector<1x16xf32>
    %cst_142 = arith.constant dense<0.000000e+00> : vector<8xf32>
    %319 = vector.multi_reduction <add>, %316, %cst_142 [1] : vector<8x16xf32> to vector<8xf32>
    %320 = vector.shape_cast %319 : vector<8xf32> to vector<8x1xf32>
    %cst_143 = arith.constant 1.600000e+01 : f32
    %321 = vector.broadcast %cst_143 : f32 to vector<8x1xf32>
    %322 = arith.divf %320, %321 : vector<8x1xf32>
    %323 = vector.broadcast %322 : vector<8x1xf32> to vector<8x16xf32>
    %324 = arith.subf %316, %323 : vector<8x16xf32>
    %325 = arith.mulf %324, %324 : vector<8x16xf32>
    %cst_144 = arith.constant dense<0.000000e+00> : vector<8xf32>
    %326 = vector.multi_reduction <add>, %325, %cst_144 [1] : vector<8x16xf32> to vector<8xf32>
    %327 = vector.shape_cast %326 : vector<8xf32> to vector<8x1xf32>
    %cst_145 = arith.constant 1.600000e+01 : f32
    %328 = vector.broadcast %cst_145 : f32 to vector<8x1xf32>
    %329 = arith.divf %327, %328 : vector<8x1xf32>
    %cst_146 = arith.constant 9.99999974E-6 : f32
    %330 = vector.broadcast %cst_146 : f32 to vector<8x1xf32>
    %331 = arith.addf %329, %330 : vector<8x1xf32>
    %332 = math.rsqrt %331 : vector<8x1xf32>
    %333 = vector.broadcast %332 : vector<8x1xf32> to vector<8x16xf32>
    %334 = arith.mulf %324, %333 : vector<8x16xf32>
    %335 = vector.broadcast %317 : vector<1x16xf32> to vector<8x16xf32>
    %336 = arith.mulf %334, %335 : vector<8x16xf32>
    %337 = vector.broadcast %318 : vector<1x16xf32> to vector<8x16xf32>
    %338 = arith.addf %336, %337 : vector<8x16xf32>
    %c0_147 = arith.constant 0 : index
    %c0_148 = arith.constant 0 : index
    %c0_149 = arith.constant 0 : index
    %339 = vector.load %arg8[%c0_147, %c0_148, %c0_149] : memref<1x8x1xf32, #tpu.memory_space<vmem>>, vector<1x8x1xf32>
    %340 = vector.shape_cast %339 : vector<1x8x1xf32> to vector<8x1xf32>
    %341 = vector.broadcast %340 : vector<8x1xf32> to vector<8x16xf32>
    %342 = arith.mulf %338, %341 : vector<8x16xf32>
    %c0_150 = arith.constant 0 : index
    %c0_151 = arith.constant 0 : index
    %c0_152 = arith.constant 0 : index
    %343 = vector.load %arg34[%c0_150, %c0_151, %c0_152] : memref<1x8x16xf32, #tpu.memory_space<vmem>>, vector<1x8x16xf32>
    %344 = vector.shape_cast %343 : vector<1x8x16xf32> to vector<8x16xf32>
    %345 = vector.shape_cast %342 : vector<8x16xf32> to vector<1x8x16xf32>
    tpu.vector_store %arg34[%c0_150, %c0_151, %c0_152], %345 {strides = array<i32>} : memref<1x8x16xf32, #tpu.memory_space<vmem>>, vector<1x8x16xf32>,
    return
  }
  func.func @transform_0(%arg0: i32, %arg1: i32) -> (i32, i32, i32) {
    %c0_i32 = arith.constant 0 : i32
    %c0_i32_0 = arith.constant 0 : i32
    return %arg0, %arg1, %c0_i32 : i32, i32, i32
  }
  func.func @transform_1(%arg0: i32, %arg1: i32) -> (i32, i32, i32) {
    %c0_i32 = arith.constant 0 : i32
    %c0_i32_0 = arith.constant 0 : i32
    return %arg0, %arg1, %c0_i32 : i32, i32, i32
  }
  func.func @transform_2(%arg0: i32, %arg1: i32) -> (i32, i32, i32) {
    %c0_i32 = arith.constant 0 : i32
    %c0_i32_0 = arith.constant 0 : i32
    return %arg0, %arg1, %c0_i32 : i32, i32, i32
  }
  func.func @transform_3(%arg0: i32, %arg1: i32) -> (i32, i32, i32) {
    %c0_i32 = arith.constant 0 : i32
    %c0_i32_0 = arith.constant 0 : i32
    return %arg0, %arg1, %c0_i32 : i32, i32, i32
  }
  func.func @transform_4(%arg0: i32, %arg1: i32) -> (i32, i32, i32) {
    %c0_i32 = arith.constant 0 : i32
    %c0_i32_0 = arith.constant 0 : i32
    return %arg0, %arg1, %c0_i32 : i32, i32, i32
  }
  func.func @transform_5(%arg0: i32, %arg1: i32) -> (i32, i32, i32) {
    %c0_i32 = arith.constant 0 : i32
    %c0_i32_0 = arith.constant 0 : i32
    return %arg0, %arg1, %c0_i32 : i32, i32, i32
  }
  func.func @transform_6(%arg0: i32, %arg1: i32) -> (i32, i32, i32) {
    %c0_i32 = arith.constant 0 : i32
    %c0_i32_0 = arith.constant 0 : i32
    return %arg0, %arg1, %c0_i32 : i32, i32, i32
  }
  func.func @transform_7(%arg0: i32, %arg1: i32) -> (i32, i32, i32) {
    %c0_i32 = arith.constant 0 : i32
    %c0_i32_0 = arith.constant 0 : i32
    %c0_i32_1 = arith.constant 0 : i32
    return %arg0, %c0_i32, %c0_i32_0 : i32, i32, i32
  }
  func.func @transform_8(%arg0: i32, %arg1: i32) -> (i32, i32) {
    %c0_i32 = arith.constant 0 : i32
    %c0_i32_0 = arith.constant 0 : i32
    %c0_i32_1 = arith.constant 0 : i32
    return %c0_i32, %c0_i32_0 : i32, i32
  }
  func.func @transform_9(%arg0: i32, %arg1: i32) -> (i32, i32) {
    %c0_i32 = arith.constant 0 : i32
    %c0_i32_0 = arith.constant 0 : i32
    %c0_i32_1 = arith.constant 0 : i32
    return %c0_i32, %c0_i32_0 : i32, i32
  }
  func.func @transform_10(%arg0: i32, %arg1: i32) -> (i32, i32) {
    %c0_i32 = arith.constant 0 : i32
    %c0_i32_0 = arith.constant 0 : i32
    %c0_i32_1 = arith.constant 0 : i32
    return %c0_i32, %c0_i32_0 : i32, i32
  }
  func.func @transform_11(%arg0: i32, %arg1: i32) -> (i32, i32) {
    %c0_i32 = arith.constant 0 : i32
    %c0_i32_0 = arith.constant 0 : i32
    %c0_i32_1 = arith.constant 0 : i32
    return %c0_i32, %c0_i32_0 : i32, i32
  }
  func.func @transform_12(%arg0: i32, %arg1: i32) -> (i32, i32) {
    %c0_i32 = arith.constant 0 : i32
    %c0_i32_0 = arith.constant 0 : i32
    %c0_i32_1 = arith.constant 0 : i32
    return %c0_i32, %c0_i32_0 : i32, i32
  }
  func.func @transform_13(%arg0: i32, %arg1: i32) -> (i32, i32) {
    %c0_i32 = arith.constant 0 : i32
    %c0_i32_0 = arith.constant 0 : i32
    %c0_i32_1 = arith.constant 0 : i32
    return %c0_i32, %c0_i32_0 : i32, i32
  }
  func.func @transform_14(%arg0: i32, %arg1: i32) -> (i32, i32) {
    %c0_i32 = arith.constant 0 : i32
    %c0_i32_0 = arith.constant 0 : i32
    %c0_i32_1 = arith.constant 0 : i32
    return %c0_i32, %c0_i32_0 : i32, i32
  }
  func.func @transform_15(%arg0: i32, %arg1: i32) -> (i32, i32) {
    %c0_i32 = arith.constant 0 : i32
    %c0_i32_0 = arith.constant 0 : i32
    %c0_i32_1 = arith.constant 0 : i32
    return %c0_i32, %c0_i32_0 : i32, i32
  }
  func.func @transform_16(%arg0: i32, %arg1: i32) -> (i32, i32) {
    %c0_i32 = arith.constant 0 : i32
    %c0_i32_0 = arith.constant 0 : i32
    %c0_i32_1 = arith.constant 0 : i32
    return %c0_i32, %c0_i32_0 : i32, i32
  }
  func.func @transform_17(%arg0: i32, %arg1: i32) -> (i32, i32) {
    %c0_i32 = arith.constant 0 : i32
    %c0_i32_0 = arith.constant 0 : i32
    %c0_i32_1 = arith.constant 0 : i32
    return %c0_i32, %c0_i32_0 : i32, i32
  }
  func.func @transform_18(%arg0: i32, %arg1: i32) -> (i32, i32) {
    %c0_i32 = arith.constant 0 : i32
    %c0_i32_0 = arith.constant 0 : i32
    %c0_i32_1 = arith.constant 0 : i32
    return %c0_i32, %c0_i32_0 : i32, i32
  }
  func.func @transform_19(%arg0: i32, %arg1: i32) -> (i32, i32) {
    %c0_i32 = arith.constant 0 : i32
    %c0_i32_0 = arith.constant 0 : i32
    %c0_i32_1 = arith.constant 0 : i32
    return %c0_i32, %c0_i32_0 : i32, i32
  }
  func.func @transform_20(%arg0: i32, %arg1: i32) -> (i32, i32) {
    %c0_i32 = arith.constant 0 : i32
    %c0_i32_0 = arith.constant 0 : i32
    %c0_i32_1 = arith.constant 0 : i32
    return %c0_i32, %c0_i32_0 : i32, i32
  }
  func.func @transform_21(%arg0: i32, %arg1: i32) -> (i32, i32) {
    %c0_i32 = arith.constant 0 : i32
    %c0_i32_0 = arith.constant 0 : i32
    %c0_i32_1 = arith.constant 0 : i32
    return %c0_i32, %c0_i32_0 : i32, i32
  }
  func.func @transform_22(%arg0: i32, %arg1: i32) -> (i32, i32) {
    %c0_i32 = arith.constant 0 : i32
    %c0_i32_0 = arith.constant 0 : i32
    %c0_i32_1 = arith.constant 0 : i32
    return %c0_i32, %c0_i32_0 : i32, i32
  }
  func.func @transform_23(%arg0: i32, %arg1: i32) -> (i32, i32) {
    %c0_i32 = arith.constant 0 : i32
    %c0_i32_0 = arith.constant 0 : i32
    %c0_i32_1 = arith.constant 0 : i32
    return %c0_i32, %c0_i32_0 : i32, i32
  }
  func.func @transform_24(%arg0: i32, %arg1: i32) -> (i32, i32) {
    %c0_i32 = arith.constant 0 : i32
    %c0_i32_0 = arith.constant 0 : i32
    %c0_i32_1 = arith.constant 0 : i32
    return %c0_i32, %c0_i32_0 : i32, i32
  }
  func.func @transform_25(%arg0: i32, %arg1: i32) -> (i32, i32) {
    %c0_i32 = arith.constant 0 : i32
    %c0_i32_0 = arith.constant 0 : i32
    %c0_i32_1 = arith.constant 0 : i32
    return %c0_i32, %c0_i32_0 : i32, i32
  }
  func.func @transform_26(%arg0: i32, %arg1: i32) -> (i32, i32) {
    %c0_i32 = arith.constant 0 : i32
    %c0_i32_0 = arith.constant 0 : i32
    %c0_i32_1 = arith.constant 0 : i32
    return %c0_i32, %c0_i32_0 : i32, i32
  }
  func.func @transform_27(%arg0: i32, %arg1: i32) -> (i32, i32) {
    %c0_i32 = arith.constant 0 : i32
    %c0_i32_0 = arith.constant 0 : i32
    %c0_i32_1 = arith.constant 0 : i32
    return %c0_i32, %c0_i32_0 : i32, i32
  }
  func.func @transform_28(%arg0: i32, %arg1: i32) -> (i32, i32) {
    %c0_i32 = arith.constant 0 : i32
    %c0_i32_0 = arith.constant 0 : i32
    %c0_i32_1 = arith.constant 0 : i32
    return %c0_i32, %c0_i32_0 : i32, i32
  }
  func.func @transform_29(%arg0: i32, %arg1: i32) -> (i32, i32) {
    %c0_i32 = arith.constant 0 : i32
    %c0_i32_0 = arith.constant 0 : i32
    %c0_i32_1 = arith.constant 0 : i32
    return %c0_i32, %c0_i32_0 : i32, i32
  }
  func.func @transform_30(%arg0: i32, %arg1: i32) -> (i32, i32) {
    %c0_i32 = arith.constant 0 : i32
    %c0_i32_0 = arith.constant 0 : i32
    %c0_i32_1 = arith.constant 0 : i32
    return %c0_i32, %c0_i32_0 : i32, i32
  }
  func.func @transform_31(%arg0: i32, %arg1: i32) -> (i32, i32) {
    %c0_i32 = arith.constant 0 : i32
    %c0_i32_0 = arith.constant 0 : i32
    %c0_i32_1 = arith.constant 0 : i32
    return %c0_i32, %c0_i32_0 : i32, i32
  }
  func.func @transform_32(%arg0: i32, %arg1: i32) -> (i32, i32, i32) {
    %c0_i32 = arith.constant 0 : i32
    %c0_i32_0 = arith.constant 0 : i32
    return %arg0, %arg1, %c0_i32 : i32, i32, i32
  }
}

</mosaic_0001>

<bundles_post_ra>
// kernel: tile.8
= control target key start
LH: loop header
LB: loop body
LE: loop exit
PB: predicated region body
PF: predicated region fallthrough
CT: control target
= control target key end

     0   :  { %s22_s0 = inlined_call_operand.vmem [shape: f32[4], index: 0, kind: input, shape index: {}]   ;;  %s23_s1 = inlined_call_operand.vmem [shape: f32[4,4], index: 1, kind: output, shape index: {}]  }
   0x1   :  { %v4_v0 = vld [vmem:[%s22_s0] ss:$0 sm:$0xff] }
   0x2   :  { %5 = vst [vmem:[%s23_s1] sm:$0xf] %v4_v0 }

// kernel: tile.9
= control target key start
LH: loop header
LB: loop body
LE: loop exit
PB: predicated region body
PF: predicated region fallthrough
CT: control target
= control target key end

     0   :  { %vm7_vm0 = vcmask 31744   ;;  %s37_s8 = smov 4   ;;  %s38_s9 = smov 8   ;;  %vm13_vm1 = vcmask 130144   ;;  %vm19_vm2 = vcmask 97344   ;;  %vm25_vm3 = vcmask 64544   ;;  %s55_s0 = inlined_call_operand.vmem [shape: f32[4,4], index: 0, kind: input, shape index: {}]   ;;  %s56_s1 = inlined_call_operand.vmem [shape: f32[1,16], index: 1, kind: output, shape index: {}]  }
   0x1   :  { %v4_v0 = vld [vmem:[%s55_s0] sm:$0xf]  ;;  %s36_s0 = smov 12  }
   0x2   :  { %5 = vst [vmem:[#allocation1] sm:$0xf] %v4_v0 }
   0x9   :  { %v10_v1 = vld [vmem:[#allocation1 + $0x3] sm:$0x1]   ;;  %v22_v2 = vld [vmem:[#allocation1 + $0x1] sm:$0x1]   ;;  %v6_v3 = vld [vmem:[#allocation1] sm:$0x1]  }
   0xa   :  { %11 = vrot.lane.b32.xlu0 %v10_v1, %s36_s0  ;;  %23 = vrot.lane.b32.xlu1 %v22_v2, %s37_s8  ;;  %v16_v4 = vld [vmem:[#allocation1 + $0x2] sm:$0x1]   ;;  %8 = vst.msk [vmem:[#allocation0] sm:$0x1] %vm7_vm0, %v6_v3  }
   0xe   :  { %17 = vrot.lane.b32.xlu0 %v16_v4, %s38_s9 }
  0x7c   :  { %v12_v5 = vpop.permute.xlu0 %11   ;;  %v24_v6 = vpop.permute.xlu1 %23  }
  0x7d   :  { %14 = vst.msk [vmem:[#allocation0] sm:$0x1] %vm13_vm1, %v12_v5  }
  0x80   :  { %v18_v7 = vpop.permute.xlu0 %17  }
  0x81   :  { %20 = vst.msk [vmem:[#allocation0] sm:$0x1] %vm19_vm2, %v18_v7  }
  0x82   :  { %26 = vst.msk [vmem:[#allocation0] sm:$0x1] %vm25_vm3, %v24_v6  }
  0x89   :  { %v30_v8 = vld [vmem:[#allocation0] sm:$0x1] }
  0x8a   :  { %32 = vst [vmem:[%s56_s1] sm:$0x1] %v30_v8 }

// kernel: ipa_pallas.2
= control target key start
LH: loop header
LB: loop body
LE: loop exit
PB: predicated region body
PF: predicated region fallthrough
CT: control target
= control target key end

     0   :  { %vm52_vm0 = vcmask 130048   ;;  %v1605_v3 = vmov 0.0   ;;  %v1606_v10 = vmov 7   ;;  %v1607_v11 = vmov 4   ;;  %s1616_s23 = smov 64   ;;  %s1617_s24 = smov 112   ;;  %s1950_s3 = inlined_call_operand.vmem [shape: f32[16,272], index: 3, kind: input, shape index: {}]   ;;  %s1951_s0 = inlined_call_operand.vmem [shape: f32[16,16], index: 0, kind: input, shape index: {}]   ;;  %s1952_s1 = inlined_call_operand.vmem [shape: f32[16,9], index: 1, kind: input, shape index: {}]   ;;  %s1953_s2 = inlined_call_operand.vmem [shape: f32[16,3], index: 2, kind: input, shape index: {}]   ;;  %s1954_s4 = inlined_call_operand.vmem [shape: f32[1,272], index: 4, kind: input, shape index: {}]   ;;  %s1955_s6 = inlined_call_operand.vmem [shape: f32[16,272], index: 6, kind: output, shape index: {}]   ;;  %s1956_s5 = inlined_call_operand.vmem [shape: f32[1,32], index: 5, kind: input, shape index: {}]  }
   0x1   :  { %v30_v0 = vld [vmem:[%s1950_s3 + $0x8] sm:$0xff]  ;;  %v33_v1 = vld [vmem:[%s1950_s3 + $0x20] sm:$0xff]  ;;  %127 = vmatprep.mubr.f32.mxu1 %v1605_v3  ;;  %234 = vmatprep.mubr.f32.mxu0 %v1605_v3  ;;  %v32_v6 = vld [vmem:[%s1950_s3 + $0x18] sm:$0xff]  ;;  %v1608_v51 = vmov 5   ;;  %v1609_v61 = vmov 8   ;;  %s1618_s27 = smov 32  }
   0x2   :  { %v29_v2 = vld [vmem:[%s1950_s3] sm:$0xff]  ;;  %v59_v4 = vand.u32 4294901760, %v30_v0  ;;  %v63_v5 = vand.u32 4294901760, %v33_v1  ;;  %v24_v9 = vld [vmem:[%s1951_s0 + $0x8] sm:$0xff]  ;;  %1587 = vset.pattern.permute.xlu1 %v1606_v10  ;;  %1586 = vset.pattern.permute.xlu0 %v1607_v11  ;;  %v65_v12 = vand.u32 4294901760, %v32_v6  ;;  %v31_v24 = vld [vmem:[%s1950_s3 + $0x10] sm:$0xff] }
   0x3   :  { %v61_v7 = vand.u32 4294901760, %v29_v2  ;;  %v23_v8 = vld [vmem:[%s1951_s0] sm:$0xff]  ;;  %v57_v14 = vsel %vm52_vm0, %v24_v9, 0  ;;  %v1705_v25 = vld [vmem:[%s1952_s1 + $0x8] sm:$0xff]  ;;  %v600_v36 = vand.u32 4294901760, %v31_v24  ;;  %v1613_v9 = vmov 2  }
   0x4   :  { %v54_v13 = vsel %vm52_vm0, %v23_v8, 0  ;;  %v1680_v15 = vld [vmem:[%s1952_s1] sm:$0xff]  ;;  %v1682_v16 = vpack.c.bf16 %v63_v5, %v59_v4  ;;  %v1684_v17 = vsub.f32 %v30_v0, %v59_v4  ;;  %v1686_v18 = vsub.f32 %v33_v1, %v63_v5  ;;  %v34_v29 = vld [vmem:[%s1950_s3 + $0x28] sm:$0xff] }
   0x5   :  { %v1688_v19 = vsub.f32 %v29_v2, %v61_v7  ;;  %1237 = vperm.xlu1 %1587, %v1680_v15   ;;  %v1691_v20 = vpack.c.bf16 %v65_v12, %v61_v7  ;;  %v1693_v21 = vsub.f32 %v32_v6, %v65_v12  ;;  %v1695_v22 = vand.u32 4294901760, %v54_v13  ;;  %1177 = vperm.xlu0 %1586, %v1680_v15   ;;  %v1843_v10 = vld [vmem:[%s1953_s2] sm:$0xff] }
   0x6   :  { %v1697_v23 = vand.u32 4294901760, %v57_v14  ;;  %1486 = vmatprep.subr.bf16.mxu1 %v1682_v16  ;;  %v152_v26 = vand.u32 4294901760, %v1684_v17  ;;  %v164_v27 = vand.u32 4294901760, %v1686_v18  ;;  %v603_v40 = vand.u32 4294901760, %v34_v29 }
   0x7   :  { %v158_v28 = vand.u32 4294901760, %v1688_v19  ;;  %1488 = vmatpush1.bf16.msra.mxu1 %v1691_v20  ;;  %v1717_v30 = vsub.f32 %v54_v13, %v1695_v22  ;;  %v170_v31 = vand.u32 4294901760, %v1693_v21  ;;  %v1743_v44 = vsub.f32 %v31_v24, %v600_v36 }
   0x8   :  { %v1721_v32 = vsub.f32 %v57_v14, %v1697_v23  ;;  %v153_v33 = vsub.f32 %v1684_v17, %v152_v26  ;;  %v165_v34 = vsub.f32 %v1686_v18, %v164_v27  ;;  %v1493_v49 = vpack.c.bf16 %v1686_v18, %v1684_v17 }
   0x9   :  { %v159_v35 = vsub.f32 %v1688_v19, %v158_v28  ;;  %1241 = vperm.xlu1 %1587, %v1705_v25   ;;  %v1734_v37 = vand.u32 4294901760, %v1717_v30  ;;  %v171_v38 = vsub.f32 %v1693_v21, %v170_v31  ;;  %1181 = vperm.xlu0 %1586, %v1705_v25   ;;  %v1751_v50 = vsub.f32 %v34_v29, %v603_v40 }
   0xa   :  { %v1740_v39 = vand.u32 4294901760, %v1721_v32  ;;  %v154_v41 = vand.u32 4294901760, %v153_v33  ;;  %v166_v42 = vand.u32 4294901760, %v165_v34  ;;  %v689_v54 = vand.u32 4294901760, %v1743_v44 }
   0xb   :  { %v160_v43 = vand.u32 4294901760, %v159_v35  ;;  %v131_v45 = vsub.f32 %v1717_v30, %v1734_v37  ;;  %v172_v46 = vand.u32 4294901760, %v171_v38  ;;  %v1755_v55 = vpack.c.bf16 %v603_v40, %v600_v36 }
   0xc   :  { %v142_v47 = vsub.f32 %v1721_v32, %v1740_v39  ;;  %v1489_v48 = vpack.c.bf16 %v166_v42, %v154_v41  ;;  %v696_v56 = vand.u32 4294901760, %v1751_v50  ;;  %v1495_v58 = vpack.c.bf16 %v1693_v21, %v1688_v19  ;;  %v35_v21 = vld [vmem:[%s1954_s4] sm:$0x7]  ;;  %s1615_s4 = smov 96  }
   0xd   :  { %1589 = vset.pattern.permute.xlu1 %v1608_v51  ;;  %v132_v52 = vand.u32 4294901760, %v131_v45  ;;  %v1491_v53 = vpack.c.bf16 %v172_v46, %v160_v43  ;;  %1588 = vset.pattern.permute.xlu0 %v1608_v51  ;;  %v690_v59 = vsub.f32 %v1743_v44, %v689_v54  ;;  %v1610_v1 = vmov 1  }
   0xe   :  { %1201 = vperm.xlu1 %1589, %v1705_v25   ;;  %1490 = vmatprep.subr.bf16.mxu0 %v1489_v48  ;;  %v143_v57 = vand.u32 4294901760, %v142_v47  ;;  %v697_v60 = vsub.f32 %v1751_v50, %v696_v56  ;;  %v1501_v2 = vpack.c.bf16 %v164_v27, %v152_v26  ;;  %v1517_v4 = vpack.c.bf16 %v1751_v50, %v1743_v44 }
   0xf   :  { %1533 = vmatprep.subr.bf16.mxu1 %v1489_v48  ;;  %133 = vmatmul.mubr.f32.vlgmr.msra.gmra.mrb[0].mxu1 %v132_v52  ;;  %v691_v62 = vand.u32 4294901760, %v690_v59  ;;  %v1503_v5 = vpack.c.bf16 %v170_v31, %v158_v28  ;;  %v1611_v6 = vmov 3   ;;  %v1612_v7 = vmov 6  }
  0x10   :  { %1492 = vmatpush1.bf16.msra.mxu0 %v1491_v53  ;;  %138 = vmatprep.mubr.f32.mxu1 %v1605_v3  ;;  %v698_v63 = vand.u32 4294901760, %v697_v60  ;;  %v1525_v8 = vpack.c.bf16 %v696_v56, %v689_v54  ;;  %v1614_v11 = vmov 0   ;;  %v37_v17 = vlaneseq }
  0x11   :  { %1494 = vmatprep.subr.bf16.mxu0 %v1493_v49  ;;  %1534 = vmatpush1.bf16.msra.mxu1 %v1491_v53  ;;  %vm1396_vm1 = vcmask 261120   ;;  %vm1399_vm2 = vcmask 523264   ;;  %vm1402_vm3 = vcmask 785408   ;;  %vm1405_vm4 = vcmask 916480  }
  0x12   :  { %1590 = vset.pattern.permute.xlu1 %v1609_v61  ;;  %1510 = vmatprep.subr.bf16.mxu1 %v1755_v55  ;;  %v1513_v0 = vpack.c.bf16 %v698_v63, %v691_v62  ;;  %v38_v18 = vshrl.u32 %v37_v17, 7 }
  0x13   :  { %236 = vmatmul.mubr.f32.vlgmr.msra.gmra.mrb[0].mxu0 %v1695_v22  ;;  %144 = vmatmul.mubr.f32.gmra.mrb[2].mxu1 %v143_v57 }
  0x14   :  { %1496 = vmatpush1.bf16.msra.mxu0 %v1495_v58  ;;  %241 = vmatprep.mubr.f32.mxu1 %v1605_v3  ;;  %v47_v51 = vsub.s32 2, %v38_v18 }
  0x15   :  { %321 = vmatprep.mubr.f32.mxu0 %v1605_v3  ;;  %1498 = vmatprep.subr.bf16.mxu0 %v1682_v16 }
  0x16   :  { %1257 = vperm.xlu1 %1590, %v1680_v15   ;;  %1197 = vperm.xlu0 %1588, %v1680_v15  }
  0x1a   :  { %1592 = vset.pattern.permute.xlu1 %v1610_v1  ;;  %1591 = vset.pattern.permute.xlu0 %v1609_v61 }
  0x1b   :  { %324 = vmatmul.mubr.f32.vlgmr.msra.gmra.mrb[0].mxu0 %v1717_v30  ;;  %1115 = vperm.xlu1 %1592, %v1680_v15  }
  0x1c   :  { %243 = vmatmul.mubr.f32.vlgmr.msra.gmra.mrb[2].mxu1 %v1697_v23  ;;  %1500 = vmatpush1.bf16.msra.mxu0 %v1691_v20 }
  0x1d   :  { %1512 = vmatpush3.bf16.msra.mxu1 %v1755_v55  ;;  %1447 = vmatprep.mubr.f32.mxu1 %v132_v52 }
  0x1e   :  { %329 = vmatprep.mubr.f32.mxu0 %v1605_v3  ;;  %1514 = vmatprep.subr.bf16.mxu1 %v1513_v0 }
  0x1f   :  { %332 = vmatmul.mubr.f32.gmra.mrb[2].mxu0 %v1721_v32  ;;  %1502 = vmatprep.subr.bf16.mxu0 %v1501_v2 }
  0x20   :  { %1448 = vmatmul.mubr.f32.vlgmr.msra.gmra.mrb[4].mxu1 %v143_v57  ;;  %406 = vmatprep.mubr.f32.mxu0 %v1605_v3 }
  0x21   :  { %1516 = vmatpush3.bf16.msra.mxu1 %v1513_v0  ;;  %1454 = vmatprep.mubr.f32.mxu1 %v1695_v22 }
  0x22   :  { %1518 = vmatprep.subr.bf16.mxu1 %v1517_v4  ;;  %1119 = vperm.xlu1 %1592, %v1705_v25  }
  0x23   :  { %410 = vmatmul.mubr.f32.vlgmr.msra.gmra.mrb[0].mxu0 %v1734_v37  ;;  %1261 = vperm.xlu0 %1591, %v1705_v25  }
  0x24   :  { %1504 = vmatpush1.bf16.msra.mxu0 %v1503_v5  ;;  %415 = vmatprep.mubr.f32.mxu0 %v1605_v3 }
  0x25   :  { %1506 = vmatprep.subr.bf16.mxu0 %v1682_v16 }
  0x26   :  { %1594 = vset.pattern.permute.xlu1 %v1611_v6 }
  0x27   :  { %419 = vmatmul.mubr.f32.gmra.mrb[2].mxu0 %v1740_v39  ;;  %1171 = vperm.xlu1 %1594, %v1705_v25  }
  0x28   :  { %1455 = vmatmul.mubr.f32.vlgmr.msra.gmra.mrb[4].mxu1 %v1697_v23  ;;  %501 = vmatprep.mubr.f32.mxu0 %v1605_v3 }
  0x29   :  { %1520 = vmatpush3.bf16.msra.mxu1 %v1517_v4  ;;  %1461 = vmatprep.mubr.f32.mxu1 %v1717_v30 }
  0x2a   :  { %1522 = vmatprep.subr.bf16.mxu1 %v1755_v55  ;;  %1593 = vset.pattern.permute.xlu0 %v1611_v6 }
  0x2b   :  { %503 = vmatmul.mubr.f32.vlgmr.msra.gmra.mrb[0].mxu0 %v1695_v22  ;;  %1595 = vset.pattern.permute.xlu1 %v1612_v7 }
  0x2c   :  { %1508 = vmatpush1.bf16.msra.mxu0 %v1691_v20  ;;  %508 = vmatprep.mubr.f32.mxu0 %v1605_v3  ;;  %v39_v20 = vsub.s32 0, %v38_v18 }
  0x2d   :  { %1227 = vperm.xlu1 %1595, %v1680_v15   ;;  %1167 = vperm.xlu0 %1593, %v1680_v15  }
  0x2e   :  { %v40_v24 = vrot.slane %v35_v21, %v39_v20 }
  0x2f   :  { %510 = vmatmul.mubr.f32.gmra.mrb[2].mxu0 %v1697_v23 }
  0x30   :  { %1462 = vmatmul.mubr.f32.vlgmr.msra.gmra.mrb[4].mxu1 %v1721_v32  ;;  %584 = vmatprep.mubr.f32.mxu0 %v1605_v3 }
  0x31   :  { %1524 = vmatpush3.bf16.msra.mxu1 %v1755_v55  ;;  %1468 = vmatprep.mubr.f32.mxu1 %v1734_v37 }
  0x32   :  { %1526 = vmatprep.subr.bf16.mxu1 %v1525_v8  ;;  %1597 = vset.pattern.permute.xlu1 %v1613_v9 }
  0x33   :  { %586 = vmatmul.mubr.f32.vlgmr.msra.gmra.mrb[0].mxu0 %v1695_v22  ;;  %1135 = vperm.xlu1 %1597, %v1680_v15  }
  0x34   :  { %591 = vmatprep.mubr.f32.mxu0 %v1605_v3  ;;  %1596 = vset.pattern.permute.xlu0 %v1612_v7  ;;  %v1838_v3 = vld [vmem:[%s1953_s2 + $0x8] sm:$0xff] }
  0x35   :  { %1231 = vperm.xlu0 %1596, %v1705_v25  }
  0x37   :  { %593 = vmatmul.mubr.f32.gmra.mrb[2].mxu0 %v1697_v23  ;;  %1139 = vperm.xlu1 %1597, %v1705_v25  }
  0x38   :  { %1469 = vmatmul.mubr.f32.vlgmr.msra.gmra.mrb[4].mxu1 %v1740_v39 }
  0x39   :  { %1528 = vmatpush3.bf16.msra.mxu1 %v1525_v8  ;;  %1475 = vmatprep.mubr.f32.mxu1 %v1695_v22 }
  0x3a   :  { %1530 = vmatprep.subr.bf16.mxu1 %v1755_v55  ;;  %1598 = vset.pattern.permute.xlu0 %v1610_v1 }
  0x3b   :  { %1599 = vset.pattern.permute.xlu1 %v1610_v1  ;;  %1217 = vperm.xlu0 %1598, %v1843_v10  }
  0x3c   :  { %1221 = vperm.xlu1 %1599, %v1838_v3  }
  0x3f   :  { %1601 = vset.pattern.permute.xlu0 %v1613_v9 }
  0x40   :  { %1476 = vmatmul.mubr.f32.vlgmr.msra.gmra.mrb[4].mxu1 %v1697_v23  ;;  %1600 = vset.pattern.permute.xlu1 %v1613_v9 }
  0x41   :  { %1532 = vmatpush3.bf16.msra.mxu1 %v1755_v55  ;;  %1482 = vmatprep.mubr.f32.mxu1 %v1695_v22  ;;  %v43_v22 = vsub.s32 1, %v38_v18  ;;  %v48_v55 = vrot.slane %v35_v21, %v47_v51 }
  0x42   :  { %1277 = vperm.xlu1 %1600, %v1843_v10   ;;  %1281 = vperm.xlu0 %1601, %v1838_v3  }
  0x43   :  { %v44_v27 = vrot.slane %v35_v21, %v43_v22 }
  0x46   :  { %1602 = vset.pattern.permute.xlu0 %v1614_v11  ;;  %1603 = vset.pattern.permute.xlu1 %v1614_v11 }
  0x48   :  { %1483 = vmatmul.mubr.f32.vlgmr.msra.gmra.mrb[4].mxu1 %v1697_v23 }
  0x84   :  { %v1238_v19 = vpop.permute.xlu1 %1237  ;;  %v1178_v26 = vpop.permute.xlu0 %1177 }
  0x88   :  { %v1242_v23 = vpop.permute.xlu1 %1241  ;;  %v1182_v32 = vpop.permute.xlu0 %1181 }
  0x8d   :  { %v1202_v30 = vpop.permute.xlu1 %1201 }
  0x95   :  { %v1258_v43 = vpop.permute.xlu1 %1257  ;;  %v1198_v45 = vpop.permute.xlu0 %1197 }
  0x9a   :  { %v1116_v48 = vpop.permute.xlu1 %1115 }
  0xa1   :  { %v1120_v53 = vpop.permute.xlu1 %1119 }
  0xa2   :  { %v1262_v54 = vpop.permute.xlu0 %1261 }
  0xa6   :  { %v1172_v60 = vpop.permute.xlu1 %1171 }
  0xac   :  { %v1228_v0 = vpop.permute.xlu1 %1227 }
  0xb2   :  { %v1136_v2 = vpop.permute.xlu1 %1135 }
  0xb6   :  { %v1140_v6 = vpop.permute.xlu1 %1139 }
  0xbb   :  { %v1222_v11 = vpop.permute.xlu1 %1221 }
  0xe2   :  { %v134_v12 = vpop.f32.mrb[0].mxu1 }
  0xe3   :  { %v136_v13 = vpop.f32.mrb[1].mxu1  ;;  %v135_v28 = vadd.f32 %v134_v12, %v40_v24 }
  0xe4   :  { %v137_v29 = vadd.f32 %v136_v13, %v44_v27  ;;  %v1278_v13 = vpop.permute.xlu1 %1277 }
  0xef   :  { %v244_v14 = vpop.f32.mrb[2].mxu1 }
  0xf0   :  { %v246_v16 = vpop.f32.mrb[3].mxu1  ;;  %v1539_v36 = vadd.f32 %v244_v14, %v40_v24  ;;  %v1910_v24 = vld [vmem:[%s1956_s5] ss:$0 sm:$0xff]  ;;  %s1619_s5 = smov 16  }
  0xf1   :  { %v1541_v37 = vadd.f32 %v246_v16, %v44_v27 }
 0x106   :  { %v587_v31 = vpop.f32.mrb[0].mxu0 }
 0x107   :  { %v1536_v33 = vadd.f32 %v587_v31, %v135_v28  ;;  %v589_v34 = vpop.f32.mrb[1].mxu0 }
 0x108   :  { %v1854_v35 = vadd.f32 %v589_v34, %v137_v29 }
 0x109   :  { %1408 = vst [vmem:[%s1955_s6] sm:$0xff] %v1536_v33 }
 0x10a   :  { %v594_v38 = vpop.f32.mrb[2].mxu0  ;;  %v1244_v39 = vmul.f32 %v1854_v35, %v1238_v19  ;;  %v1184_v40 = vmul.f32 %v1854_v35, %v1178_v26  ;;  %v1204_v46 = vmul.f32 %v1854_v35, %v1198_v45  ;;  %v1264_v49 = vmul.f32 %v1854_v35, %v1258_v43 }
 0x10b   :  { %v1540_v41 = vadd.f32 %v1539_v36, %v594_v38  ;;  %v596_v42 = vpop.f32.mrb[3].mxu0  ;;  %v1142_v8 = vmul.f32 %v1854_v35, %v1136_v2  ;;  %v1234_v22 = vmul.f32 %v1854_v35, %v1228_v0 }
 0x10c   :  { %v1861_v44 = vadd.f32 %v1541_v37, %v596_v42  ;;  %1248 = vrot.lane.b32.xlu0 %v1244_v39, %s1615_s4  ;;  %1188 = vrot.lane.b32.xlu1 %v1184_v40, %s1615_s4 }
 0x10d   :  { %1411 = vst [vmem:[%s1955_s6 + $0x18] sm:$0xff] %v1540_v41 }
 0x10e   :  { %v1185_v47 = vmul.f32 %v1861_v44, %v1182_v32  ;;  %v1245_v50 = vmul.f32 %v1861_v44, %v1242_v23  ;;  %v1205_v52 = vmul.f32 %v1861_v44, %v1202_v30  ;;  %v1265_v56 = vmul.f32 %v1861_v44, %v1262_v54 }
 0x10f   :  { %v1123_v5 = vmul.f32 %v1861_v44, %v1120_v53  ;;  %v1143_v7 = vmul.f32 %v1861_v44, %v1140_v6 }
 0x110   :  { %1208 = vrot.lane.b32.xlu0 %v1204_v46, %s1616_s23  ;;  %1190 = vrot.lane.b32.xlu1 %v1185_v47, %s1615_s4 }
 0x114   :  { %1268 = vrot.lane.b32.xlu0 %v1264_v49, %s1616_s23  ;;  %1250 = vrot.lane.b32.xlu1 %v1245_v50, %s1615_s4 }
 0x118   :  { %1308 = vrot.lane.b32.xlu0 %v1184_v40, %s1617_s24  ;;  %1210 = vrot.lane.b32.xlu1 %v1205_v52, %s1616_s23 }
 0x11b   :  { %v1484_v57 = vpop.f32.mrb[4].mxu1 }
 0x11c   :  { %v1091_v58 = vpop.f32.mrb[5].mxu1  ;;  %1330 = vrot.lane.b32.xlu0 %v1244_v39, %s1617_s24  ;;  %1270 = vrot.lane.b32.xlu1 %v1265_v56, %s1616_s23  ;;  %v1543_v62 = vadd.f32 %v1484_v57, %v48_v55 }
 0x11d   :  { %v1544_v59 = vadd.f32 %v1091_v58, %v48_v55 }
 0x11e   :  { %v1317_v1 = vmul.f32 %v1543_v62, %v1202_v30  ;;  %v1339_v4 = vmul.f32 %v1543_v62, %v1262_v54  ;;  %v1175_v30 = vmul.f32 %v1861_v44, %v1172_v60 }
 0x11f   :  { %v1316_v61 = vmul.f32 %v1544_v59, %v1198_v45  ;;  %v1338_v63 = vmul.f32 %v1544_v59, %v1258_v43 }
 0x120   :  { %1310 = vrot.lane.b32.xlu1 %v1185_v47, %s1617_s24 }
 0x121   :  { %1320 = vrot.lane.b32.xlu0 %v1316_v61, %s1615_s4 }
 0x124   :  { %1332 = vrot.lane.b32.xlu1 %v1245_v50, %s1617_s24 }
 0x125   :  { %1342 = vrot.lane.b32.xlu0 %v1338_v63, %s1615_s4 }
 0x128   :  { %1322 = vrot.lane.b32.xlu1 %v1317_v1, %s1615_s4 }
 0x129   :  { %1104 = vperm.xlu0 %1602, %v1680_v15   ;;  %v1122_v15 = vmul.f32 %v1854_v35, %v1116_v48 }
 0x12c   :  { %1344 = vrot.lane.b32.xlu1 %v1339_v4, %s1615_s4 }
 0x12d   :  { %1161 = vperm.xlu0 %1602, %v1838_v3   ;;  %v1295_v3 = vmul.f32 %v1543_v62, %v1140_v6 }
 0x130   :  { %1109 = vperm.xlu1 %1603, %v1705_v25   ;;  %v1294_v25 = vmul.f32 %v1544_v59, %v1136_v2 }
 0x131   :  { %1128 = vrot.lane.b32.xlu0 %v1123_v5, %s1615_s4 }
 0x132   :  { %1604 = vset.pattern.permute.xlu0 %v1613_v9  ;;  %v1168_v9 = vpop.permute.xlu0 %1167 }
 0x133   :  { %v1174_v18 = vmul.f32 %v1854_v35, %v1168_v9 }
 0x134   :  { %1156 = vperm.xlu1 %1603, %v1843_v10  }
 0x135   :  { %1148 = vrot.lane.b32.xlu0 %v1143_v7, %s1616_s23 }
 0x136   :  { %v1232_v10 = vpop.permute.xlu0 %1231 }
 0x137   :  { %v1235_v38 = vmul.f32 %v1861_v44, %v1232_v10 }
 0x138   :  { %1126 = vrot.lane.b32.xlu1 %v1122_v15, %s1615_s4 }
 0x139   :  { %1288 = vrot.lane.b32.xlu0 %v1123_v5, %s1617_s24 }
 0x13a   :  { %v1218_v12 = vpop.permute.xlu0 %1217 }
 0x13c   :  { %1146 = vrot.lane.b32.xlu1 %v1142_v8, %s1616_s23 }
 0x13d   :  { %1300 = vrot.lane.b32.xlu0 %v1295_v3, %s1615_s4 }
 0x13e   :  { %v1282_v14 = vpop.permute.xlu0 %1281 }
 0x140   :  { %1286 = vrot.lane.b32.xlu1 %v1122_v15, %s1617_s24 }
 0x144   :  { %1298 = vrot.lane.b32.xlu1 %v1294_v25, %s1615_s4 }
 0x17e   :  { %v1249_v16 = vpop.permute.xlu0 %1248  ;;  %v1189_v17 = vpop.permute.xlu1 %1188 }
 0x17f   :  { %v1194_v19 = vadd.f32 %v1189_v17, %v1174_v18  ;;  %v1254_v26 = vadd.f32 %v1249_v16, %v1234_v22 }
 0x182   :  { %v1209_v20 = vpop.permute.xlu0 %1208  ;;  %v1191_v21 = vpop.permute.xlu1 %1190 }
 0x183   :  { %v1214_v23 = vadd.f32 %v1209_v20, %v1194_v19  ;;  %v1195_v33 = vadd.f32 %v1191_v21, %v1175_v30 }
 0x185   :  { %v1224_v27 = vadd.f32 %v1218_v12, %v1214_v23 }
 0x186   :  { %v1269_v28 = vpop.permute.xlu0 %1268  ;;  %v1251_v29 = vpop.permute.xlu1 %1250 }
 0x187   :  { %v1274_v31 = vadd.f32 %v1269_v28, %v1254_v26  ;;  %v1360_v32 = vmul.f32 %v1910_v24, %v1224_v27  ;;  %v1255_v41 = vadd.f32 %v1251_v29, %v1235_v38 }
 0x189   :  { %v1284_v34 = vadd.f32 %v1278_v13, %v1274_v31  ;;  %1366 = vrot.lane.b32.xlu1 %v1360_v32, %s1618_s27 }
 0x18a   :  { %v1309_v36 = vpop.permute.xlu0 %1308  ;;  %v1211_v37 = vpop.permute.xlu1 %1210 }
 0x18b   :  { %v1215_v39 = vadd.f32 %v1211_v37, %v1195_v33  ;;  %v1362_v40 = vmul.f32 %v1910_v24, %v1284_v34  ;;  %v1314_v49 = vadd.f32 %v1309_v36, %v1174_v18 }
 0x18d   :  { %v1225_v42 = vadd.f32 %v1222_v11, %v1215_v39  ;;  %1374 = vrot.lane.b32.xlu1 %v1362_v40, %s1616_s23 }
 0x18e   :  { %v1331_v43 = vpop.permute.xlu0 %1330  ;;  %v1271_v45 = vpop.permute.xlu1 %1270 }
 0x18f   :  { %v1275_v46 = vadd.f32 %v1271_v45, %v1255_v41  ;;  %v1361_v47 = vmul.f32 %v1910_v24, %v1225_v42  ;;  %v1336_v54 = vadd.f32 %v1331_v43, %v1234_v22 }
 0x191   :  { %v1285_v48 = vadd.f32 %v1282_v14, %v1275_v46  ;;  %1368 = vrot.lane.b32.xlu0 %v1361_v47, %s1618_s27 }
 0x192   :  { %v1311_v50 = vpop.permute.xlu1 %1310 }
 0x193   :  { %v1321_v51 = vpop.permute.xlu0 %1320  ;;  %v1363_v52 = vmul.f32 %v1910_v24, %v1285_v48  ;;  %v1315_v59 = vadd.f32 %v1311_v50, %v1175_v30 }
 0x194   :  { %v1326_v53 = vadd.f32 %v1321_v51, %v1314_v49 }
 0x195   :  { %1376 = vrot.lane.b32.xlu0 %v1363_v52, %s1616_s23 }
 0x196   :  { %v1328_v55 = vadd.f32 %v1326_v53, %v1218_v12  ;;  %v1333_v56 = vpop.permute.xlu1 %1332 }
 0x197   :  { %v1343_v57 = vpop.permute.xlu0 %1342  ;;  %v1337_v63 = vadd.f32 %v1333_v56, %v1235_v38 }
 0x198   :  { %v1348_v58 = vadd.f32 %v1343_v57, %v1336_v54  ;;  %1382 = vrot.lane.b32.xlu1 %v1328_v55, %s1619_s5 }
 0x19a   :  { %v1350_v60 = vadd.f32 %v1348_v58, %v1278_v13  ;;  %v1323_v61 = vpop.permute.xlu1 %1322 }
 0x19b   :  { %v1327_v62 = vadd.f32 %v1323_v61, %v1315_v59 }
 0x19c   :  { %1390 = vrot.lane.b32.xlu1 %v1350_v60, %s1618_s27 }
 0x19d   :  { %v1329_v0 = vadd.f32 %v1327_v62, %v1222_v11 }
 0x19e   :  { %v1345_v1 = vpop.permute.xlu1 %1344 }
 0x19f   :  { %v1349_v2 = vadd.f32 %v1345_v1, %v1337_v63  ;;  %1384 = vrot.lane.b32.xlu0 %v1329_v0, %s1619_s5 }
 0x1a1   :  { %v1351_v4 = vadd.f32 %v1349_v2, %v1282_v14 }
 0x1a3   :  { %1392 = vrot.lane.b32.xlu0 %v1351_v4, %s1618_s27 }
 0x1a8   :  { %v1105_v7 = vpop.permute.xlu0 %1104 }
 0x1a9   :  { %v1112_v12 = vmul.f32 %v1854_v35, %v1105_v7 }
 0x1ac   :  { %v1162_v8 = vpop.permute.xlu0 %1161 }
 0x1af   :  { %v1110_v5 = vpop.permute.xlu1 %1109 }
 0x1b0   :  { %v1129_v25 = vpop.permute.xlu0 %1128  ;;  %v1113_v11 = vmul.f32 %v1861_v44, %v1110_v5 }
 0x1b2   :  { %v1133_v19 = vadd.f32 %v1129_v25, %v1113_v11 }
 0x1b3   :  { %v1157_v6 = vpop.permute.xlu1 %1156 }
 0x1b4   :  { %v1149_v10 = vpop.permute.xlu0 %1148 }
 0x1b5   :  { %v1153_v23 = vadd.f32 %v1149_v10, %v1133_v19 }
 0x1b7   :  { %v1127_v15 = vpop.permute.xlu1 %1126  ;;  %v1165_v30 = vadd.f32 %v1162_v8, %v1153_v23 }
 0x1b8   :  { %v1132_v13 = vadd.f32 %v1127_v15, %v1112_v12  ;;  %v1289_v17 = vpop.permute.xlu0 %1288 }
 0x1b9   :  { %v1293_v32 = vadd.f32 %v1289_v17, %v1113_v11  ;;  %v1359_v36 = vmul.f32 %v1910_v24, %v1165_v30 }
 0x1bb   :  { %v1147_v3 = vpop.permute.xlu1 %1146 }
 0x1bc   :  { %v1152_v18 = vadd.f32 %v1147_v3, %v1132_v13  ;;  %v1301_v21 = vpop.permute.xlu0 %1300 }
 0x1bd   :  { %v1305_v37 = vadd.f32 %v1301_v21, %v1293_v32 }
 0x1be   :  { %v1164_v20 = vadd.f32 %v1157_v6, %v1152_v18 }
 0x1bf   :  { %v1287_v9 = vpop.permute.xlu1 %1286  ;;  %v1307_v43 = vadd.f32 %v1305_v37, %v1162_v8 }
 0x1c0   :  { %v1292_v22 = vadd.f32 %v1287_v9, %v1112_v12  ;;  %v1358_v26 = vmul.f32 %v1910_v24, %v1164_v20 }
 0x1c3   :  { %v1299_v16 = vpop.permute.xlu1 %1298 }
 0x1c4   :  { %v1304_v27 = vadd.f32 %v1299_v16, %v1292_v22 }
 0x1c6   :  { %v1306_v31 = vadd.f32 %v1304_v27, %v1157_v6 }
 0x1fb   :  { %v1367_v14 = vpop.permute.xlu1 %1366 }
 0x1fc   :  { %v1397_v35 = vsel %vm1396_vm1, %v1358_v26, %v1367_v14 }
 0x1ff   :  { %v1375_v28 = vpop.permute.xlu1 %1374 }
 0x200   :  { %v1400_v44 = vsel %vm1399_vm2, %v1397_v35, %v1375_v28 }
 0x201   :  { %v1403_v33 = vsel %vm1402_vm3, %v1400_v44, %v1306_v31 }
 0x203   :  { %v1369_v29 = vpop.permute.xlu0 %1368 }
 0x204   :  { %v1398_v40 = vsel %vm1396_vm1, %v1359_v36, %v1369_v29 }
 0x207   :  { %v1377_v38 = vpop.permute.xlu0 %1376 }
 0x208   :  { %v1401_v41 = vsel %vm1399_vm2, %v1398_v40, %v1377_v38 }
 0x209   :  { %v1404_v45 = vsel %vm1402_vm3, %v1401_v41, %v1307_v43 }
 0x20a   :  { %v1383_v34 = vpop.permute.xlu1 %1382 }
 0x20b   :  { %v1406_v39 = vsel %vm1405_vm4, %v1403_v33, %v1383_v34 }
 0x20c   :  { %1409 = vst [vmem:[%s1955_s6 + $0x8] sm:$0xff] %v1406_v39 }
 0x20e   :  { %v1391_v42 = vpop.permute.xlu1 %1390 }
 0x20f   :  { %1410 = vst.msk [vmem:[%s1955_s6 + $0x10] sm:$0xff] %vm52_vm0, %v1391_v42 }
 0x211   :  { %v1385_v24 = vpop.permute.xlu0 %1384 }
 0x212   :  { %v1407_v46 = vsel %vm1405_vm4, %v1404_v45, %v1385_v24 }
 0x213   :  { %1412 = vst [vmem:[%s1955_s6 + $0x20] sm:$0xff] %v1407_v46 }
 0x215   :  { %v1393_v47 = vpop.permute.xlu0 %1392 }
 0x216   :  { %1413 = vst.msk [vmem:[%s1955_s6 + $0x28] sm:$0xff] %vm52_vm0, %v1393_v47 }

// kernel: ipa_pallas.3
= control target key start
LH: loop header
LB: loop body
LE: loop exit
PB: predicated region body
PF: predicated region fallthrough
CT: control target
= control target key end

     0   :  { %s21452_s6 = smov 1   ;;  %s21453_s10 = smov 2   ;;  %s24589_s0 = inlined_call_operand.smem [shape: u32[33], index: -1, kind: input, shape index: {}] }
   0x1   :  { %s21516_s5 = sld [smem:[%s24589_s0]]   ;;  %s21454_s14 = smov 3  }
   0x2   :  { %s21521_s9 = sld [smem:[%s24589_s0 + %s21452_s6]]   ;;  %s21455_s18 = smov 4  }
   0x3   :  { %s21526_s13 = sld [smem:[%s24589_s0 + %s21453_s10]]   ;;  %s21456_s22 = smov 5  }
   0x4   :  { %s21531_s17 = sld [smem:[%s24589_s0 + %s21454_s14]]   ;;  %s21457_s26 = smov 6  }
   0x5   :  { %s21536_s21 = sld [smem:[%s24589_s0 + %s21455_s18]]   ;;  %s21458_s30 = smov 7  }
   0x6   :  { %s21541_s25 = sld [smem:[%s24589_s0 + %s21456_s22]]   ;;  %s21459_s4 = smov 8  }
   0x7   :  { %24827 = sst [smem:[#allocation5_spill]] %s21516_s5  ;;  %s21460_s10 = smov 9  }
   0x8   :  { %24828 = sst [smem:[#allocation6_spill]] %s21521_s9  ;;  %s21461_s15 = smov 10  }
   0x9   :  { %s21546_s29 = sld [smem:[%s24589_s0 + %s21457_s26]]   ;;  %s21462_s20 = smov 11  }
   0xa   :  { %s21551_s3 = sld [smem:[%s24589_s0 + %s21458_s30]]   ;;  %s21463_s26 = smov 12  }
   0xb   :  { %s21556_s8 = sld [smem:[%s24589_s0 + %s21459_s4]]   ;;  %s21464_s1 = smov 13  }
   0xc   :  { %s21561_s14 = sld [smem:[%s24589_s0 + %s21460_s10]]   ;;  %s21465_s7 = smov 14  }
   0xd   :  { %s21566_s19 = sld [smem:[%s24589_s0 + %s21461_s15]]   ;;  %s21466_s15 = smov 15  }
   0xe   :  { %s21571_s24 = sld [smem:[%s24589_s0 + %s21462_s20]]   ;;  %s21467_s22 = smov 16  }
   0xf   :  { %24829 = sst [smem:[#allocation7_spill]] %s21546_s29  ;;  %s21468_s28 = smov 17  }
  0x10   :  { %24830 = sst [smem:[#allocation8_spill]] %s21551_s3 }
  0x11   :  { %24831 = sst [smem:[#allocation9_spill]] %s21556_s8 }
  0x12   :  { %s21576_s30 = sld [smem:[%s24589_s0 + %s21463_s26]]  }
  0x13   :  { %s21581_s6 = sld [smem:[%s24589_s0 + %s21464_s1]]  }
  0x14   :  { %24832 = sst [smem:[#allocation10_spill]] %s21571_s24 }
  0x15   :  { %s21586_s12 = sld [smem:[%s24589_s0 + %s21465_s7]]   ;;  %s21469_s7 = smov 18  }
  0x16   :  { %s21591_s20 = sld [smem:[%s24589_s0 + %s21466_s15]]   ;;  %s21470_s15 = smov 19  }
  0x17   :  { %s21596_s27 = sld [smem:[%s24589_s0 + %s21467_s22]]   ;;  %s21471_s22 = smov 20  }
  0x18   :  { %24833 = sst [smem:[#allocation11_spill]] %s21576_s30 }
  0x19   :  { %24834 = sst [smem:[#allocation12_spill]] %s21581_s6 }
  0x1a   :  { %s21601_s4 = sld [smem:[%s24589_s0 + %s21468_s28]]   ;;  %s21472_s28 = smov 21  }
  0x1b   :  { %24835 = sst [smem:[#allocation13_spill]] %s21586_s12 }
  0x1c   :  { %24836 = sst [smem:[#allocation14_spill]] %s21591_s20 }
  0x1d   :  { %s21606_s29 = sld [smem:[%s24589_s0 + %s21469_s7]]   ;;  %s21473_s7 = smov 22  }
  0x1e   :  { %s21611_s30 = sld [smem:[%s24589_s0 + %s21470_s15]]   ;;  %s21474_s15 = smov 23  }
  0x1f   :  { %s21616_s20 = sld [smem:[%s24589_s0 + %s21471_s22]]   ;;  %s21475_s22 = smov 24  }
  0x20   :  { %24837 = sst [smem:[#allocation15_spill]] %s21601_s4 }
  0x21   :  { %s21621_s24 = sld [smem:[%s24589_s0 + %s21472_s28]]   ;;  %s21476_s28 = smov 25  }
  0x23   :  { %24838 = sst [smem:[#allocation16_spill]] %s21606_s29 }
  0x24   :  { %24839 = sst [smem:[#allocation17_spill]] %s21611_s30 }
  0x25   :  { %24840 = sst [smem:[#allocation18_spill]] %s21616_s20 }
  0x26   :  { %s21626_s29 = sld [smem:[%s24589_s0 + %s21473_s7]]   ;;  %s21477_s7 = smov 26  }
  0x27   :  { %24841 = sst [smem:[#allocation19_spill]] %s21621_s24 }
  0x28   :  { %s21631_s30 = sld [smem:[%s24589_s0 + %s21474_s15]]   ;;  %s21478_s15 = smov 27  }
  0x29   :  { %s21636_s20 = sld [smem:[%s24589_s0 + %s21475_s22]]   ;;  %s21479_s22 = smov 28  }
  0x2a   :  { %s21641_s24 = sld [smem:[%s24589_s0 + %s21476_s28]]   ;;  %s21480_s28 = smov 29  }
  0x2c   :  { %24842 = sst [smem:[#allocation20_spill]] %s21626_s29 }
  0x2d   :  { %s21646_s29 = sld [smem:[%s24589_s0 + %s21477_s7]]   ;;  %s21481_s7 = smov 30  }
  0x2e   :  { %24843 = sst [smem:[#allocation21_spill]] %s21631_s30 }
  0x2f   :  { %24844 = sst [smem:[#allocation22_spill]] %s21636_s20 }
  0x30   :  { %24845 = sst [smem:[#allocation23_spill]] %s21641_s24 }
  0x31   :  { %s21651_s30 = sld [smem:[%s24589_s0 + %s21478_s15]]   ;;  %s21482_s15 = smov 31  }
  0x32   :  { %s21656_s20 = sld [smem:[%s24589_s0 + %s21479_s22]]   ;;  %s21483_s22 = smov 32  }
  0x33   :  { %24846 = sst [smem:[#allocation24_spill]] %s21646_s29 }
  0x34   :  { %s21661_s24 = sld [smem:[%s24589_s0 + %s21480_s28]]  }
  0x35   :  { %s21666_s29 = sld [smem:[%s24589_s0 + %s21481_s7]]  }
  0x37   :  { %24847 = sst [smem:[#allocation25_spill]] %s21651_s30 }
  0x38   :  { %24848 = sst [smem:[#allocation26_spill]] %s21656_s20 }
  0x39   :  { %s21671_s30 = sld [smem:[%s24589_s0 + %s21482_s15]]  }
  0x3a   :  { %s21676_s20 = sld [smem:[%s24589_s0 + %s21483_s22]]  }
  0x40   :  { %24849 = sst [smem:[#allocation27_spill]] %s21676_s20 }
  0x41   :  { %70 = vsyncpa [#allocation3], 0 }
  0x42   :  { %72 = vsyncpa [#allocation3 + $0x1], 0  ;;  %s21678_s28 = smov 0   ;;  %s21680_s1 = smov 0  }
  0x43   :  { %s21682_s2 = smov 0   ;;  %s21684_s7 = smov 0  }
  0x44   :  { %s21686_s10 = smov 0   ;;  %s21688_s11 = smov 0  }
  0x45 LB: > { %s24850_s12 = sld [smem:[#allocation13_spill]]  ;;  %s24851_s4 = sld [smem:[#allocation15_spill]]  ;;  %s21442_s7 = sphi %s21684_s7, %s25190_s7   ;;  %s21438_s2 = sphi %s21682_s2, %s25189_s2   ;;  %s21434_s1 = sphi %s21680_s1, %s25188_s1   ;;  %s21430_s28 = sphi %s21678_s28, %s25187_s28   ;;  %s21450_s11 = sphi %s21688_s11, %s78_s11   ;;  %s21446_s10 = sphi %s21686_s10, %s25191_s10  }
  0x46   : > { %s24852_s8 = sld [smem:[#allocation9_spill]]  ;;  %s24853_s6 = sld [smem:[#allocation12_spill]] }
  0x47   : > { %s17610_s0 = sadd.s32 4294967295, %s21450_s11   ;;  %s17611_s15 = sadd.s32 4294967294, %s21450_s11  }
  0x48   : > { %s90_s16 = sadd.s32 1, %s21446_s10  ;;  %s825_s18 = sadd.s32 1, %s21438_s2 }
  0x49   : > { %p92_p0 = scmp.ge.s32.totalorder %s90_s16, 2  ;;  %p835_p1 = scmp.ne.s32.totalorder %s21438_s2, %s21434_s1 }
  0x4a   : > { %p836_p2 = scmp.eq.s32.totalorder %s17610_s0, 1  ;;  %p841_p3 = scmp.ne.s32.totalorder %s21434_s1, %s21430_s28 }
  0x4b   : > { %s25193_s16 = smov (%p92_p0, %s90_s16), 0  ;;  %p842_p5 = scmp.eq.s32.totalorder %s17611_s15, 1 }
  0x4c   : > { %p21718_p4 = por %p836_p2, %p835_p1  ;;  %s820_s23 = ssub.s32 %s21446_s10, %s25193_s16 }
  0x4d   : > { %p17614_p6 = scmp.ge.s32.totalorder %s21450_s11, 1  ;;  %p823_p7 = scmp.eq.s32.totalorder %s820_s23, 0 }
  0x4e   : > { %p21725_p8 = por %p842_p5, %p841_p3  ;;  %p1010_p9 = scmp.lt.s32.totalorder %s21450_s11, 3 }
  0x4f   : > { %s21731_s20 = scalar_select %p823_p7, %s21438_s2, %s825_s18  }
  0x50   : > { %p1011_p10 = pnand %p17614_p6, %p1010_p9 }
  0x52   : > { %1014 = sbr.rel (%p1011_p10) target bundleno = 5643 (0x160b), region = 148 }
  0x59   : > { %v1204_v0 = vld [vmem:[%s24852_s8 + $0x8] sm:$0xff]  ;;  %v1206_v1 = vld [vmem:[%s24852_s8 + $0x18] sm:$0xff]  ;;  %v1203_v2 = vld [vmem:[%s24852_s8] sm:$0xff]  ;;  %p1141_p11 = scmp.lt.s32.totalorder %s21442_s7, 1  ;;  %v24635_v7 = vmov 0.0   ;;  %s24856_s5 = sld [smem:[#allocation5_spill]]  ;;  %v24599_v51 = vlaneseq }
  0x5a   : > { %v1223_v3 = vand.u32 4294901760, %v1204_v0  ;;  %v1227_v4 = vand.u32 4294901760, %v1206_v1  ;;  %v1205_v5 = vld [vmem:[%s24852_s8 + $0x10] sm:$0xff]  ;;  %v1225_v6 = vand.u32 4294901760, %v1203_v2  ;;  %1291 = vmatprep.mubr.f32.mxu0 %v24635_v7  ;;  %v21485_v9 = vmov 2   ;;  %s24869_s9 = sld [smem:[#allocation6_spill]] }
  0x5b   : > { %v1229_v8 = vand.u32 4294901760, %v1205_v5  ;;  %s21740_s0 = scalar_select %p1141_p11, %s21442_s7, 1  ;;  %21339 = vset.pattern.permute.xlu1 %v21485_v9  ;;  %v21486_v14 = vmov 1   ;;  %vm1219_vm0 = vcmask 130048   ;;  %v21487_v35 = vmov 5  }
  0x5c   : > { %v21743_v10 = vpack.c.bf16 %v1227_v4, %v1223_v3  ;;  %v21745_v11 = vsub.f32 %v1204_v0, %v1223_v3  ;;  %v21747_v12 = vsub.f32 %v1206_v1, %v1227_v4  ;;  %v21749_v13 = vsub.f32 %v1203_v2, %v1225_v6  ;;  %21337 = vset.pattern.permute.xlu0 %v21486_v14  ;;  %v1207_v56 = vld [vmem:[%s21561_s14] sm:$0x3]  ;;  %s24880_s3 = sld [smem:[#allocation8_spill]] }
  0x5d   : > { %v21752_v15 = vpack.c.bf16 %v1229_v8, %v1225_v6  ;;  %v21754_v16 = vsub.f32 %v1205_v5, %v1229_v8  ;;  %s21757_s15 = sshll.u32 %s21740_s0, 3  ;;  %v21488_v36 = vmov 4   ;;  %v21489_v42 = vmov 0  }
  0x5e   : > { %19741 = vmatprep.subr.bf16.mxu0 %v21743_v10  ;;  %v1305_v17 = vand.u32 4294901760, %v21745_v11  ;;  %v1317_v18 = vand.u32 4294901760, %v21747_v12  ;;  %v1311_v19 = vand.u32 4294901760, %v21749_v13  ;;  %s1175_s23 = scalar_lea.vmem %s21536_s21, %s21757_s15  ;;  %v19748_v41 = vpack.c.bf16 %v21747_v12, %v21745_v11 }
  0x5f   : > { %s21762_s18 = scalar_lea.vmem %s24856_s5, %s21757_s15  ;;  %19743 = vmatpush1.bf16.msra.mxu0 %v21752_v15  ;;  %v1323_v21 = vand.u32 4294901760, %v21754_v16  ;;  %v21772_v22 = vld [vmem:[%s1175_s23] sm:$0xff]  ;;  %v21490_v43 = vmov 3   ;;  %s1182_s23 = scalar_lea.vmem %s21541_s25, %s21757_s15  ;;  %v21491_v45 = vmov 7   ;;  %v19750_v46 = vpack.c.bf16 %v21754_v16, %v21749_v13 }
  0x60   : > { %v1195_v20 = vld [vmem:[%s21762_s18] sm:$0xff]  ;;  %v1306_v24 = vsub.f32 %v21745_v11, %v1305_v17  ;;  %v1318_v25 = vsub.f32 %v21747_v12, %v1317_v18  ;;  %v1312_v26 = vsub.f32 %v21749_v13, %v1311_v19  ;;  %1732 = vperm.xlu1 %21339, %v21772_v22   ;;  %1722 = vperm.xlu0 %21337, %v21772_v22   ;;  %v21492_v47 = vmov 8   ;;  %s24608_s5 = smov 64  }
  0x61   : > { %v1221_v23 = vsel %vm1219_vm0, %v1195_v20, 0  ;;  %v1324_v28 = vsub.f32 %v21754_v16, %v1323_v21  ;;  %v21794_v44 = vld [vmem:[%s1182_s23] sm:$0xff]  ;;  %v19756_v48 = vpack.c.bf16 %v1317_v18, %v1305_v17  ;;  %v19758_v49 = vpack.c.bf16 %v1323_v21, %v1311_v19  ;;  %s24610_s23 = smov 96   ;;  %v1832_v16 = vld [vmem:[%s24853_s6 + $0x8] sm:$0xff]  ;;  %v1833_v17 = vld [vmem:[%s24853_s6 + $0x10] sm:$0xff] }
  0x62   : > { %v1292_v27 = vand.u32 4294901760, %v1221_v23  ;;  %v1307_v29 = vand.u32 4294901760, %v1306_v24  ;;  %v1319_v30 = vand.u32 4294901760, %v1318_v25  ;;  %v1313_v33 = vand.u32 4294901760, %v1312_v26  ;;  %v1834_v21 = vld [vmem:[%s24853_s6 + $0x18] sm:$0xff]  ;;  %v1836_v24 = vld [vmem:[%s24853_s6 + $0x28] sm:$0xff] }
  0x63   : > { %v1325_v34 = vand.u32 4294901760, %v1324_v28  ;;  %v21493_v50 = vmov 6   ;;  %v21818_v53 = vshrl.u32 %v24599_v51, 7  ;;  %v24625_v18 = vmov 0.0|0.0  }
  0x64   : > { %v1293_v31 = vsub.f32 %v1221_v23, %v1292_v27  ;;  %v19744_v32 = vpack.c.bf16 %v1319_v30, %v1307_v29  ;;  %21340 = vset.pattern.permute.xlu1 %v21487_v35  ;;  %21338 = vset.pattern.permute.xlu0 %v21488_v36  ;;  %v1851_v20 = vand.u32 4294901760, %v1832_v16  ;;  %v1835_v23 = vld [vmem:[%s24853_s6 + $0x20] sm:$0xff]  ;;  %v1863_v26 = vand.u32 4294901760, %v1836_v24 }
  0x65   : > { %1772 = vperm.xlu1 %21340, %v21772_v22   ;;  %1762 = vperm.xlu0 %21338, %v21772_v22   ;;  %v19746_v39 = vpack.c.bf16 %v1325_v34, %v1313_v33  ;;  %v24598_v54 = vsub.s32 0, %v21818_v53  ;;  %v24597_v57 = vsub.s32 1, %v21818_v53  ;;  %v1860_v25 = vand.u32 4294901760, %v1835_v23 }
  0x66   : > { %v1294_v37 = vand.u32 4294901760, %v1293_v31  ;;  %19745 = vmatprep.subr.bf16.mxu0 %v19744_v32  ;;  %19764 = vmatprep.subr.bf16.mxu1 %v24625_v18  ;;  %v21874_v29 = vsub.f32 %v1832_v16, %v1851_v20  ;;  %v21885_v34 = vsub.f32 %v1836_v24, %v1863_v26  ;;  %vm21497_vm1 = vmmov 0  }
  0x67   : > { %v1212_v59 = vrot.slane %v1207_v56, %v24598_v54  ;;  %v1216_v60 = vrot.slane %v1207_v56, %v24597_v57  ;;  %v21880_v32 = vsub.f32 %v1835_v23, %v1860_v25  ;;  %v21889_v35 = vpack.c.bf16 %v1863_v26, %v1860_v25  ;;  %v1840_v56 = vld [vmem:[%s24853_s6 + $0x48] sm:$0xff]  ;;  %18900 = vmatprep.mubr.msk.f32.mxu1 %vm21497_vm1, %v24635_v7 }
  0x68   : > { %v1295_v38 = vsub.f32 %v1293_v31, %v1294_v37  ;;  %vm1826_vm2 = vcmask 261120   ;;  %vm1828_vm3 = vcmask 523264   ;;  %vm1843_vm4 = vcmask 785408  }
  0x69   : > { %21341 = vset.pattern.permute.xlu1 %v21489_v42  ;;  %21342 = vset.pattern.permute.xlu0 %v21490_v43  ;;  %v19807_v54 = vpack.c.bf16 %v21885_v34, %v21880_v32  ;;  %vm2532_vm5 = vcmask 1043456   ;;  %vm2528_vm6 = vcmask 31744   ;;  %vm2694_vm8 = vcmask 64512  }
  0x6a   : > { %v1296_v40 = vand.u32 4294901760, %v1295_v38  ;;  %1717 = vperm.xlu1 %21341, %v21772_v22   ;;  %1757 = vperm.xlu0 %21342, %v21772_v22   ;;  %vm8685_vm12 = vcmask 97280   ;;  %vm15552_vm15 = vcmask 654336  }
  0x6c   : > { %1297 = vmatmul.mubr.f32.vlgmr.msra.gmra.mrb[0].mxu0 %v1296_v40  ;;  %v1838_v40 = vld [vmem:[%s24853_s6 + $0x38] sm:$0xff] }
  0x6d   : > { %19747 = vmatpush1.bf16.msra.mxu0 %v19746_v39  ;;  %1387 = vmatprep.mubr.f32.mxu0 %v24635_v7  ;;  %v1837_v39 = vld [vmem:[%s24853_s6 + $0x30] sm:$0xff] }
  0x6e   : > { %19749 = vmatprep.subr.bf16.mxu0 %v19748_v41  ;;  %21343 = vset.pattern.permute.xlu1 %v21491_v45  ;;  %v1866_v41 = vand.u32 4294901760, %v1837_v39 }
  0x6f   : > { %21345 = vset.pattern.permute.xlu0 %v21489_v42  ;;  %1793 = vperm.xlu1 %21343, %v21772_v22  }
  0x70   : > { %1743 = vperm.xlu0 %21345, %v21794_v44  }
  0x73   : > { %21344 = vset.pattern.permute.xlu1 %v21492_v47 }
  0x74   : > { %1389 = vmatmul.mubr.f32.vlgmr.msra.gmra.mrb[0].mxu0 %v1292_v27  ;;  %1803 = vperm.xlu1 %21344, %v21772_v22  }
  0x75   : > { %19751 = vmatpush1.bf16.msra.mxu0 %v19750_v46  ;;  %1467 = vmatprep.mubr.f32.mxu0 %v24635_v7 }
  0x76   : > { %19753 = vmatprep.subr.bf16.mxu0 %v21743_v10  ;;  %21347 = vset.pattern.permute.xlu0 %v21493_v50  ;;  %v1839_v50 = vld [vmem:[%s24853_s6 + $0x40] sm:$0xff] }
  0x78   : > { %21346 = vset.pattern.permute.xlu1 %v21486_v14 }
  0x79   : > { %1782 = vperm.xlu1 %21346, %v21794_v44  }
  0x7c   : > { %1470 = vmatmul.mubr.f32.vlgmr.msra.gmra.mrb[0].mxu0 %v1293_v31 }
  0x7d   : > { %19755 = vmatpush1.bf16.msra.mxu0 %v21752_v15  ;;  %1544 = vmatprep.mubr.f32.mxu0 %v24635_v7 }
  0x7e   : > { %19757 = vmatprep.subr.bf16.mxu0 %v19756_v48  ;;  %21348 = vset.pattern.permute.xlu1 %v21485_v9 }
  0x84   : > { %1548 = vmatmul.mubr.f32.vlgmr.msra.gmra.mrb[0].mxu0 %v1294_v37 }
  0x85   : > { %19759 = vmatpush1.bf16.msra.mxu0 %v19758_v49  ;;  %1630 = vmatprep.mubr.f32.mxu0 %v24635_v7 }
  0x86   : > { %19761 = vmatprep.subr.bf16.mxu0 %v21743_v10  ;;  %v17624_v10 = vld [vmem:[%s21566_s19] ss:$0 sm:$0xff] }
  0x8c   : > { %1632 = vmatmul.mubr.f32.vlgmr.msra.gmra.mrb[0].mxu0 %v1292_v27 }
  0x8d   : > { %19763 = vmatpush1.bf16.msra.mxu0 %v21752_v15  ;;  %1706 = vmatprep.mubr.f32.mxu0 %v24635_v7  ;;  %v1831_v15 = vld [vmem:[%s24853_s6] sm:$0xff] }
  0x8e   : > { %v1848_v19 = vand.u32 4294901760, %v1831_v15  ;;  %19872 = vmatprep.subr.bf16.mxu0 %v24625_v18 }
  0x90   : > { %v21872_v28 = vsub.f32 %v1831_v15, %v1848_v19  ;;  %v1842_v15 = vld [vmem:[%s24853_s6 + $0x58] sm:$0xff] }
  0x92   : > { %v1937_v23 = vand.u32 4294901760, %v21872_v28 }
  0x94   : > { %1708 = vmatmul.mubr.f32.vlgmr.msra.gmra.mrb[0].mxu0 %v1292_v27  ;;  %v21870_v27 = vpack.c.bf16 %v1851_v20, %v1848_v19  ;;  %v1881_v20 = vand.u32 4294901760, %v1842_v15 }
  0x95   : > { %19046 = vmatprep.mubr.msk.f32.mxu0 %vm21497_vm1, %v24635_v7 }
  0x96   : > { %19766 = vmatpush3.bf16.msra.mxu1 %v21870_v27  ;;  %v21935_v26 = vsub.f32 %v1842_v15, %v1881_v20 }
  0x97   : > { %19767 = vmatprep.subr.bf16.mxu1 %v24625_v18 }
  0xdf   : > { %v21815_v52 = vpop.permute.xlu1 %1732  ;;  %v21825_v58 = vpop.permute.xlu0 %1722 }
  0xe0   : > { %24857 = vst [vmem:[#allocation28_spill] sm:$0xff] %v21815_v52  ;;  %24859 = vst [vmem:[#allocation30_spill] sm:$0xff] %v21825_v58 }
  0xe4   : > { %v21821_v55 = vpop.permute.xlu1 %1772  ;;  %v21835_v1 = vpop.permute.xlu0 %1762 }
  0xe5   : > { %24858 = vst [vmem:[#allocation29_spill] sm:$0xff] %v21821_v55  ;;  %24861 = vst [vmem:[#allocation32_spill] sm:$0xff] %v21835_v1 }
  0xe9   : > { %v21831_v61 = vpop.permute.xlu1 %1717  ;;  %v21894_v36 = vpop.permute.xlu0 %1757 }
  0xea   : > { %24860 = vst [vmem:[#allocation31_spill] sm:$0xff] %v21831_v61  ;;  %24864 = vst [vmem:[#allocation35_spill] sm:$0xff] %v21894_v36 }
  0xee   : > { %v21843_v5 = vpop.permute.xlu1 %1793 }
  0xef   : > { %24862 = vst [vmem:[#allocation33_spill] sm:$0xff] %v21843_v5  ;;  %v21898_v38 = vpop.permute.xlu0 %1743 }
  0xf0   : > { %24866 = vst [vmem:[#allocation37_spill] sm:$0xff] %v21898_v38 }
  0xf3   : > { %v21850_v11 = vpop.permute.xlu1 %1803 }
  0xf4   : > { %24863 = vst [vmem:[#allocation34_spill] sm:$0xff] %v21850_v11 }
  0xf8   : > { %v21896_v37 = vpop.permute.xlu1 %1782 }
  0xf9   : > { %24865 = vst [vmem:[#allocation36_spill] sm:$0xff] %v21896_v37 }
 0x167   : > { %v1709_v62 = vpop.f32.mrb[0].mxu0 }
 0x168   : > { %v21833_v63 = vadd.f32 %v1709_v62, %v1212_v59  ;;  %v1711_v0 = vpop.f32.mrb[1].mxu0  ;;  %v1872_v59 = vand.u32 4294901760, %v1839_v50 }
 0x169   : > { %v21007_v2 = vadd.f32 %v1711_v0, %v1216_v60  ;;  %v1875_v60 = vand.u32 4294901760, %v1840_v56 }
 0x16a   : > { %v1765_v3 = vmul.f32 %v21833_v63, %v21835_v1  ;;  %v1725_v4 = vmul.f32 %v21833_v63, %v21825_v58  ;;  %v1796_v13 = vmul.f32 %v21833_v63, %v21843_v5  ;;  %v1760_v48 = vmul.f32 %v21833_v63, %v21894_v36 }
 0x16b   : > { %v1775_v6 = vmul.f32 %v21007_v2, %v21821_v55  ;;  %v1735_v8 = vmul.f32 %v21007_v2, %v21815_v52  ;;  %v1806_v12 = vmul.f32 %v21007_v2, %v21850_v11  ;;  %v1720_v49 = vmul.f32 %v21833_v63, %v21831_v61 }
 0x16c   : > { %1767 = vrot.lane.b32.xlu0 %v1765_v3, %s24610_s23  ;;  %1727 = vrot.lane.b32.xlu1 %v1725_v4, %s24610_s23  ;;  %v21912_v4 = vpack.c.bf16 %v1875_v60, %v1872_v59  ;;  %v21921_v16 = vsub.f32 %v1839_v50, %v1872_v59 }
 0x170   : > { %1777 = vrot.lane.b32.xlu0 %v1775_v6, %s24608_s5  ;;  %1737 = vrot.lane.b32.xlu1 %v1735_v8, %s24608_s5 }
 0x174   : > { %1788 = vperm.xlu0 %21347, %v21772_v22   ;;  %1752 = vrot.lane.b32.xlu1 %v17624_v10, %s24608_s5  ;;  %v1854_v22 = vand.u32 4294901760, %v1833_v17  ;;  %v21914_v10 = vsub.f32 %v1837_v39, %v1866_v41  ;;  %v1944_v39 = vand.u32 4294901760, %v21874_v29 }
 0x176   : > { %v21876_v30 = vsub.f32 %v1833_v17, %v1854_v22  ;;  %v21923_v17 = vsub.f32 %v1840_v56, %v1875_v60 }
 0x178   : > { %1808 = vrot.lane.b32.xlu0 %v1806_v12, %s24608_s5  ;;  %1813 = vperm.xlu1 %21348, %v21794_v44   ;;  %v1869_v44 = vand.u32 4294901760, %v1838_v40 }
 0x179   : > { %21350 = vset.pattern.permute.xlu0 %v21486_v14  ;;  %v1857_v14 = vand.u32 4294901760, %v1834_v21 }
 0x17a   : > { %v21902_v47 = vpack.c.bf16 %v1869_v44, %v1866_v41  ;;  %v21916_v12 = vsub.f32 %v1838_v40, %v1869_v44  ;;  %v1938_v44 = vsub.f32 %v21872_v28, %v1937_v23 }
 0x17b   : > { %v21878_v31 = vsub.f32 %v1834_v21, %v1857_v14  ;;  %v21883_v33 = vpack.c.bf16 %v1857_v14, %v1854_v22 }
 0x17c   : > { %1798 = vrot.lane.b32.xlu1 %v1796_v13, %s24610_s23  ;;  %v1841_v13 = vld [vmem:[%s24853_s6 + $0x50] sm:$0xff]  ;;  %v19810_v51 = vpack.c.bf16 %v21916_v12, %v21914_v10  ;;  %s1168_s6 = scalar_lea.vmem %s21531_s17, %s21757_s15 }
 0x17d   : > { %21349 = vset.pattern.permute.xlu1 %v21489_v42  ;;  %19769 = vmatpush3.bf16.msra.mxu1 %v21883_v33  ;;  %v1878_v19 = vand.u32 4294901760, %v1841_v13 }
 0x17e   : > { %19770 = vmatprep.subr.bf16.mxu1 %v24625_v18 }
 0x17f   : > { %v21931_v14 = vpack.c.bf16 %v1881_v20, %v1878_v19  ;;  %v21933_v25 = vsub.f32 %v1841_v13, %v1878_v19  ;;  %v24605_v19 = vand.u32 4294901760, %v21914_v10  ;;  %v24604_v20 = vand.u32 4294901760, %v21916_v12 }
 0x181   : > { %19772 = vmatpush3.bf16.msra.mxu1 %v21889_v35 }
 0x182   : > { %19773 = vmatprep.subr.bf16.mxu1 %v24625_v18 }
 0x185   : > { %19775 = vmatpush3.bf16.msra.mxu1 %v21902_v47 }
 0x186   : > { %19776 = vmatprep.subr.bf16.mxu1 %v24625_v18 }
 0x189   : > { %19778 = vmatpush3.bf16.msra.mxu1 %v21912_v4 }
 0x18a   : > { %19779 = vmatprep.subr.bf16.mxu1 %v24625_v18 }
 0x18d   : > { %19781 = vmatpush3.bf16.msra.mxu1 %v21931_v14 }
 0x18e   : > { %19782 = vmatprep.subr.bf16.mxu1 %v24625_v18 }
 0x1de   : > { %v1768_v45 = vpop.permute.xlu0 %1767  ;;  %v1728_v46 = vpop.permute.xlu1 %1727 }
 0x1df   : > { %v1770_v62 = vadd.f32 %v1768_v45, %v1760_v48  ;;  %v1730_v0 = vadd.f32 %v1728_v46, %v1720_v49  ;;  %v1945_v45 = vsub.f32 %v21874_v29, %v1944_v39  ;;  %v24613_v46 = vand.u32 4294901760, %v21876_v30 }
 0x1e0   : > { %v24609_v48 = vand.u32 4294901760, %v21878_v31  ;;  %v1939_v49 = vand.u32 4294901760, %v1938_v44 }
 0x1e1   : > { %v1946_v50 = vand.u32 4294901760, %v1945_v45  ;;  %v1952_v56 = vsub.f32 %v21876_v30, %v24613_v46 }
 0x1e2   : > { %v1778_v2 = vpop.permute.xlu0 %1777  ;;  %v1738_v3 = vpop.permute.xlu1 %1737  ;;  %v1959_v59 = vsub.f32 %v21878_v31, %v24609_v48 }
 0x1e3   : > { %v1780_v6 = vadd.f32 %v1778_v2, %v1770_v62  ;;  %v1740_v8 = vadd.f32 %v1738_v3, %v1730_v0  ;;  %v21962_v60 = vpack.c.bf16 %v1946_v50, %v1939_v49  ;;  %v1953_v62 = vand.u32 4294901760, %v1952_v56 }
 0x1e4   : > { %v1960_v0 = vand.u32 4294901760, %v1959_v59  ;;  %v24607_v2 = vand.u32 4294901760, %v21880_v32  ;;  %v24606_v3 = vand.u32 4294901760, %v21885_v34  ;;  %v24603_v49 = vand.u32 4294901760, %v21921_v16 }
 0x1e5   : > { %v1785_v21 = vadd.f32 %v21896_v37, %v1780_v6  ;;  %v1746_v22 = vadd.f32 %v21898_v38, %v1740_v8  ;;  %v24602_v50 = vand.u32 4294901760, %v21923_v17 }
 0x1e6   : > { %v21929_v24 = vpop.permute.xlu1 %1752  ;;  %v21966_v6 = vpack.c.bf16 %v1960_v0, %v1953_v62  ;;  %v1966_v8 = vsub.f32 %v21880_v32, %v24607_v2  ;;  %v1973_v13 = vsub.f32 %v21885_v34, %v24606_v3  ;;  %v1994_v59 = vsub.f32 %v21921_v16, %v24603_v49 }
 0x1e7   : > { %v1755_v40 = vmul.f32 %v21929_v24, %v1746_v22  ;;  %v1786_v41 = vmul.f32 %v1785_v21, %v21929_v24  ;;  %v1980_v22 = vsub.f32 %v21914_v10, %v24605_v19  ;;  %v2001_v62 = vsub.f32 %v21923_v17, %v24602_v50 }
 0x1e8   : > { %v1967_v15 = vand.u32 4294901760, %v1966_v8  ;;  %v1974_v21 = vand.u32 4294901760, %v1973_v13  ;;  %v1995_v0 = vand.u32 4294901760, %v1994_v59  ;;  %v24601_v8 = vand.u32 4294901760, %v21933_v25 }
 0x1e9   : > { %1823 = vrot.lane.b32.xlu0 %v1786_v41, %s24610_s23  ;;  %1819 = vrot.lane.b32.xlu1 %v1755_v40, %s24608_s5  ;;  %v1987_v40 = vsub.f32 %v21916_v12, %v24604_v20  ;;  %v1981_v44 = vand.u32 4294901760, %v1980_v22  ;;  %v24600_v13 = vand.u32 4294901760, %v21935_v26  ;;  %v19801_v59 = vpack.c.bf16 %v21874_v29, %v21872_v28  ;;  %s1161_s5 = scalar_lea.vmem %s21526_s13, %s21757_s15  ;;  %s22051_s23 = scalar_lea.vmem %s24869_s9, %s21757_s15 }
 0x1ea   : > { %v21982_v41 = vpack.c.bf16 %v1974_v21, %v1967_v15  ;;  %v2002_v15 = vand.u32 4294901760, %v2001_v62  ;;  %v2008_v21 = vsub.f32 %v21933_v25, %v24601_v8  ;;  %v19804_v62 = vpack.c.bf16 %v21878_v31, %v21876_v30 }
 0x1eb   : > { %v1988_v45 = vand.u32 4294901760, %v1987_v40  ;;  %v2015_v22 = vsub.f32 %v21935_v26, %v24600_v13  ;;  %v24873_v28 = vand.u32 4294901760, %v21885_v34  ;;  %v24879_v34 = vand.u32 4294901760, %v21935_v26 }
 0x1ec   : > { %v22002_v40 = vpack.c.bf16 %v2002_v15, %v1995_v0  ;;  %v19813_v0 = vpack.c.bf16 %v21923_v17, %v21921_v16  ;;  %v19816_v15 = vpack.c.bf16 %v21935_v26, %v21933_v25 }
 0x1ed   : > { %v21986_v56 = vpack.c.bf16 %v1988_v45, %v1981_v44  ;;  %v2009_v44 = vand.u32 4294901760, %v2008_v21  ;;  %v2016_v45 = vand.u32 4294901760, %v2015_v22 }
 0x1ef   : > { %v22004_v57 = vpack.c.bf16 %v2016_v45, %v2009_v44 }
 0x1f3   : > { %v22020_v22 = vpop.permute.xlu0 %1788 }
 0x1f4   : > { %24868 = vst [vmem:[#allocation39_spill] sm:$0xff] %v22020_v22  ;;  %v1791_v45 = vmul.f32 %v21833_v63, %v22020_v22 }
 0x1f7   : > { %v22018_v21 = vpop.permute.xlu1 %1813  ;;  %v1809_v8 = vpop.permute.xlu0 %1808 }
 0x1f8   : > { %24867 = vst [vmem:[#allocation38_spill] sm:$0xff] %v22018_v21 }
 0x1fb   : > { %v1799_v44 = vpop.permute.xlu1 %1798 }
 0x1fc   : > { %v1801_v13 = vadd.f32 %v1799_v44, %v1791_v45  ;;  %v2446_v45 = vld [vmem:[%s24850_s12 + $0x18] sm:$0xff] }
 0x1fe   : > { %v1811_v50 = vadd.f32 %v1809_v8, %v1801_v13 }
 0x200   : > { %v1816_v49 = vadd.f32 %v22018_v21, %v1811_v50 }
 0x202   : > { %v1817_v20 = vmul.f32 %v1816_v49, %v21929_v24  ;;  %v2445_v49 = vld [vmem:[%s24850_s12 + $0x10] sm:$0xff] }
 0x25b   : > { %v1824_v19 = vpop.permute.xlu0 %1823  ;;  %v1820_v3 = vpop.permute.xlu1 %1819 }
 0x25c   : > { %v1827_v2 = vsel %vm1826_vm2, %v1820_v3, %v1824_v19  ;;  %v2443_v3 = vld [vmem:[%s24850_s12] sm:$0xff]  ;;  %v2444_v19 = vld [vmem:[%s24850_s12 + $0x8] sm:$0xff] }
 0x25d   : > { %v22028_v44 = vsel %vm1828_vm3, %v1827_v2, %v1817_v20  ;;  %v1197_v2 = vld [vmem:[%s1161_s5] sm:$0xff]  ;;  %v19873_v20 = vpack.c.bf16 %v2444_v19, %v2443_v3  ;;  %s24881_s5 = sld [smem:[#allocation10_spill]] }
 0x25e   : > { %v1830_v8 = vmul.f32 %v22028_v44, %v22028_v44  ;;  %2689 = vperm.xlu1 %21349, %v1197_v2   ;;  %4223 = vperm.xlu0 %21350, %v1197_v2   ;;  %v1196_v3 = vld [vmem:[%s22051_s23] sm:$0xff] }
 0x25f   : > { %19874 = vmatpush3.bf16.msra.mxu0 %v19873_v20  ;;  %v2440_v19 = vld [vmem:[%s1168_s6] sm:$0xff]  ;;  %s21226_s6 = smul.u32 24, %s21740_s0  ;;  %s24944_s0 = sld [smem:[#allocation14_spill]] }
 0x260   : > { %v1845_v13 = vsel %vm1843_vm4, %v1830_v8, 0  ;;  %v19876_v8 = vpack.c.bf16 %v2446_v45, %v2445_v49  ;;  %19875 = vmatprep.subr.bf16.mxu0 %v24625_v18  ;;  %v2527_v49 = vld [vmem:[%s21596_s27] sm:$0xf] }
 0x261   : > { %v22033_v50 = vand.u32 4294901760, %v1845_v13  ;;  %s22179_s8 = scalar_lea.vmem %s24880_s3, %s21226_s6  ;;  %s24945_s6 = sld [smem:[#allocation11_spill]] }
 0x262   : > { %21351 = vset.pattern.permute.xlu1 %v21485_v9  ;;  %21354 = vset.pattern.permute.xlu0 %v21489_v42  ;;  %v17625_v9 = vadd.f32 -1.0, %v2440_v19  ;;  %s24799_s3 = smov 116  }
 0x263   : > { %v22036_v24 = vsub.f32 %v1845_v13, %v22033_v50  ;;  %19877 = vmatpush3.bf16.msra.mxu0 %v19876_v8  ;;  %5706 = vperm.xlu1 %21351, %v1197_v2   ;;  %v2866_v26 = vld [vmem:[%s24881_s5 + $0x10] sm:$0xff]  ;;  %v2884_v20 = vld [vmem:[%s24881_s5 + $0xa0] sm:$0xff]  ;;  %v2885_v19 = vld [vmem:[%s24881_s5 + $0xa8] sm:$0xff] }
 0x264   : > { %19049 = vmatprep.subr.mxu0 %v24635_v7  ;;  %v2874_v55 = vld [vmem:[%s24881_s5 + $0x50] sm:$0xff]  ;;  %v2875_v11 = vld [vmem:[%s24881_s5 + $0x58] sm:$0xff] }
 0x265   : > { %v1926_v48 = vand.u32 4294901760, %v22036_v24  ;;  %v2935_v1 = vand.u32 4294901760, %v2875_v11 }
 0x266   : > { %19047 = vmatmul.mubr.msk.f32.vlgmr.msra.gmra.mrb[2].mxu0 %vm1826_vm2, %v1196_v3  ;;  %v2908_v3 = vand.u32 4294901760, %v2866_v26 }
 0x267   : > { %v1927_v13 = vsub.f32 %v22036_v24, %v1926_v48  ;;  %19050 = vmatpush3.msk.msra.mxu0 %vm2532_vm5, %v2527_v49  ;;  %19051 = vmatprep.mubr.msk.f32.mxu0 %vm21497_vm1, %v24635_v7 }
 0x268   : > { %19054 = vmatprep.subr.mxu0 %v24635_v7  ;;  %21352 = vset.pattern.permute.xlu1 %v21490_v43  ;;  %v24870_v43 = vand.u32 4294901760, %v21876_v30  ;;  %v24875_v30 = vand.u32 4294901760, %v21916_v12  ;;  %v2865_v12 = vld [vmem:[%s24881_s5 + $0x8] sm:$0xff] }
 0x269   : > { %v1928_v46 = vand.u32 4294901760, %v1927_v13  ;;  %7189 = vperm.xlu1 %21352, %v1197_v2   ;;  %v2867_v2 = vld [vmem:[%s24881_s5 + $0x18] sm:$0xff] }
 0x26b   : > { %18901 = vmatmul.mubr.f32.vlgmr.msra.gmra.mrb[0].mxu1 %v1928_v46  ;;  %v2442_v46 = vmul.f32 100000.0, %v17625_v9 }
 0x26c   : > { %19784 = vmatpush3.bf16.msra.mxu1 %v21962_v60  ;;  %18927 = vmatprep.mubr.msk.f32.mxu1 %vm21497_vm1, %v24635_v7  ;;  %v2607_v60 = vld [vmem:[%s24851_s4] sm:$0xf] }
 0x26d   : > { %19785 = vmatprep.subr.bf16.mxu1 %v24625_v18  ;;  %21353 = vset.pattern.permute.xlu1 %v21489_v42  ;;  %v19837_v42 = vpack.c.bf16 %v1944_v39, %v1937_v23  ;;  %v24874_v23 = vand.u32 4294901760, %v21914_v10  ;;  %v24876_v39 = vand.u32 4294901760, %v21921_v16 }
 0x26e   : > { %19052 = vmatmul.mubr.msk.f32.vlgmr.msra.gmra.mrb[2].mxu0 %vm2528_vm6, %v2442_v46 }
 0x26f   : > { %19055 = vmatpush3.msk.msra.mxu0 %vm2532_vm5, %v2607_v60  ;;  %19056 = vmatprep.mubr.msk.f32.mxu0 %vm21497_vm1, %v24635_v7 }
 0x270   : > { %19787 = vmatpush3.bf16.msra.mxu1 %v21966_v6 }
 0x271   : > { %19788 = vmatprep.subr.bf16.mxu1 %v24625_v18 }
 0x274   : > { %19790 = vmatpush3.bf16.msra.mxu1 %v21982_v41 }
 0x275   : > { %19791 = vmatprep.subr.bf16.mxu1 %v24625_v18 }
 0x278   : > { %19793 = vmatpush3.bf16.msra.mxu1 %v21986_v56 }
 0x279   : > { %19794 = vmatprep.subr.bf16.mxu1 %v24625_v18 }
 0x27c   : > { %19796 = vmatpush3.bf16.msra.mxu1 %v22002_v40 }
 0x27d   : > { %19797 = vmatprep.subr.bf16.mxu1 %v24625_v18 }
 0x280   : > { %19799 = vmatpush3.bf16.msra.mxu1 %v22004_v57  ;;  %v24872_v57 = vand.u32 4294901760, %v21880_v32  ;;  %v24878_v32 = vand.u32 4294901760, %v21933_v25  ;;  %v2883_v25 = vld [vmem:[%s24881_s5 + $0x98] sm:$0xff] }
 0x281   : > { %19800 = vmatprep.subr.bf16.mxu1 %v24625_v18 }
 0x282   : > { %v19843_v29 = vpack.c.bf16 %v24873_v28, %v24872_v57  ;;  %v19852_v41 = vpack.c.bf16 %v24879_v34, %v24878_v32 }
 0x283   : > { %18928 = vmatmul.mubr.f32.vlgmr.msra.gmra.mrb[0].mxu1 %v22033_v50 }
 0x284   : > { %19802 = vmatpush3.bf16.msra.mxu1 %v19801_v59  ;;  %18954 = vmatprep.mubr.msk.f32.mxu1 %vm21497_vm1, %v24635_v7 }
 0x285   : > { %19803 = vmatprep.subr.bf16.mxu1 %v24625_v18 }
 0x288   : > { %19805 = vmatpush3.bf16.msra.mxu1 %v19804_v62 }
 0x289   : > { %19806 = vmatprep.subr.bf16.mxu1 %v24625_v18 }
 0x28c   : > { %19808 = vmatpush3.bf16.msra.mxu1 %v19807_v54 }
 0x28d   : > { %19809 = vmatprep.subr.bf16.mxu1 %v24625_v18 }
 0x290   : > { %19811 = vmatpush3.bf16.msra.mxu1 %v19810_v51  ;;  %v24871_v51 = vand.u32 4294901760, %v21878_v31  ;;  %v19846_v31 = vpack.c.bf16 %v24875_v30, %v24874_v23  ;;  %v2965_v23 = vand.u32 4294901760, %v2885_v19  ;;  %v2868_v30 = vld [vmem:[%s24881_s5 + $0x20] sm:$0xff] }
 0x291   : > { %19812 = vmatprep.subr.bf16.mxu1 %v24625_v18 }
 0x292   : > { %v19840_v54 = vpack.c.bf16 %v24871_v51, %v24870_v43  ;;  %v2911_v43 = vand.u32 4294901760, %v2867_v2  ;;  %v22223_v51 = vsub.f32 %v2866_v26, %v2908_v3 }
 0x294   : > { %19814 = vmatpush3.bf16.msra.mxu1 %v19813_v0  ;;  %v22241_v32 = vsub.f32 %v2867_v2, %v2911_v43  ;;  %v2871_v2 = vld [vmem:[%s24881_s5 + $0x38] sm:$0xff] }
 0x295   : > { %19815 = vmatprep.subr.bf16.mxu1 %v24625_v18 }
 0x298   : > { %19817 = vmatpush3.bf16.msra.mxu1 %v19816_v15 }
 0x299   : > { %19818 = vmatprep.subr.bf16.mxu1 %v24625_v18 }
 0x29b   : > { %18955 = vmatmul.mubr.f32.vlgmr.msra.gmra.mrb[0].mxu1 %v22036_v24  ;;  %v2959_v24 = vand.u32 4294901760, %v2883_v25 }
 0x29c   : > { %19820 = vmatpush3.bf16.msra.mxu1 %v21870_v27  ;;  %18981 = vmatprep.mubr.msk.f32.mxu1 %vm21497_vm1, %v24635_v7 }
 0x29d   : > { %19821 = vmatprep.subr.bf16.mxu1 %v24625_v18  ;;  %v22215_v60 = vsub.f32 %v2883_v25, %v2959_v24 }
 0x2a0   : > { %19823 = vmatpush3.bf16.msra.mxu1 %v21883_v33 }
 0x2a1   : > { %19824 = vmatprep.subr.bf16.mxu1 %v24625_v18 }
 0x2a4   : > { %19826 = vmatpush3.bf16.msra.mxu1 %v21889_v35 }
 0x2a5   : > { %19827 = vmatprep.subr.bf16.mxu1 %v24625_v18 }
 0x2a8   : > { %19829 = vmatpush3.bf16.msra.mxu1 %v21902_v47 }
 0x2a9   : > { %19830 = vmatprep.subr.bf16.mxu1 %v24625_v18 }
 0x2ac   : > { %19832 = vmatpush3.bf16.msra.mxu1 %v21912_v4 }
 0x2ad   : > { %19833 = vmatprep.subr.bf16.mxu1 %v24625_v18 }
 0x2b0   : > { %19835 = vmatpush3.bf16.msra.mxu1 %v21931_v14 }
 0x2b1   : > { %19836 = vmatprep.subr.bf16.mxu1 %v24625_v18 }
 0x2b3   : > { %18982 = vmatmul.mubr.f32.vlgmr.msra.gmra.mrb[0].mxu1 %v1926_v48  ;;  %v24877_v48 = vand.u32 4294901760, %v21923_v17  ;;  %v2905_v17 = vand.u32 4294901760, %v2865_v12 }
 0x2b4   : > { %19838 = vmatpush3.bf16.msra.mxu1 %v19837_v42  ;;  %19008 = vmatprep.mubr.msk.f32.mxu1 %vm21497_vm1, %v24635_v7 }
 0x2b5   : > { %19839 = vmatprep.subr.bf16.mxu1 %v24625_v18  ;;  %v19849_v6 = vpack.c.bf16 %v24877_v48, %v24876_v39  ;;  %v22202_v15 = vsub.f32 %v2865_v12, %v2905_v17  ;;  %v22238_v48 = vpack.c.bf16 %v2911_v43, %v2908_v3  ;;  %v22257_v12 = vsub.f32 %v2885_v19, %v2965_v23 }
 0x2b7   : > { %v24617_v49 = vand.u32 4294901760, %v22202_v15  ;;  %24887 = vst [vmem:[#allocation45_spill] sm:$0xff] %v22238_v48  ;;  %v24619_v26 = vand.u32 4294901760, %v22257_v12 }
 0x2b8   : > { %19841 = vmatpush3.bf16.msra.mxu1 %v19840_v54  ;;  %v2962_v54 = vand.u32 4294901760, %v2884_v20 }
 0x2b9   : > { %19842 = vmatprep.subr.bf16.mxu1 %v24625_v18 }
 0x2ba   : > { %v22243_v34 = vsub.f32 %v2884_v20, %v2962_v54 }
 0x2bc   : > { %19844 = vmatpush3.bf16.msra.mxu1 %v19843_v29  ;;  %v24615_v29 = vand.u32 4294901760, %v22215_v60 }
 0x2bd   : > { %19845 = vmatprep.subr.bf16.mxu1 %v24625_v18 }
 0x2c0   : > { %19847 = vmatpush3.bf16.msra.mxu1 %v19846_v31  ;;  %v2869_v31 = vld [vmem:[%s24881_s5 + $0x28] sm:$0xff] }
 0x2c1   : > { %19848 = vmatprep.subr.bf16.mxu1 %v24625_v18  ;;  %v2917_v25 = vand.u32 4294901760, %v2869_v31 }
 0x2c4   : > { %19850 = vmatpush3.bf16.msra.mxu1 %v19849_v6  ;;  %v24621_v6 = vand.u32 4294901760, %v22223_v51 }
 0x2c5   : > { %19851 = vmatprep.subr.bf16.mxu1 %v24625_v18 }
 0x2c8   : > { %19853 = vmatpush3.bf16.msra.mxu1 %v19852_v41  ;;  %v2886_v41 = vld [vmem:[%s24881_s5 + $0xb0] sm:$0xff] }
 0x2c9   : > { %19854 = vmatprep.subr.bf16.mxu1 %v24625_v18 }
 0x2cb   : > { %19009 = vmatmul.mubr.f32.vlgmr.msra.gmra.mrb[0].mxu1 %v22033_v50 }
 0x2cc   : > { %19856 = vmatpush3.bf16.msra.mxu1 %v21870_v27  ;;  %19035 = vmatprep.mubr.msk.f32.mxu1 %vm21497_vm1, %v24635_v7  ;;  %v22182_v27 = vld [vmem:[%s22179_s8 + $0x8] sm:$0xff] }
 0x2cd   : > { %19857 = vmatprep.subr.bf16.mxu1 %v24625_v18  ;;  %2698 = vmatprep.subr.mxu0 %v22182_v27 }
 0x2d0   : > { %19859 = vmatpush3.bf16.msra.mxu1 %v21883_v33  ;;  %v2880_v33 = vld [vmem:[%s24881_s5 + $0x80] sm:$0xff] }
 0x2d1   : > { %19860 = vmatprep.subr.bf16.mxu1 %v24625_v18 }
 0x2d4   : > { %19862 = vmatpush3.bf16.msra.mxu1 %v21889_v35  ;;  %v2881_v35 = vld [vmem:[%s24881_s5 + $0x88] sm:$0xff] }
 0x2d5   : > { %19863 = vmatprep.subr.bf16.mxu1 %v24625_v18  ;;  %v2953_v10 = vand.u32 4294901760, %v2881_v35 }
 0x2d7   : > { %v22196_v59 = vsub.f32 %v2881_v35, %v2953_v10  ;;  %v2870_v35 = vld [vmem:[%s24881_s5 + $0x30] sm:$0xff] }
 0x2d8   : > { %19865 = vmatpush3.bf16.msra.mxu1 %v21902_v47  ;;  %v2864_v47 = vld [vmem:[%s24881_s5] sm:$0xff]  ;;  %v2920_v20 = vand.u32 4294901760, %v2870_v35 }
 0x2d9   : > { %19866 = vmatprep.subr.bf16.mxu1 %v24625_v18  ;;  %v2902_v16 = vand.u32 4294901760, %v2864_v47  ;;  %v24623_v8 = vand.u32 4294901760, %v22196_v59 }
 0x2db   : > { %v22198_v62 = vsub.f32 %v2864_v47, %v2902_v16  ;;  %v22200_v0 = vpack.c.bf16 %v2905_v17, %v2902_v16  ;;  %v24618_v16 = vand.u32 4294901760, %v22241_v32  ;;  %v24620_v17 = vand.u32 4294901760, %v22243_v34 }
 0x2dc   : > { %19868 = vmatpush3.bf16.msra.mxu1 %v21912_v4  ;;  %v2950_v4 = vand.u32 4294901760, %v2880_v33 }
 0x2dd   : > { %19869 = vmatprep.subr.bf16.mxu1 %v24625_v18  ;;  %24883 = vst [vmem:[#allocation41_spill] sm:$0xff] %v22200_v0  ;;  %v24622_v13 = vand.u32 4294901760, %v22198_v62  ;;  %v22268_v3 = vpack.c.bf16 %v24618_v16, %v24621_v6 }
 0x2de   : > { %v22192_v56 = vpack.c.bf16 %v2953_v10, %v2950_v4  ;;  %v22194_v40 = vsub.f32 %v2880_v33, %v2950_v4  ;;  %v2887_v33 = vld [vmem:[%s24881_s5 + $0xb8] sm:$0xff]  ;;  %v22255_v10 = vpack.c.bf16 %v2965_v23, %v2962_v54  ;;  %v22274_v54 = vsub.f32 %v2869_v31, %v2917_v25  ;;  %v2888_v23 = vld [vmem:[%s24881_s5 + $0xc0] sm:$0xff] }
 0x2df   : > { %v22229_v57 = vpack.c.bf16 %v24617_v49, %v24622_v13  ;;  %24890 = vst [vmem:[#allocation48_spill] sm:$0xff] %v22268_v3  ;;  %v2974_v6 = vand.u32 4294901760, %v2888_v23 }
 0x2e0   : > { %19871 = vmatpush3.bf16.msra.mxu1 %v21931_v14  ;;  %v2882_v14 = vld [vmem:[%s24881_s5 + $0x90] sm:$0xff]  ;;  %24882 = vst [vmem:[#allocation40_spill] sm:$0xff] %v22192_v56  ;;  %v24624_v45 = vand.u32 4294901760, %v22194_v40  ;;  %24889 = vst [vmem:[#allocation47_spill] sm:$0xff] %v22255_v10  ;;  %v24633_v31 = vand.u32 4294901760, %v22274_v54 }
 0x2e1   : > { %24886 = vst [vmem:[#allocation44_spill] sm:$0xff] %v22229_v57 }
 0x2e2   : > { %v22221_v42 = vpack.c.bf16 %v24623_v8, %v24624_v45  ;;  %v22317_v45 = vsub.f32 %v2888_v23, %v2974_v6  ;;  %v24900_v23 = vlaneseq }
 0x2e3   : > { %19036 = vmatmul.mubr.f32.vlgmr.msra.gmra.mrb[0].mxu1 %v22033_v50  ;;  %v2956_v50 = vand.u32 4294901760, %v2882_v14 }
 0x2e4   : > { %24885 = vst [vmem:[#allocation43_spill] sm:$0xff] %v22221_v42  ;;  %20007 = vmatprep.subr.bf16.mxu1 %v22221_v42 }
 0x2e5   : > { %v22211_v9 = vpack.c.bf16 %v2959_v24, %v2956_v50  ;;  %v22213_v46 = vsub.f32 %v2882_v14, %v2956_v50  ;;  %20009 = vmatpush3.bf16.msra.mxu1 %v22229_v57  ;;  %v2914_v14 = vand.u32 4294901760, %v2868_v30  ;;  %v2968_v50 = vand.u32 4294901760, %v2886_v41  ;;  %v2879_v57 = vld [vmem:[%s24881_s5 + $0x78] sm:$0xff] }
 0x2e6   : > { %v2971_v24 = vand.u32 4294901760, %v2887_v33 }
 0x2e7   : > { %24884 = vst [vmem:[#allocation42_spill] sm:$0xff] %v22211_v9  ;;  %v24616_v28 = vand.u32 4294901760, %v22213_v46  ;;  %v22270_v19 = vpack.c.bf16 %v2917_v25, %v2914_v14  ;;  %v22272_v43 = vsub.f32 %v2868_v30, %v2914_v14  ;;  %v22286_v49 = vsub.f32 %v2886_v41, %v2968_v50 }
 0x2e8   : > { %v22288_v16 = vsub.f32 %v2887_v33, %v2971_v24  ;;  %v2923_v14 = vand.u32 4294901760, %v2871_v2  ;;  %v22293_v25 = vsub.f32 %v2870_v35, %v2920_v20 }
 0x2e9   : > { %v22253_v47 = vpack.c.bf16 %v24615_v29, %v24616_v28  ;;  %24891 = vst [vmem:[#allocation49_spill] sm:$0xff] %v22270_v19  ;;  %v22282_v29 = vpack.c.bf16 %v24619_v26, %v24620_v17  ;;  %v22284_v28 = vpack.c.bf16 %v2971_v24, %v2968_v50  ;;  %v24634_v30 = vand.u32 4294901760, %v22272_v43 }
 0x2ea   : > { %v24628_v26 = vand.u32 4294901760, %v22286_v49  ;;  %v24627_v17 = vand.u32 4294901760, %v22288_v16  ;;  %v22304_v50 = vpack.c.bf16 %v2923_v14, %v2920_v20  ;;  %v24630_v24 = vand.u32 4294901760, %v22293_v25 }
 0x2eb   : > { %24888 = vst [vmem:[#allocation46_spill] sm:$0xff] %v22253_v47  ;;  %20011 = vmatprep.subr.bf16.mxu1 %v22253_v47  ;;  %24892 = vst [vmem:[#allocation50_spill] sm:$0xff] %v22282_v29  ;;  %v22302_v33 = vpack.c.bf16 %v24633_v31, %v24634_v30  ;;  %v22307_v35 = vsub.f32 %v2871_v2, %v2923_v14  ;;  %v24632_v2 = vand.u32 4294901760, %v22317_v45  ;;  %v2890_v30 = vld [vmem:[%s24881_s5 + $0xd0] sm:$0xff] }
 0x2ec   : > { %24893 = vst [vmem:[#allocation51_spill] sm:$0xff] %v22284_v28  ;;  %20013 = vmatpush3.bf16.msra.mxu1 %v22268_v3  ;;  %24895 = vst [vmem:[#allocation53_spill] sm:$0xff] %v22304_v50  ;;  %v22313_v13 = vpack.c.bf16 %v24627_v17, %v24628_v26  ;;  %v22344_v26 = vld [vmem:[%s22179_s8] sm:$0xff]  ;;  %v2980_v52 = vand.u32 4294901760, %v2890_v30 }
 0x2ed   : > { %20015 = vmatprep.subr.bf16.mxu1 %v22282_v29  ;;  %24894 = vst [vmem:[#allocation52_spill] sm:$0xff] %v22302_v33  ;;  %v24629_v20 = vand.u32 4294901760, %v22307_v35  ;;  %v2877_v29 = vld [vmem:[%s24881_s5 + $0x68] sm:$0xff] }
 0x2ee   : > { %24896 = vst [vmem:[#allocation54_spill] sm:$0xff] %v22313_v13  ;;  %v22381_v36 = vsub.f32 %v2890_v30, %v2980_v52  ;;  %v2892_v30 = vld [vmem:[%s24881_s5 + $0xe0] sm:$0xff] }
 0x2ef   : > { %v22330_v17 = vpack.c.bf16 %v24629_v20, %v24630_v24 }
 0x2f0   : > { %20017 = vmatpush3.bf16.msra.mxu1 %v22302_v33  ;;  %24905 = vst [vmem:[#allocation62_spill] sm:$0xff] %v22381_v36  ;;  %v24668_v5 = vand.u32 4294901760, %v22381_v36  ;;  %v2876_v33 = vld [vmem:[%s24881_s5 + $0x60] sm:$0xff] }
 0x2f1   : > { %20019 = vmatprep.subr.bf16.mxu1 %v22313_v13  ;;  %24898 = vst [vmem:[#allocation56_spill] sm:$0xff] %v22330_v17 }
 0x2f4   : > { %20021 = vmatpush3.bf16.msra.mxu1 %v22330_v17  ;;  %v2893_v17 = vld [vmem:[%s24881_s5 + $0xe8] sm:$0xff] }
 0x2f5   : > { %v2989_v13 = vand.u32 4294901760, %v2893_v17 }
 0x2f7   : > { %v22416_v47 = vsub.f32 %v2893_v17, %v2989_v13 }
 0x2f9   : > { %24914 = vst [vmem:[#allocation71_spill] sm:$0xff] %v22416_v47 }
 0x341   : > { %v22236_v39 = vpop.f32.mrb[2].mxu0 }
 0x342   : > { %v19053_v4 = vpop.f32.mrb[3].mxu0 }
 0x343   : > { %v2889_v4 = vld [vmem:[%s24881_s5 + $0xc8] sm:$0xff] }
 0x344   : > { %v2977_v41 = vand.u32 4294901760, %v2889_v4 }
 0x346   : > { %v22315_v8 = vpack.c.bf16 %v2977_v41, %v2974_v6  ;;  %v22319_v18 = vsub.f32 %v2889_v4, %v2977_v41  ;;  %v22341_v4 = vand.u32 127, %v24900_v23  ;;  %v2690_v41 = vpop.permute.xlu1 %2689  ;;  %v22353_v23 = vld [vmem:[%s22179_s8 + $0x10] sm:$0xff] }
 0x347   : > { %24902 = vst [vmem:[#allocation59_spill] sm:$0xff] %v22353_v23 }
 0x348   : > { %24897 = vst [vmem:[#allocation55_spill] sm:$0xff] %v22315_v8  ;;  %v24631_v14 = vand.u32 4294901760, %v22319_v18  ;;  %24901 = vst [vmem:[#allocation58_spill] sm:$0xff] %v22341_v4  ;;  %vm2691_vm7 = vcmp.eq.s32.totalorder %v2690_v41, %v22341_v4 }
 0x34a   : > { %v22336_v6 = vpack.c.bf16 %v24631_v14, %v24632_v2  ;;  %v17632_v14 = vsel %vm2691_vm7, 1.0, %v24635_v7 }
 0x34c   : > { %24899 = vst [vmem:[#allocation57_spill] sm:$0xff] %v22336_v6  ;;  %20023 = vmatprep.subr.bf16.mxu1 %v22336_v6  ;;  %v22395_v6 = vsub.f32 %v2875_v11, %v2935_v1 }
 0x34e   : > { %24909 = vst [vmem:[#allocation66_spill] sm:$0xff] %v22395_v6 }
 0x3b6   : > { %v2432_v20 = vpop.f32.mrb[0].mxu1 }
 0x3b7   : > { %v19037_v24 = vpop.f32.mrb[1].mxu1  ;;  %19057 = vmatmul.mubr.msk.f32.vlgmr.msra.gmra.mrb[4].mxu0 %vm2528_vm6, %v2432_v20  ;;  %v2873_v20 = vld [vmem:[%s24881_s5 + $0x48] sm:$0xff] }
 0x3b8   : > { %2699 = vmatpush1.msra.mxu0 %v22344_v26  ;;  %2762 = vmatprep.mubr.f32.mxu0 %v24635_v7  ;;  %v2872_v24 = vld [vmem:[%s24881_s5 + $0x40] sm:$0xff]  ;;  %v2929_v41 = vand.u32 4294901760, %v2873_v20 }
 0x3b9   : > { %19059 = vmatprep.subr.mxu0 %v24635_v7 }
 0x3ba   : > { %v22373_v31 = vsub.f32 %v2873_v20, %v2929_v41  ;;  %v2932_v20 = vand.u32 4294901760, %v2874_v55 }
 0x3bb   : > { %17633 = vmatmul.mubr.msk.f32.vlgmr.msra.gmra.mrb[6].mxu0 %vm2694_vm8, %v17632_v14 }
 0x3bc   : > { %19060 = vmatpush3.msra.mxu0 %v22353_v23  ;;  %19061 = vmatprep.mubr.msk.f32.mxu0 %vm21497_vm1, %v24635_v7  ;;  %24904 = vst [vmem:[#allocation61_spill] sm:$0xff] %v22373_v31  ;;  %v2891_v7 = vld [vmem:[%s24881_s5 + $0xd8] sm:$0xff]  ;;  %v24659_v38 = vand.u32 4294901760, %v22373_v31  ;;  %v22393_v21 = vsub.f32 %v2874_v55, %v2932_v20 }
 0x3bd   : > { %19879 = vmatprep.subr.bf16.mxu0 %v22192_v56  ;;  %v2983_v61 = vand.u32 4294901760, %v2891_v7  ;;  %v22456_v56 = vpack.c.bf16 %v2935_v1, %v2932_v20  ;;  %v24929_v1 = vmov 0.0|0.0  }
 0x3be   : > { %24908 = vst [vmem:[#allocation65_spill] sm:$0xff] %v22393_v21  ;;  %v24684_v11 = vand.u32 4294901760, %v22393_v21 }
 0x3bf   : > { %19062 = vmatmul.mubr.msk.f32.vlgmr.msra.gmra.mrb[8].mxu0 %vm2694_vm8, %v17632_v14  ;;  %v2926_v14 = vand.u32 4294901760, %v2872_v24  ;;  %24924 = vst [vmem:[#allocation81_spill] sm:$0xff] %v22456_v56 }
 0x3c0   : > { %19881 = vmatpush3.bf16.msra.mxu0 %v22200_v0 }
 0x3c1   : > { %19883 = vmatprep.subr.bf16.mxu0 %v22211_v9  ;;  %v22371_v2 = vsub.f32 %v2872_v24, %v2926_v14  ;;  %v22383_v24 = vsub.f32 %v2891_v7, %v2983_v61  ;;  %v2986_v7 = vand.u32 4294901760, %v2892_v30 }
 0x3c3   : > { %24903 = vst [vmem:[#allocation60_spill] sm:$0xff] %v22371_v2  ;;  %v24660_v58 = vand.u32 4294901760, %v22371_v2  ;;  %24906 = vst [vmem:[#allocation63_spill] sm:$0xff] %v22383_v24  ;;  %v24667_v37 = vand.u32 4294901760, %v22383_v24  ;;  %v22414_v3 = vsub.f32 %v2892_v30, %v2986_v7  ;;  %v3219_v30 = vand.u32 4294901760, %v22416_v47 }
 0x3c4   : > { %19885 = vmatpush3.bf16.msra.mxu0 %v22238_v48 }
 0x3c5   : > { %19887 = vmatprep.subr.bf16.mxu0 %v22255_v10  ;;  %v22389_v22 = vpack.c.bf16 %v24659_v38, %v24660_v58  ;;  %v22402_v38 = vpack.c.bf16 %v2929_v41, %v2926_v14  ;;  %v22404_v58 = vpack.c.bf16 %v2983_v61, %v2980_v52  ;;  %v22410_v55 = vpack.c.bf16 %v24667_v37, %v24668_v5  ;;  %v2894_v61 = vld [vmem:[%s24881_s5 + $0xf0] sm:$0xff]  ;;  %v2895_v41 = vld [vmem:[%s24881_s5 + $0xf8] sm:$0xff] }
 0x3c6   : > { %24913 = vst [vmem:[#allocation70_spill] sm:$0xff] %v22414_v3  ;;  %v2938_v14 = vand.u32 4294901760, %v2876_v33  ;;  %v2941_v52 = vand.u32 4294901760, %v2877_v29  ;;  %v3212_v5 = vand.u32 4294901760, %v22414_v3 }
 0x3c7   : > { %24907 = vst [vmem:[#allocation64_spill] sm:$0xff] %v22389_v22  ;;  %20025 = vmatpush3.bf16.msra.mxu1 %v22389_v22  ;;  %24910 = vst [vmem:[#allocation67_spill] sm:$0xff] %v22402_v38  ;;  %v24683_v22 = vand.u32 4294901760, %v22395_v6 }
 0x3c8   : > { %19889 = vmatpush3.bf16.msra.mxu0 %v22270_v19  ;;  %24911 = vst [vmem:[#allocation68_spill] sm:$0xff] %v22404_v58  ;;  %24912 = vst [vmem:[#allocation69_spill] sm:$0xff] %v22410_v55  ;;  %20027 = vmatprep.subr.bf16.mxu1 %v22410_v55  ;;  %v22430_v17 = vsub.f32 %v2876_v33, %v2938_v14  ;;  %v2878_v55 = vld [vmem:[%s24881_s5 + $0x70] sm:$0xff]  ;;  %v22435_v42 = vsub.f32 %v2877_v29, %v2941_v52 }
 0x3c9   : > { %19891 = vmatprep.subr.bf16.mxu0 %v22284_v28  ;;  %v22426_v37 = vpack.c.bf16 %v24683_v22, %v24684_v11  ;;  %v22438_v28 = vpack.c.bf16 %v3219_v30, %v3212_v5  ;;  %v2947_v11 = vand.u32 4294901760, %v2879_v57 }
 0x3ca   : > { %24916 = vst [vmem:[#allocation73_spill] sm:$0xff] %v22430_v17  ;;  %24917 = vst [vmem:[#allocation74_spill] sm:$0xff] %v22435_v42  ;;  %v3100_v22 = vand.u32 4294901760, %v22430_v17  ;;  %v3107_v19 = vand.u32 4294901760, %v22435_v42 }
 0x3cb   : > { %24915 = vst [vmem:[#allocation72_spill] sm:$0xff] %v22426_v37  ;;  %20029 = vmatpush3.bf16.msra.mxu1 %v22426_v37  ;;  %24918 = vst [vmem:[#allocation75_spill] sm:$0xff] %v22438_v28  ;;  %v22449_v29 = vsub.f32 %v2879_v57, %v2947_v11 }
 0x3cc   : > { %19893 = vmatpush3.bf16.msra.mxu0 %v22304_v50  ;;  %v2944_v50 = vand.u32 4294901760, %v2878_v55  ;;  %20031 = vmatprep.subr.bf16.mxu1 %v22438_v28  ;;  %v22451_v48 = vpack.c.bf16 %v3107_v19, %v3100_v22  ;;  %v22468_v28 = vpack.c.bf16 %v2941_v52, %v2938_v14 }
 0x3cd   : > { %19895 = vmatprep.subr.bf16.mxu0 %v22315_v8  ;;  %v2995_v8 = vand.u32 4294901760, %v2895_v41  ;;  %24922 = vst [vmem:[#allocation79_spill] sm:$0xff] %v22449_v29 }
 0x3ce   : > { %24923 = vst [vmem:[#allocation80_spill] sm:$0xff] %v22451_v48  ;;  %24928 = vst [vmem:[#allocation85_spill] sm:$0xff] %v22468_v28  ;;  %v22482_v14 = vpack.c.bf16 %v2947_v11, %v2944_v50 }
 0x3cf   : > { %v22444_v10 = vsub.f32 %v2895_v41, %v2995_v8  ;;  %20033 = vmatpush3.bf16.msra.mxu1 %v22451_v48  ;;  %v22465_v41 = vpack.c.bf16 %v2989_v13, %v2986_v7  ;;  %v24931_v48 = vand.u32 4294901760, %v22194_v40  ;;  %v24932_v13 = vand.u32 4294901760, %v22196_v59 }
 0x3d0   : > { %19897 = vmatpush3.bf16.msra.mxu0 %v22402_v38  ;;  %v2992_v38 = vand.u32 4294901760, %v2894_v61  ;;  %24933 = vst [vmem:[#allocation87_spill] sm:$0xff] %v22482_v14 }
 0x3d1   : > { %19899 = vmatprep.subr.bf16.mxu0 %v22404_v58  ;;  %24920 = vst [vmem:[#allocation77_spill] sm:$0xff] %v22444_v10  ;;  %v22446_v58 = vsub.f32 %v2878_v55, %v2944_v50  ;;  %v3233_v9 = vand.u32 4294901760, %v22444_v10  ;;  %24927 = vst [vmem:[#allocation84_spill] sm:$0xff] %v22465_v41  ;;  %v3136_v7 = vsub.f32 %v22196_v59, %v24932_v13 }
 0x3d2   : > { %v22442_v33 = vsub.f32 %v2894_v61, %v2992_v38  ;;  %v3121_v61 = vand.u32 4294901760, %v22449_v29  ;;  %v22474_v20 = vpack.c.bf16 %v2995_v8, %v2992_v38  ;;  %v24935_v38 = vand.u32 4294901760, %v22371_v2 }
 0x3d3   : > { %24921 = vst [vmem:[#allocation78_spill] sm:$0xff] %v22446_v58  ;;  %v3114_v0 = vand.u32 4294901760, %v22446_v58 }
 0x3d4   : > { %24919 = vst [vmem:[#allocation76_spill] sm:$0xff] %v22442_v33  ;;  %v3226_v37 = vand.u32 4294901760, %v22442_v33  ;;  %19901 = vmatpush3.bf16.msra.mxu0 %v22456_v56  ;;  %24930 = vst [vmem:[#allocation86_spill] sm:$0xff] %v22474_v20  ;;  %v3129_v56 = vsub.f32 %v22194_v40, %v24931_v48  ;;  %v3073_v8 = vsub.f32 %v22371_v2, %v24935_v38  ;;  %v24936_v48 = vand.u32 4294901760, %v22373_v31 }
 0x3d5   : > { %v22463_v57 = vpack.c.bf16 %v3121_v61, %v3114_v0  ;;  %19903 = vmatprep.subr.bf16.mxu0 %v22465_v41 }
 0x3d6   : > { %v22460_v55 = vpack.c.bf16 %v3233_v9, %v3226_v37  ;;  %v3130_v52 = vand.u32 4294901760, %v3129_v56  ;;  %v3080_v13 = vsub.f32 %v22373_v31, %v24936_v48  ;;  %v3074_v50 = vand.u32 4294901760, %v3073_v8 }
 0x3d7   : > { %24926 = vst [vmem:[#allocation83_spill] sm:$0xff] %v22463_v57 }
 0x3d8   : > { %24925 = vst [vmem:[#allocation82_spill] sm:$0xff] %v22460_v55  ;;  %20035 = vmatprep.subr.bf16.mxu1 %v22460_v55  ;;  %19905 = vmatpush3.bf16.msra.mxu0 %v22468_v28  ;;  %v3081_v11 = vand.u32 4294901760, %v3080_v13  ;;  %v24941_v28 = vand.u32 4294901760, %v22395_v6 }
 0x3d9   : > { %20037 = vmatpush3.bf16.msra.mxu1 %v22463_v57  ;;  %19907 = vmatprep.subr.bf16.mxu0 %v22474_v20  ;;  %v3137_v57 = vand.u32 4294901760, %v3136_v7  ;;  %v24937_v20 = vand.u32 4294901760, %v22381_v36  ;;  %v24938_v7 = vand.u32 4294901760, %v22383_v24 }
 0x3da   : > { %20070 = vmatprep.subr.bf16.mxu1 %v24929_v1  ;;  %v3094_v48 = vsub.f32 %v22395_v6, %v24941_v28 }
 0x3db   : > { %v22486_v55 = vpack.c.bf16 %v3137_v57, %v3130_v52  ;;  %v3199_v56 = vsub.f32 %v22381_v36, %v24937_v20  ;;  %v3206_v57 = vsub.f32 %v22383_v24, %v24938_v7  ;;  %v22501_v52 = vpack.c.bf16 %v3081_v11, %v3074_v50 }
 0x3dc   : > { %19909 = vmatpush3.bf16.msra.mxu0 %v22482_v14  ;;  %v24940_v14 = vand.u32 4294901760, %v22393_v21  ;;  %v3213_v20 = vsub.f32 %v22414_v3, %v3212_v5  ;;  %v3220_v7 = vsub.f32 %v22416_v47, %v3219_v30  ;;  %v3101_v11 = vsub.f32 %v22430_v17, %v3100_v22 }
 0x3dd   : > { %24934 = vst [vmem:[#allocation88_spill] sm:$0xff] %v22486_v55  ;;  %19911 = vmatprep.subr.bf16.mxu0 %v22486_v55  ;;  %24939 = vst [vmem:[#allocation89_spill] sm:$0xff] %v22501_v52  ;;  %v3200_v8 = vand.u32 4294901760, %v3199_v56  ;;  %v3207_v13 = vand.u32 4294901760, %v3206_v57  ;;  %v3095_v55 = vand.u32 4294901760, %v3094_v48  ;;  %v3234_v5 = vsub.f32 %v22444_v10, %v3233_v9 }
 0x3de   : > { %v3087_v38 = vsub.f32 %v22393_v21, %v24940_v14  ;;  %v3108_v14 = vsub.f32 %v22435_v42, %v3107_v19  ;;  %v3214_v21 = vand.u32 4294901760, %v3213_v20  ;;  %v3221_v24 = vand.u32 4294901760, %v3220_v7  ;;  %v2687_v20 = vld [vmem:[%s24945_s6] sm:$0x7]  ;;  %s21500_s6 = smov 12  }
 0x3df   : > { %v22509_v23 = vpack.c.bf16 %v3207_v13, %v3200_v8  ;;  %v3102_v28 = vand.u32 4294901760, %v3101_v11  ;;  %v3115_v22 = vsub.f32 %v22446_v58, %v3114_v0  ;;  %v3122_v19 = vsub.f32 %v22449_v29, %v3121_v61  ;;  %v2896_v7 = vld [vmem:[%s24881_s5 + $0x100] sm:$0xff]  ;;  %v2897_v11 = vld [vmem:[%s24881_s5 + $0x108] sm:$0xff] }
 0x3e0   : > { %v3088_v41 = vand.u32 4294901760, %v3087_v38  ;;  %v3109_v56 = vand.u32 4294901760, %v3108_v14  ;;  %v22517_v57 = vpack.c.bf16 %v3221_v24, %v3214_v21  ;;  %v3227_v38 = vsub.f32 %v22442_v33, %v3226_v37  ;;  %v17626_v24 = vld [vmem:[%s24944_s0] ss:$0 sm:$0xff]  ;;  %s21499_s0 = smov 8  }
 0x3e1   : > { %24942 = vst [vmem:[#allocation90_spill] sm:$0xff] %v22509_v23  ;;  %v3116_v48 = vand.u32 4294901760, %v3115_v22  ;;  %v3123_v8 = vand.u32 4294901760, %v3122_v19  ;;  %v22532_v37 = vadd.f32 %v17626_v24, %v22236_v39  ;;  %v24952_v0 = vsub.s32 0, %v21818_v53 }
 0x3e2   : > { %v22513_v50 = vpack.c.bf16 %v3095_v55, %v3088_v41  ;;  %24946 = vst [vmem:[#allocation92_spill] sm:$0xff] %v22517_v57  ;;  %v22521_v30 = vpack.c.bf16 %v3109_v56, %v3102_v28  ;;  %v3228_v55 = vand.u32 4294901760, %v3227_v38  ;;  %v3235_v41 = vand.u32 4294901760, %v3234_v5 }
 0x3e3   : > { %v22527_v21 = vpack.c.bf16 %v3123_v8, %v3116_v48  ;;  %24950 = vst [vmem:[#allocation96_spill] sm:$0xff] %v22532_v37  ;;  %v22540_v61 = vrot.slane %v2687_v20, %v24952_v0  ;;  %v2850_v14 = vsub.s32 2, %v21818_v53  ;;  %v24954_v38 = vsub.s32 1, %v21818_v53 }
 0x3e4   : > { %24943 = vst [vmem:[#allocation91_spill] sm:$0xff] %v22513_v50  ;;  %24947 = vst [vmem:[#allocation93_spill] sm:$0xff] %v22521_v30  ;;  %v22525_v13 = vpack.c.bf16 %v3235_v41, %v3228_v55  ;;  %v2436_v39 = vmul.f32 0.14433756, %v21833_v63  ;;  %v2437_v22 = vmul.f32 2.0, %v22028_v44  ;;  %v3764_v19 = vand.u32 4294901760, %v2896_v7 }
 0x3e5   : > { %24949 = vst [vmem:[#allocation95_spill] sm:$0xff] %v22527_v21  ;;  %24953 = vst [vmem:[#allocation98_spill] sm:$0xff] %v22540_v61  ;;  %v22547_v5 = vrot.slane %v2687_v20, %v24954_v38  ;;  %v3767_v55 = vand.u32 4294901760, %v2897_v11  ;;  %v22553_v48 = vrot.slane %v2687_v20, %v2850_v14  ;;  %v24962_v28 = vand.u32 4294901760, %v22198_v62 }
 0x3e6   : > { %24948 = vst [vmem:[#allocation94_spill] sm:$0xff] %v22525_v13  ;;  %v22560_v0 = vsel %vm1828_vm3, %v2436_v39, 0.0  ;;  %v22565_v63 = vsel %vm1843_vm4, %v2437_v22, 0.0  ;;  %v24978_v36 = vand.u32 4294901760, %v22272_v43 }
 0x3e7   : > { %24955 = vst [vmem:[#allocation99_spill] sm:$0xff] %v22547_v5  ;;  %24957 = vst [vmem:[#allocation101_spill] sm:$0xff] %v22553_v48  ;;  %v22570_v20 = vsub.f32 %v2897_v11, %v3767_v55  ;;  %v3017_v39 = vsub.f32 %v22198_v62, %v24962_v28 }
 0x3e8   : > { %24959 = vst [vmem:[#allocation103_spill] sm:$0xff] %v22560_v0  ;;  %24960 = vst [vmem:[#allocation104_spill] sm:$0xff] %v22565_v63 }
 0x48a   : > { %v22534_v9 = vpop.f32.mrb[4].mxu0 }
 0x48b   : > { %24951 = vst [vmem:[#allocation97_spill] sm:$0xff] %v22534_v9  ;;  %v19058_v56 = vpop.f32.mrb[5].mxu0  ;;  %v24963_v9 = vand.u32 4294901760, %v22202_v15 }
 0x48c   : > { %v22568_v56 = vsub.f32 %v2896_v7, %v3764_v19 }
 0x48d   : > { %v3024_v37 = vsub.f32 %v22202_v15, %v24963_v9  ;;  %v22591_v9 = vpack.c.bf16 %v3767_v55, %v3764_v19  ;;  %v24969_v55 = vand.u32 4294901760, %v22241_v32 }
 0x48e   : > { %v22551_v41 = vpop.f32.mrb[6].mxu0 }
 0x48f   : > { %24956 = vst [vmem:[#allocation100_spill] sm:$0xff] %v22551_v41  ;;  %v2855_v8 = vmul.f32 %v22540_v61, %v22551_v41  ;;  %v22557_v24 = vpop.f32.mrb[7].mxu0  ;;  %v3018_v61 = vand.u32 4294901760, %v3017_v39  ;;  %v3025_v29 = vand.u32 4294901760, %v3024_v37  ;;  %24964 = vst [vmem:[#allocation106_spill] sm:$0xff] %v22591_v9  ;;  %v24968_v37 = vand.u32 4294901760, %v22223_v51 }
 0x490   : > { %24958 = vst [vmem:[#allocation102_spill] sm:$0xff] %v22557_v24  ;;  %v2856_v53 = vmul.f32 %v22547_v5, %v22557_v24  ;;  %v3038_v39 = vsub.f32 %v22241_v32, %v24969_v55  ;;  %v24972_v55 = vmov 0.0  }
 0x491   : > { %v2858_v44 = vsub.f32 %v22560_v0, %v2855_v8  ;;  %v3031_v19 = vsub.f32 %v22223_v51, %v24968_v37  ;;  %v22637_v10 = vpack.c.bf16 %v3025_v29, %v3018_v61  ;;  %v24979_v29 = vand.u32 4294901760, %v22274_v54 }
 0x492   : > { %v2859_v14 = vsub.f32 %v22565_v63, %v2856_v53  ;;  %v22573_v38 = vpop.f32.mrb[8].mxu0  ;;  %v3039_v3 = vand.u32 4294901760, %v3038_v39 }
 0x493   : > { %24961 = vst [vmem:[#allocation105_spill] sm:$0xff] %v22573_v38  ;;  %v2861_v22 = vmul.f32 %v2858_v44, %v22551_v41  ;;  %v2857_v7 = vmul.f32 %v22553_v48, %v22573_v38  ;;  %v19063_v8 = vpop.f32.mrb[9].mxu0  ;;  %v24974_v48 = vand.u32 4294901760, %v22257_v12  ;;  %24976 = vst [vmem:[#allocation108_spill] sm:$0xff] %v22637_v10  ;;  %v3032_v47 = vand.u32 4294901760, %v3031_v19 }
 0x494   : > { %v2862_v11 = vmul.f32 %v2859_v14, %v22557_v24  ;;  %v24966_v14 = vand.u32 4294901760, %v22213_v46  ;;  %v3052_v61 = vsub.f32 %v22274_v54, %v24979_v29  ;;  %v24982_v19 = vand.u32 4294901760, %v22288_v16 }
 0x495   : > { %v22585_v0 = vand.u32 4294901760, %v2861_v22  ;;  %v2860_v53 = vsub.f32 0.0, %v2857_v7  ;;  %v24967_v7 = vand.u32 4294901760, %v22215_v60 }
 0x496   : > { %v22589_v28 = vand.u32 4294901760, %v2862_v11  ;;  %v3143_v24 = vsub.f32 %v22213_v46, %v24966_v14  ;;  %v24970_v14 = vand.u32 4294901760, %v22568_v56 }
 0x497   : > { %v22594_v44 = vsub.f32 %v2861_v22, %v22585_v0  ;;  %v2863_v8 = vmul.f32 %v2860_v53, %v22573_v38  ;;  %v3150_v63 = vsub.f32 %v22215_v60, %v24967_v7  ;;  %v24971_v7 = vand.u32 4294901760, %v22570_v20 }
 0x498   : > { %v22604_v5 = vsub.f32 %v2862_v11, %v22589_v28  ;;  %3652 = vmatprep.mubr.f32.mxu1 %v22589_v28  ;;  %v3844_v11 = vsub.f32 %v22568_v56, %v24970_v14  ;;  %v3164_v14 = vsub.f32 %v22257_v12, %v24974_v48  ;;  %v3144_v37 = vand.u32 4294901760, %v3143_v24 }
 0x499   : > { %24965 = vst [vmem:[#allocation107_spill] sm:$0xff] %v22594_v44  ;;  %v2899_v22 = vsel %vm1219_vm0, %v2863_v8, 0  ;;  %3654 = vmatmul.mubr.f32.vlgmr.msra.gmra.mrb[2].mxu1 %v22585_v0  ;;  %v3851_v38 = vsub.f32 %v22570_v20, %v24971_v7  ;;  %v24973_v8 = vand.u32 4294901760, %v22243_v34  ;;  %v24975_v58 = vand.u32 4294901760, %v22594_v44 }
 0x49a   : > { %v22622_v41 = vand.u32 4294901760, %v2899_v22  ;;  %20072 = vmatpush3.bf16.msra.mxu1 %v22591_v9  ;;  %19068 = vmatprep.mubr.msk.f32.mxu1 %vm21497_vm1, %v24972_v55  ;;  %v3151_v33 = vand.u32 4294901760, %v3150_v63  ;;  %v24977_v17 = vand.u32 4294901760, %v22604_v5  ;;  %v3845_v48 = vand.u32 4294901760, %v3844_v11 }
 0x49b   : > { %v3157_v53 = vsub.f32 %v22243_v34, %v24973_v8  ;;  %v3006_v7 = vsub.f32 %v22594_v44, %v24975_v58  ;;  %20073 = vmatprep.subr.bf16.mxu1 %v24929_v1  ;;  %v3852_v6 = vand.u32 4294901760, %v3851_v38  ;;  %v3045_v58 = vsub.f32 %v22272_v43, %v24978_v36 }
 0x49c   : > { %v22641_v42 = vsub.f32 %v2899_v22, %v22622_v41  ;;  %v3000_v8 = vsub.f32 %v22604_v5, %v24977_v17  ;;  %v3165_v44 = vand.u32 4294901760, %v3164_v14  ;;  %v22653_v2 = vpack.c.bf16 %v3151_v33, %v3144_v37 }
 0x49d   : > { %v3158_v22 = vand.u32 4294901760, %v3157_v53  ;;  %v3007_v31 = vand.u32 4294901760, %v3006_v7  ;;  %v24981_v17 = vand.u32 4294901760, %v22286_v49  ;;  %v3178_v36 = vsub.f32 %v22288_v16, %v24982_v19 }
 0x49e   : > { %v3001_v24 = vand.u32 4294901760, %v3000_v8  ;;  %v3832_v63 = vand.u32 4294901760, %v22641_v42  ;;  %24980 = vst [vmem:[#allocation109_spill] sm:$0xff] %v22653_v2  ;;  %v22662_v11 = vpack.c.bf16 %v3039_v3, %v3032_v47  ;;  %v22664_v8 = vpack.c.bf16 %v3852_v6, %v3845_v48 }
 0x49f   : > { %v3171_v38 = vsub.f32 %v22286_v49, %v24981_v17  ;;  %v3046_v53 = vand.u32 4294901760, %v3045_v58  ;;  %v3053_v14 = vand.u32 4294901760, %v3052_v61  ;;  %v22668_v37 = vpack.c.bf16 %v3165_v44, %v3158_v22 }
 0x4a0   : > { %3002 = vmatprep.mubr.f32.mxu0 %v3001_v24  ;;  %v3833_v39 = vsub.f32 %v22641_v42, %v3832_v63  ;;  %24983 = vst [vmem:[#allocation110_spill] sm:$0xff] %v22662_v11  ;;  %24984 = vst [vmem:[#allocation111_spill] sm:$0xff] %v22664_v8  ;;  %v24986_v7 = vand.u32 4294901760, %v22293_v25  ;;  %v24987_v24 = vand.u32 4294901760, %v22307_v35  ;;  %v24988_v6 = vand.u32 4294901760, %v22317_v45 }
 0x4a1   : > { %3008 = vmatmul.mubr.f32.vlgmr.msra.gmra.mrb[10].mxu0 %v3007_v31  ;;  %24985 = vst [vmem:[#allocation112_spill] sm:$0xff] %v22668_v37  ;;  %v3172_v3 = vand.u32 4294901760, %v3171_v38  ;;  %v3179_v31 = vand.u32 4294901760, %v3178_v36  ;;  %v24989_v58 = vand.u32 4294901760, %v22319_v18  ;;  %v22687_v61 = vpack.c.bf16 %v3053_v14, %v3046_v53 }
 0x4a2   : > { %19913 = vmatpush3.bf16.msra.mxu0 %v22637_v10  ;;  %3238 = vmatprep.mubr.f32.mxu0 %v22589_v28  ;;  %v3834_v33 = vand.u32 4294901760, %v3833_v39  ;;  %v3059_v29 = vsub.f32 %v22293_v25, %v24986_v7  ;;  %v3066_v47 = vsub.f32 %v22307_v35, %v24987_v24  ;;  %v3185_v48 = vsub.f32 %v22317_v45, %v24988_v6  ;;  %v25009_v24 = vld [vmem:[#allocation73_spill] sm:$0xff] }
 0x4a3   : > { %19915 = vmatprep.subr.bf16.mxu0 %v22653_v2  ;;  %v3192_v44 = vsub.f32 %v22319_v18, %v24989_v58  ;;  %24990 = vst [vmem:[#allocation113_spill] sm:$0xff] %v22687_v61  ;;  %v22691_v38 = vpack.c.bf16 %v3179_v31, %v3172_v3  ;;  %v22695_v39 = vpack.c.bf16 %v22570_v20, %v22568_v56  ;;  %v24995_v14 = vand.u32 4294901760, %v22568_v56  ;;  %v25011_v31 = vld [vmem:[#allocation76_spill] sm:$0xff]  ;;  %v25012_v6 = vld [vmem:[#allocation77_spill] sm:$0xff]  ;;  %v25013_v58 = vld [vmem:[#allocation78_spill] sm:$0xff] }
 0x4a4   : > { %19069 = vmatmul.mubr.f32.vlgmr.msra.gmra.mrb[4].mxu1 %v3834_v33  ;;  %v3060_v22 = vand.u32 4294901760, %v3059_v29  ;;  %v3067_v17 = vand.u32 4294901760, %v3066_v47  ;;  %v3186_v19 = vand.u32 4294901760, %v3185_v48  ;;  %v24996_v7 = vand.u32 4294901760, %v22570_v20  ;;  %v25008_v20 = vld [vmem:[#allocation71_spill] sm:$0xff]  ;;  %v25010_v47 = vld [vmem:[#allocation74_spill] sm:$0xff] }
 0x4a5   : > { %20075 = vmatpush3.bf16.msra.mxu1 %v22664_v8  ;;  %19075 = vmatprep.mubr.msk.f32.mxu1 %vm21497_vm1, %v24972_v55  ;;  %24991 = vst [vmem:[#allocation114_spill] sm:$0xff] %v22691_v38  ;;  %v3193_v36 = vand.u32 4294901760, %v3192_v44  ;;  %24992 = vst [vmem:[#allocation115_spill] sm:$0xff] %v22695_v39  ;;  %v22737_v56 = vpack.c.bf16 %v22202_v15, %v22198_v62  ;;  %v22755_v62 = vpack.c.bf16 %v22257_v12, %v22243_v34  ;;  %v25000_v34 = vld [vmem:[#allocation61_spill] sm:$0xff]  ;;  %v25014_v44 = vld [vmem:[#allocation79_spill] sm:$0xff] }
 0x4a6   : > { %19917 = vmatpush3.bf16.msra.mxu0 %v22662_v11  ;;  %20076 = vmatprep.subr.bf16.mxu1 %v24929_v1  ;;  %v22698_v33 = vpack.c.bf16 %v3067_v17, %v3060_v22  ;;  %v22723_v29 = vpack.c.bf16 %v24996_v7, %v24995_v14  ;;  %v22764_v15 = vpack.c.bf16 %v22274_v54, %v22272_v43  ;;  %v25003_v43 = vld [vmem:[#allocation59_spill] sm:$0xff]  ;;  %v25005_v54 = vld [vmem:[#allocation66_spill] sm:$0xff]  ;;  %v25015_v17 = vld [vmem:[#allocation40_spill] sm:$0xff]  ;;  %v25018_v14 = vand.u32 4294901760, %v22604_v5 }
 0x4a7   : > { %19919 = vmatprep.subr.bf16.mxu0 %v22668_v37  ;;  %v22701_v53 = vpack.c.bf16 %v3193_v36, %v3186_v19  ;;  %v22818_v3 = vpack.c.bf16 %v25010_v47, %v25009_v24  ;;  %v22824_v48 = vpack.c.bf16 %v25012_v6, %v25011_v31  ;;  %v22830_v22 = vpack.c.bf16 %v25014_v44, %v25013_v58  ;;  %v25016_v19 = vld [vmem:[#allocation107_spill] sm:$0xff]  ;;  %v25017_v36 = vld [vmem:[#allocation41_spill] sm:$0xff]  ;;  %v25019_v7 = vld [vmem:[#allocation42_spill] sm:$0xff] }
 0x4a8   : > { %24993 = vst [vmem:[#allocation116_spill] sm:$0xff] %v22698_v33  ;;  %24997 = vst [vmem:[#allocation118_spill] sm:$0xff] %v22723_v29  ;;  %v25032_v24 = vld [vmem:[#allocation87_spill] sm:$0xff]  ;;  %v25033_v47 = vand.u32 4294901760, %v25016_v19 }
 0x4a9   : > { %24994 = vst [vmem:[#allocation117_spill] sm:$0xff] %v22701_v53 }
 0x4aa   : > { %19921 = vmatpush3.bf16.msra.mxu0 %v22687_v61 }
 0x4ab   : > { %19923 = vmatprep.subr.bf16.mxu0 %v22691_v38 }
 0x4ac   : > { %19076 = vmatmul.mubr.f32.vlgmr.msra.gmra.mrb[4].mxu1 %v22622_v41 }
 0x4ad   : > { %20078 = vmatpush3.bf16.msra.mxu1 %v22695_v39  ;;  %19082 = vmatprep.mubr.msk.f32.mxu1 %vm21497_vm1, %v24972_v55 }
 0x4ae   : > { %19925 = vmatpush3.bf16.msra.mxu0 %v22698_v33  ;;  %20079 = vmatprep.subr.bf16.mxu1 %v24929_v1 }
 0x4af   : > { %19927 = vmatprep.subr.bf16.mxu0 %v22701_v53 }
 0x4b2   : > { %19929 = vmatpush3.bf16.msra.mxu0 %v22501_v52 }
 0x4b3   : > { %19931 = vmatprep.subr.bf16.mxu0 %v22509_v23 }
 0x4b4   : > { %19083 = vmatmul.mubr.f32.vlgmr.msra.gmra.mrb[4].mxu1 %v22641_v42  ;;  %v22729_v42 = vpack.c.bf16 %v22196_v59, %v22194_v40  ;;  %v22743_v40 = vpack.c.bf16 %v22215_v60, %v22213_v46  ;;  %v22750_v59 = vpack.c.bf16 %v22241_v32, %v22223_v51  ;;  %v22770_v46 = vpack.c.bf16 %v22288_v16, %v22286_v49  ;;  %v4224_v60 = vpop.permute.xlu0 %4223  ;;  %v24999_v32 = vld [vmem:[#allocation60_spill] sm:$0xff] }
 0x4b5   : > { %20081 = vmatpush3.bf16.msra.mxu1 %v22591_v9  ;;  %19089 = vmatprep.mubr.msk.f32.mxu1 %vm21497_vm1, %v24972_v55  ;;  %vm4225_vm9 = vcmp.eq.s32.totalorder %v4224_v60, %v22341_v4  ;;  %v22776_v51 = vpack.c.bf16 %v22307_v35, %v22293_v25  ;;  %v22790_v12 = vpack.c.bf16 %v25000_v34, %v24999_v32  ;;  %v25006_v35 = vld [vmem:[#allocation88_spill] sm:$0xff]  ;;  %v25020_v60 = vld [vmem:[#allocation45_spill] sm:$0xff] }
 0x4b6   : > { %19933 = vmatpush3.bf16.msra.mxu0 %v22513_v50  ;;  %20082 = vmatprep.subr.bf16.mxu1 %v24929_v1  ;;  %24998 = vst [vmem:[#allocation119_spill] sm:$0xff] %v22729_v42  ;;  %v17635_v49 = vsel %vm4225_vm9, 1.0, %v24972_v55  ;;  %v25022_v32 = vld [vmem:[#allocation49_spill] sm:$0xff] }
 0x4b7   : > { %19935 = vmatprep.subr.bf16.mxu0 %v22517_v57  ;;  %v25024_v34 = vld [vmem:[#allocation53_spill] sm:$0xff] }
 0x4ba   : > { %19937 = vmatpush3.bf16.msra.mxu0 %v22521_v30 }
 0x4bb   : > { %19939 = vmatprep.subr.bf16.mxu0 %v22525_v13 }
 0x4bc   : > { %19090 = vmatmul.mubr.f32.vlgmr.msra.gmra.mrb[4].mxu1 %v3832_v63 }
 0x4bd   : > { %20084 = vmatpush3.bf16.msra.mxu1 %v22723_v29  ;;  %19096 = vmatprep.mubr.msk.f32.mxu1 %vm21497_vm1, %v24972_v55 }
 0x4be   : > { %19941 = vmatpush3.bf16.msra.mxu0 %v22527_v21  ;;  %20085 = vmatprep.subr.bf16.mxu1 %v24929_v1 }
 0x4bf   : > { %19943 = vmatprep.subr.bf16.mxu0 %v22729_v42 }
 0x4c1   : > { %3240 = vmatmul.mubr.f32.vlgmr.msra.gmra.mrb[12].mxu0 %v22585_v0 }
 0x4c2   : > { %19945 = vmatpush3.bf16.msra.mxu0 %v22737_v56  ;;  %3375 = vmatprep.mubr.f32.mxu0 %v22604_v5  ;;  %v25023_v5 = vld [vmem:[#allocation51_spill] sm:$0xff] }
 0x4c3   : > { %19947 = vmatprep.subr.bf16.mxu0 %v22743_v40 }
 0x4c4   : > { %19097 = vmatmul.mubr.f32.vlgmr.msra.gmra.mrb[4].mxu1 %v22622_v41 }
 0x4c5   : > { %20087 = vmatpush3.bf16.msra.mxu1 %v22591_v9  ;;  %19103 = vmatprep.mubr.msk.f32.mxu1 %vm21497_vm1, %v24972_v55 }
 0x4c6   : > { %19949 = vmatpush3.bf16.msra.mxu0 %v22750_v59  ;;  %4231 = vmatprep.subr.mxu1 %v22182_v27  ;;  %v22781_v27 = vpack.c.bf16 %v22319_v18, %v22317_v45  ;;  %v25001_v18 = vld [vmem:[#allocation62_spill] sm:$0xff]  ;;  %v25002_v45 = vld [vmem:[#allocation63_spill] sm:$0xff] }
 0x4c7   : > { %19951 = vmatprep.subr.bf16.mxu0 %v22755_v62  ;;  %v22796_v16 = vpack.c.bf16 %v25002_v45, %v25001_v18  ;;  %v25025_v18 = vld [vmem:[#allocation55_spill] sm:$0xff] }
 0x4c8   : > { %v25026_v45 = vld [vmem:[#allocation67_spill] sm:$0xff] }
 0x4ca   : > { %19953 = vmatpush3.bf16.msra.mxu0 %v22764_v15 }
 0x4cb   : > { %19955 = vmatprep.subr.bf16.mxu0 %v22770_v46 }
 0x4cc   : > { %19104 = vmatmul.mubr.f32.vlgmr.msra.gmra.mrb[4].mxu1 %v22622_v41  ;;  %v25007_v41 = vld [vmem:[#allocation70_spill] sm:$0xff] }
 0x4cd   : > { %4232 = vmatpush1.msra.mxu1 %v22344_v26  ;;  %4295 = vmatprep.mubr.f32.mxu1 %v24972_v55  ;;  %v25004_v26 = vld [vmem:[#allocation65_spill] sm:$0xff]  ;;  %v22811_v63 = vpack.c.bf16 %v25008_v20, %v25007_v41  ;;  %v25031_v20 = vld [vmem:[#allocation86_spill] sm:$0xff] }
 0x4ce   : > { %19957 = vmatpush3.bf16.msra.mxu0 %v22776_v51  ;;  %19106 = vmatprep.subr.mxu1 %v24972_v55  ;;  %v22805_v25 = vpack.c.bf16 %v25005_v54, %v25004_v26  ;;  %v25028_v26 = vld [vmem:[#allocation81_spill] sm:$0xff]  ;;  %v25029_v54 = vld [vmem:[#allocation84_spill] sm:$0xff] }
 0x4cf   : > { %19959 = vmatprep.subr.bf16.mxu0 %v22781_v27  ;;  %v25030_v41 = vld [vmem:[#allocation85_spill] sm:$0xff] }
 0x4d0   : > { %17636 = vmatmul.mubr.msk.f32.vlgmr.msra.gmra.mrb[6].mxu1 %vm2694_vm8, %v17635_v49 }
 0x4d1   : > { %19107 = vmatpush3.msra.mxu1 %v25003_v43  ;;  %19108 = vmatprep.mubr.msk.f32.mxu1 %vm21497_vm1, %v24972_v55  ;;  %v25027_v43 = vld [vmem:[#allocation68_spill] sm:$0xff] }
 0x4d2   : > { %19961 = vmatpush3.bf16.msra.mxu0 %v22790_v12  ;;  %20121 = vmatprep.subr.bf16.mxu1 %v25006_v35 }
 0x4d3   : > { %19963 = vmatprep.subr.bf16.mxu0 %v22796_v16 }
 0x4d4   : > { %19109 = vmatmul.mubr.msk.f32.vlgmr.msra.gmra.mrb[8].mxu1 %vm2694_vm8, %v17635_v49  ;;  %v25021_v49 = vld [vmem:[#allocation47_spill] sm:$0xff] }
 0x4d5   : > { %20123 = vmatpush3.bf16.msra.mxu1 %v22637_v10 }
 0x4d6   : > { %19965 = vmatpush3.bf16.msra.mxu0 %v22805_v25  ;;  %20125 = vmatprep.subr.bf16.mxu1 %v22653_v2 }
 0x4d7   : > { %19967 = vmatprep.subr.bf16.mxu0 %v22811_v63 }
 0x4d9   : > { %20127 = vmatpush3.bf16.msra.mxu1 %v22662_v11 }
 0x4da   : > { %19969 = vmatpush3.bf16.msra.mxu0 %v22818_v3  ;;  %20129 = vmatprep.subr.bf16.mxu1 %v22668_v37 }
 0x4db   : > { %19971 = vmatprep.subr.bf16.mxu0 %v22824_v48 }
 0x4dd   : > { %20131 = vmatpush3.bf16.msra.mxu1 %v22687_v61 }
 0x4de   : > { %19973 = vmatpush3.bf16.msra.mxu0 %v22830_v22  ;;  %20133 = vmatprep.subr.bf16.mxu1 %v22691_v38 }
 0x4df   : > { %19975 = vmatprep.subr.bf16.mxu0 %v25015_v17 }
 0x4e1   : > { %3378 = vmatmul.mubr.f32.vlgmr.msra.gmra.mrb[14].mxu0 %v25016_v19  ;;  %20135 = vmatpush3.bf16.msra.mxu1 %v22698_v33 }
 0x4e2   : > { %19977 = vmatpush3.bf16.msra.mxu0 %v25017_v36  ;;  %3482 = vmatprep.mubr.f32.mxu0 %v25018_v14 }
 0x4e3   : > { %19979 = vmatprep.subr.bf16.mxu0 %v25019_v7  ;;  %20137 = vmatprep.subr.bf16.mxu1 %v22701_v53  ;;  %v25037_v53 = vld [vmem:[#allocation99_spill] sm:$0xff] }
 0x4e5   : > { %20139 = vmatpush3.bf16.msra.mxu1 %v22501_v52 }
 0x4e6   : > { %19981 = vmatpush3.bf16.msra.mxu0 %v25020_v60  ;;  %20141 = vmatprep.subr.bf16.mxu1 %v22509_v23 }
 0x4e7   : > { %19983 = vmatprep.subr.bf16.mxu0 %v25021_v49 }
 0x4e9   : > { %20143 = vmatpush3.bf16.msra.mxu1 %v22513_v50  ;;  %v25035_v50 = vld [vmem:[#allocation98_spill] sm:$0xff] }
 0x4ea   : > { %19985 = vmatpush3.bf16.msra.mxu0 %v25022_v32  ;;  %20145 = vmatprep.subr.bf16.mxu1 %v22517_v57 }
 0x4eb   : > { %19987 = vmatprep.subr.bf16.mxu0 %v25023_v5 }
 0x4ed   : > { %20147 = vmatpush3.bf16.msra.mxu1 %v22521_v30 }
 0x4ee   : > { %19989 = vmatpush3.bf16.msra.mxu0 %v25024_v34  ;;  %20149 = vmatprep.subr.bf16.mxu1 %v22525_v13 }
 0x4ef   : > { %19991 = vmatprep.subr.bf16.mxu0 %v25025_v18 }
 0x4f1   : > { %20151 = vmatpush3.bf16.msra.mxu1 %v22527_v21 }
 0x4f2   : > { %19993 = vmatpush3.bf16.msra.mxu0 %v25026_v45  ;;  %20185 = vmatprep.subr.bf16.mxu1 %v25015_v17 }
 0x4f3   : > { %19995 = vmatprep.subr.bf16.mxu0 %v25027_v43 }
 0x4f6   : > { %19997 = vmatpush3.bf16.msra.mxu0 %v25028_v26 }
 0x4f7   : > { %19999 = vmatprep.subr.bf16.mxu0 %v25029_v54 }
 0x4fa   : > { %20001 = vmatpush3.bf16.msra.mxu0 %v25030_v41 }
 0x4fb   : > { %20003 = vmatprep.subr.bf16.mxu0 %v25031_v20 }
 0x4fe   : > { %20005 = vmatpush3.bf16.msra.mxu0 %v25032_v24 }
 0x4ff   : > { %20039 = vmatprep.subr.bf16.mxu0 %v25015_v17 }
 0x501   : > { %3486 = vmatmul.mubr.f32.vlgmr.msra.gmra.mrb[16].mxu0 %v25033_v47 }
 0x502   : > { %20041 = vmatpush3.bf16.msra.mxu0 %v25017_v36  ;;  %3756 = vmatprep.mubr.f32.mxu0 %v22589_v28 }
 0x503   : > { %20043 = vmatprep.subr.bf16.mxu0 %v25019_v7 }
 0x506   : > { %20045 = vmatpush3.bf16.msra.mxu0 %v25020_v60 }
 0x507   : > { %20047 = vmatprep.subr.bf16.mxu0 %v25021_v49 }
 0x50a   : > { %20049 = vmatpush3.bf16.msra.mxu0 %v25022_v32 }
 0x50b   : > { %20051 = vmatprep.subr.bf16.mxu0 %v25023_v5 }
 0x50e   : > { %20053 = vmatpush3.bf16.msra.mxu0 %v25024_v34 }
 0x50f   : > { %20055 = vmatprep.subr.bf16.mxu0 %v25025_v18 }
 0x512   : > { %20057 = vmatpush3.bf16.msra.mxu0 %v25026_v45 }
 0x513   : > { %20059 = vmatprep.subr.bf16.mxu0 %v25027_v43 }
 0x516   : > { %20061 = vmatpush3.bf16.msra.mxu0 %v25028_v26 }
 0x517   : > { %20063 = vmatprep.subr.bf16.mxu0 %v25029_v54 }
 0x51a   : > { %20065 = vmatpush3.bf16.msra.mxu0 %v25030_v41 }
 0x51b   : > { %20067 = vmatprep.subr.bf16.mxu0 %v25031_v20 }
 0x51e   : > { %20069 = vmatpush3.bf16.msra.mxu0 %v25032_v24 }
 0x51f   : > { %20089 = vmatprep.subr.bf16.mxu0 %v25015_v17 }
 0x521   : > { %3758 = vmatmul.mubr.f32.vlgmr.msra.gmra.mrb[18].mxu0 %v22585_v0 }
 0x522   : > { %20091 = vmatpush3.bf16.msra.mxu0 %v25017_v36 }
 0x523   : > { %20093 = vmatprep.subr.bf16.mxu0 %v25019_v7 }
 0x526   : > { %20095 = vmatpush3.bf16.msra.mxu0 %v25020_v60 }
 0x527   : > { %20097 = vmatprep.subr.bf16.mxu0 %v25021_v49 }
 0x52a   : > { %20099 = vmatpush3.bf16.msra.mxu0 %v25022_v32 }
 0x52b   : > { %20101 = vmatprep.subr.bf16.mxu0 %v25023_v5 }
 0x52e   : > { %20103 = vmatpush3.bf16.msra.mxu0 %v25024_v34 }
 0x52f   : > { %20105 = vmatprep.subr.bf16.mxu0 %v25025_v18 }
 0x532   : > { %20107 = vmatpush3.bf16.msra.mxu0 %v25026_v45 }
 0x533   : > { %20109 = vmatprep.subr.bf16.mxu0 %v25027_v43 }
 0x536   : > { %20111 = vmatpush3.bf16.msra.mxu0 %v25028_v26 }
 0x537   : > { %20113 = vmatprep.subr.bf16.mxu0 %v25029_v54 }
 0x53a   : > { %20115 = vmatpush3.bf16.msra.mxu0 %v25030_v41 }
 0x53b   : > { %20117 = vmatprep.subr.bf16.mxu0 %v25031_v20 }
 0x53e   : > { %20119 = vmatpush3.bf16.msra.mxu0 %v25032_v24 }
 0x53f   : > { %20153 = vmatprep.subr.bf16.mxu0 %v22729_v42 }
 0x56c   : > { %v17922_v0 = vpop.f32.mrb[2].mxu1 }
 0x56d   : > { %v17923_v28 = vpop.f32.mrb[3].mxu1 }
 0x56e   : > { %v22903_v31 = vadd.f32 %v17923_v28, %v17922_v0  ;;  %v25038_v28 = vld [vmem:[#allocation103_spill] sm:$0xff] }
 0x574   : > { %v17782_v6 = vpop.f32.mrb[10].mxu0 }
 0x575   : > { %v17783_v58 = vpop.f32.mrb[11].mxu0 }
 0x576   : > { %v17784_v44 = vadd.f32 %v17783_v58, %v17782_v6  ;;  %v25039_v6 = vld [vmem:[#allocation104_spill] sm:$0xff] }
 0x594   : > { %v17817_v19 = vpop.f32.mrb[12].mxu0 }
 0x595   : > { %v17818_v14 = vpop.f32.mrb[13].mxu0 }
 0x596   : > { %v17819_v47 = vadd.f32 %v17818_v14, %v17817_v19 }
 0x598   : > { %v3242_v21 = vadd.f32 %v17819_v47, %v17784_v44 }
 0x59f   : > { %v22905_v13 = vpop.f32.mrb[4].mxu1 }
 0x5a0   : > { %v19105_v30 = vpop.f32.mrb[5].mxu1 }
 0x5a3   : > { %v22907_v57 = vpop.f32.mrb[6].mxu1 }
 0x5a4   : > { %25034 = vst [vmem:[#allocation60_spill] sm:$0xff] %v22907_v57  ;;  %v4372_v23 = vmul.f32 %v22907_v57, %v25035_v50  ;;  %v22911_v52 = vpop.f32.mrb[7].mxu1 }
 0x5a5   : > { %25036 = vst [vmem:[#allocation61_spill] sm:$0xff] %v22911_v52  ;;  %v4373_v0 = vmul.f32 %v22911_v52, %v25037_v53 }
 0x5a6   : > { %v4375_v33 = vsub.f32 %v25038_v28, %v4372_v23 }
 0x5a7   : > { %v4376_v58 = vsub.f32 %v25039_v6, %v4373_v0  ;;  %v22917_v38 = vpop.f32.mrb[8].mxu1 }
 0x5a8   : > { %25040 = vst [vmem:[#allocation62_spill] sm:$0xff] %v22917_v38  ;;  %v4378_v44 = vmul.f32 %v4375_v33, %v22907_v57  ;;  %v19110_v19 = vpop.f32.mrb[9].mxu1 }
 0x5a9   : > { %v4379_v30 = vmul.f32 %v4376_v58, %v22911_v52 }
 0x5aa   : > { %v22921_v14 = vand.u32 4294901760, %v4378_v44 }
 0x5ab   : > { %v4480_v47 = vand.u32 4294901760, %v4379_v30 }
 0x5ac   : > { %v4487_v50 = vsub.f32 %v4378_v44, %v22921_v14 }
 0x5ad   : > { %v4481_v61 = vsub.f32 %v4379_v30, %v4480_v47  ;;  %4721 = vmatprep.mubr.f32.mxu1 %v4480_v47 }
 0x5ae   : > { %4723 = vmatmul.mubr.f32.vlgmr.msra.gmra.mrb[10].mxu1 %v22921_v14  ;;  %v4488_v53 = vand.u32 4294901760, %v4487_v50 }
 0x5af   : > { %20187 = vmatpush3.bf16.msra.mxu1 %v25017_v36  ;;  %v4482_v23 = vand.u32 4294901760, %v4481_v61 }
 0x5b0   : > { %20189 = vmatprep.subr.bf16.mxu1 %v25019_v7  ;;  %v4489_v0 = vsub.f32 %v4487_v50, %v4488_v53 }
 0x5b1   : > { %4965 = vmatprep.mubr.f32.mxu1 %v4482_v23  ;;  %v4483_v33 = vsub.f32 %v4481_v61, %v4482_v23  ;;  %v25042_v23 = vld [vmem:[#allocation44_spill] sm:$0xff] }
 0x5b2   : > { %v4490_v44 = vand.u32 4294901760, %v4489_v0 }
 0x5b3   : > { %20191 = vmatpush3.bf16.msra.mxu1 %v25020_v60  ;;  %v4484_v58 = vand.u32 4294901760, %v4483_v33  ;;  %v25043_v33 = vld [vmem:[#allocation46_spill] sm:$0xff] }
 0x5b4   : > { %v17852_v19 = vpop.f32.mrb[14].mxu0  ;;  %20193 = vmatprep.subr.bf16.mxu1 %v25021_v49 }
 0x5b5   : > { %v17853_v30 = vpop.f32.mrb[15].mxu0  ;;  %4485 = vmatprep.mubr.f32.mxu0 %v4484_v58  ;;  %v25044_v58 = vld [vmem:[#allocation101_spill] sm:$0xff] }
 0x5b6   : > { %v17854_v52 = vadd.f32 %v17853_v30, %v17852_v19  ;;  %4491 = vmatmul.mubr.f32.vlgmr.msra.gmra.mrb[20].mxu0 %v4490_v44  ;;  %v4374_v19 = vmul.f32 %v22917_v38, %v25044_v58  ;;  %v25045_v30 = vld [vmem:[#allocation48_spill] sm:$0xff] }
 0x5b7   : > { %20155 = vmatpush3.bf16.msra.mxu0 %v22737_v56  ;;  %20195 = vmatpush3.bf16.msra.mxu1 %v25022_v32 }
 0x5b8   : > { %v3380_v57 = vadd.f32 %v17854_v52, %v3242_v21  ;;  %4858 = vmatprep.mubr.f32.mxu0 %v4481_v61  ;;  %20157 = vmatprep.subr.bf16.mxu0 %v22743_v40  ;;  %v25041_v21 = vld [vmem:[#allocation43_spill] sm:$0xff] }
 0x5b9   : > { %20197 = vmatprep.subr.bf16.mxu1 %v25023_v5 }
 0x5bb   : > { %20159 = vmatpush3.bf16.msra.mxu0 %v22750_v59  ;;  %20199 = vmatpush3.bf16.msra.mxu1 %v25024_v34 }
 0x5bc   : > { %20161 = vmatprep.subr.bf16.mxu0 %v22755_v62  ;;  %20201 = vmatprep.subr.bf16.mxu1 %v25025_v18 }
 0x5bf   : > { %20163 = vmatpush3.bf16.msra.mxu0 %v22764_v15  ;;  %20203 = vmatpush3.bf16.msra.mxu1 %v25026_v45 }
 0x5c0   : > { %20165 = vmatprep.subr.bf16.mxu0 %v22770_v46  ;;  %20205 = vmatprep.subr.bf16.mxu1 %v25027_v43 }
 0x5c3   : > { %20167 = vmatpush3.bf16.msra.mxu0 %v22776_v51  ;;  %20207 = vmatpush3.bf16.msra.mxu1 %v25028_v26 }
 0x5c4   : > { %20169 = vmatprep.subr.bf16.mxu0 %v22781_v27  ;;  %20209 = vmatprep.subr.bf16.mxu1 %v25029_v54 }
 0x5c7   : > { %20171 = vmatpush3.bf16.msra.mxu0 %v22790_v12  ;;  %20211 = vmatpush3.bf16.msra.mxu1 %v25030_v41 }
 0x5c8   : > { %20173 = vmatprep.subr.bf16.mxu0 %v22796_v16  ;;  %20213 = vmatprep.subr.bf16.mxu1 %v25031_v20 }
 0x5cb   : > { %20175 = vmatpush3.bf16.msra.mxu0 %v22805_v25  ;;  %20215 = vmatpush3.bf16.msra.mxu1 %v25032_v24 }
 0x5cc   : > { %20177 = vmatprep.subr.bf16.mxu0 %v22811_v63  ;;  %20249 = vmatprep.subr.bf16.mxu1 %v25015_v17 }
 0x5ce   : > { %4969 = vmatmul.mubr.f32.vlgmr.msra.gmra.mrb[12].mxu1 %v4488_v53 }
 0x5cf   : > { %20179 = vmatpush3.bf16.msra.mxu0 %v22818_v3  ;;  %20251 = vmatpush3.bf16.msra.mxu1 %v25017_v36 }
 0x5d0   : > { %5239 = vmatprep.mubr.f32.mxu1 %v4480_v47  ;;  %20181 = vmatprep.subr.bf16.mxu0 %v22824_v48 }
 0x5d1   : > { %20253 = vmatprep.subr.bf16.mxu1 %v25019_v7 }
 0x5d3   : > { %20183 = vmatpush3.bf16.msra.mxu0 %v22830_v22  ;;  %20255 = vmatpush3.bf16.msra.mxu1 %v25020_v60 }
 0x5d4   : > { %v17887_v52 = vpop.f32.mrb[16].mxu0  ;;  %20217 = vmatprep.subr.bf16.mxu0 %v25041_v21  ;;  %20257 = vmatprep.subr.bf16.mxu1 %v25021_v49 }
 0x5d5   : > { %v17888_v61 = vpop.f32.mrb[17].mxu0 }
 0x5d6   : > { %v17889_v53 = vadd.f32 %v17888_v61, %v17887_v52  ;;  %4861 = vmatmul.mubr.f32.vlgmr.msra.gmra.mrb[22].mxu0 %v4487_v50  ;;  %v25046_v50 = vld [vmem:[#allocation50_spill] sm:$0xff]  ;;  %v4377_v52 = vsub.f32 0.0, %v4374_v19  ;;  %v25051_v19 = vld [vmem:[#allocation64_spill] sm:$0xff] }
 0x5d7   : > { %20219 = vmatpush3.bf16.msra.mxu0 %v25042_v23  ;;  %5135 = vmatprep.mubr.f32.mxu0 %v4480_v47  ;;  %v25048_v47 = vld [vmem:[#allocation54_spill] sm:$0xff] }
 0x5d8   : > { %v3488_v0 = vadd.f32 %v17889_v53, %v3380_v57  ;;  %20259 = vmatpush3.bf16.msra.mxu1 %v25022_v32  ;;  %20221 = vmatprep.subr.bf16.mxu0 %v25043_v33  ;;  %v25047_v57 = vld [vmem:[#allocation52_spill] sm:$0xff]  ;;  %v4380_v61 = vmul.f32 %v4377_v52, %v22917_v38  ;;  %v25050_v53 = vld [vmem:[#allocation57_spill] sm:$0xff]  ;;  %v5707_v38 = vpop.permute.xlu1 %5706 }
 0x5d9   : > { %20261 = vmatprep.subr.bf16.mxu1 %v25023_v5  ;;  %v25052_v52 = vld [vmem:[#allocation69_spill] sm:$0xff]  ;;  %vm5708_vm10 = vcmp.eq.s32.totalorder %v5707_v38, %v22341_v4  ;;  %v25059_v38 = vld [vmem:[#allocation83_spill] sm:$0xff] }
 0x5da   : > { %v3656_v44 = vadd.f32 %v22903_v31, %v3488_v0  ;;  %v25049_v31 = vld [vmem:[#allocation56_spill] sm:$0xff]  ;;  %v4382_v0 = vsel %vm1219_vm0, %v4380_v61, 0  ;;  %v25054_v61 = vld [vmem:[#allocation75_spill] sm:$0xff] }
 0x5db   : > { %20223 = vmatpush3.bf16.msra.mxu0 %v25045_v30 }
 0x5dc   : > { %20263 = vmatpush3.bf16.msra.mxu1 %v25024_v34  ;;  %20225 = vmatprep.subr.bf16.mxu0 %v25046_v50 }
 0x5dd   : > { %20265 = vmatprep.subr.bf16.mxu1 %v25025_v18 }
 0x5df   : > { %20227 = vmatpush3.bf16.msra.mxu0 %v25047_v57  ;;  %v22983_v57 = vand.u32 4294901760, %v4382_v0 }
 0x5e0   : > { %20267 = vmatpush3.bf16.msra.mxu1 %v25026_v45  ;;  %20229 = vmatprep.subr.bf16.mxu0 %v25048_v47  ;;  %v22993_v47 = vld [vmem:[%s22179_s8 + $0x8] sm:$0xff] }
 0x5e1   : > { %20269 = vmatprep.subr.bf16.mxu1 %v25027_v43  ;;  %25055 = vst [vmem:[#allocation63_spill] sm:$0xff] %v22993_v47 }
 0x5e3   : > { %20231 = vmatpush3.bf16.msra.mxu0 %v25049_v31  ;;  %v25053_v31 = vld [vmem:[#allocation72_spill] sm:$0xff] }
 0x5e4   : > { %20271 = vmatpush3.bf16.msra.mxu1 %v25028_v26  ;;  %20233 = vmatprep.subr.bf16.mxu0 %v25050_v53  ;;  %v5314_v53 = vsub.f32 %v4382_v0, %v22983_v57  ;;  %v17638_v0 = vsel %vm5708_vm10, 1.0, %v24972_v55 }
 0x5e5   : > { %20273 = vmatprep.subr.bf16.mxu1 %v25029_v54 }
 0x5e7   : > { %20235 = vmatpush3.bf16.msra.mxu0 %v25051_v19  ;;  %v23000_v19 = vld [vmem:[%s22179_s8] sm:$0xff] }
 0x5e8   : > { %20275 = vmatpush3.bf16.msra.mxu1 %v25030_v41  ;;  %20237 = vmatprep.subr.bf16.mxu0 %v25052_v52  ;;  %v25056_v52 = vld [vmem:[#allocation80_spill] sm:$0xff]  ;;  %25057 = vst [vmem:[#allocation59_spill] sm:$0xff] %v23000_v19 }
 0x5e9   : > { %20277 = vmatprep.subr.bf16.mxu1 %v25031_v20 }
 0x5eb   : > { %20239 = vmatpush3.bf16.msra.mxu0 %v25053_v31  ;;  %v25058_v31 = vld [vmem:[#allocation82_spill] sm:$0xff] }
 0x5ec   : > { %20279 = vmatpush3.bf16.msra.mxu1 %v25032_v24  ;;  %20241 = vmatprep.subr.bf16.mxu0 %v25054_v61  ;;  %v5315_v61 = vand.u32 4294901760, %v5314_v53 }
 0x5ed   : > { %5714 = vmatprep.subr.mxu1 %v22993_v47  ;;  %v23010_v47 = vld [vmem:[%s22179_s8 + $0x10] sm:$0xff]  ;;  %s21498_s8 = smov 4  }
 0x5ee   : > { %25060 = vst [vmem:[#allocation65_spill] sm:$0xff] %v23010_v47 }
 0x5ef   : > { %5241 = vmatmul.mubr.f32.vlgmr.msra.gmra.mrb[14].mxu1 %v22921_v14  ;;  %20243 = vmatpush3.bf16.msra.mxu0 %v25056_v52 }
 0x5f0   : > { %5715 = vmatpush1.msra.mxu1 %v23000_v19  ;;  %5778 = vmatprep.mubr.f32.mxu1 %v24972_v55  ;;  %v5316_v19 = vsub.f32 %v5314_v53, %v5315_v61 }
 0x5f1   : > { %20245 = vmatprep.subr.bf16.mxu0 %v25058_v31  ;;  %19153 = vmatprep.subr.mxu1 %v24972_v55 }
 0x5f3   : > { %17639 = vmatmul.mubr.msk.f32.vlgmr.msra.gmra.mrb[16].mxu1 %vm2694_vm8, %v17638_v0  ;;  %20247 = vmatpush3.bf16.msra.mxu0 %v25059_v38 }
 0x5f4   : > { %v17957_v4 = vpop.f32.mrb[18].mxu0  ;;  %19154 = vmatpush3.msra.mxu1 %v23010_v47  ;;  %19155 = vmatprep.mubr.msk.f32.mxu1 %vm21497_vm1, %v24972_v55  ;;  %v5317_v47 = vand.u32 4294901760, %v5316_v19  ;;  %v25070_v19 = vld [vmem:[#allocation93_spill] sm:$0xff] }
 0x5f5   : > { %v17958_v52 = vpop.f32.mrb[19].mxu0  ;;  %20280 = vmatprep.subr.bf16.mxu0 %v24929_v1  ;;  %20299 = vmatprep.subr.bf16.mxu1 %v25015_v17 }
 0x5f6   : > { %v17959_v31 = vadd.f32 %v17958_v52, %v17957_v4  ;;  %5137 = vmatmul.mubr.f32.vlgmr.msra.gmra.mrb[24].mxu0 %v22921_v14  ;;  %v25062_v4 = vld [vmem:[#allocation113_spill] sm:$0xff]  ;;  %v25064_v14 = vld [vmem:[#allocation116_spill] sm:$0xff]  ;;  %v25071_v52 = vld [vmem:[#allocation94_spill] sm:$0xff] }
 0x5f7   : > { %19156 = vmatmul.mubr.msk.f32.vlgmr.msra.gmra.mrb[18].mxu1 %vm2694_vm8, %v17638_v0  ;;  %20282 = vmatpush3.bf16.msra.mxu0 %v22591_v9 }
 0x5f8   : > { %v3760_v38 = vadd.f32 %v17959_v31, %v3656_v44  ;;  %19115 = vmatprep.mubr.msk.f32.mxu0 %vm21497_vm1, %v24972_v55  ;;  %20283 = vmatprep.subr.bf16.mxu0 %v24929_v1  ;;  %v25065_v44 = vld [vmem:[#allocation117_spill] sm:$0xff]  ;;  %v25067_v31 = vld [vmem:[#allocation90_spill] sm:$0xff] }
 0x5f9   : > { %20301 = vmatpush3.bf16.msra.mxu1 %v25017_v36 }
 0x5fa   : > { %v23025_v50 = vadd.f32 %v22905_v13, %v3760_v38  ;;  %19116 = vmatmul.mubr.f32.vlgmr.msra.gmra.mrb[26].mxu0 %v5317_v47  ;;  %20303 = vmatprep.subr.bf16.mxu1 %v25019_v7  ;;  %v25063_v13 = vld [vmem:[#allocation114_spill] sm:$0xff]  ;;  %v25066_v47 = vld [vmem:[#allocation89_spill] sm:$0xff] }
 0x5fb   : > { %20285 = vmatpush3.bf16.msra.mxu0 %v22664_v8  ;;  %19122 = vmatprep.mubr.msk.f32.mxu0 %vm21497_vm1, %v24972_v55 }
 0x5fc   : > { %25061 = vst [vmem:[#allocation66_spill] sm:$0xff] %v23025_v50  ;;  %20286 = vmatprep.subr.bf16.mxu0 %v24929_v1 }
 0x5fd   : > { %20305 = vmatpush3.bf16.msra.mxu1 %v25020_v60 }
 0x5fe   : > { %20307 = vmatprep.subr.bf16.mxu1 %v25021_v49 }
 0x601   : > { %20309 = vmatpush3.bf16.msra.mxu1 %v25022_v32 }
 0x602   : > { %19123 = vmatmul.mubr.f32.vlgmr.msra.gmra.mrb[26].mxu0 %v22983_v57  ;;  %20311 = vmatprep.subr.bf16.mxu1 %v25023_v5 }
 0x603   : > { %20288 = vmatpush3.bf16.msra.mxu0 %v22695_v39  ;;  %19129 = vmatprep.mubr.msk.f32.mxu0 %vm21497_vm1, %v24972_v55 }
 0x604   : > { %20289 = vmatprep.subr.bf16.mxu0 %v24929_v1 }
 0x605   : > { %20313 = vmatpush3.bf16.msra.mxu1 %v25024_v34 }
 0x606   : > { %20315 = vmatprep.subr.bf16.mxu1 %v25025_v18 }
 0x609   : > { %20317 = vmatpush3.bf16.msra.mxu1 %v25026_v45 }
 0x60a   : > { %19130 = vmatmul.mubr.f32.vlgmr.msra.gmra.mrb[26].mxu0 %v5314_v53  ;;  %20319 = vmatprep.subr.bf16.mxu1 %v25027_v43  ;;  %v25069_v53 = vld [vmem:[#allocation92_spill] sm:$0xff] }
 0x60b   : > { %20291 = vmatpush3.bf16.msra.mxu0 %v22591_v9  ;;  %19136 = vmatprep.mubr.msk.f32.mxu0 %vm21497_vm1, %v24972_v55 }
 0x60c   : > { %20292 = vmatprep.subr.bf16.mxu0 %v24929_v1 }
 0x60d   : > { %20321 = vmatpush3.bf16.msra.mxu1 %v25028_v26 }
 0x60e   : > { %20323 = vmatprep.subr.bf16.mxu1 %v25029_v54 }
 0x611   : > { %20325 = vmatpush3.bf16.msra.mxu1 %v25030_v41 }
 0x612   : > { %19137 = vmatmul.mubr.f32.vlgmr.msra.gmra.mrb[26].mxu0 %v5315_v61  ;;  %20327 = vmatprep.subr.bf16.mxu1 %v25031_v20  ;;  %v25072_v61 = vld [vmem:[#allocation95_spill] sm:$0xff] }
 0x613   : > { %20294 = vmatpush3.bf16.msra.mxu0 %v22723_v29  ;;  %19143 = vmatprep.mubr.msk.f32.mxu0 %vm21497_vm1, %v24972_v55 }
 0x614   : > { %20295 = vmatprep.subr.bf16.mxu0 %v24929_v1 }
 0x615   : > { %20329 = vmatpush3.bf16.msra.mxu1 %v25032_v24 }
 0x616   : > { %20363 = vmatprep.subr.bf16.mxu1 %v22729_v42  ;;  %v25074_v42 = vld [vmem:[#allocation98_spill] sm:$0xff] }
 0x61a   : > { %19144 = vmatmul.mubr.f32.vlgmr.msra.gmra.mrb[26].mxu0 %v22983_v57 }
 0x61b   : > { %20297 = vmatpush3.bf16.msra.mxu0 %v22591_v9  ;;  %19150 = vmatprep.mubr.msk.f32.mxu0 %vm21497_vm1, %v24972_v55 }
 0x61c   : > { %20331 = vmatprep.subr.bf16.mxu0 %v25006_v35 }
 0x622   : > { %19151 = vmatmul.mubr.f32.vlgmr.msra.gmra.mrb[26].mxu0 %v22983_v57  ;;  %v25068_v57 = vld [vmem:[#allocation91_spill] sm:$0xff] }
 0x623   : > { %20333 = vmatpush3.bf16.msra.mxu0 %v22637_v10 }
 0x624   : > { %20335 = vmatprep.subr.bf16.mxu0 %v22653_v2 }
 0x627   : > { %20337 = vmatpush3.bf16.msra.mxu0 %v22662_v11 }
 0x628   : > { %20339 = vmatprep.subr.bf16.mxu0 %v22668_v37 }
 0x62b   : > { %20341 = vmatpush3.bf16.msra.mxu0 %v25062_v4 }
 0x62c   : > { %20343 = vmatprep.subr.bf16.mxu0 %v25063_v13 }
 0x62f   : > { %20345 = vmatpush3.bf16.msra.mxu0 %v25064_v14 }
 0x630   : > { %20347 = vmatprep.subr.bf16.mxu0 %v25065_v44 }
 0x633   : > { %20349 = vmatpush3.bf16.msra.mxu0 %v25066_v47 }
 0x634   : > { %20351 = vmatprep.subr.bf16.mxu0 %v25067_v31 }
 0x637   : > { %20353 = vmatpush3.bf16.msra.mxu0 %v25068_v57 }
 0x638   : > { %20355 = vmatprep.subr.bf16.mxu0 %v25069_v53 }
 0x63b   : > { %20357 = vmatpush3.bf16.msra.mxu0 %v25070_v19 }
 0x63c   : > { %20359 = vmatprep.subr.bf16.mxu0 %v25071_v52 }
 0x63f   : > { %20361 = vmatpush3.bf16.msra.mxu0 %v25072_v61 }
 0x640   : > { %20395 = vmatprep.subr.bf16.mxu0 %v25015_v17 }
 0x681   : > { %v18047_v0 = vpop.f32.mrb[10].mxu1 }
 0x682   : > { %v18048_v38 = vpop.f32.mrb[11].mxu1 }
 0x683   : > { %v18049_v50 = vadd.f32 %v18048_v38, %v18047_v0 }
 0x689   : > { %v18012_v44 = vpop.f32.mrb[20].mxu0 }
 0x68a   : > { %v18013_v14 = vpop.f32.mrb[21].mxu0 }
 0x68b   : > { %v18014_v47 = vadd.f32 %v18013_v14, %v18012_v44  ;;  %v25076_v14 = vld [vmem:[#allocation99_spill] sm:$0xff] }
 0x68d   : > { %v4725_v13 = vadd.f32 %v18049_v50, %v18014_v47 }
 0x6a1   : > { %v18117_v31 = vpop.f32.mrb[12].mxu1 }
 0x6a2   : > { %v18118_v4 = vpop.f32.mrb[13].mxu1 }
 0x6a3   : > { %v18119_v57 = vadd.f32 %v18118_v4, %v18117_v31 }
 0x6a9   : > { %v18082_v37 = vpop.f32.mrb[22].mxu0 }
 0x6aa   : > { %v18083_v53 = vpop.f32.mrb[23].mxu0 }
 0x6ab   : > { %v18084_v11 = vadd.f32 %v18083_v53, %v18082_v37 }
 0x6ad   : > { %v4863_v19 = vadd.f32 %v18084_v11, %v4725_v13 }
 0x6af   : > { %v4971_v2 = vadd.f32 %v18119_v57, %v4863_v19 }
 0x6c2   : > { %v18187_v52 = vpop.f32.mrb[14].mxu1 }
 0x6c3   : > { %v18188_v10 = vpop.f32.mrb[15].mxu1 }
 0x6c4   : > { %v18189_v61 = vadd.f32 %v18188_v10, %v18187_v52 }
 0x6c6   : > { %v23081_v35 = vpop.f32.mrb[16].mxu1 }
 0x6c7   : > { %25073 = vst [vmem:[#allocation70_spill] sm:$0xff] %v23081_v35  ;;  %v5855_v0 = vmul.f32 %v23081_v35, %v25074_v42  ;;  %v23085_v38 = vpop.f32.mrb[17].mxu1 }
 0x6c8   : > { %25075 = vst [vmem:[#allocation71_spill] sm:$0xff] %v23085_v38  ;;  %v5856_v50 = vmul.f32 %v23085_v38, %v25076_v14 }
 0x6c9   : > { %v5858_v4 = vsub.f32 %v25038_v28, %v5855_v0  ;;  %v18152_v44 = vpop.f32.mrb[24].mxu0 }
 0x6ca   : > { %v5859_v37 = vsub.f32 %v25039_v6, %v5856_v50  ;;  %v23091_v11 = vpop.f32.mrb[18].mxu1  ;;  %v18153_v13 = vpop.f32.mrb[25].mxu0 }
 0x6cb   : > { %25077 = vst [vmem:[#allocation73_spill] sm:$0xff] %v23091_v11  ;;  %v5861_v10 = vmul.f32 %v5858_v4, %v23081_v35  ;;  %v18154_v47 = vadd.f32 %v18153_v13, %v18152_v44  ;;  %v19157_v31 = vpop.f32.mrb[19].mxu1  ;;  %v25102_v35 = vld [vmem:[#allocation116_spill] sm:$0xff] }
 0x6cc   : > { %v5862_v57 = vmul.f32 %v5859_v37, %v23085_v38  ;;  %v25080_v31 = vld [vmem:[#allocation54_spill] sm:$0xff] }
 0x6cd   : > { %v23095_v53 = vand.u32 4294901760, %v5861_v10  ;;  %v5139_v19 = vadd.f32 %v18154_v47, %v4971_v2 }
 0x6ce   : > { %v5963_v52 = vand.u32 4294901760, %v5862_v57 }
 0x6cf   : > { %v5970_v14 = vsub.f32 %v5861_v10, %v23095_v53  ;;  %v5243_v42 = vadd.f32 %v18189_v61, %v5139_v19  ;;  %v5857_v10 = vmul.f32 %v23091_v11, %v25044_v58  ;;  %v25081_v19 = vld [vmem:[#allocation56_spill] sm:$0xff] }
 0x6d0   : > { %v5964_v0 = vsub.f32 %v5862_v57, %v5963_v52  ;;  %6204 = vmatprep.mubr.f32.mxu0 %v5963_v52 }
 0x6d1   : > { %6206 = vmatmul.mubr.f32.vlgmr.msra.gmra.mrb[28].mxu0 %v23095_v53  ;;  %v5971_v50 = vand.u32 4294901760, %v5970_v14  ;;  %v5860_v47 = vsub.f32 0.0, %v5857_v10  ;;  %v25088_v10 = vld [vmem:[#allocation58_spill] sm:$0xff] }
 0x6d2   : > { %20397 = vmatpush3.bf16.msra.mxu0 %v25017_v36  ;;  %v5965_v6 = vand.u32 4294901760, %v5964_v0 }
 0x6d3   : > { %20399 = vmatprep.subr.bf16.mxu0 %v25019_v7  ;;  %v5972_v4 = vsub.f32 %v5970_v14, %v5971_v50  ;;  %v5863_v57 = vmul.f32 %v5860_v47, %v23091_v11  ;;  %v25089_v47 = vld [vmem:[#allocation80_spill] sm:$0xff] }
 0x6d4   : > { %6448 = vmatprep.mubr.f32.mxu0 %v5965_v6  ;;  %v5966_v44 = vsub.f32 %v5964_v0, %v5965_v6 }
 0x6d5   : > { %v5973_v37 = vand.u32 4294901760, %v5972_v4 }
 0x6d6   : > { %20401 = vmatpush3.bf16.msra.mxu0 %v25020_v60  ;;  %v5967_v2 = vand.u32 4294901760, %v5966_v44  ;;  %v25084_v44 = vld [vmem:[#allocation69_spill] sm:$0xff] }
 0x6d7   : > { %20403 = vmatprep.subr.bf16.mxu0 %v25021_v49 }
 0x6d8   : > { %5968 = vmatprep.mubr.f32.mxu1 %v5967_v2  ;;  %v7190_v2 = vpop.permute.xlu1 %7189 }
 0x6d9   : > { %5974 = vmatmul.mubr.f32.vlgmr.msra.gmra.mrb[20].mxu1 %v5973_v37  ;;  %v25085_v37 = vld [vmem:[#allocation72_spill] sm:$0xff]  ;;  %vm7191_vm11 = vcmp.eq.s32.totalorder %v7190_v2, %v25088_v10  ;;  %v25093_v2 = vld [vmem:[#allocation65_spill] sm:$0xff] }
 0x6da   : > { %20365 = vmatpush3.bf16.msra.mxu1 %v22737_v56  ;;  %20405 = vmatpush3.bf16.msra.mxu0 %v25022_v32  ;;  %v17641_v11 = vsel %vm7191_vm11, 1.0, %v24972_v55 }
 0x6db   : > { %6341 = vmatprep.mubr.f32.mxu1 %v5964_v0  ;;  %20367 = vmatprep.subr.bf16.mxu1 %v22743_v40  ;;  %v5865_v0 = vsel %vm1219_vm0, %v5863_v57, 0  ;;  %v25090_v57 = vld [vmem:[#allocation59_spill] sm:$0xff] }
 0x6dc   : > { %20407 = vmatprep.subr.bf16.mxu0 %v25023_v5  ;;  %v23156_v4 = vand.u32 4294901760, %v5865_v0 }
 0x6de   : > { %20369 = vmatpush3.bf16.msra.mxu1 %v22750_v59  ;;  %20409 = vmatpush3.bf16.msra.mxu0 %v25024_v34 }
 0x6df   : > { %20371 = vmatprep.subr.bf16.mxu1 %v22755_v62  ;;  %20411 = vmatprep.subr.bf16.mxu0 %v25025_v18 }
 0x6e2   : > { %20373 = vmatpush3.bf16.msra.mxu1 %v22764_v15  ;;  %20413 = vmatpush3.bf16.msra.mxu0 %v25026_v45 }
 0x6e3   : > { %20375 = vmatprep.subr.bf16.mxu1 %v22770_v46  ;;  %20415 = vmatprep.subr.bf16.mxu0 %v25027_v43 }
 0x6e6   : > { %20377 = vmatpush3.bf16.msra.mxu1 %v22776_v51  ;;  %20417 = vmatpush3.bf16.msra.mxu0 %v25028_v26 }
 0x6e7   : > { %20379 = vmatprep.subr.bf16.mxu1 %v22781_v27  ;;  %20419 = vmatprep.subr.bf16.mxu0 %v25029_v54 }
 0x6ea   : > { %20381 = vmatpush3.bf16.msra.mxu1 %v22790_v12  ;;  %20421 = vmatpush3.bf16.msra.mxu0 %v25030_v41 }
 0x6eb   : > { %20383 = vmatprep.subr.bf16.mxu1 %v22796_v16  ;;  %20423 = vmatprep.subr.bf16.mxu0 %v25031_v20 }
 0x6ee   : > { %20385 = vmatpush3.bf16.msra.mxu1 %v22805_v25  ;;  %20425 = vmatpush3.bf16.msra.mxu0 %v25032_v24 }
 0x6ef   : > { %20387 = vmatprep.subr.bf16.mxu1 %v22811_v63  ;;  %20459 = vmatprep.subr.bf16.mxu0 %v25015_v17 }
 0x6f1   : > { %6452 = vmatmul.mubr.f32.vlgmr.msra.gmra.mrb[30].mxu0 %v5971_v50  ;;  %v25083_v50 = vld [vmem:[#allocation64_spill] sm:$0xff] }
 0x6f2   : > { %20389 = vmatpush3.bf16.msra.mxu1 %v22818_v3  ;;  %20461 = vmatpush3.bf16.msra.mxu0 %v25017_v36 }
 0x6f3   : > { %6722 = vmatprep.mubr.f32.mxu0 %v5963_v52  ;;  %20391 = vmatprep.subr.bf16.mxu1 %v22824_v48 }
 0x6f4   : > { %20463 = vmatprep.subr.bf16.mxu0 %v25019_v7 }
 0x6f5   : > { %v5701_v6 = vpop.f32.mrb[26].mxu0 }
 0x6f6   : > { %20393 = vmatpush3.bf16.msra.mxu1 %v22830_v22  ;;  %20465 = vmatpush3.bf16.msra.mxu0 %v25020_v60  ;;  %v21010_v61 = vadd.f32 %v5701_v6, %v5243_v42  ;;  %v19152_v13 = vpop.f32.mrb[27].mxu0  ;;  %v25078_v42 = vld [vmem:[#allocation50_spill] sm:$0xff]  ;;  %v6797_v6 = vsub.f32 %v5865_v0, %v23156_v4 }
 0x6f7   : > { %20427 = vmatprep.subr.bf16.mxu1 %v25041_v21  ;;  %20467 = vmatprep.subr.bf16.mxu0 %v25021_v49  ;;  %v25087_v13 = vld [vmem:[#allocation63_spill] sm:$0xff]  ;;  %v25091_v0 = vld [vmem:[#allocation82_spill] sm:$0xff] }
 0x6f8   : > { %8672 = vrot.lane.b32.xlu0 %v21010_v61, %s21498_s8  ;;  %v25086_v61 = vld [vmem:[#allocation75_spill] sm:$0xff]  ;;  %v6798_v38 = vand.u32 4294901760, %v6797_v6  ;;  %s25130_s8 = sld [smem:[#allocation16_spill]] }
 0x6f9   : > { %6344 = vmatmul.mubr.f32.vlgmr.msra.gmra.mrb[22].mxu1 %v5970_v14  ;;  %v25079_v14 = vld [vmem:[#allocation52_spill] sm:$0xff] }
 0x6fa   : > { %20429 = vmatpush3.bf16.msra.mxu1 %v25042_v23  ;;  %6618 = vmatprep.mubr.f32.mxu1 %v5963_v52  ;;  %v25082_v52 = vld [vmem:[#allocation57_spill] sm:$0xff]  ;;  %v6799_v10 = vsub.f32 %v6797_v6, %v6798_v38 }
 0x6fb   : > { %20469 = vmatpush3.bf16.msra.mxu0 %v25022_v32  ;;  %20431 = vmatprep.subr.bf16.mxu1 %v25043_v33 }
 0x6fc   : > { %20471 = vmatprep.subr.bf16.mxu0 %v25023_v5 }
 0x6fe   : > { %20433 = vmatpush3.bf16.msra.mxu1 %v25045_v30 }
 0x6ff   : > { %20473 = vmatpush3.bf16.msra.mxu0 %v25024_v34  ;;  %20435 = vmatprep.subr.bf16.mxu1 %v25078_v42 }
 0x700   : > { %20475 = vmatprep.subr.bf16.mxu0 %v25025_v18 }
 0x702   : > { %20437 = vmatpush3.bf16.msra.mxu1 %v25079_v14 }
 0x703   : > { %20477 = vmatpush3.bf16.msra.mxu0 %v25026_v45  ;;  %20439 = vmatprep.subr.bf16.mxu1 %v25080_v31 }
 0x704   : > { %20479 = vmatprep.subr.bf16.mxu0 %v25027_v43 }
 0x706   : > { %20441 = vmatpush3.bf16.msra.mxu1 %v25081_v19 }
 0x707   : > { %20481 = vmatpush3.bf16.msra.mxu0 %v25028_v26  ;;  %20443 = vmatprep.subr.bf16.mxu1 %v25082_v52 }
 0x708   : > { %20483 = vmatprep.subr.bf16.mxu0 %v25029_v54 }
 0x70a   : > { %20445 = vmatpush3.bf16.msra.mxu1 %v25083_v50 }
 0x70b   : > { %20485 = vmatpush3.bf16.msra.mxu0 %v25030_v41  ;;  %20447 = vmatprep.subr.bf16.mxu1 %v25084_v44 }
 0x70c   : > { %20487 = vmatprep.subr.bf16.mxu0 %v25031_v20 }
 0x70e   : > { %20449 = vmatpush3.bf16.msra.mxu1 %v25085_v37  ;;  %v25111_v37 = vld [vmem:[#allocation98_spill] sm:$0xff] }
 0x70f   : > { %20489 = vmatpush3.bf16.msra.mxu0 %v25032_v24  ;;  %20451 = vmatprep.subr.bf16.mxu1 %v25086_v61 }
 0x710   : > { %7197 = vmatprep.subr.mxu0 %v25087_v13  ;;  %v25092_v13 = vld [vmem:[#allocation83_spill] sm:$0xff] }
 0x712   : > { %6724 = vmatmul.mubr.f32.vlgmr.msra.gmra.mrb[32].mxu0 %v23095_v53  ;;  %20453 = vmatpush3.bf16.msra.mxu1 %v25089_v47 }
 0x713   : > { %7198 = vmatpush1.msra.mxu0 %v25090_v57  ;;  %7261 = vmatprep.mubr.f32.mxu0 %v24972_v55  ;;  %v6800_v57 = vand.u32 4294901760, %v6799_v10  ;;  %v25099_v10 = vld [vmem:[#allocation112_spill] sm:$0xff] }
 0x714   : > { %20455 = vmatprep.subr.bf16.mxu1 %v25091_v0  ;;  %19200 = vmatprep.subr.mxu0 %v24972_v55 }
 0x716   : > { %17642 = vmatmul.mubr.msk.f32.vlgmr.msra.gmra.mrb[34].mxu0 %vm2694_vm8, %v17641_v11  ;;  %20457 = vmatpush3.bf16.msra.mxu1 %v25092_v13 }
 0x717   : > { %19201 = vmatpush3.msra.mxu0 %v25093_v2  ;;  %19202 = vmatprep.mubr.msk.f32.mxu0 %vm21497_vm1, %v24972_v55  ;;  %v25098_v2 = vld [vmem:[#allocation110_spill] sm:$0xff] }
 0x718   : > { %20490 = vmatprep.subr.bf16.mxu1 %v24929_v1  ;;  %20509 = vmatprep.subr.bf16.mxu0 %v25015_v17 }
 0x719   : > { %6620 = vmatmul.mubr.f32.vlgmr.msra.gmra.mrb[24].mxu1 %v23095_v53  ;;  %v25096_v53 = vld [vmem:[#allocation108_spill] sm:$0xff] }
 0x71a   : > { %19203 = vmatmul.mubr.msk.f32.vlgmr.msra.gmra.mrb[36].mxu0 %vm2694_vm8, %v17641_v11  ;;  %20492 = vmatpush3.bf16.msra.mxu1 %v22591_v9  ;;  %v25094_v11 = vld [vmem:[#allocation119_spill] sm:$0xff] }
 0x71b   : > { %19162 = vmatprep.mubr.msk.f32.mxu1 %vm21497_vm1, %v24972_v55  ;;  %20493 = vmatprep.subr.bf16.mxu1 %v24929_v1 }
 0x71c   : > { %20511 = vmatpush3.bf16.msra.mxu0 %v25017_v36 }
 0x71d   : > { %19163 = vmatmul.mubr.f32.vlgmr.msra.gmra.mrb[26].mxu1 %v6800_v57  ;;  %20513 = vmatprep.subr.bf16.mxu0 %v25019_v7  ;;  %v25100_v57 = vld [vmem:[#allocation113_spill] sm:$0xff] }
 0x71e   : > { %20495 = vmatpush3.bf16.msra.mxu1 %v22664_v8  ;;  %19169 = vmatprep.mubr.msk.f32.mxu1 %vm21497_vm1, %v24972_v55 }
 0x71f   : > { %20496 = vmatprep.subr.bf16.mxu1 %v24929_v1 }
 0x720   : > { %20515 = vmatpush3.bf16.msra.mxu0 %v25020_v60 }
 0x721   : > { %20517 = vmatprep.subr.bf16.mxu0 %v25021_v49 }
 0x724   : > { %20519 = vmatpush3.bf16.msra.mxu0 %v25022_v32 }
 0x725   : > { %19170 = vmatmul.mubr.f32.vlgmr.msra.gmra.mrb[26].mxu1 %v23156_v4  ;;  %20521 = vmatprep.subr.bf16.mxu0 %v25023_v5 }
 0x726   : > { %20498 = vmatpush3.bf16.msra.mxu1 %v22695_v39  ;;  %19176 = vmatprep.mubr.msk.f32.mxu1 %vm21497_vm1, %v24972_v55  ;;  %v25104_v39 = vld [vmem:[#allocation89_spill] sm:$0xff] }
 0x727   : > { %20499 = vmatprep.subr.bf16.mxu1 %v24929_v1 }
 0x728   : > { %20523 = vmatpush3.bf16.msra.mxu0 %v25024_v34 }
 0x729   : > { %20525 = vmatprep.subr.bf16.mxu0 %v25025_v18 }
 0x72c   : > { %20527 = vmatpush3.bf16.msra.mxu0 %v25026_v45 }
 0x72d   : > { %19177 = vmatmul.mubr.f32.vlgmr.msra.gmra.mrb[26].mxu1 %v6797_v6  ;;  %20529 = vmatprep.subr.bf16.mxu0 %v25027_v43  ;;  %v25097_v6 = vld [vmem:[#allocation109_spill] sm:$0xff] }
 0x72e   : > { %20501 = vmatpush3.bf16.msra.mxu1 %v22591_v9  ;;  %19183 = vmatprep.mubr.msk.f32.mxu1 %vm21497_vm1, %v24972_v55 }
 0x72f   : > { %20502 = vmatprep.subr.bf16.mxu1 %v24929_v1 }
 0x730   : > { %20531 = vmatpush3.bf16.msra.mxu0 %v25028_v26 }
 0x731   : > { %20533 = vmatprep.subr.bf16.mxu0 %v25029_v54 }
 0x734   : > { %20535 = vmatpush3.bf16.msra.mxu0 %v25030_v41 }
 0x735   : > { %19184 = vmatmul.mubr.f32.vlgmr.msra.gmra.mrb[26].mxu1 %v6798_v38  ;;  %20537 = vmatprep.subr.bf16.mxu0 %v25031_v20  ;;  %v25095_v38 = vld [vmem:[#allocation88_spill] sm:$0xff] }
 0x736   : > { %20504 = vmatpush3.bf16.msra.mxu1 %v22723_v29  ;;  %19190 = vmatprep.mubr.msk.f32.mxu1 %vm21497_vm1, %v24972_v55  ;;  %v25103_v29 = vld [vmem:[#allocation117_spill] sm:$0xff] }
 0x737   : > { %20505 = vmatprep.subr.bf16.mxu1 %v24929_v1 }
 0x738   : > { %20539 = vmatpush3.bf16.msra.mxu0 %v25032_v24 }
 0x739   : > { %20573 = vmatprep.subr.bf16.mxu0 %v25094_v11  ;;  %v25101_v11 = vld [vmem:[#allocation114_spill] sm:$0xff] }
 0x73d   : > { %19191 = vmatmul.mubr.f32.vlgmr.msra.gmra.mrb[26].mxu1 %v23156_v4 }
 0x73e   : > { %20507 = vmatpush3.bf16.msra.mxu1 %v22591_v9  ;;  %19197 = vmatprep.mubr.msk.f32.mxu1 %vm21497_vm1, %v24972_v55 }
 0x73f   : > { %20541 = vmatprep.subr.bf16.mxu1 %v25095_v38  ;;  %v25105_v38 = vld [vmem:[#allocation90_spill] sm:$0xff] }
 0x745   : > { %19198 = vmatmul.mubr.f32.vlgmr.msra.gmra.mrb[26].mxu1 %v23156_v4  ;;  %v25106_v4 = vld [vmem:[#allocation91_spill] sm:$0xff] }
 0x746   : > { %20543 = vmatpush3.bf16.msra.mxu1 %v25096_v53  ;;  %v25107_v53 = vld [vmem:[#allocation92_spill] sm:$0xff] }
 0x747   : > { %20545 = vmatprep.subr.bf16.mxu1 %v25097_v6  ;;  %v25108_v6 = vld [vmem:[#allocation93_spill] sm:$0xff] }
 0x74a   : > { %20547 = vmatpush3.bf16.msra.mxu1 %v25098_v2  ;;  %v25109_v2 = vld [vmem:[#allocation94_spill] sm:$0xff] }
 0x74b   : > { %20549 = vmatprep.subr.bf16.mxu1 %v25099_v10  ;;  %v25110_v10 = vld [vmem:[#allocation95_spill] sm:$0xff] }
 0x74e   : > { %20551 = vmatpush3.bf16.msra.mxu1 %v25100_v57 }
 0x74f   : > { %20553 = vmatprep.subr.bf16.mxu1 %v25101_v11 }
 0x752   : > { %20555 = vmatpush3.bf16.msra.mxu1 %v25102_v35 }
 0x753   : > { %20557 = vmatprep.subr.bf16.mxu1 %v25103_v29 }
 0x756   : > { %20559 = vmatpush3.bf16.msra.mxu1 %v25104_v39 }
 0x757   : > { %20561 = vmatprep.subr.bf16.mxu1 %v25105_v38 }
 0x75a   : > { %20563 = vmatpush3.bf16.msra.mxu1 %v25106_v4 }
 0x75b   : > { %20565 = vmatprep.subr.bf16.mxu1 %v25107_v53 }
 0x75e   : > { %20567 = vmatpush3.bf16.msra.mxu1 %v25108_v6 }
 0x75f   : > { %20569 = vmatprep.subr.bf16.mxu1 %v25109_v2 }
 0x762   : > { %20571 = vmatpush3.bf16.msra.mxu1 %v25110_v10 }
 0x763   : > { %20605 = vmatprep.subr.bf16.mxu1 %v25015_v17 }
 0x7a4   : > { %v18277_v57 = vpop.f32.mrb[28].mxu0 }
 0x7a5   : > { %v18278_v35 = vpop.f32.mrb[29].mxu0 }
 0x7a6   : > { %v18279_v11 = vadd.f32 %v18278_v35, %v18277_v57 }
 0x7ac   : > { %v18242_v29 = vpop.f32.mrb[20].mxu1 }
 0x7ad   : > { %v18243_v8 = vpop.f32.mrb[21].mxu1 }
 0x7ae   : > { %v18244_v39 = vadd.f32 %v18243_v8, %v18242_v29  ;;  %v25112_v8 = vld [vmem:[#allocation99_spill] sm:$0xff] }
 0x7b0   : > { %v6208_v9 = vadd.f32 %v18279_v11, %v18244_v39  ;;  %v25113_v39 = vld [vmem:[#allocation104_spill] sm:$0xff] }
 0x7c4   : > { %v18347_v38 = vpop.f32.mrb[30].mxu0 }
 0x7c5   : > { %v18348_v13 = vpop.f32.mrb[31].mxu0 }
 0x7c6   : > { %v18349_v4 = vadd.f32 %v18348_v13, %v18347_v38 }
 0x7cc   : > { %v18312_v1 = vpop.f32.mrb[22].mxu1 }
 0x7cd   : > { %v18313_v53 = vpop.f32.mrb[23].mxu1 }
 0x7ce   : > { %v18314_v0 = vadd.f32 %v18313_v53, %v18312_v1 }
 0x7d0   : > { %v6346_v6 = vadd.f32 %v18314_v0, %v6208_v9 }
 0x7d2   : > { %v6454_v47 = vadd.f32 %v18349_v4, %v6346_v6 }
 0x7e5   : > { %v18417_v2 = vpop.f32.mrb[32].mxu0 }
 0x7e6   : > { %v18418_v55 = vpop.f32.mrb[33].mxu0 }
 0x7e7   : > { %v18419_v10 = vadd.f32 %v18418_v55, %v18417_v2 }
 0x7e9   : > { %v23242_v61 = vpop.f32.mrb[34].mxu0 }
 0x7ea   : > { %v7338_v57 = vmul.f32 %v23242_v61, %v25111_v37  ;;  %v23246_v35 = vpop.f32.mrb[35].mxu0 }
 0x7eb   : > { %v7339_v11 = vmul.f32 %v23246_v35, %v25112_v8 }
 0x7ec   : > { %v7341_v13 = vsub.f32 %v25038_v28, %v7338_v57  ;;  %v18382_v29 = vpop.f32.mrb[24].mxu1 }
 0x7ed   : > { %v7342_v1 = vsub.f32 %v25113_v39, %v7339_v11  ;;  %v23252_v9 = vpop.f32.mrb[36].mxu0  ;;  %v18383_v0 = vpop.f32.mrb[25].mxu1 }
 0x7ee   : > { %v7344_v55 = vmul.f32 %v7341_v13, %v23242_v61  ;;  %v18384_v38 = vadd.f32 %v18383_v0, %v18382_v29  ;;  %v19204_v4 = vpop.f32.mrb[37].mxu0 }
 0x7ef   : > { %v7345_v53 = vmul.f32 %v7342_v1, %v23246_v35 }
 0x7f0   : > { %v23256_v37 = vand.u32 4294901760, %v7344_v55  ;;  %v6622_v6 = vadd.f32 %v18384_v38, %v6454_v47 }
 0x7f1   : > { %v7446_v2 = vand.u32 4294901760, %v7345_v53 }
 0x7f2   : > { %v7453_v8 = vsub.f32 %v7344_v55, %v23256_v37  ;;  %v6726_v44 = vadd.f32 %v18419_v10, %v6622_v6  ;;  %v8673_v6 = vpop.permute.xlu0 %8672 }
 0x7f3   : > { %v7447_v28 = vsub.f32 %v7345_v53, %v7446_v2  ;;  %7687 = vmatprep.mubr.f32.mxu1 %v7446_v2 }
 0x7f4   : > { %7689 = vmatmul.mubr.f32.vlgmr.msra.gmra.mrb[28].mxu1 %v23256_v37  ;;  %v7454_v57 = vand.u32 4294901760, %v7453_v8 }
 0x7f5   : > { %20607 = vmatpush3.bf16.msra.mxu1 %v25017_v36  ;;  %v7448_v11 = vand.u32 4294901760, %v7447_v28 }
 0x7f6   : > { %20609 = vmatprep.subr.bf16.mxu1 %v25019_v7  ;;  %v7455_v13 = vsub.f32 %v7453_v8, %v7454_v57 }
 0x7f7   : > { %7931 = vmatprep.mubr.f32.mxu1 %v7448_v11  ;;  %v7449_v29 = vsub.f32 %v7447_v28, %v7448_v11 }
 0x7f8   : > { %v7456_v39 = vand.u32 4294901760, %v7455_v13 }
 0x7f9   : > { %20611 = vmatpush3.bf16.msra.mxu1 %v25020_v60  ;;  %v7450_v47 = vand.u32 4294901760, %v7449_v29  ;;  %v25127_v29 = vld [vmem:[#allocation96_spill] sm:$0xff] }
 0x7fa   : > { %20613 = vmatprep.subr.bf16.mxu1 %v25021_v49 }
 0x7fb   : > { %7451 = vmatprep.mubr.f32.mxu0 %v7450_v47  ;;  %v25128_v47 = vld [vmem:[#allocation97_spill] sm:$0xff] }
 0x7fc   : > { %7457 = vmatmul.mubr.f32.vlgmr.msra.gmra.mrb[38].mxu0 %v7456_v39  ;;  %v25129_v39 = vsub.f32 %v25127_v29, %v25128_v47 }
 0x7fd   : > { %20575 = vmatpush3.bf16.msra.mxu0 %v22737_v56  ;;  %20615 = vmatpush3.bf16.msra.mxu1 %v25022_v32 }
 0x7fe   : > { %7824 = vmatprep.mubr.f32.mxu0 %v7447_v28  ;;  %20577 = vmatprep.subr.bf16.mxu0 %v22743_v40 }
 0x7ff   : > { %20617 = vmatprep.subr.bf16.mxu1 %v25023_v5 }
 0x801   : > { %20579 = vmatpush3.bf16.msra.mxu0 %v22750_v59  ;;  %20619 = vmatpush3.bf16.msra.mxu1 %v25024_v34 }
 0x802   : > { %20581 = vmatprep.subr.bf16.mxu0 %v22755_v62  ;;  %20621 = vmatprep.subr.bf16.mxu1 %v25025_v18  ;;  %v7340_v62 = vmul.f32 %v23252_v9, %v25044_v58 }
 0x805   : > { %20583 = vmatpush3.bf16.msra.mxu0 %v22764_v15  ;;  %20623 = vmatpush3.bf16.msra.mxu1 %v25026_v45  ;;  %v7343_v15 = vsub.f32 0.0, %v7340_v62 }
 0x806   : > { %20585 = vmatprep.subr.bf16.mxu0 %v22770_v46  ;;  %20625 = vmatprep.subr.bf16.mxu1 %v25027_v43 }
 0x807   : > { %v7346_v46 = vmul.f32 %v7343_v15, %v23252_v9 }
 0x809   : > { %20587 = vmatpush3.bf16.msra.mxu0 %v22776_v51  ;;  %20627 = vmatpush3.bf16.msra.mxu1 %v25028_v26  ;;  %v7348_v51 = vsel %vm1219_vm0, %v7346_v46, 0 }
 0x80a   : > { %20589 = vmatprep.subr.bf16.mxu0 %v22781_v27  ;;  %20629 = vmatprep.subr.bf16.mxu1 %v25029_v54  ;;  %v8279_v27 = vand.u32 4294901760, %v7348_v51 }
 0x80d   : > { %20591 = vmatpush3.bf16.msra.mxu0 %v22790_v12  ;;  %20631 = vmatpush3.bf16.msra.mxu1 %v25030_v41  ;;  %v25114_v12 = vld [vmem:[#allocation69_spill] sm:$0xff] }
 0x80e   : > { %20593 = vmatprep.subr.bf16.mxu0 %v22796_v16  ;;  %20633 = vmatprep.subr.bf16.mxu1 %v25031_v20  ;;  %v25115_v16 = vld [vmem:[#allocation72_spill] sm:$0xff] }
 0x811   : > { %20595 = vmatpush3.bf16.msra.mxu0 %v22805_v25  ;;  %20635 = vmatpush3.bf16.msra.mxu1 %v25032_v24  ;;  %v8280_v25 = vsub.f32 %v7348_v51, %v8279_v27 }
 0x812   : > { %20597 = vmatprep.subr.bf16.mxu0 %v22811_v63  ;;  %20669 = vmatprep.subr.bf16.mxu1 %v25015_v17  ;;  %v25116_v63 = vld [vmem:[#allocation75_spill] sm:$0xff] }
 0x813   : > { %v8281_v17 = vand.u32 4294901760, %v8280_v25 }
 0x814   : > { %7935 = vmatmul.mubr.f32.vlgmr.msra.gmra.mrb[30].mxu1 %v7454_v57 }
 0x815   : > { %20599 = vmatpush3.bf16.msra.mxu0 %v22818_v3  ;;  %20671 = vmatpush3.bf16.msra.mxu1 %v25017_v36  ;;  %v25117_v3 = vmov 0.0   ;;  %v23328_v36 = vld [vmem:[%s24851_s4] sm:$0xf]  ;;  %s1138_s4 = sand.u32 1, %s21434_s1  }
 0x816   : > { %8205 = vmatprep.mubr.f32.mxu1 %v7446_v2  ;;  %20601 = vmatprep.subr.bf16.mxu0 %v22824_v48  ;;  %v25118_v48 = vld [vmem:[#allocation80_spill] sm:$0xff]  ;;  %s17615_s5 = sshll.u32 %s1138_s4, 3 }
 0x817   : > { %20673 = vmatprep.subr.bf16.mxu1 %v25019_v7  ;;  %v25120_v7 = vmov 0.0|0.0  }
 0x818   : > { %v7184_v56 = vpop.f32.mrb[26].mxu1 }
 0x819   : > { %20603 = vmatpush3.bf16.msra.mxu0 %v22830_v22  ;;  %20675 = vmatpush3.bf16.msra.mxu1 %v25020_v60  ;;  %v21011_v40 = vadd.f32 %v7184_v56, %v6726_v44  ;;  %v19199_v59 = vpop.f32.mrb[27].mxu1  ;;  %v25119_v22 = vld [vmem:[#allocation82_spill] sm:$0xff]  ;;  %v25121_v60 = vld [vmem:[#allocation83_spill] sm:$0xff] }
 0x81a   : > { %20637 = vmatprep.subr.bf16.mxu0 %v25041_v21  ;;  %20677 = vmatprep.subr.bf16.mxu1 %v25021_v49  ;;  %v8282_v49 = vsub.f32 %v8280_v25, %v8281_v17 }
 0x81b   : > { %8676 = vrot.lane.b32.xlu1 %v21011_v40, %s21499_s0  ;;  %s21501_s0 = smov 120  }
 0x81c   : > { %7827 = vmatmul.mubr.f32.vlgmr.msra.gmra.mrb[40].mxu0 %v7453_v8  ;;  %v25126_v8 = vld [vmem:[#allocation66_spill] sm:$0xff] }
 0x81d   : > { %20639 = vmatpush3.bf16.msra.mxu0 %v25042_v23  ;;  %8101 = vmatprep.mubr.f32.mxu0 %v7446_v2  ;;  %v8683_v28 = vsel %vm2528_vm6, %v25126_v8, %v8673_v6 }
 0x81e   : > { %20679 = vmatpush3.bf16.msra.mxu1 %v25022_v32  ;;  %20641 = vmatprep.subr.bf16.mxu0 %v25043_v33  ;;  %v25122_v32 = vld [vmem:[#allocation106_spill] sm:$0xff] }
 0x81f   : > { %20681 = vmatprep.subr.bf16.mxu1 %v25023_v5  ;;  %v8283_v5 = vand.u32 4294901760, %v8282_v49 }
 0x821   : > { %20643 = vmatpush3.bf16.msra.mxu0 %v25045_v30 }
 0x822   : > { %20683 = vmatpush3.bf16.msra.mxu1 %v25024_v34  ;;  %20645 = vmatprep.subr.bf16.mxu0 %v25078_v42  ;;  %v25123_v34 = vld [vmem:[#allocation111_spill] sm:$0xff] }
 0x823   : > { %20685 = vmatprep.subr.bf16.mxu1 %v25025_v18  ;;  %v25124_v18 = vld [vmem:[#allocation115_spill] sm:$0xff] }
 0x825   : > { %20647 = vmatpush3.bf16.msra.mxu0 %v25079_v14 }
 0x826   : > { %20687 = vmatpush3.bf16.msra.mxu1 %v25026_v45  ;;  %20649 = vmatprep.subr.bf16.mxu0 %v25080_v31  ;;  %v25125_v45 = vld [vmem:[#allocation118_spill] sm:$0xff] }
 0x827   : > { %20689 = vmatprep.subr.bf16.mxu1 %v25027_v43 }
 0x829   : > { %20651 = vmatpush3.bf16.msra.mxu0 %v25081_v19 }
 0x82a   : > { %20691 = vmatpush3.bf16.msra.mxu1 %v25028_v26  ;;  %20653 = vmatprep.subr.bf16.mxu0 %v25082_v52 }
 0x82b   : > { %20693 = vmatprep.subr.bf16.mxu1 %v25029_v54 }
 0x82d   : > { %20655 = vmatpush3.bf16.msra.mxu0 %v25083_v50 }
 0x82e   : > { %20695 = vmatpush3.bf16.msra.mxu1 %v25030_v41  ;;  %20657 = vmatprep.subr.bf16.mxu0 %v25114_v12  ;;  %v8778_v12 = vld [vmem:[%s25130_s8 + $0x8] sm:$0xff] }
 0x82f   : > { %20697 = vmatprep.subr.bf16.mxu1 %v25031_v20 }
 0x831   : > { %20659 = vmatpush3.bf16.msra.mxu0 %v25115_v16 }
 0x832   : > { %20699 = vmatpush3.bf16.msra.mxu1 %v25032_v24  ;;  %20661 = vmatprep.subr.bf16.mxu0 %v25116_v63 }
 0x833   : > { %19247 = vmatprep.subr.mxu1 %v25117_v3 }
 0x835   : > { %8207 = vmatmul.mubr.f32.vlgmr.msra.gmra.mrb[32].mxu1 %v23256_v37  ;;  %20663 = vmatpush3.bf16.msra.mxu0 %v25118_v48 }
 0x836   : > { %20665 = vmatprep.subr.bf16.mxu0 %v25119_v22  ;;  %19248 = vmatpush3.msk.msra.mxu1 %vm2532_vm5, %v23328_v36 }
 0x837   : > { %19249 = vmatprep.mubr.msk.f32.mxu1 %vm21497_vm1, %v25117_v3  ;;  %20718 = vmatprep.subr.bf16.mxu1 %v25120_v7 }
 0x839   : > { %20667 = vmatpush3.bf16.msra.mxu0 %v25121_v60 }
 0x83a   : > { %20700 = vmatprep.subr.bf16.mxu0 %v25120_v7 }
 0x83c   : > { %8103 = vmatmul.mubr.f32.vlgmr.msra.gmra.mrb[42].mxu0 %v23256_v37 }
 0x83d   : > { %20702 = vmatpush3.bf16.msra.mxu0 %v25122_v32  ;;  %19209 = vmatprep.mubr.msk.f32.mxu0 %vm21497_vm1, %v25117_v3 }
 0x83e   : > { %20703 = vmatprep.subr.bf16.mxu0 %v25120_v7 }
 0x840   : > { %19210 = vmatmul.mubr.f32.vlgmr.msra.gmra.mrb[44].mxu0 %v8283_v5 }
 0x841   : > { %20705 = vmatpush3.bf16.msra.mxu0 %v25123_v34  ;;  %19216 = vmatprep.mubr.msk.f32.mxu0 %vm21497_vm1, %v25117_v3 }
 0x842   : > { %20706 = vmatprep.subr.bf16.mxu0 %v25120_v7 }
 0x848   : > { %19217 = vmatmul.mubr.f32.vlgmr.msra.gmra.mrb[44].mxu0 %v8279_v27 }
 0x849   : > { %20708 = vmatpush3.bf16.msra.mxu0 %v25124_v18  ;;  %19223 = vmatprep.mubr.msk.f32.mxu0 %vm21497_vm1, %v25117_v3 }
 0x84a   : > { %20709 = vmatprep.subr.bf16.mxu0 %v25120_v7 }
 0x850   : > { %19224 = vmatmul.mubr.f32.vlgmr.msra.gmra.mrb[44].mxu0 %v8280_v25  ;;  %v8786_v25 = vand.u32 4294901760, %v8778_v12 }
 0x851   : > { %20711 = vmatpush3.bf16.msra.mxu0 %v25122_v32  ;;  %19230 = vmatprep.mubr.msk.f32.mxu0 %vm21497_vm1, %v25117_v3 }
 0x852   : > { %20712 = vmatprep.subr.bf16.mxu0 %v25120_v7  ;;  %v8868_v22 = vsub.f32 %v8778_v12, %v8786_v25 }
 0x854   : > { %v8869_v60 = vand.u32 4294901760, %v8868_v22 }
 0x858   : > { %19231 = vmatmul.mubr.f32.vlgmr.msra.gmra.mrb[44].mxu0 %v8281_v17 }
 0x859   : > { %20714 = vmatpush3.bf16.msra.mxu0 %v25125_v45  ;;  %19237 = vmatprep.mubr.msk.f32.mxu0 %vm21497_vm1, %v25117_v3 }
 0x85a   : > { %20715 = vmatprep.subr.bf16.mxu0 %v25120_v7 }
 0x860   : > { %19238 = vmatmul.mubr.f32.vlgmr.msra.gmra.mrb[44].mxu0 %v8279_v27 }
 0x861   : > { %20717 = vmatpush3.bf16.msra.mxu0 %v25122_v32  ;;  %19244 = vmatprep.mubr.msk.f32.mxu0 %vm21497_vm1, %v25117_v3  ;;  %v8870_v32 = vsub.f32 %v8868_v22, %v8869_v60 }
 0x862   : > { %19294 = vmatprep.subr.mxu0 %v25117_v3 }
 0x863   : > { %v8871_v34 = vand.u32 4294901760, %v8870_v32  ;;  %v23470_v32 = vld [vmem:[%s22051_s23] sm:$0xff]  ;;  %s25133_s23 = sld [smem:[#allocation18_spill]] }
 0x868   : > { %19245 = vmatmul.mubr.f32.vlgmr.msra.gmra.mrb[44].mxu0 %v8279_v27  ;;  %v8777_v27 = vld [vmem:[%s25130_s8] sm:$0xff]  ;;  %s17391_s8 = scalar_lea.sflag [#allocation3], %s1138_s4 }
 0x869   : > { %19296 = vmatprep.mubr.msk.f32.mxu0 %vm21497_vm1, %v25117_v3  ;;  %v8783_v16 = vand.u32 4294901760, %v8777_v27 }
 0x86b   : > { %v20719_v63 = vpack.c.bf16 %v8786_v25, %v8783_v16  ;;  %v8861_v48 = vsub.f32 %v8777_v27, %v8783_v16 }
 0x86d   : > { %v8862_v17 = vand.u32 4294901760, %v8861_v48  ;;  %v20725_v45 = vpack.c.bf16 %v8868_v22, %v8861_v48 }
 0x86f   : > { %v8863_v49 = vsub.f32 %v8861_v48, %v8862_v17 }
 0x871   : > { %v8864_v5 = vand.u32 4294901760, %v8863_v49 }
 0x873   : > { %v20722_v18 = vpack.c.bf16 %v8871_v34, %v8864_v5 }
 0x88d   : > { %v8677_v2 = vpop.permute.xlu1 %8676 }
 0x88e   : > { %v8684_v57 = vsel %vm2694_vm8, %v8683_v28, %v8677_v2 }
 0x8c7   : > { %v18507_v43 = vpop.f32.mrb[28].mxu1 }
 0x8c8   : > { %v18508_v26 = vpop.f32.mrb[29].mxu1 }
 0x8c9   : > { %v18509_v54 = vadd.f32 %v18508_v26, %v18507_v43  ;;  %v20731_v43 = vpack.c.bf16 %v8869_v60, %v8862_v17 }
 0x8cf   : > { %v18472_v41 = vpop.f32.mrb[38].mxu0 }
 0x8d0   : > { %v18473_v20 = vpop.f32.mrb[39].mxu0 }
 0x8d1   : > { %v18474_v24 = vadd.f32 %v18473_v20, %v18472_v41 }
 0x8d3   : > { %v7691_v21 = vadd.f32 %v18509_v54, %v18474_v24 }
 0x8e7   : > { %v18577_v23 = vpop.f32.mrb[30].mxu1 }
 0x8e8   : > { %v18578_v33 = vpop.f32.mrb[31].mxu1 }
 0x8e9   : > { %v18579_v58 = vadd.f32 %v18578_v33, %v18577_v23 }
 0x8ef   : > { %v18542_v30 = vpop.f32.mrb[40].mxu0 }
 0x8f0   : > { %v18543_v42 = vpop.f32.mrb[41].mxu0 }
 0x8f1   : > { %v18544_v14 = vadd.f32 %v18543_v42, %v18542_v30 }
 0x8f3   : > { %v7829_v31 = vadd.f32 %v18544_v14, %v7691_v21 }
 0x8f5   : > { %v7937_v19 = vadd.f32 %v18579_v58, %v7829_v31 }
 0x908   : > { %v18647_v52 = vpop.f32.mrb[32].mxu1 }
 0x909   : > { %v18648_v50 = vpop.f32.mrb[33].mxu1 }
 0x90a   : > { %v18649_v44 = vadd.f32 %v18648_v50, %v18647_v52 }
 0x90f   : > { %v18612_v10 = vpop.f32.mrb[42].mxu0 }
 0x910   : > { %v18613_v1 = vpop.f32.mrb[43].mxu0 }
 0x911   : > { %v18614_v0 = vadd.f32 %v18613_v1, %v18612_v10  ;;  %v2612_v10 = vsel %vm2532_vm5, %v23328_v36, 0 }
 0x912   : > { %v9249_v1 = vand.u32 4294901760, %v2612_v10 }
 0x913   : > { %v8105_v55 = vadd.f32 %v18614_v0, %v7937_v19 }
 0x914   : > { %19295 = vmatpush3.msra.mxu0 %v9249_v1 }
 0x915   : > { %v8209_v38 = vadd.f32 %v18649_v44, %v8105_v55  ;;  %19299 = vmatprep.subr.mxu0 %v25117_v3 }
 0x93b   : > { %v8667_v4 = vpop.f32.mrb[44].mxu0 }
 0x93c   : > { %v21012_v53 = vadd.f32 %v8667_v4, %v8209_v38  ;;  %v19246_v37 = vpop.f32.mrb[45].mxu0 }
 0x93d   : > { %v9326_v37 = vsub.f32 %v2612_v10, %v9249_v1 }
 0x93e   : > { %8680 = vrot.lane.b32.xlu0 %v21012_v53, %s21500_s6  ;;  %s21502_s6 = smov 124  }
 0x93f   : > { %v9327_v8 = vand.u32 4294901760, %v9326_v37 }
 0x9b0   : > { %v8681_v11 = vpop.permute.xlu0 %8680 }
 0x9b1   : > { %v8686_v13 = vsel %vm8685_vm12, %v8684_v57, %v8681_v11  ;;  %v9328_v11 = vsub.f32 %v9326_v37, %v9327_v8 }
 0x9b2   : > { %v8687_v56 = vadd.f32 %v8686_v13, %v25129_v39 }
 0x9b3   : > { %v9329_v29 = vand.u32 4294901760, %v9328_v11 }
 0x9b4   : > { %8693 = vrot.lane.b32.xlu0 %v8687_v56, %s21501_s0  ;;  %8689 = vrot.lane.b32.xlu1 %v8687_v56, %s21502_s6 }
 0x9b8   : > { %8697 = vrot.lane.b32.xlu1 %v8687_v56, %s24799_s3  ;;  %s25131_s3 = sld [smem:[#allocation17_spill]] }
 0x9be   : > { %v9695_v14 = vld [vmem:[%s25131_s3] sm:$0xff]  ;;  %v9696_v39 = vld [vmem:[%s25131_s3 + $0x8] sm:$0xf]  ;;  %s25132_s3 = smov 116  }
 0x9bf   : > { %v9699_v31 = vcombine.high %v9695_v14, %v9695_v14  ;;  %v9703_v50 = vsel %vm2532_vm5, %v9695_v14, 0 }
 0x9c0   : > { %v23403_v44 = vand.u32 4294901760, %v9703_v50 }
 0x9c1   : > { %v9705_v19 = vsel %vm2532_vm5, %v9699_v31, 0 }
 0x9c2   : > { %v23397_v52 = vand.u32 4294901760, %v9705_v19 }
 0xa26   : > { %v8690_v40 = vpop.permute.xlu1 %8689  ;;  %v8694_v62 = vpop.permute.xlu0 %8693 }
 0xa27   : > { %v8692_v59 = vmax.f32 %v8687_v56, %v8690_v40 }
 0xa29   : > { %v8696_v15 = vmax.f32 %v8692_v59, %v8694_v62  ;;  %v23435_v59 = vsub.f32 %v9705_v19, %v23397_v52 }
 0xa2a   : > { %v8698_v46 = vpop.permute.xlu1 %8697 }
 0xa2b   : > { %v8700_v51 = vmax.f32 %v8696_v15, %v8698_v46  ;;  %v23438_v62 = vand.u32 4294901760, %v23435_v59 }
 0xa2d   : > { %19250 = vmatmul.mubr.msk.f32.vlgmr.msra.gmra.mrb[34].mxu1 %vm2528_vm6, %v8700_v51  ;;  %v9790_v15 = vsub.f32 %v23435_v59, %v23438_v62  ;;  %v23446_v51 = vsub.f32 %v9703_v50, %v23403_v44 }
 0xa2e   : > { %19256 = vmatprep.mubr.msk.f32.mxu1 %vm21497_vm1, %v25117_v3  ;;  %20720 = vmatpush3.bf16.msra.mxu1 %v20719_v63 }
 0xa2f   : > { %20721 = vmatprep.subr.bf16.mxu1 %v25120_v7  ;;  %v23442_v46 = vand.u32 4294901760, %v9790_v15  ;;  %v23456_v48 = vand.u32 4294901760, %v23446_v51 }
 0xa31   : > { %v9796_v49 = vsub.f32 %v23446_v51, %v23456_v48 }
 0xb00   : > { %v8770_v26 = vpop.f32.mrb[34].mxu1 }
 0xb01   : > { %v8774_v54 = vsub.f32 %v8687_v56, %v8770_v26  ;;  %v19251_v41 = vpop.f32.mrb[35].mxu1  ;;  %v9707_v56 = vsel %vm2532_vm5, %v9696_v39, 0 }
 0xb02   : > { %v23428_v40 = vand.u32 4294901760, %v9707_v56 }
 0xb03   : > { %v8775_v20 = vmul.f32 1.442695, %v8774_v54  ;;  %v10626_v54 = vld [vmem:[%s25133_s23] sm:$0xf]  ;;  %s25145_s23 = sld [smem:[#allocation20_spill]] }
 0xb04   : > { %v23449_v12 = vsub.f32 %v9707_v56, %v23428_v40  ;;  %v10628_v41 = vsel %vm2532_vm5, %v10626_v54, 0  ;;  %v25135_v56 = vld [vmem:[#allocation100_spill] sm:$0xff] }
 0xb05   : > { %21356 = vpow2.f32 %v8775_v20  ;;  %v23516_v20 = vand.u32 4294901760, %v10628_v41 }
 0xb06   : > { %v23461_v17 = vand.u32 4294901760, %v23449_v12 }
 0xb08   : > { %v10254_v34 = vsub.f32 %v23449_v12, %v23461_v17 }
 0xb0a   : > { %v23483_v26 = vand.u32 4294901760, %v10254_v34 }
 0xb0f   : > { %v23379_v24 = vpop.eup %21356 }
 0xb10   : > { %v8780_v21 = vsel %vm1219_vm0, %v23379_v24, 0 }
 0xb11   : > { %v8849_v23 = vand.u32 4294901760, %v8780_v21 }
 0xb13   : > { %v8850_v33 = vsub.f32 %v8780_v21, %v8849_v23 }
 0xb15   : > { %v8851_v58 = vand.u32 4294901760, %v8850_v33 }
 0xb17   : > { %v8852_v30 = vsub.f32 %v8850_v33, %v8851_v58 }
 0xb19   : > { %v8853_v42 = vand.u32 4294901760, %v8852_v30 }
 0xb1b   : > { %19257 = vmatmul.mubr.f32.vlgmr.msra.gmra.mrb[36].mxu1 %v8853_v42 }
 0xb1c   : > { %20723 = vmatpush3.bf16.msra.mxu1 %v20722_v18  ;;  %19263 = vmatprep.mubr.msk.f32.mxu1 %vm21497_vm1, %v25117_v3 }
 0xb1d   : > { %20724 = vmatprep.subr.bf16.mxu1 %v25120_v7 }
 0xb23   : > { %19264 = vmatmul.mubr.f32.vlgmr.msra.gmra.mrb[36].mxu1 %v8849_v23 }
 0xb24   : > { %20726 = vmatpush3.bf16.msra.mxu1 %v20725_v45  ;;  %19270 = vmatprep.mubr.msk.f32.mxu1 %vm21497_vm1, %v25117_v3  ;;  %v23481_v45 = vand.u32 4294901760, %v9796_v49 }
 0xb25   : > { %20727 = vmatprep.subr.bf16.mxu1 %v25120_v7 }
 0xb2b   : > { %19271 = vmatmul.mubr.f32.vlgmr.msra.gmra.mrb[36].mxu1 %v8850_v33 }
 0xb2c   : > { %20729 = vmatpush3.bf16.msra.mxu1 %v20719_v63  ;;  %19277 = vmatprep.mubr.msk.f32.mxu1 %vm21497_vm1, %v25117_v3 }
 0xb2d   : > { %20730 = vmatprep.subr.bf16.mxu1 %v25120_v7 }
 0xb33   : > { %19278 = vmatmul.mubr.f32.vlgmr.msra.gmra.mrb[36].mxu1 %v8851_v58 }
 0xb34   : > { %20732 = vmatpush3.bf16.msra.mxu1 %v20731_v43  ;;  %19284 = vmatprep.mubr.msk.f32.mxu1 %vm21497_vm1, %v25117_v3 }
 0xb35   : > { %20733 = vmatprep.subr.bf16.mxu1 %v25120_v7 }
 0xb3b   : > { %19285 = vmatmul.mubr.f32.vlgmr.msra.gmra.mrb[36].mxu1 %v8849_v23 }
 0xb3c   : > { %20735 = vmatpush3.bf16.msra.mxu1 %v20719_v63  ;;  %19291 = vmatprep.mubr.msk.f32.mxu1 %vm21497_vm1, %v25117_v3 }
 0xb3d   : > { %9710 = vmatprep.subr.mxu1 %v23397_v52 }
 0xb43   : > { %19292 = vmatmul.mubr.f32.vlgmr.msra.gmra.mrb[36].mxu1 %v8849_v23 }
 0xb44   : > { %9712 = vmatpush1.msra.mxu1 %v23403_v44  ;;  %9775 = vmatprep.mubr.f32.mxu1 %v25117_v3 }
 0xb45   : > { %9792 = vmatprep.subr.mxu1 %v23442_v46 }
 0xc16   : > { %v9237_v0 = vpop.f32.mrb[36].mxu1 }
 0xc17   : > { %21358 = vrcp.f32 %v9237_v0  ;;  %v19293_v55 = vpop.f32.mrb[37].mxu1 }
 0xc21   : > { %v21359_v38 = vpop.eup %21358 }
 0xc22   : > { %v9242_v4 = vmul.f32 %v21359_v38, %v9237_v0 }
 0xc24   : > { %v9243_v53 = vsub.f32 2.0, %v9242_v4 }
 0xc26   : > { %v9244_v6 = vmul.f32 %v21359_v38, %v9243_v53 }
 0xc28   : > { %v9246_v2 = vsel %vm2528_vm6, %v9244_v6, 0 }
 0xc29   : > { %v9314_v28 = vand.u32 4294901760, %v9246_v2 }
 0xc2b   : > { %v9315_v57 = vsub.f32 %v9246_v2, %v9314_v28 }
 0xc2d   : > { %v9316_v13 = vand.u32 4294901760, %v9315_v57 }
 0xc2f   : > { %v9317_v36 = vsub.f32 %v9315_v57, %v9316_v13 }
 0xc31   : > { %v9318_v47 = vand.u32 4294901760, %v9317_v36 }
 0xc33   : > { %19297 = vmatmul.mubr.f32.vlgmr.msra.gmra.mrb[46].mxu0 %v9318_v47 }
 0xc34   : > { %19300 = vmatpush3.msra.mxu0 %v9329_v29  ;;  %19301 = vmatprep.mubr.msk.f32.mxu0 %vm21497_vm1, %v25117_v3 }
 0xc35   : > { %19304 = vmatprep.subr.mxu0 %v25117_v3 }
 0xc3b   : > { %19302 = vmatmul.mubr.f32.vlgmr.msra.gmra.mrb[46].mxu0 %v9314_v28 }
 0xc3c   : > { %19305 = vmatpush3.msra.mxu0 %v9326_v37  ;;  %19306 = vmatprep.mubr.msk.f32.mxu0 %vm21497_vm1, %v25117_v3 }
 0xc3d   : > { %19309 = vmatprep.subr.mxu0 %v25117_v3 }
 0xc43   : > { %19307 = vmatmul.mubr.f32.vlgmr.msra.gmra.mrb[46].mxu0 %v9315_v57 }
 0xc44   : > { %19310 = vmatpush3.msra.mxu0 %v9249_v1  ;;  %19311 = vmatprep.mubr.msk.f32.mxu0 %vm21497_vm1, %v25117_v3 }
 0xc45   : > { %19314 = vmatprep.subr.mxu0 %v25117_v3 }
 0xc4b   : > { %19312 = vmatmul.mubr.f32.vlgmr.msra.gmra.mrb[46].mxu0 %v9316_v13 }
 0xc4c   : > { %19315 = vmatpush3.msra.mxu0 %v9327_v8  ;;  %19316 = vmatprep.mubr.msk.f32.mxu0 %vm21497_vm1, %v25117_v3 }
 0xc4d   : > { %19319 = vmatprep.subr.mxu0 %v25117_v3 }
 0xc53   : > { %19317 = vmatmul.mubr.f32.vlgmr.msra.gmra.mrb[46].mxu0 %v9314_v28 }
 0xc54   : > { %19320 = vmatpush3.msra.mxu0 %v9249_v1  ;;  %19321 = vmatprep.mubr.msk.f32.mxu0 %vm21497_vm1, %v25117_v3 }
 0xc55   : > { %19324 = vmatprep.subr.mxu0 %v25117_v3 }
 0xc5b   : > { %19322 = vmatmul.mubr.f32.vlgmr.msra.gmra.mrb[46].mxu0 %v9314_v28 }
 0xc5c   : > { %19325 = vmatpush3.msra.mxu0 %v23428_v40  ;;  %19326 = vmatprep.mubr.msk.f32.mxu0 %vm21497_vm1, %v25117_v3 }
 0xc5d   : > { %19329 = vmatprep.subr.mxu0 %v25117_v3 }
 0xd2e   : > { %v9690_v27 = vpop.f32.mrb[46].mxu0 }
 0xd2f   : > { %v9694_v16 = vmul.f32 %v23379_v24, %v9690_v27  ;;  %v19323_v25 = vpop.f32.mrb[47].mxu0  ;;  %v23526_v24 = vsub.f32 %v10628_v41, %v23516_v20  ;;  %v25136_v27 = vld [vmem:[#allocation105_spill] sm:$0xff] }
 0xd31   : > { %v9701_v63 = vsel %vm2528_vm6, %v9694_v16, 0  ;;  %12594 = vrot.lane.b32.xlu1 %v9694_v16, %s21501_s0  ;;  %11151 = vrot.lane.b32.xlu0 %v9694_v16, %s21502_s6  ;;  %v23533_v21 = vand.u32 4294901760, %v23526_v24  ;;  %s21505_s6 = smov 104  }
 0xd32   : > { %v23458_v22 = vand.u32 4294901760, %v9701_v63 }
 0xd33   : > { %v10710_v23 = vsub.f32 %v23526_v24, %v23533_v21 }
 0xd34   : > { %v23464_v60 = vsub.f32 %v9701_v63, %v23458_v22 }
 0xd35   : > { %14037 = vrot.lane.b32.xlu1 %v9694_v16, %s25132_s3  ;;  %12518 = vrot.lane.b32.xlu0 %v23470_v32, %s21501_s0  ;;  %s21504_s3 = smov 112   ;;  %s25134_s0 = sld [smem:[#allocation19_spill]]  ;;  %v23550_v58 = vand.u32 4294901760, %v10710_v23 }
 0xd36   : > { %v23475_v5 = vand.u32 4294901760, %v23464_v60 }
 0xd38   : > { %v9779_v18 = vsub.f32 %v23464_v60, %v23475_v5 }
 0xd39   : > { %13961 = vrot.lane.b32.xlu0 %v23470_v32, %s21504_s3  ;;  %15404 = vrot.lane.b32.xlu1 %v23470_v32, %s21505_s6  ;;  %s25154_s6 = smov 64  }
 0xd3a   : > { %v9780_v43 = vand.u32 4294901760, %v9779_v18  ;;  %v25140_v18 = vld [vmem:[#allocation61_spill] sm:$0xff] }
 0xd3b   : > { %v23543_v33 = vld [vmem:[%s25134_s0] sm:$0xff]  ;;  %s25149_s0 = smov 96  }
 0xd3c   : > { %9781 = vmatmul.mubr.f32.vlgmr.msra.gmra.mrb[38].mxu1 %v9780_v43  ;;  %19327 = vmatmul.mubr.f32.vlgmr.msra.gmra.mrb[48].mxu0 %v9780_v43 }
 0xd3d   : > { %9798 = vmatpush1.msra.mxu1 %v23481_v45  ;;  %9861 = vmatprep.mubr.f32.mxu1 %v25117_v3 }
 0xd3e   : > { %19330 = vmatpush3.msra.mxu0 %v23483_v26  ;;  %19331 = vmatprep.mubr.msk.f32.mxu0 %vm21497_vm1, %v25117_v3 }
 0xd3f   : > { %9871 = vmatprep.subr.mxu1 %v23435_v59  ;;  %19334 = vmatprep.subr.mxu0 %v25117_v3 }
 0xd44   : > { %9863 = vmatmul.mubr.f32.vlgmr.msra.gmra.mrb[38].mxu1 %v23458_v22  ;;  %19332 = vmatmul.mubr.f32.vlgmr.msra.gmra.mrb[48].mxu0 %v23458_v22 }
 0xd45   : > { %9874 = vmatpush1.msra.mxu1 %v23446_v51  ;;  %9937 = vmatprep.mubr.f32.mxu1 %v25117_v3 }
 0xd46   : > { %19335 = vmatpush3.msra.mxu0 %v23449_v12  ;;  %19336 = vmatprep.mubr.msk.f32.mxu0 %vm21497_vm1, %v25117_v3 }
 0xd47   : > { %9947 = vmatprep.subr.mxu1 %v23397_v52  ;;  %19339 = vmatprep.subr.mxu0 %v25117_v3 }
 0xd4c   : > { %9940 = vmatmul.mubr.f32.vlgmr.msra.gmra.mrb[38].mxu1 %v23464_v60  ;;  %19337 = vmatmul.mubr.f32.vlgmr.msra.gmra.mrb[48].mxu0 %v23464_v60 }
 0xd4d   : > { %9949 = vmatpush1.msra.mxu1 %v23403_v44  ;;  %10012 = vmatprep.mubr.f32.mxu1 %v25117_v3 }
 0xd4e   : > { %19340 = vmatpush3.msra.mxu0 %v23428_v40  ;;  %19341 = vmatprep.mubr.msk.f32.mxu0 %vm21497_vm1, %v25117_v3 }
 0xd4f   : > { %10025 = vmatprep.subr.mxu1 %v23438_v62  ;;  %19344 = vmatprep.subr.mxu0 %v25117_v3 }
 0xd54   : > { %10016 = vmatmul.mubr.f32.vlgmr.msra.gmra.mrb[38].mxu1 %v23475_v5  ;;  %19342 = vmatmul.mubr.f32.vlgmr.msra.gmra.mrb[48].mxu0 %v23475_v5 }
 0xd55   : > { %10029 = vmatpush1.msra.mxu1 %v23456_v48  ;;  %10092 = vmatprep.mubr.f32.mxu1 %v25117_v3 }
 0xd56   : > { %19345 = vmatpush3.msra.mxu0 %v23461_v17  ;;  %19346 = vmatprep.mubr.msk.f32.mxu0 %vm21497_vm1, %v25117_v3 }
 0xd57   : > { %10101 = vmatprep.subr.mxu1 %v23397_v52  ;;  %19349 = vmatprep.subr.mxu0 %v25117_v3 }
 0xd5c   : > { %10094 = vmatmul.mubr.f32.vlgmr.msra.gmra.mrb[38].mxu1 %v23458_v22  ;;  %19347 = vmatmul.mubr.f32.vlgmr.msra.gmra.mrb[48].mxu0 %v23458_v22 }
 0xd5d   : > { %10103 = vmatpush1.msra.mxu1 %v23403_v44  ;;  %10166 = vmatprep.mubr.f32.mxu1 %v25117_v3 }
 0xd5e   : > { %19350 = vmatpush3.msra.mxu0 %v23428_v40  ;;  %19351 = vmatprep.mubr.msk.f32.mxu0 %vm21497_vm1, %v25117_v3 }
 0xd5f   : > { %19354 = vmatprep.subr.mxu1 %v25117_v3  ;;  %19384 = vmatprep.subr.mxu0 %v25117_v3 }
 0xd64   : > { %10168 = vmatmul.mubr.f32.vlgmr.msra.gmra.mrb[38].mxu1 %v23458_v22  ;;  %19352 = vmatmul.mubr.f32.vlgmr.msra.gmra.mrb[48].mxu0 %v23458_v22 }
 0xd65   : > { %19355 = vmatpush3.msra.mxu1 %v23516_v20  ;;  %19356 = vmatprep.mubr.msk.f32.mxu1 %vm21497_vm1, %v25117_v3 }
 0xd66   : > { %19359 = vmatprep.subr.mxu1 %v25117_v3  ;;  %19385 = vmatpush3.msra.mxu0 %v23543_v33 }
 0xd67   : > { %19386 = vmatprep.mubr.msk.f32.mxu0 %vm21497_vm1, %v25117_v3  ;;  %11156 = vmatprep.subr.mxu0 %v23397_v52 }
 0xd68   : > { %19357 = vmatmul.mubr.f32.vlgmr.msra.gmra.mrb[40].mxu1 %v9780_v43  ;;  %19387 = vmatmul.mubr.msk.f32.vlgmr.msra.gmra.mrb[50].mxu0 %vm2694_vm8, %v23470_v32 }
 0xd69   : > { %19360 = vmatpush3.msra.mxu1 %v23550_v58  ;;  %19361 = vmatprep.mubr.msk.f32.mxu1 %vm21497_vm1, %v25117_v3 }
 0xd6a   : > { %19364 = vmatprep.subr.mxu1 %v25117_v3  ;;  %11158 = vmatpush1.msra.mxu0 %v23403_v44 }
 0xd6b   : > { %11221 = vmatprep.mubr.f32.mxu0 %v25117_v3  ;;  %11238 = vmatprep.subr.mxu0 %v23442_v46 }
 0xd70   : > { %19362 = vmatmul.mubr.f32.vlgmr.msra.gmra.mrb[40].mxu1 %v23458_v22 }
 0xd71   : > { %19365 = vmatpush3.msra.mxu1 %v23526_v24  ;;  %19366 = vmatprep.mubr.msk.f32.mxu1 %vm21497_vm1, %v25117_v3 }
 0xd72   : > { %19369 = vmatprep.subr.mxu1 %v25117_v3 }
 0xd78   : > { %19367 = vmatmul.mubr.f32.vlgmr.msra.gmra.mrb[40].mxu1 %v23464_v60 }
 0xd79   : > { %19370 = vmatpush3.msra.mxu1 %v23516_v20  ;;  %19371 = vmatprep.mubr.msk.f32.mxu1 %vm21497_vm1, %v25117_v3 }
 0xd7a   : > { %19374 = vmatprep.subr.mxu1 %v25117_v3 }
 0xd80   : > { %19372 = vmatmul.mubr.f32.vlgmr.msra.gmra.mrb[40].mxu1 %v23475_v5 }
 0xd81   : > { %19375 = vmatpush3.msra.mxu1 %v23533_v21  ;;  %19376 = vmatprep.mubr.msk.f32.mxu1 %vm21497_vm1, %v25117_v3 }
 0xd82   : > { %19379 = vmatprep.subr.mxu1 %v25117_v3 }
 0xd88   : > { %19377 = vmatmul.mubr.f32.vlgmr.msra.gmra.mrb[40].mxu1 %v23458_v22 }
 0xd89   : > { %19380 = vmatpush3.msra.mxu1 %v23516_v20  ;;  %19381 = vmatprep.mubr.msk.f32.mxu1 %vm21497_vm1, %v25117_v3 }
 0xd8a   : > { %19389 = vmatprep.subr.mxu1 %v25117_v3 }
 0xd90   : > { %19382 = vmatmul.mubr.f32.vlgmr.msra.gmra.mrb[40].mxu1 %v23458_v22  ;;  %v25137_v22 = vld [vmem:[#allocation102_spill] sm:$0xff] }
 0xd91   : > { %19390 = vmatpush3.msra.mxu1 %v23428_v40  ;;  %19391 = vmatprep.mubr.msk.f32.mxu1 %vm21497_vm1, %v25117_v3 }
 0xd92   : > { %19394 = vmatprep.subr.mxu1 %v25117_v3 }
 0xda3   : > { %v11152_v30 = vpop.permute.xlu0 %11151  ;;  %v12595_v1 = vpop.permute.xlu1 %12594 }
 0xda4   : > { %v11153_v42 = vsel %vm2528_vm6, %v11152_v30, 0  ;;  %v12596_v0 = vsel %vm2528_vm6, %v12595_v1, 0  ;;  %v25141_v30 = vld [vmem:[#allocation70_spill] sm:$0xff] }
 0xda5   : > { %v23593_v14 = vand.u32 4294901760, %v11153_v42  ;;  %v23638_v55 = vand.u32 4294901760, %v12596_v0 }
 0xda7   : > { %v23596_v31 = vsub.f32 %v11153_v42, %v23593_v14  ;;  %v23645_v38 = vsub.f32 %v12596_v0, %v23638_v55  ;;  %v12519_v53 = vpop.permute.xlu0 %12518  ;;  %v14038_v2 = vpop.permute.xlu1 %14037  ;;  %v25143_v0 = vld [vmem:[#allocation73_spill] sm:$0xff] }
 0xda8   : > { %v14039_v8 = vsel %vm2528_vm6, %v14038_v2, 0 }
 0xda9   : > { %v23599_v19 = vand.u32 4294901760, %v23596_v31  ;;  %v23653_v4 = vand.u32 4294901760, %v23645_v38  ;;  %v23762_v28 = vand.u32 4294901760, %v14039_v8 }
 0xdab   : > { %v11225_v50 = vsub.f32 %v23596_v31, %v23599_v19  ;;  %v12668_v37 = vsub.f32 %v23645_v38, %v23653_v4  ;;  %v23770_v57 = vsub.f32 %v14039_v8, %v23762_v28  ;;  %v13962_v13 = vpop.permute.xlu0 %13961 }
 0xdad   : > { %v11226_v10 = vand.u32 4294901760, %v11225_v50  ;;  %v12669_v6 = vand.u32 4294901760, %v12668_v37  ;;  %v23778_v11 = vand.u32 4294901760, %v23770_v57 }
 0xdaf   : > { %11227 = vmatmul.mubr.f32.vlgmr.msra.gmra.mrb[52].mxu0 %v11226_v10  ;;  %19392 = vmatmul.mubr.f32.vlgmr.msra.gmra.mrb[42].mxu1 %v11226_v10  ;;  %v14111_v36 = vsub.f32 %v23770_v57, %v23778_v11 }
 0xdb0   : > { %19395 = vmatpush3.msra.mxu1 %v23483_v26  ;;  %11244 = vmatpush1.msra.mxu0 %v23481_v45 }
 0xdb1   : > { %11307 = vmatprep.mubr.f32.mxu0 %v25117_v3  ;;  %19396 = vmatprep.mubr.msk.f32.mxu1 %vm21497_vm1, %v25117_v3  ;;  %v14112_v29 = vand.u32 4294901760, %v14111_v36 }
 0xdb2   : > { %19399 = vmatprep.subr.mxu1 %v25117_v3  ;;  %11317 = vmatprep.subr.mxu0 %v23435_v59 }
 0xdb7   : > { %11309 = vmatmul.mubr.f32.vlgmr.msra.gmra.mrb[52].mxu0 %v23593_v14  ;;  %19397 = vmatmul.mubr.f32.vlgmr.msra.gmra.mrb[42].mxu1 %v23593_v14 }
 0xdb8   : > { %19400 = vmatpush3.msra.mxu1 %v23449_v12  ;;  %11320 = vmatpush1.msra.mxu0 %v23446_v51 }
 0xdb9   : > { %11383 = vmatprep.mubr.f32.mxu0 %v25117_v3  ;;  %19401 = vmatprep.mubr.msk.f32.mxu1 %vm21497_vm1, %v25117_v3 }
 0xdba   : > { %19404 = vmatprep.subr.mxu1 %v25117_v3  ;;  %11393 = vmatprep.subr.mxu0 %v23397_v52 }
 0xdbf   : > { %11386 = vmatmul.mubr.f32.vlgmr.msra.gmra.mrb[52].mxu0 %v23596_v31  ;;  %19402 = vmatmul.mubr.f32.vlgmr.msra.gmra.mrb[42].mxu1 %v23596_v31 }
 0xdc0   : > { %19405 = vmatpush3.msra.mxu1 %v23428_v40  ;;  %11395 = vmatpush1.msra.mxu0 %v23403_v44 }
 0xdc1   : > { %11458 = vmatprep.mubr.f32.mxu0 %v25117_v3  ;;  %19406 = vmatprep.mubr.msk.f32.mxu1 %vm21497_vm1, %v25117_v3 }
 0xdc2   : > { %19409 = vmatprep.subr.mxu1 %v25117_v3  ;;  %11471 = vmatprep.subr.mxu0 %v23438_v62 }
 0xdc7   : > { %11462 = vmatmul.mubr.f32.vlgmr.msra.gmra.mrb[52].mxu0 %v23599_v19  ;;  %19407 = vmatmul.mubr.f32.vlgmr.msra.gmra.mrb[42].mxu1 %v23599_v19 }
 0xdc8   : > { %19410 = vmatpush3.msra.mxu1 %v23461_v17  ;;  %11475 = vmatpush1.msra.mxu0 %v23456_v48 }
 0xdc9   : > { %11538 = vmatprep.mubr.f32.mxu0 %v25117_v3  ;;  %19411 = vmatprep.mubr.msk.f32.mxu1 %vm21497_vm1, %v25117_v3 }
 0xdca   : > { %19414 = vmatprep.subr.mxu1 %v25117_v3  ;;  %11547 = vmatprep.subr.mxu0 %v23397_v52 }
 0xdcf   : > { %11540 = vmatmul.mubr.f32.vlgmr.msra.gmra.mrb[52].mxu0 %v23593_v14  ;;  %19412 = vmatmul.mubr.f32.vlgmr.msra.gmra.mrb[42].mxu1 %v23593_v14 }
 0xdd0   : > { %19415 = vmatpush3.msra.mxu1 %v23428_v40  ;;  %11549 = vmatpush1.msra.mxu0 %v23403_v44 }
 0xdd1   : > { %11612 = vmatprep.mubr.f32.mxu0 %v25117_v3  ;;  %19416 = vmatprep.mubr.msk.f32.mxu1 %vm21497_vm1, %v25117_v3 }
 0xdd2   : > { %19449 = vmatprep.subr.mxu1 %v25117_v3  ;;  %19419 = vmatprep.subr.mxu0 %v25117_v3 }
 0xdd7   : > { %11614 = vmatmul.mubr.f32.vlgmr.msra.gmra.mrb[52].mxu0 %v23593_v14  ;;  %19417 = vmatmul.mubr.f32.vlgmr.msra.gmra.mrb[42].mxu1 %v23593_v14 }
 0xdd8   : > { %19450 = vmatpush3.msra.mxu1 %v23543_v33  ;;  %19420 = vmatpush3.msra.mxu0 %v23516_v20 }
 0xdd9   : > { %19421 = vmatprep.mubr.msk.f32.mxu0 %vm21497_vm1, %v25117_v3  ;;  %19451 = vmatprep.mubr.msk.f32.mxu1 %vm21497_vm1, %v25117_v3 }
 0xdda   : > { %12599 = vmatprep.subr.mxu1 %v23397_v52  ;;  %19424 = vmatprep.subr.mxu0 %v25117_v3 }
 0xddb   : > { %19422 = vmatmul.mubr.f32.vlgmr.msra.gmra.mrb[54].mxu0 %v11226_v10  ;;  %19452 = vmatmul.mubr.msk.f32.vlgmr.msra.gmra.mrb[44].mxu1 %vm2694_vm8, %v12519_v53 }
 0xddc   : > { %12601 = vmatpush1.msra.mxu1 %v23403_v44  ;;  %12664 = vmatprep.mubr.f32.mxu1 %v25117_v3 }
 0xddd   : > { %19425 = vmatpush3.msra.mxu0 %v23550_v58  ;;  %12681 = vmatprep.subr.mxu1 %v23442_v46 }
 0xdde   : > { %19426 = vmatprep.mubr.msk.f32.mxu0 %vm21497_vm1, %v25117_v3  ;;  %19429 = vmatprep.subr.mxu0 %v25117_v3 }
 0xddf   : > { %12670 = vmatmul.mubr.f32.vlgmr.msra.gmra.mrb[46].mxu1 %v12669_v6 }
 0xde0   : > { %12687 = vmatpush1.msra.mxu1 %v23481_v45  ;;  %12750 = vmatprep.mubr.f32.mxu1 %v25117_v3 }
 0xde1   : > { %12760 = vmatprep.subr.mxu1 %v23435_v59 }
 0xde3   : > { %19427 = vmatmul.mubr.f32.vlgmr.msra.gmra.mrb[54].mxu0 %v23593_v14 }
 0xde4   : > { %19430 = vmatpush3.msra.mxu0 %v23526_v24  ;;  %19431 = vmatprep.mubr.msk.f32.mxu0 %vm21497_vm1, %v25117_v3 }
 0xde5   : > { %19434 = vmatprep.subr.mxu0 %v25117_v3 }
 0xde7   : > { %12752 = vmatmul.mubr.f32.vlgmr.msra.gmra.mrb[46].mxu1 %v23638_v55 }
 0xde8   : > { %12763 = vmatpush1.msra.mxu1 %v23446_v51  ;;  %12826 = vmatprep.mubr.f32.mxu1 %v25117_v3 }
 0xde9   : > { %12836 = vmatprep.subr.mxu1 %v23397_v52 }
 0xdeb   : > { %19432 = vmatmul.mubr.f32.vlgmr.msra.gmra.mrb[54].mxu0 %v23596_v31  ;;  %v25142_v31 = vld [vmem:[#allocation71_spill] sm:$0xff] }
 0xdec   : > { %19435 = vmatpush3.msra.mxu0 %v23516_v20  ;;  %19436 = vmatprep.mubr.msk.f32.mxu0 %vm21497_vm1, %v25117_v3 }
 0xded   : > { %19439 = vmatprep.subr.mxu0 %v25117_v3 }
 0xdef   : > { %12829 = vmatmul.mubr.f32.vlgmr.msra.gmra.mrb[46].mxu1 %v23645_v38 }
 0xdf0   : > { %12838 = vmatpush1.msra.mxu1 %v23403_v44  ;;  %12901 = vmatprep.mubr.f32.mxu1 %v25117_v3 }
 0xdf1   : > { %12914 = vmatprep.subr.mxu1 %v23438_v62 }
 0xdf3   : > { %19437 = vmatmul.mubr.f32.vlgmr.msra.gmra.mrb[54].mxu0 %v23599_v19 }
 0xdf4   : > { %19440 = vmatpush3.msra.mxu0 %v23533_v21  ;;  %19441 = vmatprep.mubr.msk.f32.mxu0 %vm21497_vm1, %v25117_v3 }
 0xdf5   : > { %19444 = vmatprep.subr.mxu0 %v25117_v3 }
 0xdf7   : > { %12905 = vmatmul.mubr.f32.vlgmr.msra.gmra.mrb[46].mxu1 %v23653_v4 }
 0xdf8   : > { %12918 = vmatpush1.msra.mxu1 %v23456_v48  ;;  %12981 = vmatprep.mubr.f32.mxu1 %v25117_v3 }
 0xdf9   : > { %12990 = vmatprep.subr.mxu1 %v23397_v52 }
 0xdfb   : > { %19442 = vmatmul.mubr.f32.vlgmr.msra.gmra.mrb[54].mxu0 %v23593_v14 }
 0xdfc   : > { %19445 = vmatpush3.msra.mxu0 %v23516_v20  ;;  %19446 = vmatprep.mubr.msk.f32.mxu0 %vm21497_vm1, %v25117_v3 }
 0xdfd   : > { %19454 = vmatprep.subr.mxu0 %v25117_v3 }
 0xdff   : > { %12983 = vmatmul.mubr.f32.vlgmr.msra.gmra.mrb[46].mxu1 %v23638_v55 }
 0xe00   : > { %12992 = vmatpush1.msra.mxu1 %v23403_v44  ;;  %13055 = vmatprep.mubr.f32.mxu1 %v25117_v3 }
 0xe01   : > { %19484 = vmatprep.subr.mxu1 %v25117_v3 }
 0xe03   : > { %19447 = vmatmul.mubr.f32.vlgmr.msra.gmra.mrb[54].mxu0 %v23593_v14 }
 0xe04   : > { %19455 = vmatpush3.msra.mxu0 %v23428_v40  ;;  %19456 = vmatprep.mubr.msk.f32.mxu0 %vm21497_vm1, %v25117_v3 }
 0xe05   : > { %19459 = vmatprep.subr.mxu0 %v25117_v3 }
 0xe07   : > { %13057 = vmatmul.mubr.f32.vlgmr.msra.gmra.mrb[46].mxu1 %v23638_v55  ;;  %19457 = vmatmul.mubr.f32.vlgmr.msra.gmra.mrb[56].mxu0 %v12669_v6 }
 0xe08   : > { %19485 = vmatpush3.msra.mxu1 %v23516_v20  ;;  %19486 = vmatprep.mubr.msk.f32.mxu1 %vm21497_vm1, %v25117_v3 }
 0xe09   : > { %19460 = vmatpush3.msra.mxu0 %v23483_v26  ;;  %19489 = vmatprep.subr.mxu1 %v25117_v3 }
 0xe0a   : > { %19461 = vmatprep.mubr.msk.f32.mxu0 %vm21497_vm1, %v25117_v3  ;;  %19464 = vmatprep.subr.mxu0 %v25117_v3 }
 0xe0b   : > { %19487 = vmatmul.mubr.f32.vlgmr.msra.gmra.mrb[48].mxu1 %v12669_v6 }
 0xe0c   : > { %19490 = vmatpush3.msra.mxu1 %v23550_v58  ;;  %19491 = vmatprep.mubr.msk.f32.mxu1 %vm21497_vm1, %v25117_v3 }
 0xe0d   : > { %19494 = vmatprep.subr.mxu1 %v25117_v3 }
 0xe0f   : > { %19462 = vmatmul.mubr.f32.vlgmr.msra.gmra.mrb[56].mxu0 %v23638_v55 }
 0xe10   : > { %19465 = vmatpush3.msra.mxu0 %v23449_v12  ;;  %19466 = vmatprep.mubr.msk.f32.mxu0 %vm21497_vm1, %v25117_v3 }
 0xe11   : > { %19469 = vmatprep.subr.mxu0 %v25117_v3 }
 0xe13   : > { %19492 = vmatmul.mubr.f32.vlgmr.msra.gmra.mrb[48].mxu1 %v23638_v55 }
 0xe14   : > { %19495 = vmatpush3.msra.mxu1 %v23526_v24  ;;  %19496 = vmatprep.mubr.msk.f32.mxu1 %vm21497_vm1, %v25117_v3 }
 0xe15   : > { %19499 = vmatprep.subr.mxu1 %v25117_v3 }
 0xe17   : > { %19467 = vmatmul.mubr.f32.vlgmr.msra.gmra.mrb[56].mxu0 %v23645_v38 }
 0xe18   : > { %19470 = vmatpush3.msra.mxu0 %v23428_v40  ;;  %19471 = vmatprep.mubr.msk.f32.mxu0 %vm21497_vm1, %v25117_v3 }
 0xe19   : > { %19474 = vmatprep.subr.mxu0 %v25117_v3 }
 0xe1b   : > { %19497 = vmatmul.mubr.f32.vlgmr.msra.gmra.mrb[48].mxu1 %v23645_v38 }
 0xe1c   : > { %19500 = vmatpush3.msra.mxu1 %v23516_v20  ;;  %19501 = vmatprep.mubr.msk.f32.mxu1 %vm21497_vm1, %v25117_v3 }
 0xe1d   : > { %19504 = vmatprep.subr.mxu1 %v25117_v3 }
 0xe1f   : > { %19472 = vmatmul.mubr.f32.vlgmr.msra.gmra.mrb[56].mxu0 %v23653_v4 }
 0xe20   : > { %19475 = vmatpush3.msra.mxu0 %v23461_v17  ;;  %19476 = vmatprep.mubr.msk.f32.mxu0 %vm21497_vm1, %v25117_v3 }
 0xe21   : > { %19479 = vmatprep.subr.mxu0 %v25117_v3 }
 0xe23   : > { %19502 = vmatmul.mubr.f32.vlgmr.msra.gmra.mrb[48].mxu1 %v23653_v4 }
 0xe24   : > { %19505 = vmatpush3.msra.mxu1 %v23533_v21  ;;  %19506 = vmatprep.mubr.msk.f32.mxu1 %vm21497_vm1, %v25117_v3 }
 0xe25   : > { %19509 = vmatprep.subr.mxu1 %v25117_v3 }
 0xe27   : > { %19477 = vmatmul.mubr.f32.vlgmr.msra.gmra.mrb[56].mxu0 %v23638_v55 }
 0xe28   : > { %19480 = vmatpush3.msra.mxu0 %v23428_v40  ;;  %19481 = vmatprep.mubr.msk.f32.mxu0 %vm21497_vm1, %v25117_v3 }
 0xe29   : > { %19514 = vmatprep.subr.mxu0 %v25117_v3 }
 0xe2b   : > { %19507 = vmatmul.mubr.f32.vlgmr.msra.gmra.mrb[48].mxu1 %v23638_v55 }
 0xe2c   : > { %19510 = vmatpush3.msra.mxu1 %v23516_v20  ;;  %19511 = vmatprep.mubr.msk.f32.mxu1 %vm21497_vm1, %v25117_v3 }
 0xe2d   : > { %19519 = vmatprep.subr.mxu1 %v25117_v3 }
 0xe2f   : > { %19482 = vmatmul.mubr.f32.vlgmr.msra.gmra.mrb[56].mxu0 %v23638_v55 }
 0xe30   : > { %19515 = vmatpush3.msra.mxu0 %v23543_v33  ;;  %19516 = vmatprep.mubr.msk.f32.mxu0 %vm21497_vm1, %v25117_v3 }
 0xe31   : > { %14042 = vmatprep.subr.mxu0 %v23397_v52 }
 0xe33   : > { %19512 = vmatmul.mubr.f32.vlgmr.msra.gmra.mrb[48].mxu1 %v23638_v55  ;;  %19517 = vmatmul.mubr.msk.f32.vlgmr.msra.gmra.mrb[58].mxu0 %vm2694_vm8, %v13962_v13 }
 0xe34   : > { %19520 = vmatpush3.msra.mxu1 %v23428_v40  ;;  %14044 = vmatpush1.msra.mxu0 %v23403_v44 }
 0xe35   : > { %14107 = vmatprep.mubr.f32.mxu0 %v25117_v3  ;;  %19521 = vmatprep.mubr.msk.f32.mxu1 %vm21497_vm1, %v25117_v3 }
 0xe36   : > { %19524 = vmatprep.subr.mxu1 %v25117_v3  ;;  %14124 = vmatprep.subr.mxu0 %v23442_v46 }
 0xe37   : > { %v10169_v47 = vpop.f32.mrb[38].mxu1  ;;  %v10616_v39 = vpop.f32.mrb[48].mxu0  ;;  %14113 = vmatmul.mubr.f32.vlgmr.msra.gmra.mrb[60].mxu0 %v14112_v29  ;;  %19522 = vmatmul.mubr.f32.vlgmr.msra.gmra.mrb[50].mxu1 %v14112_v29 }
 0xe38   : > { %v23798_v15 = vmul.f32 %v10169_v47, %v25135_v56  ;;  %v23801_v16 = vmul.f32 %v10616_v39, %v25136_v27  ;;  %v10171_v25 = vpop.f32.mrb[39].mxu1  ;;  %v19353_v63 = vpop.f32.mrb[49].mxu0  ;;  %19525 = vmatpush3.msra.mxu1 %v23483_v26  ;;  %14130 = vmatpush1.msra.mxu0 %v23481_v45 }
 0xe39   : > { %v23806_v60 = vmul.f32 %v10171_v25, %v25137_v22  ;;  %14193 = vmatprep.mubr.f32.mxu0 %v25117_v3  ;;  %19526 = vmatprep.mubr.msk.f32.mxu1 %vm21497_vm1, %v25117_v3  ;;  %v25144_v25 = vld [vmem:[#allocation38_spill] sm:$0xff] }
 0xe3a   : > { %19529 = vmatprep.subr.mxu1 %v25117_v3  ;;  %14203 = vmatprep.subr.mxu0 %v23435_v59 }
 0xe3b   : > { %v11145_v46 = vpop.f32.mrb[50].mxu0 }
 0xe3c   : > { %v19388_v49 = vpop.f32.mrb[51].mxu0 }
 0xe3d   : > { %v25148_v49 = vld [vmem:[#allocation39_spill] sm:$0xff] }
 0xe3f   : > { %14195 = vmatmul.mubr.f32.vlgmr.msra.gmra.mrb[60].mxu0 %v23762_v28  ;;  %19527 = vmatmul.mubr.f32.vlgmr.msra.gmra.mrb[50].mxu1 %v23762_v28 }
 0xe40   : > { %19530 = vmatpush3.msra.mxu1 %v23449_v12  ;;  %14206 = vmatpush1.msra.mxu0 %v23446_v51  ;;  %v25138_v12 = vld [vmem:[#allocation60_spill] sm:$0xff] }
 0xe41   : > { %14269 = vmatprep.mubr.f32.mxu0 %v25117_v3  ;;  %19531 = vmatprep.mubr.msk.f32.mxu1 %vm21497_vm1, %v25117_v3 }
 0xe42   : > { %19534 = vmatprep.subr.mxu1 %v25117_v3  ;;  %14279 = vmatprep.subr.mxu0 %v23397_v52 }
 0xe47   : > { %14272 = vmatmul.mubr.f32.vlgmr.msra.gmra.mrb[60].mxu0 %v23770_v57  ;;  %19532 = vmatmul.mubr.f32.vlgmr.msra.gmra.mrb[50].mxu1 %v23770_v57 }
 0xe48   : > { %19535 = vmatpush3.msra.mxu1 %v23428_v40  ;;  %14281 = vmatpush1.msra.mxu0 %v23403_v44 }
 0xe49   : > { %14344 = vmatprep.mubr.f32.mxu0 %v25117_v3  ;;  %19536 = vmatprep.mubr.msk.f32.mxu1 %vm21497_vm1, %v25117_v3 }
 0xe4a   : > { %19539 = vmatprep.subr.mxu1 %v25117_v3  ;;  %14357 = vmatprep.subr.mxu0 %v23438_v62 }
 0xe4f   : > { %14348 = vmatmul.mubr.f32.vlgmr.msra.gmra.mrb[60].mxu0 %v23778_v11  ;;  %19537 = vmatmul.mubr.f32.vlgmr.msra.gmra.mrb[50].mxu1 %v23778_v11 }
 0xe50   : > { %19540 = vmatpush3.msra.mxu1 %v23461_v17  ;;  %14361 = vmatpush1.msra.mxu0 %v23456_v48  ;;  %v25139_v17 = vld [vmem:[#allocation62_spill] sm:$0xff] }
 0xe51   : > { %14424 = vmatprep.mubr.f32.mxu0 %v25117_v3  ;;  %19541 = vmatprep.mubr.msk.f32.mxu1 %vm21497_vm1, %v25117_v3 }
 0xe52   : > { %19544 = vmatprep.subr.mxu1 %v25117_v3  ;;  %14433 = vmatprep.subr.mxu0 %v23397_v52  ;;  %v15405_v52 = vpop.permute.xlu1 %15404 }
 0xe57   : > { %14426 = vmatmul.mubr.f32.vlgmr.msra.gmra.mrb[60].mxu0 %v23762_v28  ;;  %19542 = vmatmul.mubr.f32.vlgmr.msra.gmra.mrb[50].mxu1 %v23762_v28 }
 0xe58   : > { %19545 = vmatpush3.msra.mxu1 %v23428_v40  ;;  %14435 = vmatpush1.msra.mxu0 %v23403_v44 }
 0xe59   : > { %14498 = vmatprep.mubr.f32.mxu0 %v25117_v3  ;;  %19546 = vmatprep.mubr.msk.f32.mxu1 %vm21497_vm1, %v25117_v3 }
 0xe5a   : > { %19549 = vmatprep.subr.mxu0 %v25117_v3  ;;  %19579 = vmatprep.subr.mxu1 %v25117_v3 }
 0xe5f   : > { %14500 = vmatmul.mubr.f32.vlgmr.msra.gmra.mrb[60].mxu0 %v23762_v28  ;;  %19547 = vmatmul.mubr.f32.vlgmr.msra.gmra.mrb[50].mxu1 %v23762_v28 }
 0xe60   : > { %19550 = vmatpush3.msra.mxu0 %v23516_v20  ;;  %19551 = vmatprep.mubr.msk.f32.mxu0 %vm21497_vm1, %v25117_v3 }
 0xe61   : > { %19554 = vmatprep.subr.mxu0 %v25117_v3  ;;  %19580 = vmatpush3.msra.mxu1 %v23543_v33 }
 0xe62   : > { %19581 = vmatprep.mubr.msk.f32.mxu1 %vm21497_vm1, %v25117_v3  ;;  %20736 = vmatprep.subr.bf16.mxu1 %v25120_v7 }
 0xe63   : > { %v11072_v44 = vpop.f32.mrb[40].mxu1  ;;  %19552 = vmatmul.mubr.f32.vlgmr.msra.gmra.mrb[62].mxu0 %v14112_v29  ;;  %19582 = vmatmul.mubr.msk.f32.vlgmr.msra.gmra.mrb[52].mxu1 %vm2694_vm8, %v15405_v52 }
 0xe64   : > { %v11149_v40 = vmul.f32 %v11145_v46, %v11072_v44  ;;  %v19383_v59 = vpop.f32.mrb[41].mxu1  ;;  %19555 = vmatpush3.msra.mxu0 %v23550_v58  ;;  %19556 = vmatprep.mubr.msk.f32.mxu0 %vm21497_vm1, %v25117_v3 }
 0xe65   : > { %19559 = vmatprep.subr.mxu0 %v25117_v3 }
 0xe6b   : > { %19557 = vmatmul.mubr.f32.vlgmr.msra.gmra.mrb[62].mxu0 %v23762_v28 }
 0xe6c   : > { %19560 = vmatpush3.msra.mxu0 %v23526_v24  ;;  %19561 = vmatprep.mubr.msk.f32.mxu0 %vm21497_vm1, %v25117_v3 }
 0xe6d   : > { %19564 = vmatprep.subr.mxu0 %v25117_v3 }
 0xe73   : > { %19562 = vmatmul.mubr.f32.vlgmr.msra.gmra.mrb[62].mxu0 %v23770_v57 }
 0xe74   : > { %19565 = vmatpush3.msra.mxu0 %v23516_v20  ;;  %19566 = vmatprep.mubr.msk.f32.mxu0 %vm21497_vm1, %v25117_v3 }
 0xe75   : > { %19569 = vmatprep.subr.mxu0 %v25117_v3 }
 0xe7b   : > { %19567 = vmatmul.mubr.f32.vlgmr.msra.gmra.mrb[62].mxu0 %v23778_v11 }
 0xe7c   : > { %19570 = vmatpush3.msra.mxu0 %v23533_v21  ;;  %19571 = vmatprep.mubr.msk.f32.mxu0 %vm21497_vm1, %v25117_v3 }
 0xe7d   : > { %19574 = vmatprep.subr.mxu0 %v25117_v3 }
 0xe83   : > { %19572 = vmatmul.mubr.f32.vlgmr.msra.gmra.mrb[62].mxu0 %v23762_v28 }
 0xe84   : > { %19575 = vmatpush3.msra.mxu0 %v23516_v20  ;;  %19576 = vmatprep.mubr.msk.f32.mxu0 %vm21497_vm1, %v25117_v3 }
 0xe85   : > { %20766 = vmatprep.subr.bf16.mxu0 %v25120_v7 }
 0xe8b   : > { %19577 = vmatmul.mubr.f32.vlgmr.msra.gmra.mrb[62].mxu0 %v23762_v28 }
 0xeaa   : > { %v11615_v62 = vpop.f32.mrb[52].mxu0  ;;  %v12062_v51 = vpop.f32.mrb[42].mxu1 }
 0xeab   : > { %v12066_v48 = vmul.f32 %v11615_v62, %v25138_v12  ;;  %v12068_v32 = vmul.f32 %v12062_v51, %v25139_v17  ;;  %v11617_v5 = vpop.f32.mrb[53].mxu0  ;;  %v19418_v34 = vpop.f32.mrb[43].mxu1  ;;  %v25152_v62 = vld [vmem:[#allocation34_spill] sm:$0xff]  ;;  %v25153_v12 = vld [vmem:[#allocation29_spill] sm:$0xff] }
 0xeac   : > { %v12067_v45 = vmul.f32 %v11617_v5, %v25140_v18  ;;  %v15557_v17 = vld [vmem:[%s25145_s23] sm:$0xff]  ;;  %v23920_v5 = vld [vmem:[%s25145_s23 + $0x10] sm:$0xff] }
 0xead   : > { %v12069_v43 = vadd.f32 %v12066_v48, %v23798_v15  ;;  %v12071_v26 = vadd.f32 %v12068_v32, %v23801_v16  ;;  %v15558_v32 = vld [vmem:[%s25145_s23 + $0x8] sm:$0xff]  ;;  %v15588_v34 = vand.u32 4294901760, %v15557_v17 }
 0xeae   : > { %v12070_v54 = vadd.f32 %v12067_v45, %v23806_v60  ;;  %v12588_v41 = vpop.f32.mrb[44].mxu1  ;;  %v25146_v60 = vld [vmem:[#allocation36_spill] sm:$0xff]  ;;  %v15591_v18 = vand.u32 4294901760, %v15558_v32  ;;  %v23923_v45 = vld [vmem:[%s25145_s23 + $0x18] sm:$0xff] }
 0xeaf   : > { %v19453_v20 = vpop.f32.mrb[45].mxu1 }
 0xed6   : > { %v12514_v24 = vpop.f32.mrb[54].mxu0 }
 0xed7   : > { %v12592_v21 = vmul.f32 %v12588_v41, %v12514_v24  ;;  %v19448_v23 = vpop.f32.mrb[55].mxu0  ;;  %v15597_v41 = vand.u32 4294901760, %v23923_v45 }
 0xed8   : > { %v23937_v23 = vsub.f32 %v15558_v32, %v15591_v18 }
 0xed9   : > { %v12593_v33 = vadd.f32 %v12592_v21, %v11149_v40  ;;  %v25151_v40 = vld [vmem:[#allocation35_spill] sm:$0xff]  ;;  %v23935_v21 = vsub.f32 %v15557_v17, %v15588_v34 }
 0xeda   : > { %v13058_v58 = vpop.f32.mrb[46].mxu1 }
 0xedb   : > { %v13509_v42 = vmul.f32 %v13058_v58, %v25141_v30  ;;  %v13060_v14 = vpop.f32.mrb[47].mxu1  ;;  %v23944_v58 = vpack.c.bf16 %v15591_v18, %v15588_v34  ;;  %v23949_v30 = vsub.f32 %v23923_v45, %v15597_v41  ;;  %v24069_v45 = vld [vmem:[%s25145_s23 + $0x60] sm:$0xff] }
 0xedc   : > { %v13510_v19 = vmul.f32 %v13060_v14, %v25142_v31  ;;  %v24812_v31 = vand.u32 4294901760, %v23935_v21 }
 0xedd   : > { %v13512_v50 = vadd.f32 %v13509_v42, %v12069_v43  ;;  %v15594_v43 = vand.u32 4294901760, %v23920_v5  ;;  %20738 = vmatpush1.bf16.msra.mxu1 %v23944_v58 }
 0xede   : > { %v13513_v10 = vadd.f32 %v13510_v19, %v12070_v54  ;;  %v23930_v54 = vld [vmem:[%s25145_s23 + $0x28] sm:$0xff]  ;;  %v24811_v19 = vand.u32 4294901760, %v23937_v23  ;;  %20739 = vmatprep.subr.bf16.mxu1 %v25120_v7 }
 0xedf   : > { %v15603_v24 = vand.u32 4294901760, %v23930_v54 }
 0xee1   : > { %v23959_v14 = vsub.f32 %v23930_v54, %v15603_v24  ;;  %v25158_v54 = vld [vmem:[#allocation28_spill] sm:$0xff] }
 0xf02   : > { %v13505_v1 = vpop.f32.mrb[56].mxu0 }
 0xf03   : > { %v13511_v55 = vmul.f32 %v13505_v1, %v25143_v0  ;;  %v19483_v38 = vpop.f32.mrb[57].mxu0  ;;  %v24807_v0 = vand.u32 4294901760, %v23959_v14 }
 0xf04   : > { %v15698_v38 = vsub.f32 %v23937_v23, %v24811_v19 }
 0xf05   : > { %v13514_v4 = vadd.f32 %v13511_v55, %v12071_v26  ;;  %v23927_v26 = vld [vmem:[%s25145_s23 + $0x20] sm:$0xff]  ;;  %v15691_v55 = vsub.f32 %v23935_v21, %v24812_v31 }
 0xf06   : > { %v13957_v53 = vpop.f32.mrb[48].mxu1  ;;  %v14031_v37 = vpop.f32.mrb[58].mxu0  ;;  %v15600_v20 = vand.u32 4294901760, %v23927_v26 }
 0xf07   : > { %v14035_v6 = vmul.f32 %v14031_v37, %v13957_v53  ;;  %v19513_v2 = vpop.f32.mrb[49].mxu1  ;;  %v19518_v8 = vpop.f32.mrb[59].mxu0 }
 0xf08   : > { %v23954_v42 = vsub.f32 %v23927_v26, %v15600_v20  ;;  %v15699_v2 = vand.u32 4294901760, %v15698_v38  ;;  %v25155_v38 = vld [vmem:[#allocation37_spill] sm:$0xff]  ;;  %v15624_v26 = vand.u32 4294901760, %v24069_v45 }
 0xf09   : > { %v23894_v28 = vadd.f32 %v14035_v6, %v12593_v33  ;;  %v23942_v33 = vsub.f32 %v23920_v5, %v15594_v43  ;;  %v15692_v6 = vand.u32 4294901760, %v15691_v55 }
 0xf0a   : > { %v24808_v1 = vand.u32 4294901760, %v23954_v42 }
 0xf0c   : > { %v15719_v37 = vsub.f32 %v23954_v42, %v24808_v1 }
 0xf32   : > { %v14501_v57 = vpop.f32.mrb[60].mxu0  ;;  %v14948_v11 = vpop.f32.mrb[50].mxu1 }
 0xf33   : > { %v14952_v13 = vmul.f32 %v14501_v57, %v23242_v61  ;;  %v14954_v36 = vmul.f32 %v14948_v11, %v23252_v9  ;;  %v14503_v29 = vpop.f32.mrb[61].mxu0  ;;  %v19548_v47 = vpop.f32.mrb[51].mxu1  ;;  %v25147_v61 = vld [vmem:[#allocation33_spill] sm:$0xff]  ;;  %v15726_v57 = vsub.f32 %v23959_v14, %v24807_v0 }
 0xf34   : > { %v14953_v39 = vmul.f32 %v14503_v29, %v23246_v35  ;;  %v25150_v35 = vld [vmem:[#allocation32_spill] sm:$0xff]  ;;  %v15720_v29 = vand.u32 4294901760, %v15719_v37  ;;  %v24040_v37 = vld [vmem:[%s25145_s23 + $0x58] sm:$0xff] }
 0xf35   : > { %v14955_v56 = vadd.f32 %v14952_v13, %v13512_v50  ;;  %v14957_v15 = vadd.f32 %v14954_v36, %v13514_v4  ;;  %v24810_v50 = vand.u32 4294901760, %v23942_v33  ;;  %v20767_v13 = vpack.c.bf16 %v15699_v2, %v15692_v6 }
 0xf36   : > { %v23899_v27 = vadd.f32 %v14953_v39, %v13513_v10  ;;  %v15474_v16 = vpop.f32.mrb[52].mxu1  ;;  %v24809_v10 = vand.u32 4294901760, %v23949_v30  ;;  %v15727_v47 = vand.u32 4294901760, %v15726_v57 }
 0xf37   : > { %v15482_v63 = vsub.f32 %v14957_v15, %v25144_v25  ;;  %v19583_v22 = vpop.f32.mrb[53].mxu1  ;;  %v15705_v4 = vsub.f32 %v23942_v33, %v24810_v50  ;;  %20768 = vmatpush1.bf16.msra.mxu0 %v20767_v13  ;;  %v15621_v13 = vand.u32 4294901760, %v24040_v37 }
 0xf38   : > { %v15481_v46 = vsub.f32 %v23899_v27, %v25146_v60  ;;  %v15712_v53 = vsub.f32 %v23949_v30, %v24809_v10  ;;  %20769 = vmatprep.subr.bf16.mxu0 %v25120_v7  ;;  %v20773_v25 = vpack.c.bf16 %v15727_v47, %v15720_v29 }
 0xf39   : > { %v15503_v9 = vmul.f32 %v15482_v63, %v25147_v61  ;;  %v15490_v52 = vmul.f32 %v15482_v63, %v25148_v49  ;;  %v15516_v51 = vmul.f32 %v15482_v63, %v25152_v62  ;;  %v15706_v8 = vand.u32 4294901760, %v15705_v4  ;;  %v15564_v49 = vld [vmem:[%s25145_s23 + $0x38] sm:$0xff]  ;;  %v24012_v62 = vld [vmem:[%s25145_s23 + $0x48] sm:$0xff] }
 0xf3a   : > { %v15497_v44 = vmul.f32 %v15481_v46, %v25150_v35  ;;  %v15484_v59 = vmul.f32 %v15481_v46, %v25151_v40  ;;  %v15510_v48 = vmul.f32 %v15481_v46, %v25153_v12  ;;  %v15713_v11 = vand.u32 4294901760, %v15712_v53  ;;  %v24037_v53 = vld [vmem:[%s25145_s23 + $0x50] sm:$0xff] }
 0xf3b   : > { %15505 = vrot.lane.b32.xlu1 %v15503_v9, %s25149_s0  ;;  %15492 = vrot.lane.b32.xlu0 %v15490_v52, %s25149_s0  ;;  %v15563_v9 = vld [vmem:[%s25145_s23 + $0x30] sm:$0xff]  ;;  %v15609_v35 = vand.u32 4294901760, %v15564_v49  ;;  %v15615_v17 = vand.u32 4294901760, %v24012_v62  ;;  %v15480_v4 = vsub.f32 %v23899_v27, %v25155_v38  ;;  %v24050_v27 = vpack.c.bf16 %v15597_v41, %v15594_v43  ;;  %v24072_v43 = vld [vmem:[%s25145_s23 + $0x68] sm:$0xff]  ;;  %v25156_v41 = vld [vmem:[#allocation30_spill] sm:$0xff] }
 0xf3c   : > { %v20770_v36 = vpack.c.bf16 %v15713_v11, %v15706_v8  ;;  %v15606_v52 = vand.u32 4294901760, %v15563_v9  ;;  %v15618_v11 = vand.u32 4294901760, %v24037_v53  ;;  %v24066_v5 = vsub.f32 %v24040_v37, %v15621_v13 }
 0xf3d   : > { %v24006_v40 = vsub.f32 %v15564_v49, %v15609_v35  ;;  %v24032_v55 = vsub.f32 %v24012_v62, %v15615_v17  ;;  %20741 = vmatpush1.bf16.msra.mxu1 %v24050_v27 }
 0xf3e   : > { %20771 = vmatpush1.bf16.msra.mxu0 %v20770_v36  ;;  %20742 = vmatprep.subr.bf16.mxu1 %v25120_v7 }
 0xf3f   : > { %15499 = vrot.lane.b32.xlu1 %v15497_v44, %s21504_s3  ;;  %15486 = vrot.lane.b32.xlu0 %v15484_v59, %s21504_s3  ;;  %v24004_v44 = vsub.f32 %v15563_v9, %v15606_v52  ;;  %v24009_v59 = vld [vmem:[%s25145_s23 + $0x40] sm:$0xff]  ;;  %v24805_v12 = vand.u32 4294901760, %v24006_v40  ;;  %v24803_v57 = vand.u32 4294901760, %v24032_v55 }
 0xf40   : > { %20772 = vmatprep.subr.bf16.mxu0 %v25120_v7 }
 0xf41   : > { %v15740_v34 = vsub.f32 %v24006_v40, %v24805_v12  ;;  %v15754_v47 = vsub.f32 %v24032_v55, %v24803_v57 }
 0xf42   : > { %20774 = vmatpush1.bf16.msra.mxu0 %v20773_v25 }
 0xf43   : > { %15518 = vrot.lane.b32.xlu1 %v15516_v51, %s25149_s0  ;;  %15512 = vrot.lane.b32.xlu0 %v15510_v48, %s21504_s3  ;;  %v24806_v51 = vand.u32 4294901760, %v24004_v44  ;;  %v15612_v48 = vand.u32 4294901760, %v24009_v59  ;;  %v15741_v2 = vand.u32 4294901760, %v15740_v34  ;;  %v15755_v9 = vand.u32 4294901760, %v15754_v47 }
 0xf44   : > { %20775 = vmatprep.subr.bf16.mxu0 %v25120_v7 }
 0xf45   : > { %v15733_v32 = vsub.f32 %v24004_v44, %v24806_v51  ;;  %v24027_v18 = vsub.f32 %v24009_v59, %v15612_v48 }
 0xf47   : > { %15536 = vrot.lane.b32.xlu0 %v14955_v56, %s25154_s6  ;;  %v15734_v6 = vand.u32 4294901760, %v15733_v32  ;;  %v24804_v8 = vand.u32 4294901760, %v24027_v18  ;;  %v24801_v32 = vand.u32 4294901760, %v24066_v5  ;;  %s25180_s6 = sld [smem:[#allocation24_spill]] }
 0xf49   : > { %v20776_v36 = vpack.c.bf16 %v15741_v2, %v15734_v6  ;;  %v15747_v29 = vsub.f32 %v24027_v18, %v24804_v8  ;;  %v24099_v6 = vld [vmem:[%s25145_s23 + $0x80] sm:$0xff] }
 0xf4a   : > { %v24818_v57 = vand.u32 4294901760, %v24099_v6 }
 0xf4b   : > { %20777 = vmatpush1.bf16.msra.mxu0 %v20776_v36 }
 0xf4c   : > { %20778 = vmatprep.subr.bf16.mxu0 %v25120_v7  ;;  %v24153_v50 = vsub.f32 %v24099_v6, %v24818_v57 }
 0xf5e   : > { %v15400_v39 = vpop.f32.mrb[62].mxu0 }
 0xf5f   : > { %v15478_v56 = vmul.f32 %v15474_v16, %v15400_v39  ;;  %v19578_v15 = vpop.f32.mrb[63].mxu0  ;;  %v24061_v39 = vsub.f32 %v24037_v53, %v15618_v11 }
 0xf60   : > { %v25157_v15 = vld [vmem:[#allocation31_spill] sm:$0xff] }
 0xf61   : > { %v15479_v63 = vadd.f32 %v15478_v56, %v23894_v28  ;;  %v15496_v56 = vmul.f32 %v15480_v4, %v25156_v41  ;;  %v15483_v25 = vmul.f32 %v15480_v4, %v25157_v15  ;;  %v24802_v49 = vand.u32 4294901760, %v24061_v39  ;;  %v24113_v15 = vld [vmem:[%s25145_s23 + $0x88] sm:$0xff] }
 0xf62   : > { %v15768_v41 = vsub.f32 %v24066_v5, %v24801_v32  ;;  %v24819_v0 = vand.u32 4294901760, %v24113_v15 }
 0xf63   : > { %v15585_v22 = vsel %vm1826_vm2, %v15479_v63, 0  ;;  %v24081_v63 = vpack.c.bf16 %v15603_v24, %v15600_v20  ;;  %v15509_v20 = vmul.f32 %v15480_v4, %v25158_v54  ;;  %v15627_v24 = vand.u32 4294901760, %v24072_v43 }
 0xf64   : > { %v23991_v60 = vand.u32 4294901760, %v15585_v22  ;;  %v15761_v47 = vsub.f32 %v24061_v39, %v24802_v49  ;;  %v24110_v4 = vsub.f32 %v24069_v45, %v15624_v26  ;;  %v24116_v54 = vpack.c.bf16 %v15609_v35, %v15606_v52 }
 0xf65   : > { %20744 = vmatpush1.bf16.msra.mxu1 %v24081_v63  ;;  %v15769_v35 = vand.u32 4294901760, %v15768_v41  ;;  %vm15555_vm2 = vcmask 916480  }
 0xf66   : > { %v23995_v16 = vsub.f32 %v15585_v22, %v23991_v60  ;;  %15852 = vmatprep.mubr.f32.mxu0 %v23991_v60  ;;  %v15748_v22 = vand.u32 4294901760, %v15747_v29  ;;  %20745 = vmatprep.subr.bf16.mxu1 %v25120_v7  ;;  %v15762_v52 = vand.u32 4294901760, %v15761_v47  ;;  %v24816_v49 = vand.u32 4294901760, %v24110_v4 }
 0xf67   : > { %v24145_v47 = vpack.c.bf16 %v15615_v17, %v15612_v48  ;;  %v24163_v48 = vld [vmem:[%s25145_s23 + $0x90] sm:$0xff] }
 0xf68   : > { %v24817_v46 = vand.u32 4294901760, %v23995_v16  ;;  %v20779_v29 = vpack.c.bf16 %v15755_v9, %v15748_v22  ;;  %v24121_v22 = vsub.f32 %v24072_v43, %v15627_v24  ;;  %v20782_v10 = vpack.c.bf16 %v15769_v35, %v15762_v52  ;;  %v15576_v52 = vld [vmem:[%s25145_s23 + $0x98] sm:$0xff] }
 0xf69   : > { %v15775_v41 = vsub.f32 %v24110_v4, %v24816_v49  ;;  %20747 = vmatpush1.bf16.msra.mxu1 %v24116_v54 }
 0xf6a   : > { %v15674_v28 = vsub.f32 %v23995_v16, %v24817_v46  ;;  %20780 = vmatpush1.bf16.msra.mxu0 %v20779_v29  ;;  %v24814_v8 = vand.u32 4294901760, %v24121_v22  ;;  %20748 = vmatprep.subr.bf16.mxu1 %v25120_v7  ;;  %v15642_v46 = vand.u32 4294901760, %v24163_v48 }
 0xf6b   : > { %20781 = vmatprep.subr.bf16.mxu0 %v25120_v7  ;;  %v15776_v17 = vand.u32 4294901760, %v15775_v41 }
 0xf6c   : > { %v15675_v61 = vand.u32 4294901760, %v15674_v28  ;;  %v24084_v28 = vld [vmem:[%s25145_s23 + $0x70] sm:$0xff]  ;;  %v15782_v59 = vsub.f32 %v24121_v22, %v24814_v8 }
 0xf6d   : > { %v15630_v34 = vand.u32 4294901760, %v24084_v28  ;;  %20750 = vmatpush1.bf16.msra.mxu1 %v24145_v47 }
 0xf6e   : > { %15676 = vmatprep.mubr.f32.mxu1 %v15675_v61  ;;  %v24087_v61 = vld [vmem:[%s25145_s23 + $0x78] sm:$0xff]  ;;  %20783 = vmatpush1.bf16.msra.mxu0 %v20782_v10  ;;  %v15783_v10 = vand.u32 4294901760, %v15782_v59 }
 0xf6f   : > { %v24820_v38 = vand.u32 4294901760, %v24087_v61  ;;  %v24126_v9 = vsub.f32 %v24084_v28, %v15630_v34  ;;  %20784 = vmatprep.subr.bf16.mxu0 %v25120_v7  ;;  %20751 = vmatprep.subr.bf16.mxu1 %v25120_v7 }
 0xf71   : > { %v24131_v32 = vsub.f32 %v24087_v61, %v24820_v38  ;;  %v24813_v12 = vand.u32 4294901760, %v24126_v9 }
 0xf73   : > { %v24815_v51 = vand.u32 4294901760, %v24131_v32  ;;  %v15789_v62 = vsub.f32 %v24126_v9, %v24813_v12 }
 0xf75   : > { %v15790_v12 = vand.u32 4294901760, %v15789_v62 }
 0xfad   : > { %v15506_v2 = vpop.permute.xlu1 %15505  ;;  %v15493_v36 = vpop.permute.xlu0 %15492 }
 0xfb1   : > { %v15500_v29 = vpop.permute.xlu1 %15499  ;;  %v15487_v1 = vpop.permute.xlu0 %15486 }
 0xfb2   : > { %v15502_v19 = vadd.f32 %v15500_v29, %v15496_v56  ;;  %v15489_v31 = vadd.f32 %v15487_v1, %v15483_v25  ;;  %v15796_v1 = vsub.f32 %v24131_v32, %v24815_v51  ;;  %v15802_v56 = vand.u32 4294901760, %v24153_v50 }
 0xfb3   : > { %v24173_v25 = vsub.f32 %v24113_v15, %v24819_v0 }
 0xfb4   : > { %v15508_v35 = vadd.f32 %v15506_v2, %v15502_v19  ;;  %v15495_v29 = vadd.f32 %v15493_v36, %v15489_v31  ;;  %v15797_v41 = vand.u32 4294901760, %v15796_v1  ;;  %v15803_v51 = vsub.f32 %v24153_v50, %v15802_v56 }
 0xfb5   : > { %v15513_v8 = vpop.permute.xlu0 %15512  ;;  %v15809_v49 = vand.u32 4294901760, %v24173_v25  ;;  %v15645_v31 = vand.u32 4294901760, %v15576_v52  ;;  %v15519_v19 = vpop.permute.xlu1 %15518  ;;  %v20785_v2 = vpack.c.bf16 %v15783_v10, %v15776_v17  ;;  %v24189_v36 = vpack.c.bf16 %v15621_v13, %v15618_v11 }
 0xfb6   : > { %v15523_v57 = vmul.f32 %v15508_v35, %v15508_v35  ;;  %v15522_v0 = vmul.f32 %v15495_v29, %v15495_v29  ;;  %v15515_v38 = vadd.f32 %v15513_v8, %v15509_v20  ;;  %15544 = vrot.lane.b32.xlu0 %v15508_v35, %s21504_s3  ;;  %15540 = vrot.lane.b32.xlu1 %v15495_v29, %s25149_s0  ;;  %v15804_v53 = vand.u32 4294901760, %v15803_v51  ;;  %s21506_s3 = smov 16   ;;  %s25179_s0 = sld [smem:[#allocation21_spill]] }
 0xfb7   : > { %v15810_v59 = vsub.f32 %v24173_v25, %v15809_v49  ;;  %v24198_v20 = vsub.f32 %v24163_v48, %v15642_v46  ;;  %v24200_v62 = vsub.f32 %v15576_v52, %v15645_v31  ;;  %20786 = vmatpush1.bf16.msra.mxu0 %v20785_v2  ;;  %v20788_v17 = vpack.c.bf16 %v15797_v41, %v15790_v12 }
 0xfb8   : > { %v24194_v8 = vadd.f32 %v15519_v19, %v15515_v38  ;;  %v15524_v37 = vadd.f32 %v15523_v57, %v15522_v0  ;;  %20787 = vmatprep.subr.bf16.mxu0 %v25120_v7  ;;  %20753 = vmatpush1.bf16.msra.mxu1 %v24189_v36  ;;  %v24212_v48 = vpack.c.bf16 %v15627_v24, %v15624_v26  ;;  %v25159_v26 = vand.u32 4294901760, %v24087_v61 }
 0xfb9   : > { %v15811_v1 = vand.u32 4294901760, %v15810_v59  ;;  %v15816_v13 = vand.u32 4294901760, %v24198_v20  ;;  %v15823_v38 = vand.u32 4294901760, %v24200_v62  ;;  %20754 = vmatprep.subr.bf16.mxu1 %v25120_v7  ;;  %v25160_v29 = vand.u32 4294901760, %v24099_v6 }
 0xfba   : > { %v15525_v11 = vmul.f32 %v24194_v8, %v24194_v8  ;;  %v24227_v24 = vpack.c.bf16 %v25159_v26, %v15630_v34  ;;  %v25161_v10 = vand.u32 4294901760, %v24113_v15  ;;  %v24242_v61 = vpack.c.bf16 %v15645_v31, %v15642_v46 }
 0xfbb   : > { %v15817_v0 = vsub.f32 %v24198_v20, %v15816_v13  ;;  %v15824_v12 = vsub.f32 %v24200_v62, %v15823_v38  ;;  %20789 = vmatpush1.bf16.msra.mxu0 %v20788_v17  ;;  %v20791_v57 = vpack.c.bf16 %v15811_v1, %v15804_v53  ;;  %v20806_v2 = vpack.c.bf16 %v24006_v40, %v24004_v44 }
 0xfbc   : > { %v15526_v51 = vadd.f32 %v15525_v11, %v15524_v37  ;;  %20790 = vmatprep.subr.bf16.mxu0 %v25120_v7  ;;  %20756 = vmatpush1.bf16.msra.mxu1 %v24212_v48  ;;  %v24237_v28 = vpack.c.bf16 %v25161_v10, %v25160_v29  ;;  %v20809_v46 = vpack.c.bf16 %v24032_v55, %v24027_v18  ;;  %v15537_v37 = vpop.permute.xlu0 %15536 }
 0xfbd   : > { %v15818_v45 = vand.u32 4294901760, %v15817_v0  ;;  %v15825_v43 = vand.u32 4294901760, %v15824_v12  ;;  %20757 = vmatprep.subr.bf16.mxu1 %v25120_v7  ;;  %v20812_v31 = vpack.c.bf16 %v24066_v5, %v24061_v39  ;;  %v20815_v59 = vpack.c.bf16 %v24121_v22, %v24110_v4 }
 0xfbe   : > { %v15527_v52 = vadd.f32 1e-08, %v15526_v51  ;;  %v20818_v17 = vpack.c.bf16 %v24131_v32, %v24126_v9  ;;  %v20821_v53 = vpack.c.bf16 %v24173_v25, %v24153_v50  ;;  %v20824_v1 = vpack.c.bf16 %v24200_v62, %v24198_v20 }
 0xfbf   : > { %20792 = vmatpush1.bf16.msra.mxu0 %v20791_v57  ;;  %v20794_v35 = vpack.c.bf16 %v15825_v43, %v15818_v45 }
 0xfc0   : > { %21360 = vrsqrt.f32 %v15527_v52  ;;  %20793 = vmatprep.subr.bf16.mxu0 %v25120_v7  ;;  %20759 = vmatpush1.bf16.msra.mxu1 %v24227_v24  ;;  %vm15530_vm13 = vcmp.eq.f32.partialorder %v15527_v52, inf  ;;  %v15533_v19 = vand.u32 2147483648, %v15527_v52  ;;  %vm15532_vm14 = vcmp.eq.f32.partialorder %v15527_v52, 0.0 }
 0xfc1   : > { %20760 = vmatprep.subr.bf16.mxu1 %v25120_v7 }
 0xfc3   : > { %20795 = vmatpush1.bf16.msra.mxu0 %v20794_v35  ;;  %v25162_v35 = vand.u32 4294901760, %v23995_v16 }
 0xfc4   : > { %20826 = vmatprep.subr.bf16.mxu0 %v25120_v7  ;;  %20762 = vmatpush1.bf16.msra.mxu1 %v24237_v28 }
 0xfc5   : > { %20763 = vmatprep.subr.bf16.mxu1 %v25120_v7 }
 0xfc8   : > { %20765 = vmatpush1.bf16.msra.mxu1 %v24242_v61 }
 0xfc9   : > { %20796 = vmatprep.subr.bf16.mxu1 %v25120_v7 }
 0xfca   : > { %v21361_v34 = vpop.eup %21360 }
 0xfcb   : > { %v15529_v41 = vmul.f32 %v21361_v34, %v15527_v52 }
 0xfcd   : > { %v15531_v6 = vsel %vm15530_vm13, %v15527_v52, %v15529_v41  ;;  %v20800_v41 = vpack.c.bf16 %v23949_v30, %v23942_v33 }
 0xfce   : > { %v15534_v15 = vsel %vm15532_vm14, %v15533_v19, %v15531_v6  ;;  %v20803_v19 = vpack.c.bf16 %v23959_v14, %v23954_v42  ;;  %v25164_v6 = vand.u32 4294901760, %v23937_v23 }
 0xfcf   : > { %15548 = vrot.lane.b32.xlu1 %v15534_v15, %s21506_s3  ;;  %s25182_s3 = sld [smem:[#allocation23_spill]] }
0x1028   : > { %v15541_v11 = vpop.permute.xlu1 %15540  ;;  %v15545_v51 = vpop.permute.xlu0 %15544 }
0x1029   : > { %v15551_v0 = vsel %vm1828_vm3, %v15537_v37, %v15541_v11  ;;  %v21371_v37 = vld [vmem:[%s21762_s18] sm:$0xff]  ;;  %s25181_s18 = sld [smem:[#allocation22_spill]] }
0x102a   : > { %v15553_v12 = vsel %vm15552_vm15, %v15551_v0, %v15545_v51 }
0x102b   : > { %v15554_v57 = vsel %vm1843_vm4, %v15553_v12, %v24194_v8  ;;  %v20797_v8 = vpack.c.bf16 %v23937_v23, %v23935_v21  ;;  %v25168_v23 = vand.u32 4294901760, %v23959_v14  ;;  %v25172_v14 = vand.u32 4294901760, %v24032_v55 }
0x102c   : > { %v25176_v55 = vand.u32 4294901760, %v24121_v22  ;;  %v17650_v22 = vld [vmem:[%s25179_s0] ss:$0 sm:$0xff]  ;;  %s25183_s0 = sld [smem:[#allocation26_spill]] }
0x1041   : > { %v15549_v52 = vpop.permute.xlu1 %15548 }
0x1042   : > { %v15556_v45 = vsel %vm15555_vm2, %v15554_v57, %v15549_v52 }
0x1043   : > { %v24263_v43 = vand.u32 4294901760, %v15556_v45 }
0x1045   : > { %v15678_v26 = vsub.f32 %v15556_v45, %v24263_v43  ;;  %15854 = vmatmul.mubr.f32.vlgmr.msra.gmra.mrb[64].mxu0 %v24263_v43 }
0x1046   : > { %20828 = vmatpush1.bf16.msra.mxu0 %v23944_v58  ;;  %16060 = vmatprep.mubr.f32.mxu0 %v25162_v35 }
0x1047   : > { %v15679_v29 = vand.u32 4294901760, %v15678_v26  ;;  %20829 = vmatprep.subr.bf16.mxu0 %v25120_v7 }
0x1049   : > { %v15680_v10 = vsub.f32 %v15678_v26, %v15679_v29 }
0x104a   : > { %20831 = vmatpush1.bf16.msra.mxu0 %v24050_v27 }
0x104b   : > { %20832 = vmatprep.subr.bf16.mxu0 %v25120_v7  ;;  %v15681_v34 = vand.u32 4294901760, %v15680_v10 }
0x104d   : > { %15682 = vmatmul.mubr.f32.vlgmr.msra.gmra.mrb[54].mxu1 %v15681_v34 }
0x104e   : > { %20798 = vmatpush1.bf16.msra.mxu1 %v20797_v8  ;;  %20834 = vmatpush1.bf16.msra.mxu0 %v24081_v63 }
0x104f   : > { %15965 = vmatprep.mubr.f32.mxu1 %v23995_v16  ;;  %20799 = vmatprep.subr.bf16.mxu1 %v25120_v7  ;;  %v25163_v16 = vand.u32 4294901760, %v23935_v21  ;;  %v25167_v21 = vand.u32 4294901760, %v23954_v42  ;;  %v25171_v42 = vand.u32 4294901760, %v24027_v18  ;;  %v25175_v18 = vand.u32 4294901760, %v24110_v4 }
0x1050   : > { %20835 = vmatprep.subr.bf16.mxu0 %v25120_v7  ;;  %v20881_v4 = vpack.c.bf16 %v15809_v49, %v15802_v56 }
0x1051   : > { %v20857_v15 = vpack.c.bf16 %v25164_v6, %v25163_v16 }
0x1052   : > { %20801 = vmatpush1.bf16.msra.mxu1 %v20800_v41  ;;  %20837 = vmatpush1.bf16.msra.mxu0 %v24116_v54 }
0x1053   : > { %20802 = vmatprep.subr.bf16.mxu1 %v25120_v7  ;;  %20838 = vmatprep.subr.bf16.mxu0 %v25120_v7 }
0x1056   : > { %20804 = vmatpush1.bf16.msra.mxu1 %v20803_v19  ;;  %20840 = vmatpush1.bf16.msra.mxu0 %v24145_v47 }
0x1057   : > { %20805 = vmatprep.subr.bf16.mxu1 %v25120_v7  ;;  %20841 = vmatprep.subr.bf16.mxu0 %v25120_v7 }
0x105a   : > { %20807 = vmatpush1.bf16.msra.mxu1 %v20806_v2  ;;  %20843 = vmatpush1.bf16.msra.mxu0 %v24189_v36  ;;  %v25166_v2 = vand.u32 4294901760, %v23949_v30  ;;  %v25170_v30 = vand.u32 4294901760, %v24006_v40  ;;  %v25174_v40 = vand.u32 4294901760, %v24066_v5  ;;  %v25178_v5 = vand.u32 4294901760, %v24131_v32 }
0x105b   : > { %20808 = vmatprep.subr.bf16.mxu1 %v25120_v7  ;;  %20844 = vmatprep.subr.bf16.mxu0 %v25120_v7  ;;  %v20884_v32 = vpack.c.bf16 %v15823_v38, %v15816_v13 }
0x105e   : > { %20810 = vmatpush1.bf16.msra.mxu1 %v20809_v46  ;;  %20846 = vmatpush1.bf16.msra.mxu0 %v24212_v48 }
0x105f   : > { %20811 = vmatprep.subr.bf16.mxu1 %v25120_v7  ;;  %20847 = vmatprep.subr.bf16.mxu0 %v25120_v7 }
0x1062   : > { %20813 = vmatpush1.bf16.msra.mxu1 %v20812_v31  ;;  %20849 = vmatpush1.bf16.msra.mxu0 %v24227_v24 }
0x1063   : > { %20814 = vmatprep.subr.bf16.mxu1 %v25120_v7  ;;  %20850 = vmatprep.subr.bf16.mxu0 %v25120_v7 }
0x1066   : > { %20816 = vmatpush1.bf16.msra.mxu1 %v20815_v59  ;;  %20852 = vmatpush1.bf16.msra.mxu0 %v24237_v28 }
0x1067   : > { %20817 = vmatprep.subr.bf16.mxu1 %v25120_v7  ;;  %20853 = vmatprep.subr.bf16.mxu0 %v25120_v7 }
0x106a   : > { %20819 = vmatpush1.bf16.msra.mxu1 %v20818_v17  ;;  %20855 = vmatpush1.bf16.msra.mxu0 %v24242_v61 }
0x106b   : > { %20820 = vmatprep.subr.bf16.mxu1 %v25120_v7  ;;  %20886 = vmatprep.subr.bf16.mxu0 %v25120_v7 }
0x106d   : > { %16064 = vmatmul.mubr.f32.vlgmr.msra.gmra.mrb[66].mxu0 %v15679_v29 }
0x106e   : > { %20822 = vmatpush1.bf16.msra.mxu1 %v20821_v53  ;;  %20888 = vmatpush1.bf16.msra.mxu0 %v23944_v58  ;;  %v25165_v58 = vand.u32 4294901760, %v23942_v33  ;;  %v25169_v33 = vand.u32 4294901760, %v24004_v44  ;;  %v25173_v44 = vand.u32 4294901760, %v24061_v39  ;;  %v25177_v39 = vand.u32 4294901760, %v24126_v9 }
0x106f   : > { %16286 = vmatprep.mubr.f32.mxu0 %v23991_v60  ;;  %20823 = vmatprep.subr.bf16.mxu1 %v25120_v7 }
0x1070   : > { %20889 = vmatprep.subr.bf16.mxu0 %v25120_v7  ;;  %v20860_v46 = vpack.c.bf16 %v25166_v2, %v25165_v58 }
0x1072   : > { %20825 = vmatpush1.bf16.msra.mxu1 %v20824_v1  ;;  %20891 = vmatpush1.bf16.msra.mxu0 %v24050_v27  ;;  %v20863_v27 = vpack.c.bf16 %v25168_v23, %v25167_v21 }
0x1073   : > { %20856 = vmatprep.subr.bf16.mxu1 %v25120_v7  ;;  %20892 = vmatprep.subr.bf16.mxu0 %v25120_v7 }
0x1075   : > { %15968 = vmatmul.mubr.f32.vlgmr.msra.gmra.mrb[56].mxu1 %v15678_v26  ;;  %v16325_v26 = vld [vmem:[%s25180_s6 + $0x8] sm:$0xff] }
0x1076   : > { %20858 = vmatpush1.bf16.msra.mxu1 %v20857_v15  ;;  %16194 = vmatprep.mubr.f32.mxu1 %v23991_v60  ;;  %v20866_v60 = vpack.c.bf16 %v25170_v30, %v25169_v33  ;;  %v16340_v29 = vand.u32 4294901760, %v16325_v26 }
0x1077   : > { %20894 = vmatpush1.bf16.msra.mxu0 %v24081_v63  ;;  %20859 = vmatprep.subr.bf16.mxu1 %v25120_v7  ;;  %v20869_v63 = vpack.c.bf16 %v25172_v14, %v25171_v42  ;;  %v17652_v14 = vld [vmem:[%s25182_s3] ss:$0 sm:$0xff]  ;;  %s25185_s3 = sld [smem:[#allocation7_spill]] }
0x1078   : > { %20895 = vmatprep.subr.bf16.mxu0 %v25120_v7  ;;  %v16422_v34 = vsub.f32 %v16325_v26, %v16340_v29  ;;  %v16802_v26 = vld [vmem:[%s25183_s0 + $0x30] sm:$0xff] }
0x107a   : > { %20861 = vmatpush1.bf16.msra.mxu1 %v20860_v46  ;;  %v16423_v19 = vand.u32 4294901760, %v16422_v34 }
0x107b   : > { %20897 = vmatpush1.bf16.msra.mxu0 %v24116_v54  ;;  %20862 = vmatprep.subr.bf16.mxu1 %v25120_v7  ;;  %v20872_v54 = vpack.c.bf16 %v25174_v40, %v25173_v44 }
0x107c   : > { %20898 = vmatprep.subr.bf16.mxu0 %v25120_v7  ;;  %v16424_v6 = vsub.f32 %v16422_v34, %v16423_v19 }
0x107e   : > { %20864 = vmatpush1.bf16.msra.mxu1 %v20863_v27  ;;  %v16425_v58 = vand.u32 4294901760, %v16424_v6 }
0x107f   : > { %20900 = vmatpush1.bf16.msra.mxu0 %v24145_v47  ;;  %20865 = vmatprep.subr.bf16.mxu1 %v25120_v7  ;;  %v20875_v47 = vpack.c.bf16 %v25176_v55, %v25175_v18 }
0x1080   : > { %20901 = vmatprep.subr.bf16.mxu0 %v25120_v7 }
0x1082   : > { %20867 = vmatpush1.bf16.msra.mxu1 %v20866_v60  ;;  %v17651_v60 = vld [vmem:[%s25181_s18] ss:$0 sm:$0xff]  ;;  %s25184_s18 = sld [smem:[#allocation25_spill]] }
0x1083   : > { %20903 = vmatpush1.bf16.msra.mxu0 %v24189_v36  ;;  %20868 = vmatprep.subr.bf16.mxu1 %v25120_v7  ;;  %v20878_v36 = vpack.c.bf16 %v25178_v5, %v25177_v39  ;;  %v24410_v5 = vld [vmem:[%s25183_s0] sm:$0xff] }
0x1084   : > { %20904 = vmatprep.subr.bf16.mxu0 %v25120_v7 }
0x1086   : > { %20870 = vmatpush1.bf16.msra.mxu1 %v20869_v63 }
0x1087   : > { %20906 = vmatpush1.bf16.msra.mxu0 %v24212_v48  ;;  %20871 = vmatprep.subr.bf16.mxu1 %v25120_v7 }
0x1088   : > { %20907 = vmatprep.subr.bf16.mxu0 %v25120_v7 }
0x108a   : > { %20873 = vmatpush1.bf16.msra.mxu1 %v20872_v54 }
0x108b   : > { %20909 = vmatpush1.bf16.msra.mxu0 %v24227_v24  ;;  %20874 = vmatprep.subr.bf16.mxu1 %v25120_v7 }
0x108c   : > { %20910 = vmatprep.subr.bf16.mxu0 %v25120_v7 }
0x108e   : > { %20876 = vmatpush1.bf16.msra.mxu1 %v20875_v47 }
0x108f   : > { %20912 = vmatpush1.bf16.msra.mxu0 %v24237_v28  ;;  %20877 = vmatprep.subr.bf16.mxu1 %v25120_v7 }
0x1090   : > { %20913 = vmatprep.subr.bf16.mxu0 %v25120_v7 }
0x1092   : > { %20879 = vmatpush1.bf16.msra.mxu1 %v20878_v36  ;;  %v24413_v36 = vld [vmem:[%s25183_s0 + $0x8] sm:$0xff] }
0x1093   : > { %20915 = vmatpush1.bf16.msra.mxu0 %v24242_v61  ;;  %20880 = vmatprep.subr.bf16.mxu1 %v25120_v7 }
0x1094   : > { %20934 = vmatprep.subr.bf16.mxu0 %v25120_v7 }
0x1096   : > { %16288 = vmatmul.mubr.f32.vlgmr.msra.gmra.mrb[68].mxu0 %v24263_v43  ;;  %20882 = vmatpush1.bf16.msra.mxu1 %v20881_v4  ;;  %v16808_v4 = vand.u32 4294901760, %v24410_v5 }
0x1097   : > { %20883 = vmatprep.subr.bf16.mxu1 %v25120_v7  ;;  %19642 = vmatprep.mubr.msk.f32.mxu0 %vm21497_vm1, %v25117_v3 }
0x109a   : > { %20885 = vmatpush1.bf16.msra.mxu1 %v20884_v32  ;;  %v16811_v32 = vand.u32 4294901760, %v24413_v36 }
0x109b   : > { %20916 = vmatprep.subr.bf16.mxu1 %v25120_v7 }
0x109d   : > { %16196 = vmatmul.mubr.f32.vlgmr.msra.gmra.mrb[58].mxu1 %v24263_v43  ;;  %v16324_v43 = vld [vmem:[%s25180_s6] sm:$0xff] }
0x109e   : > { %19588 = vmatprep.mubr.msk.f32.mxu1 %vm21497_vm1, %v25117_v3  ;;  %v16337_v35 = vand.u32 4294901760, %v16324_v43 }
0x10a0   : > { %v24393_v10 = vpack.c.bf16 %v16340_v29, %v16337_v35  ;;  %v16415_v8 = vsub.f32 %v16324_v43, %v16337_v35  ;;  %v16803_v35 = vld [vmem:[%s25183_s0 + $0x38] sm:$0xff] }
0x10a2   : > { %20918 = vmatpush3.bf16.msra.mxu1 %v24393_v10  ;;  %v16416_v41 = vand.u32 4294901760, %v16415_v8  ;;  %v20923_v46 = vpack.c.bf16 %v16422_v34, %v16415_v8  ;;  %v16829_v34 = vand.u32 4294901760, %v16803_v35 }
0x10a3   : > { %20919 = vmatprep.subr.bf16.mxu1 %v25120_v7 }
0x10a4   : > { %v16417_v16 = vsub.f32 %v16415_v8, %v16416_v41  ;;  %v20929_v21 = vpack.c.bf16 %v16423_v19, %v16416_v41  ;;  %v16826_v8 = vand.u32 4294901760, %v16802_v26  ;;  %v24482_v6 = vsub.f32 %v16803_v35, %v16829_v34 }
0x10a6   : > { %v16418_v15 = vand.u32 4294901760, %v16417_v16  ;;  %v24480_v16 = vsub.f32 %v16802_v26, %v16826_v8 }
0x10a8   : > { %v20920_v2 = vpack.c.bf16 %v16425_v58, %v16418_v15 }
0x1118   : > { %v15855_v50 = vpop.f32.mrb[64].mxu0 }
0x1119   : > { %v15857_v49 = vpop.f32.mrb[65].mxu0 }
0x111a   : > { %v24425_v49 = vld [vmem:[%s25183_s0 + $0x18] sm:$0xff] }
0x1120   : > { %v15683_v9 = vpop.f32.mrb[54].mxu1 }
0x1121   : > { %v15684_v56 = vadd.f32 %v17650_v22, %v15683_v9  ;;  %v15685_v25 = vpop.f32.mrb[55].mxu1  ;;  %v24428_v22 = vsub.f32 %v24410_v5, %v16808_v4  ;;  %v24431_v9 = vsub.f32 %v24413_v36, %v16811_v32 }
0x1122   : > { %v16817_v25 = vand.u32 4294901760, %v24425_v49 }
0x1123   : > { %v15856_v20 = vadd.f32 %v15855_v50, %v15684_v56  ;;  %v24422_v50 = vld [vmem:[%s25183_s0 + $0x10] sm:$0xff] }
0x1124   : > { %v16814_v56 = vand.u32 4294901760, %v24422_v50 }
0x1140   : > { %v16065_v62 = vpop.f32.mrb[66].mxu0 }
0x1141   : > { %v16067_v13 = vpop.f32.mrb[67].mxu0 }
0x1142   : > { %v24440_v13 = vsub.f32 %v24422_v50, %v16814_v56 }
0x1148   : > { %v15969_v38 = vpop.f32.mrb[56].mxu1 }
0x1149   : > { %v15970_v48 = vadd.f32 %v15969_v38, %v15856_v20  ;;  %v15971_v24 = vpop.f32.mrb[57].mxu1  ;;  %v16893_v20 = vand.u32 4294901760, %v24428_v22  ;;  %v24443_v38 = vsub.f32 %v24425_v49, %v16817_v25 }
0x114b   : > { %v16066_v28 = vadd.f32 %v16065_v62, %v15970_v48  ;;  %v16900_v62 = vand.u32 4294901760, %v24431_v9  ;;  %v16894_v48 = vsub.f32 %v24428_v22, %v16893_v20 }
0x114d   : > { %v16901_v24 = vsub.f32 %v24431_v9, %v16900_v62 }
0x1169   : > { %v16289_v61 = vpop.f32.mrb[68].mxu0 }
0x116a   : > { %v16291_v31 = vpop.f32.mrb[69].mxu0 }
0x116b   : > { %v16895_v31 = vand.u32 4294901760, %v16894_v48 }
0x1170   : > { %v16197_v59 = vpop.f32.mrb[58].mxu1 }
0x1171   : > { %v16198_v17 = vadd.f32 %v16197_v59, %v16066_v28  ;;  %v16199_v53 = vpop.f32.mrb[59].mxu1  ;;  %v16907_v28 = vand.u32 4294901760, %v24440_v13  ;;  %v16902_v59 = vand.u32 4294901760, %v16901_v24  ;;  %v20959_v24 = vpack.c.bf16 %v24431_v9, %v24428_v22 }
0x1173   : > { %v16290_v1 = vadd.f32 %v16289_v61, %v16198_v17  ;;  %v16914_v61 = vand.u32 4294901760, %v24443_v38  ;;  %v16908_v17 = vsub.f32 %v24440_v13, %v16907_v28 }
0x1175   : > { %v16293_v11 = vadd.f32 %v21371_v37, %v16290_v1  ;;  %v16915_v53 = vsub.f32 %v24443_v38, %v16914_v61  ;;  %v20947_v1 = vpack.c.bf16 %v16902_v59, %v16895_v31  ;;  %v16909_v37 = vand.u32 4294901760, %v16908_v17 }
0x1176   : > { %v20962_v59 = vpack.c.bf16 %v24443_v38, %v24440_v13  ;;  %v20983_v17 = vpack.c.bf16 %v16900_v62, %v16893_v20 }
0x1177   : > { %v16296_v51 = vsel %vm1219_vm0, %v16293_v11, 0.0 }
0x1178   : > { %16297 = vadd.xlane.f32.xlu0 %v16296_v51 }
0x1205   : > { %v16298_v0 = vpop.xlane.xlu0 %16297 }
0x1206   : > { %v16300_v12 = vmul.f32 0.0625, %v16298_v0  ;;  %v16800_v0 = vld [vmem:[%s25183_s0 + $0x20] sm:$0xff] }
0x1208   : > { %v16301_v57 = vsub.f32 %v16293_v11, %v16300_v12  ;;  %v16916_v11 = vand.u32 4294901760, %v16915_v53  ;;  %v16801_v12 = vld [vmem:[%s25183_s0 + $0x28] sm:$0xff]  ;;  %v20986_v53 = vpack.c.bf16 %v16914_v61, %v16907_v28  ;;  %s25186_s0 = sld [smem:[#allocation27_spill]] }
0x120a   : > { %v16302_v52 = vmul.f32 %v16301_v57, %v16301_v57  ;;  %v20950_v51 = vpack.c.bf16 %v16916_v11, %v16909_v37 }
0x120c   : > { %v16303_v45 = vsel %vm1219_vm0, %v16302_v52, 0.0  ;;  %v16823_v52 = vand.u32 4294901760, %v16801_v12 }
0x120d   : > { %16304 = vadd.xlane.f32.xlu1 %v16303_v45 }
0x120e   : > { %v24472_v43 = vsub.f32 %v16801_v12, %v16823_v52 }
0x129a   : > { %v16305_v23 = vpop.xlane.xlu1 %16304 }
0x129b   : > { %v16306_v27 = vmul.f32 0.0625, %v16305_v23 }
0x129d   : > { %v16307_v33 = vadd.f32 1e-05, %v16306_v27 }
0x129f   : > { %21362 = vrsqrt.f32 %v16307_v33 }
0x12a9   : > { %v21363_v30 = vpop.eup %21362 }
0x12aa   : > { %v16309_v42 = vmul.f32 %v21363_v30, %v16301_v57  ;;  %v16820_v57 = vand.u32 4294901760, %v16800_v0 }
0x12ac   : > { %v16316_v63 = vmul.f32 %v17651_v60, %v16309_v42  ;;  %v24470_v45 = vsub.f32 %v16800_v0, %v16820_v57  ;;  %v20938_v42 = vpack.c.bf16 %v16817_v25, %v16814_v56 }
0x12ae   : > { %v24399_v44 = vadd.f32 %v17652_v14, %v16316_v63  ;;  %v16921_v29 = vand.u32 4294901760, %v24470_v45  ;;  %v20941_v63 = vpack.c.bf16 %v16823_v52, %v16820_v57  ;;  %v17654_v52 = vld [vmem:[%s21661_s24] ss:$0 sm:$0xff] }
0x12b0   : > { %v16334_v40 = vsel %vm1219_vm0, %v24399_v44, 0  ;;  %v16922_v41 = vsub.f32 %v24470_v45, %v16921_v29 }
0x12b1   : > { %v16403_v54 = vand.u32 4294901760, %v16334_v40 }
0x12b2   : > { %v16923_v15 = vand.u32 4294901760, %v16922_v41 }
0x12b3   : > { %v16404_v18 = vsub.f32 %v16334_v40, %v16403_v54  ;;  %v20944_v40 = vpack.c.bf16 %v16829_v34, %v16826_v8 }
0x12b5   : > { %v16405_v55 = vand.u32 4294901760, %v16404_v18 }
0x12b7   : > { %v16406_v47 = vsub.f32 %v16404_v18, %v16405_v55 }
0x12b9   : > { %v16407_v39 = vand.u32 4294901760, %v16406_v47 }
0x12bb   : > { %19589 = vmatmul.mubr.f32.vlgmr.msra.gmra.mrb[60].mxu1 %v16407_v39  ;;  %v17653_v39 = vld [vmem:[%s25184_s18] ss:$0 sm:$0xff]  ;;  %s1189_s18 = scalar_lea.vmem %s25185_s3, %s21757_s15  ;;  %s17658_s15 = sshll.u32 %s21442_s7, 7 }
0x12bc   : > { %20921 = vmatpush3.bf16.msra.mxu1 %v20920_v2  ;;  %19595 = vmatprep.mubr.msk.f32.mxu1 %vm21497_vm1, %v25117_v3  ;;  %v16935_v2 = vand.u32 4294901760, %v24480_v16  ;;  %v17382_v35 = vld [vmem:[%s1189_s18] sm:$0xff]  ;;  %s1140_s3 = scalar_lea.vmem [#allocation2], %s17615_s5  ;;  %s24545_s6 = scalar_lea.hbm %s25186_s0, %s17658_s15 }
0x12bd   : > { %20922 = vmatprep.subr.bf16.mxu1 %v25120_v7  ;;  %17385 = vperm.xlu1 %21353, %v17382_v35   ;;  %s17405_s18 = sshll.u32 %s1140_s3, 4  ;;  %s21507_s7 = smov [#allocation2]   ;;  %s24547_s18 = int_to_ptr.vmem [resolvable:$true] %s17405_s18 }
0x12be   : > { %v16936_v27 = vsub.f32 %v24480_v16, %v16935_v2  ;;  %s21372_s9 = scalar_lea.vmem %s24547_s18, 128  ;;  %s21376_s5 = sshll.u32 %s21507_s7, 4  ;;  %s21377_s5 = int_to_ptr.vmem [resolvable:$false] %s21376_s5 }
0x12bf   : > { %p21373_p12 = scmp.ne.s32.totalorder %s24547_s18, %s21372_s9  ;;  %s21378_s12 = scalar_lea.vmem %s21377_s5, 256 }
0x12c0   : > { %v16937_v30 = vand.u32 4294901760, %v16936_v27  ;;  %p21379_p1 = scmp.lt.s32.totalorder %s24547_s18, %s21377_s5  ;;  %p21380_p2 = scmp.lt.s32.totalorder %s21378_s12, %s21372_s9 }
0x12c1   : > { %p21374_p13 = pnand %p21373_p12, %p21718_p4 }
0x12c2   : > { %p21381_p3 = por %p21380_p2, %p21379_p1 }
0x12c3   : > { %19596 = vmatmul.mubr.f32.vlgmr.msra.gmra.mrb[60].mxu1 %v16403_v54  ;;  %p21375_p0 = pneg %p21374_p13 }
0x12c4   : > { %20924 = vmatpush3.bf16.msra.mxu1 %v20923_v46  ;;  %19602 = vmatprep.mubr.msk.f32.mxu1 %vm21497_vm1, %v25117_v3  ;;  %v16942_v46 = vand.u32 4294901760, %v24482_v6 }
0x12c5   : > { %20925 = vmatprep.subr.bf16.mxu1 %v25120_v7  ;;  %p21382_p5 = pnand %p21381_p3, %p21375_p0 }
0x12c6   : > { %v16943_v33 = vsub.f32 %v24482_v6, %v16942_v46  ;;  %v20992_v47 = vpack.c.bf16 %v16942_v46, %v16935_v2  ;;  %v17656_v2 = vld [vmem:[%s21671_s30] ss:$0 sm:$0xff] }
0x12c8   : > { %v16944_v60 = vand.u32 4294901760, %v16943_v33 }
0x12ca   : > { %v20956_v14 = vpack.c.bf16 %v16944_v60, %v16937_v30 }
0x12cb   : > { %19603 = vmatmul.mubr.f32.vlgmr.msra.gmra.mrb[60].mxu1 %v16404_v18  ;;  %v20968_v18 = vpack.c.bf16 %v24482_v6, %v24480_v16 }
0x12cc   : > { %20927 = vmatpush3.bf16.msra.mxu1 %v24393_v10  ;;  %19609 = vmatprep.mubr.msk.f32.mxu1 %vm21497_vm1, %v25117_v3 }
0x12cd   : > { %20928 = vmatprep.subr.bf16.mxu1 %v25120_v7 }
0x12d3   : > { %19610 = vmatmul.mubr.f32.vlgmr.msra.gmra.mrb[60].mxu1 %v16405_v55 }
0x12d4   : > { %20930 = vmatpush3.bf16.msra.mxu1 %v20929_v21  ;;  %19616 = vmatprep.mubr.msk.f32.mxu1 %vm21497_vm1, %v25117_v3  ;;  %v20935_v21 = vpack.c.bf16 %v16811_v32, %v16808_v4 }
0x12d5   : > { %20931 = vmatprep.subr.bf16.mxu1 %v25120_v7 }
0x12d6   : > { %20936 = vmatpush3.bf16.msra.mxu0 %v20935_v21 }
0x12d7   : > { %20937 = vmatprep.subr.bf16.mxu0 %v25120_v7 }
0x12da   : > { %20939 = vmatpush3.bf16.msra.mxu0 %v20938_v42 }
0x12db   : > { %19617 = vmatmul.mubr.f32.vlgmr.msra.gmra.mrb[60].mxu1 %v16403_v54  ;;  %20940 = vmatprep.subr.bf16.mxu0 %v25120_v7 }
0x12dc   : > { %20933 = vmatpush3.bf16.msra.mxu1 %v24393_v10  ;;  %19623 = vmatprep.mubr.msk.f32.mxu1 %vm21497_vm1, %v25117_v3  ;;  %v16928_v10 = vand.u32 4294901760, %v24472_v43 }
0x12dd   : > { %20946 = vmatprep.subr.bf16.mxu1 %v25120_v7 }
0x12de   : > { %v16929_v19 = vsub.f32 %v24472_v43, %v16928_v10  ;;  %20942 = vmatpush3.bf16.msra.mxu0 %v20941_v63  ;;  %v20989_v55 = vpack.c.bf16 %v16928_v10, %v16921_v29 }
0x12df   : > { %20943 = vmatprep.subr.bf16.mxu0 %v25120_v7 }
0x12e0   : > { %v16930_v58 = vand.u32 4294901760, %v16929_v19 }
0x12e2   : > { %v20953_v23 = vpack.c.bf16 %v16930_v58, %v16923_v15  ;;  %20945 = vmatpush3.bf16.msra.mxu0 %v20944_v40  ;;  %v17655_v15 = vld [vmem:[%s21666_s29] ss:$0 sm:$0xff] }
0x12e3   : > { %19624 = vmatmul.mubr.f32.vlgmr.msra.gmra.mrb[60].mxu1 %v16403_v54  ;;  %20958 = vmatprep.subr.bf16.mxu0 %v25120_v7  ;;  %v20965_v54 = vpack.c.bf16 %v24472_v43, %v24470_v45 }
0x12e4   : > { %20948 = vmatpush3.bf16.msra.mxu1 %v20947_v1  ;;  %19661 = vmatprep.mubr.msk.f32.mxu1 %vm21497_vm1, %v25117_v3 }
0x12e5   : > { %20949 = vmatprep.subr.bf16.mxu1 %v25120_v7 }
0x12e8   : > { %20951 = vmatpush3.bf16.msra.mxu1 %v20950_v51 }
0x12e9   : > { %20952 = vmatprep.subr.bf16.mxu1 %v25120_v7 }
0x12ec   : > { %20954 = vmatpush3.bf16.msra.mxu1 %v20953_v23 }
0x12ed   : > { %20955 = vmatprep.subr.bf16.mxu1 %v25120_v7 }
0x12f0   : > { %20957 = vmatpush3.bf16.msra.mxu1 %v20956_v14 }
0x12f1   : > { %20970 = vmatprep.subr.bf16.mxu1 %v25120_v7 }
0x13b6   : > { %v16791_v5 = vpop.f32.mrb[60].mxu1 }
0x13b7   : > { %v21013_v36 = vadd.f32 %v17653_v39, %v16791_v5  ;;  %v19625_v4 = vpop.f32.mrb[61].mxu1 }
0x13b9   : > { %v16795_v32 = vmax.f32 %v21013_v36, 0.0 }
0x13bb   : > { %v16805_v50 = vsel %vm1828_vm3, %v16795_v32, 0 }
0x13bc   : > { %v16880_v49 = vand.u32 4294901760, %v16805_v50 }
0x13be   : > { %v16881_v56 = vsub.f32 %v16805_v50, %v16880_v49  ;;  %19662 = vmatmul.mubr.f32.vlgmr.msra.gmra.mrb[62].mxu1 %v16880_v49 }
0x13bf   : > { %20972 = vmatpush3.bf16.msra.mxu1 %v20935_v21  ;;  %19699 = vmatprep.mubr.msk.f32.mxu1 %vm21497_vm1, %v25117_v3 }
0x13c0   : > { %v16882_v25 = vand.u32 4294901760, %v16881_v56  ;;  %20973 = vmatprep.subr.bf16.mxu1 %v25120_v7 }
0x13c2   : > { %v16883_v48 = vsub.f32 %v16881_v56, %v16882_v25 }
0x13c3   : > { %20975 = vmatpush3.bf16.msra.mxu1 %v20938_v42 }
0x13c4   : > { %20976 = vmatprep.subr.bf16.mxu1 %v25120_v7  ;;  %v16884_v31 = vand.u32 4294901760, %v16883_v48 }
0x13c6   : > { %19643 = vmatmul.mubr.f32.vlgmr.msra.gmra.mrb[70].mxu0 %v16884_v31 }
0x13c7   : > { %20960 = vmatpush3.bf16.msra.mxu0 %v20959_v24  ;;  %20978 = vmatpush3.bf16.msra.mxu1 %v20941_v63 }
0x13c8   : > { %20961 = vmatprep.subr.bf16.mxu0 %v25120_v7  ;;  %20979 = vmatprep.subr.bf16.mxu1 %v25120_v7 }
0x13c9   : > { %19680 = vmatprep.mubr.msk.f32.mxu0 %vm21497_vm1, %v25117_v3 }
0x13cb   : > { %20963 = vmatpush3.bf16.msra.mxu0 %v20962_v59  ;;  %20981 = vmatpush3.bf16.msra.mxu1 %v20944_v40 }
0x13cc   : > { %20964 = vmatprep.subr.bf16.mxu0 %v25120_v7  ;;  %20994 = vmatprep.subr.bf16.mxu1 %v25120_v7 }
0x13ce   : > { %19700 = vmatmul.mubr.f32.vlgmr.msra.gmra.mrb[64].mxu1 %v16882_v25 }
0x13cf   : > { %20966 = vmatpush3.bf16.msra.mxu0 %v20965_v54  ;;  %20996 = vmatpush3.bf16.msra.mxu1 %v20935_v21  ;;  %v17386_v21 = vpop.permute.xlu1 %17385 }
0x13d0   : > { %20967 = vmatprep.subr.bf16.mxu0 %v25120_v7  ;;  %20997 = vmatprep.subr.bf16.mxu1 %v25120_v7 }
0x13d1   : > { %19737 = vmatprep.mubr.msk.f32.mxu1 %vm21497_vm1, %v25117_v3 }
0x13d3   : > { %20969 = vmatpush3.bf16.msra.mxu0 %v20968_v18  ;;  %20999 = vmatpush3.bf16.msra.mxu1 %v20938_v42 }
0x13d4   : > { %20982 = vmatprep.subr.bf16.mxu0 %v25120_v7  ;;  %21000 = vmatprep.subr.bf16.mxu1 %v25120_v7 }
0x13d6   : > { %19681 = vmatmul.mubr.f32.vlgmr.msra.gmra.mrb[72].mxu0 %v16881_v56 }
0x13d7   : > { %20984 = vmatpush3.bf16.msra.mxu0 %v20983_v17  ;;  %21002 = vmatpush3.bf16.msra.mxu1 %v20941_v63 }
0x13d8   : > { %20985 = vmatprep.subr.bf16.mxu0 %v25120_v7  ;;  %21003 = vmatprep.subr.bf16.mxu1 %v25120_v7 }
0x13d9   : > { %19718 = vmatprep.mubr.msk.f32.mxu0 %vm21497_vm1, %v25117_v3 }
0x13db   : > { %20987 = vmatpush3.bf16.msra.mxu0 %v20986_v53  ;;  %21005 = vmatpush3.bf16.msra.mxu1 %v20944_v40 }
0x13dc   : > { %20988 = vmatprep.subr.bf16.mxu0 %v25120_v7 }
0x13de   : > { %19738 = vmatmul.mubr.f32.vlgmr.msra.gmra.mrb[66].mxu1 %v16880_v49 }
0x13df   : > { %20990 = vmatpush3.bf16.msra.mxu0 %v20989_v55 }
0x13e0   : > { %20991 = vmatprep.subr.bf16.mxu0 %v25120_v7 }
0x13e3   : > { %20993 = vmatpush3.bf16.msra.mxu0 %v20992_v47 }
0x13e6   : > { %19719 = vmatmul.mubr.f32.vlgmr.msra.gmra.mrb[74].mxu0 %v16880_v49 }
0x1491   : > { %v16997_v22 = vpop.f32.mrb[62].mxu1 }
0x1492   : > { %v19663_v9 = vpop.f32.mrb[63].mxu1 }
0x1499   : > { %v16886_v20 = vpop.f32.mrb[70].mxu0 }
0x149a   : > { %v16998_v62 = vadd.f32 %v16997_v22, %v16886_v20  ;;  %v19644_v13 = vpop.f32.mrb[71].mxu0 }
0x14a1   : > { %v17166_v38 = vpop.f32.mrb[64].mxu1 }
0x14a2   : > { %v19701_v28 = vpop.f32.mrb[65].mxu1 }
0x14a9   : > { %v17085_v3 = vpop.f32.mrb[72].mxu0 }
0x14aa   : > { %v17086_v61 = vadd.f32 %v17085_v3, %v16998_v62  ;;  %v19682_v1 = vpop.f32.mrb[73].mxu0 }
0x14ac   : > { %v17167_v37 = vadd.f32 %v17166_v38, %v17086_v61 }
0x14b1   : > { %v17340_v11 = vpop.f32.mrb[66].mxu1 }
0x14b2   : > { %v19739_v51 = vpop.f32.mrb[67].mxu1 }
0x14b9   : > { %v17261_v0 = vpop.f32.mrb[74].mxu0 }
0x14ba   : > { %v17262_v7 = vadd.f32 %v17261_v0, %v17167_v37  ;;  %v19720_v12 = vpop.f32.mrb[75].mxu0 }
0x14bc   : > { %v17341_v57 = vadd.f32 %v17340_v11, %v17262_v7 }
0x14be   : > { %v17344_v45 = vadd.f32 %v17341_v57, %v24399_v44 }
0x14c0   : > { %v17352_v43 = vadd.f32 %v17654_v52, %v17344_v45 }
0x14c2   : > { %v17355_v26 = vsel %vm1219_vm0, %v17352_v43, 0.0 }
0x14c3   : > { %17356 = vadd.xlane.f32.xlu0 %v17355_v26 }
0x1550   : > { %v17357_v29 = vpop.xlane.xlu0 %17356 }
0x1551   : > { %v17358_v10 = vmul.f32 0.0625, %v17357_v29 }
0x1553   : > { %v17359_v8 = vsub.f32 %v17352_v43, %v17358_v10 }
0x1555   : > { %v17360_v34 = vmul.f32 %v17359_v8, %v17359_v8 }
0x1557   : > { %v17361_v41 = vsel %vm1219_vm0, %v17360_v34, 0.0 }
0x1558   : > { %17362 = vadd.xlane.f32.xlu0 %v17361_v41 }
0x15e5   : > { %v17363_v19 = vpop.xlane.xlu0 %17362 }
0x15e6   : > { %v17364_v44 = vmul.f32 0.0625, %v17363_v19 }
0x15e8   : > { %v17365_v16 = vadd.f32 1e-05, %v17364_v44 }
0x15ea   : > { %21364 = vrsqrt.f32 %v17365_v16 }
0x15f4   : > { %v21365_v6 = vpop.eup %21364 }
0x15f5   : > { %v17367_v58 = vmul.f32 %v21365_v6, %v17359_v8 }
0x15f7   : > { %v17374_v46 = vmul.f32 %v17655_v15, %v17367_v58 }
0x15f9   : > { %v17381_v23 = vadd.f32 %v17656_v2, %v17374_v46 }
0x15fb   : > { %v17388_v27 = vmul.f32 %v17386_v21, %v17381_v23 }
0x15fd   : > { %17389 = vst.msk [vmem:[%s1140_s3] sm:$0xff] %vm1219_vm0, %v17388_v27 }
0x15fe   : > { %21385 = shalt.err (!%p21382_p5)
}
0x15ff   : > { %s21386_s4 = scalar_lea.hbm %s24545_s6, 128  ;;  %s21390_s15 = scalar_lea.hbm %s25186_s0, 256 }
0x1600   : > { %p21387_p6 = scmp.ne.s32.totalorder %s24545_s6, %s21386_s4  ;;  %p21391_p10 = scmp.lt.u32.totalorder %s24545_s6, %s25186_s0 }
0x1601   : > { %p21392_p11 = scmp.lt.u32.totalorder %s21390_s15, %s21386_s4  ;;  %p21394_p13 = scmp.lt.u32.totalorder %s21386_s4, %s24545_s6 }
0x1602   : > { %p21388_p7 = pnand %p21387_p6, %p21718_p4 }
0x1603   : > { %p21393_p12 = por %p21392_p11, %p21391_p10 }
0x1604   : > { %p21389_p9 = pneg %p21388_p7 }
0x1605   : > { %p21395_p1 = por %p21394_p13, %p21393_p12 }
0x1607   : > { %p21396_p0 = pnand %p21395_p1, %p21389_p9 }
0x1609   : > { %21399 = shalt.err (!%p21396_p0)
}
0x160a   : > { %21227 = dma.vmem_to_hbm [thread:$0]  (%p21718_p4), %s24547_s18, 128, %s24545_s6, %s17391_s8  }
0x160b PF: > { %p21233_p2 = scmp.ge.s32.totalorder %s21450_s11, 2  ;;  %s17417_s9 = sand.u32 1, %s21430_s28  }
0x160c   : > { %s17418_s12 = scalar_lea.sflag [#allocation3], %s17417_s9 }
0x160d   : > { %p21230_p3 = pnand %p21233_p2, %p21725_p8 }
0x160f   : > { %21425 = dma.done.wait (!%p21230_p3), %s17418_s12, 128  }
0x1610   : > { %21427 = vsyncadd (!%p21230_p3), %s17418_s12, 4294967168  ;;  %s78_s11 = sadd.s32 1, %s21450_s11   ;;  %s25187_s28 = smov %s21434_s1 }
0x1611   : > { %p75_p5 = scmp.ge.s32.totalorder %s78_s11, 4   ;;  %s25188_s1 = smov %s21438_s2 }
0x1612   : > { %s25189_s2 = smov %s21731_s20  ;;  %s25190_s7 = smov %s21446_s10 }
0x1613   : > { %s25191_s10 = smov %s25193_s16  ;;  %77 = sbr.rel (!%p75_p5) target bundleno = 69 (0x45), region = 236 }
0x161a   :  { %17423 = vsyncpa [#allocation3], 1 }
0x161b   :  { %17425 = vsyncpa [#allocation3 + $0x1], 1 }

</bundles_post_ra>
